<compile_context>
chip_gen: v7x
topology: tpu7x:2x2x1
jax: 0.10.0
libtpu: 0.0.40
codegen_flags: <defaults>
</compile_context>

<pallas_src>
import functools
import math

import jax
import jax.numpy as jnp
from jax.experimental import pallas as pl
from jax.experimental.pallas import tpu as pltpu


def _pe_kernel(freq_ref, phase_ref, o_ref):
    # freq_ref / phase_ref: (1, d_pad) f32 rows resident in VMEM across the grid.
    # o_ref: (tile_s, d_pad) output block.
    tile_s, d_pad = o_ref.shape
    row0 = pl.program_id(0) * tile_s
    pos = (row0 + jax.lax.broadcasted_iota(jnp.int32, (tile_s, d_pad), 0)).astype(jnp.float32)
    # pe[:, 2j]   = sin(pos * w_j)            (phase 0)
    # pe[:, 2j+1] = cos(pos * w_j) = sin(pos * w_j + pi/2)   (phase pi/2)
    angle = pos * freq_ref[...] + phase_ref[...]       # (1, d_pad) broadcasts up
    o_ref[...] = jnp.sin(angle).astype(o_ref.dtype)    # single EUP op / element


def _round_up(n, m):
    return ((n + m - 1) // m) * m


@functools.lru_cache(maxsize=None)
def _build_pe_table(d_model, max_len, dtype_name):
    """Build the full (max_len, d_model) PE table once via the Pallas kernel."""
    dtype = jnp.dtype(dtype_name)
    d_pad = max(128, _round_up(d_model, 128))          # lane-dense output stores

    # Sequence tile: prefer 512 rows; shrink by powers of two (staying a
    # multiple of 8) if a single f32 tile would exceed ~4 MiB of VMEM.
    tile_s = min(512, _round_up(max_len, 8))
    while tile_s > 8 and tile_s * d_pad * 4 > 4 * 1024 * 1024:
        tile_s //= 2
    tile_s = max(8, tile_s)
    grid = (pl.cdiv(max_len, tile_s),)

    # Per-lane frequency and phase rows (tiny, computed once on host/XLA).
    col = jnp.arange(d_pad)
    even = ((col // 2) * 2).astype(jnp.float32)
    freq = jnp.where(
        col < d_model,
        jnp.exp(even * (-math.log(10000.0) / d_model)),
        0.0,
    ).astype(jnp.float32)[None, :]
    phase = jnp.where(
        (col % 2) == 1, jnp.float32(math.pi / 2.0), jnp.float32(0.0)
    )[None, :]

    pe_padded = pl.pallas_call(
        _pe_kernel,
        out_shape=jax.ShapeDtypeStruct((max_len, d_pad), dtype),
        grid=grid,
        in_specs=[
            pl.BlockSpec((1, d_pad), lambda i: (0, 0)),   # freq row (resident)
            pl.BlockSpec((1, d_pad), lambda i: (0, 0)),   # phase row (resident)
        ],
        out_specs=pl.BlockSpec((tile_s, d_pad), lambda i: (i, 0)),
        compiler_params=pltpu.CompilerParams(
            dimension_semantics=("parallel",),
        ),
    )(freq, phase)

    return pe_padded[:, :d_model]                      # strip lane padding once


def positional_embedding(x, d_model, max_len=512, dtype=jnp.float32):
    """Forward of PositionalEmbedding: returns pe[:, :x.shape[1]],
    shape (1, seq_len, d_model)."""
    seq_len = x.shape[1]
    assert seq_len <= max_len
    pe = _build_pe_table(int(d_model), int(max_len), jnp.dtype(dtype).name)
    return pe[None, :seq_len, :]


def _reference_pe(seq_len, d_model):
    # Pure-JAX reference mirroring the PyTorch buffer construction.
    position = jnp.arange(seq_len, dtype=jnp.float32)[:, None]
    div_term = jnp.exp(
        jnp.arange(0, d_model, 2, dtype=jnp.float32) * (-math.log(10000.0) / d_model)
    )
    pe = jnp.zeros((seq_len, d_model), dtype=jnp.float32)
    pe = pe.at[:, 0::2].set(jnp.sin(position * div_term))
    pe = pe.at[:, 1::2].set(jnp.cos(position * div_term))
    return pe[None]


if __name__ == "__main__":
    d_model = 32
    seq_len = 8
    batch = 2
    max_len = 512

    key = jax.random.PRNGKey(0)
    x = jax.random.normal(key, (batch, seq_len, d_model), dtype=jnp.float32)

    out = positional_embedding(x, d_model=d_model, max_len=max_len)
    out = jax.block_until_ready(out)

    ref = _reference_pe(seq_len, d_model)
    assert out.shape == (1, seq_len, d_model), out.shape
    assert out.dtype == jnp.float32, out.dtype
    assert jnp.allclose(out, ref, atol=1e-4, rtol=1e-4), float(jnp.max(jnp.abs(out - ref)))

    # A second forward with a shorter sequence reuses the cached table (no new
    # kernel launch), matching the PyTorch buffer-slice semantics.
    x2 = jax.random.normal(key, (batch, 4, d_model), dtype=jnp.float32)
    out2 = jax.block_until_ready(positional_embedding(x2, d_model=d_model, max_len=max_len))
    assert out2.shape == (1, 4, d_model), out2.shape
    assert jnp.allclose(out2, ref[:, :4, :], atol=1e-4, rtol=1e-4)

    print("KERNEL_OK")
</pallas_src>

<mosaic_0001>
module attributes {stable_mosaic.version = 11 : i64} {
  func.func @_pe_kernel(%arg0: i32, %arg1: memref<1x128xf32, #tpu.memory_space<vmem>>, %arg2: memref<1x128xf32, #tpu.memory_space<vmem>>, %arg3: memref<512x128xf32, #tpu.memory_space<vmem>>) attributes {dimension_semantics = [#tpu.dimension_semantics<parallel>], iteration_bounds = array<i64: 1>, scalar_prefetch = 0 : i64, scratch_operands = 0 : i64, tpu.core_type = #tpu.core_type<tc>, window_params = [{pipeline_mode = #tpu.pipeline_mode<synchronous>, transform_indices = @transform_0, window_bounds = array<i64: 1, 128>}, {pipeline_mode = #tpu.pipeline_mode<synchronous>, transform_indices = @transform_1, window_bounds = array<i64: 1, 128>}, {transform_indices = @transform_2, window_bounds = array<i64: 512, 128>}]} {
    %c512_i32 = arith.constant 512 : i32
    %0 = arith.muli %arg0, %c512_i32 : i32
    %1 = tpu.iota {dimensions = array<i32: 0>} : vector<512x128xi32>
    %2 = vector.broadcast %0 : i32 to vector<512x128xi32>
    %3 = arith.addi %2, %1 : vector<512x128xi32>
    %4 = arith.sitofp %3 : vector<512x128xi32> to vector<512x128xf32>
    %c0 = arith.constant 0 : index
    %c0_0 = arith.constant 0 : index
    %5 = vector.load %arg1[%c0, %c0_0] : memref<1x128xf32, #tpu.memory_space<vmem>>, vector<1x128xf32>
    %6 = vector.broadcast %5 : vector<1x128xf32> to vector<512x128xf32>
    %7 = arith.mulf %4, %6 : vector<512x128xf32>
    %c0_1 = arith.constant 0 : index
    %c0_2 = arith.constant 0 : index
    %8 = vector.load %arg2[%c0_1, %c0_2] : memref<1x128xf32, #tpu.memory_space<vmem>>, vector<1x128xf32>
    %9 = vector.broadcast %8 : vector<1x128xf32> to vector<512x128xf32>
    %10 = arith.addf %7, %9 : vector<512x128xf32>
    %11 = math.sin %10 : vector<512x128xf32>
    %c0_3 = arith.constant 0 : index
    %c0_4 = arith.constant 0 : index
    %12 = vector.load %arg3[%c0_3, %c0_4] : memref<512x128xf32, #tpu.memory_space<vmem>>, vector<512x128xf32>
    tpu.vector_store %arg3[%c0_3, %c0_4], %11 {strides = array<i32>} : memref<512x128xf32, #tpu.memory_space<vmem>>, vector<512x128xf32>,
    return
  }
  func.func @transform_0(%arg0: i32) -> (i32, i32) {
    %c0_i32 = arith.constant 0 : i32
    %c0_i32_0 = arith.constant 0 : i32
    %c0_i32_1 = arith.constant 0 : i32
    return %c0_i32, %c0_i32_0 : i32, i32
  }
  func.func @transform_1(%arg0: i32) -> (i32, i32) {
    %c0_i32 = arith.constant 0 : i32
    %c0_i32_0 = arith.constant 0 : i32
    %c0_i32_1 = arith.constant 0 : i32
    return %c0_i32, %c0_i32_0 : i32, i32
  }
  func.func @transform_2(%arg0: i32) -> (i32, i32) {
    %c0_i32 = arith.constant 0 : i32
    %c0_i32_0 = arith.constant 0 : i32
    return %arg0, %c0_i32 : i32, i32
  }
}

</mosaic_0001>

<bundles_post_ra>
// kernel: tpu_custom_call.1
= control target key start
LH: loop header
LB: loop body
LE: loop exit
PB: predicated region body
PF: predicated region fallthrough
CT: control target
= control target key end

     0   :  { %7 = vsyncpa [#allocation3], 0  ;;  %s13789_s0 = inlined_call_operand.hbm [shape: f32[1,128], index: 0, kind: input, shape index: {}]   ;;  %s13790_s1 = inlined_call_operand.vmem [shape: f32[1,128], index: 1, kind: input, shape index: {}]   ;;  %s13791_s2 = inlined_call_operand.hbm [shape: f32[512,128], index: 2, kind: output, shape index: {}]  }
   0x1   :  { %8 = vsyncpa [#allocation4], 0  ;;  %s7926_s9 = smov [#allocation2]   ;;  %s7878_s13 = scalar_lea.hbm %s13789_s0, 16 }
   0x2   :  { %s15_s10 = sshll.u32 %s7926_s9, 4  ;;  %p7879_p0 = scmp.ne.s32.totalorder %s13789_s0, %s7878_s13  ;;  %s16_s10 = int_to_ptr.vmem [resolvable:$true] %s15_s10 }
   0x3   :  { %p7882_p1 = scmp.lt.u32.totalorder %s7878_s13, %s13789_s0 }
   0x5   :  { %p7884_p2 = pnand %p7882_p1, %p7879_p0 }
   0x7   :  { %7887 = shalt.err (!%p7884_p2)
}
   0x8   :  { %s7888_s18 = scalar_lea.vmem %s16_s10, 16  ;;  %s7892_s19 = scalar_lea.vmem %s16_s10, 32 }
   0x9   :  { %p7889_p3 = scmp.ne.s32.totalorder %s16_s10, %s7888_s18  ;;  %p7893_p4 = scmp.lt.s32.totalorder %s16_s10, %s16_s10 }
   0xa   :  { %p7894_p5 = scmp.lt.s32.totalorder %s7892_s19, %s7888_s18 }
   0xc   :  { %p7895_p6 = por %p7894_p5, %p7893_p4 }
   0xe   :  { %p7896_p7 = pnand %p7895_p6, %p7889_p3 }
  0x10   :  { %7899 = shalt.err (!%p7896_p7)
}
  0x11   :  { %18 = dma.hbm_to_vmem [thread:$0]  %s13789_s0, 16, %s16_s10, [#allocation3]  }
  0x12   :  { %7922 = dma.done.wait [#allocation3], 16  }
  0x13   :  { %7923 = vsyncadd [#allocation3], 4294967280  ;;  %v25_v0 = vlaneseq }
  0x15   :  { %v7963_v1 = vshrl.u32 %v25_v0, 7 }
  0x17   :  { %v7966_v2 = vadd.s32 8, %v7963_v1  ;;  %v7969_v3 = vadd.s32 16, %v7963_v1  ;;  %v7972_v4 = vadd.s32 24, %v7963_v1  ;;  %v7975_v5 = vadd.s32 32, %v7963_v1 }
  0x18   :  { %v7978_v6 = vadd.s32 40, %v7963_v1  ;;  %v7981_v7 = vadd.s32 48, %v7963_v1  ;;  %v7984_v8 = vadd.s32 56, %v7963_v1  ;;  %v7987_v9 = vadd.s32 64, %v7963_v1 }
  0x19   :  { %13870 = vst [vmem:[#allocation8_spill] sm:$0xff] %v7969_v3  ;;  %13871 = vst [vmem:[#allocation9_spill] sm:$0xff] %v7972_v4  ;;  %v7990_v10 = vadd.s32 72, %v7963_v1  ;;  %v7993_v11 = vadd.s32 80, %v7963_v1  ;;  %v7996_v12 = vadd.s32 88, %v7963_v1  ;;  %v7999_v13 = vadd.s32 96, %v7963_v1 }
  0x1a   :  { %v8002_v14 = vadd.s32 104, %v7963_v1  ;;  %v8005_v15 = vadd.s32 112, %v7963_v1  ;;  %v8008_v16 = vadd.s32 120, %v7963_v1  ;;  %v8011_v17 = vadd.s32 128, %v7963_v1  ;;  %v8208_v3 = vld [vmem:[#allocation2] ss:$0 sm:$0xff] }
  0x1b   :  { %v8014_v18 = vadd.s32 136, %v7963_v1  ;;  %v8017_v19 = vadd.s32 144, %v7963_v1  ;;  %v8020_v20 = vadd.s32 152, %v7963_v1  ;;  %v8023_v21 = vadd.s32 160, %v7963_v1 }
  0x1c   :  { %v8026_v22 = vadd.s32 168, %v7963_v1  ;;  %v8029_v23 = vadd.s32 176, %v7963_v1  ;;  %v8032_v24 = vadd.s32 184, %v7963_v1  ;;  %v8035_v25 = vadd.s32 192, %v7963_v1 }
  0x1d   :  { %v8038_v26 = vadd.s32 200, %v7963_v1  ;;  %v8041_v27 = vadd.s32 208, %v7963_v1  ;;  %v8044_v28 = vadd.s32 216, %v7963_v1  ;;  %v8047_v29 = vadd.s32 224, %v7963_v1 }
  0x1e   :  { %v8050_v30 = vadd.s32 232, %v7963_v1  ;;  %v8053_v31 = vadd.s32 240, %v7963_v1  ;;  %v8056_v32 = vadd.s32 248, %v7963_v1  ;;  %v8059_v33 = vadd.s32 256, %v7963_v1 }
  0x1f   :  { %v8062_v34 = vadd.s32 264, %v7963_v1  ;;  %v8065_v35 = vadd.s32 272, %v7963_v1  ;;  %v8068_v36 = vadd.s32 280, %v7963_v1  ;;  %v8071_v37 = vadd.s32 288, %v7963_v1 }
  0x20   :  { %v8074_v38 = vadd.s32 296, %v7963_v1  ;;  %v8077_v39 = vadd.s32 304, %v7963_v1  ;;  %v8080_v40 = vadd.s32 312, %v7963_v1  ;;  %v8083_v41 = vadd.s32 320, %v7963_v1 }
  0x21   :  { %v8086_v42 = vadd.s32 328, %v7963_v1  ;;  %v8089_v43 = vadd.s32 336, %v7963_v1  ;;  %v8092_v44 = vadd.s32 344, %v7963_v1  ;;  %v8095_v45 = vadd.s32 352, %v7963_v1 }
  0x22   :  { %v8098_v46 = vadd.s32 360, %v7963_v1  ;;  %v8101_v47 = vadd.s32 368, %v7963_v1  ;;  %v8104_v48 = vadd.s32 376, %v7963_v1  ;;  %v8107_v49 = vadd.s32 384, %v7963_v1 }
  0x23   :  { %v8110_v50 = vadd.s32 392, %v7963_v1  ;;  %v8113_v51 = vadd.s32 400, %v7963_v1  ;;  %v8116_v52 = vadd.s32 408, %v7963_v1  ;;  %v8119_v53 = vadd.s32 416, %v7963_v1 }
  0x24   :  { %13872 = vst [vmem:[#allocation10_spill] sm:$0xff] %v8101_v47  ;;  %13873 = vst [vmem:[#allocation11_spill] sm:$0xff] %v8104_v48  ;;  %v8122_v54 = vadd.s32 424, %v7963_v1  ;;  %v8125_v55 = vadd.s32 432, %v7963_v1  ;;  %v8128_v56 = vadd.s32 440, %v7963_v1  ;;  %v8131_v57 = vadd.s32 448, %v7963_v1 }
  0x25   :  { %13874 = vst [vmem:[#allocation12_spill] sm:$0xff] %v8107_v49  ;;  %13875 = vst [vmem:[#allocation13_spill] sm:$0xff] %v8110_v50  ;;  %v8134_v58 = vadd.s32 456, %v7963_v1  ;;  %v8137_v59 = vadd.s32 464, %v7963_v1  ;;  %v8140_v60 = vadd.s32 472, %v7963_v1  ;;  %v8143_v61 = vadd.s32 480, %v7963_v1 }
  0x26   :  { %13876 = vst [vmem:[#allocation14_spill] sm:$0xff] %v8113_v51  ;;  %13877 = vst [vmem:[#allocation15_spill] sm:$0xff] %v8116_v52  ;;  %v8146_v62 = vadd.s32 488, %v7963_v1  ;;  %v8149_v63 = vadd.s32 496, %v7963_v1  ;;  %v8152_v0 = vadd.s32 504, %v7963_v1 }
  0x27   :  { %13878 = vst [vmem:[#allocation16_spill] sm:$0xff] %v8119_v53  ;;  %13879 = vst [vmem:[#allocation17_spill] sm:$0xff] %v8122_v54  ;;  %v13892_v48 = vmov %v8134_v58  ;;  %v13893_v49 = vmov %v8137_v59  ;;  %v13894_v50 = vmov %v8140_v60 }
  0x28   :  { %13880 = vst [vmem:[#allocation18_spill] sm:$0xff] %v8125_v55  ;;  %13881 = vst [vmem:[#allocation19_spill] sm:$0xff] %v8128_v56  ;;  %v13897_v53 = vmov %v8149_v63  ;;  %v13898_v54 = vmov %v8152_v0  ;;  %v13899_v55 = vcvt.s32.f32 %v7963_v1  ;;  %v13903_v1 = vcvt.s32.f32 %v7981_v7 }
  0x29   :  { %13882 = vst [vmem:[#allocation20_spill] sm:$0xff] %v8131_v57  ;;  %13883 = vst [vmem:[#allocation21_spill] sm:$0xff] %v8134_v58  ;;  %v13890_v57 = vmov %v8128_v56  ;;  %v13902_v58 = vcvt.s32.f32 %v7978_v6  ;;  %v13906_v6 = vcvt.s32.f32 %v7990_v10  ;;  %v13907_v7 = vcvt.s32.f32 %v7993_v11 }
  0x2a   :  { %13884 = vst [vmem:[#allocation22_spill] sm:$0xff] %v8137_v59  ;;  %13885 = vst [vmem:[#allocation23_spill] sm:$0xff] %v8140_v60  ;;  %v13910_v10 = vcvt.s32.f32 %v8002_v14  ;;  %v13911_v11 = vcvt.s32.f32 %v8005_v15  ;;  %v13914_v14 = vcvt.s32.f32 %v8014_v18  ;;  %v13915_v15 = vcvt.s32.f32 %v8017_v19 }
  0x2b   :  { %13886 = vst [vmem:[#allocation24_spill] sm:$0xff] %v8143_v61  ;;  %13887 = vst [vmem:[#allocation25_spill] sm:$0xff] %v8146_v62  ;;  %v210_v61 = vcvt.s32.f32 %v13890_v57  ;;  %v8222_v57 = vmul.f32 %v8208_v3, %v13899_v55  ;;  %v8237_v59 = vmul.f32 %v8208_v3, %v13902_v58  ;;  %v8242_v55 = vmul.f32 %v8208_v3, %v13903_v1  ;;  %v13946_v60 = vld [vmem:[#allocation10_spill] sm:$0xff] }
  0x2c   :  { %13888 = vst [vmem:[#allocation26_spill] sm:$0xff] %v8149_v63  ;;  %13889 = vst [vmem:[#allocation27_spill] sm:$0xff] %v8152_v0  ;;  %v13901_v0 = vcvt.s32.f32 %v7975_v5  ;;  %v13905_v5 = vcvt.s32.f32 %v7987_v9  ;;  %v8257_v58 = vmul.f32 %v8208_v3, %v13906_v6  ;;  %v8262_v1 = vmul.f32 %v8208_v3, %v13907_v7  ;;  %v13949_v63 = vld [vmem:[#allocation11_spill] sm:$0xff] }
  0x2d   :  { %v13909_v9 = vcvt.s32.f32 %v7999_v13  ;;  %v8277_v6 = vmul.f32 %v8208_v3, %v13910_v10  ;;  %v8282_v7 = vmul.f32 %v8208_v3, %v13911_v11  ;;  %v13913_v13 = vcvt.s32.f32 %v8011_v17 }
  0x2e   :  { %v8232_v4 = vmul.f32 %v8208_v3, %v13901_v0  ;;  %v8252_v0 = vmul.f32 %v8208_v3, %v13905_v5  ;;  %v8297_v10 = vmul.f32 %v8208_v3, %v13914_v14  ;;  %v8302_v11 = vmul.f32 %v8208_v3, %v13915_v15 }
  0x2f   :  { %v8272_v5 = vmul.f32 %v8208_v3, %v13909_v9  ;;  %v8292_v9 = vmul.f32 %v8208_v3, %v13913_v13  ;;  %v13917_v17 = vcvt.s32.f32 %v8023_v21  ;;  %v13918_v18 = vcvt.s32.f32 %v8026_v22 }
  0x30   :  { %v13891_v47 = vld [vmem:[#allocation20_spill] sm:$0xff]  ;;  %v13919_v19 = vcvt.s32.f32 %v8029_v23  ;;  %v13921_v21 = vcvt.s32.f32 %v8035_v25  ;;  %v13922_v22 = vcvt.s32.f32 %v8038_v26  ;;  %v13923_v23 = vcvt.s32.f32 %v8041_v27 }
  0x31   :  { %v211_v62 = vcvt.s32.f32 %v13891_v47  ;;  %v13900_v47 = vcvt.s32.f32 %v7966_v2  ;;  %v13904_v2 = vcvt.s32.f32 %v7984_v8  ;;  %v13908_v8 = vcvt.s32.f32 %v7996_v12 }
  0x32   :  { %v13895_v51 = vld [vmem:[#allocation24_spill] sm:$0xff]  ;;  %v13896_v52 = vld [vmem:[#allocation25_spill] sm:$0xff]  ;;  %v13912_v12 = vcvt.s32.f32 %v8008_v16  ;;  %v13916_v16 = vcvt.s32.f32 %v8020_v20  ;;  %v8312_v13 = vmul.f32 %v8208_v3, %v13917_v17  ;;  %v8317_v14 = vmul.f32 %v8208_v3, %v13918_v18 }
  0x33   :  { %v8227_v56 = vmul.f32 %v8208_v3, %v13900_v47  ;;  %v8247_v47 = vmul.f32 %v8208_v3, %v13904_v2  ;;  %v8267_v2 = vmul.f32 %v8208_v3, %v13908_v8  ;;  %v8322_v15 = vmul.f32 %v8208_v3, %v13919_v19 }
  0x34   :  { %v8287_v8 = vmul.f32 %v8208_v3, %v13912_v12  ;;  %v8307_v12 = vmul.f32 %v8208_v3, %v13916_v16  ;;  %v13920_v20 = vcvt.s32.f32 %v8032_v24  ;;  %v8332_v17 = vmul.f32 %v8208_v3, %v13921_v21 }
  0x35   :  { %v8337_v18 = vmul.f32 %v8208_v3, %v13922_v22  ;;  %v8342_v19 = vmul.f32 %v8208_v3, %v13923_v23  ;;  %v13924_v24 = vcvt.s32.f32 %v8044_v28  ;;  %v13925_v25 = vcvt.s32.f32 %v8047_v29 }
  0x36   :  { %v8327_v16 = vmul.f32 %v8208_v3, %v13920_v20  ;;  %v13926_v26 = vcvt.s32.f32 %v8050_v30  ;;  %v13927_v27 = vcvt.s32.f32 %v8053_v31  ;;  %v13928_v28 = vcvt.s32.f32 %v8056_v32 }
  0x37   :  { %v8347_v20 = vmul.f32 %v8208_v3, %v13924_v24  ;;  %v8352_v21 = vmul.f32 %v8208_v3, %v13925_v25  ;;  %v13929_v29 = vcvt.s32.f32 %v8059_v33  ;;  %v13930_v30 = vcvt.s32.f32 %v8062_v34 }
  0x38   :  { %v8357_v22 = vmul.f32 %v8208_v3, %v13926_v26  ;;  %v8362_v23 = vmul.f32 %v8208_v3, %v13927_v27  ;;  %v8367_v24 = vmul.f32 %v8208_v3, %v13928_v28  ;;  %v13931_v31 = vcvt.s32.f32 %v8065_v35 }
  0x39   :  { %v8372_v25 = vmul.f32 %v8208_v3, %v13929_v29  ;;  %v8377_v26 = vmul.f32 %v8208_v3, %v13930_v30  ;;  %v13932_v32 = vcvt.s32.f32 %v8068_v36  ;;  %v13933_v33 = vcvt.s32.f32 %v8071_v37 }
  0x3a   :  { %v8382_v27 = vmul.f32 %v8208_v3, %v13931_v31  ;;  %v13934_v34 = vcvt.s32.f32 %v8074_v38  ;;  %v13935_v35 = vcvt.s32.f32 %v8077_v39  ;;  %v13936_v36 = vcvt.s32.f32 %v8080_v40 }
  0x3b   :  { %v8387_v28 = vmul.f32 %v8208_v3, %v13932_v32  ;;  %v8392_v29 = vmul.f32 %v8208_v3, %v13933_v33  ;;  %v13937_v37 = vcvt.s32.f32 %v8083_v41  ;;  %v13938_v38 = vcvt.s32.f32 %v8086_v42 }
  0x3c   :  { %v8397_v30 = vmul.f32 %v8208_v3, %v13934_v34  ;;  %v8402_v31 = vmul.f32 %v8208_v3, %v13935_v35  ;;  %v8407_v32 = vmul.f32 %v8208_v3, %v13936_v36  ;;  %v13939_v39 = vcvt.s32.f32 %v8089_v43 }
  0x3d   :  { %v8412_v33 = vmul.f32 %v8208_v3, %v13937_v37  ;;  %v8417_v34 = vmul.f32 %v8208_v3, %v13938_v38  ;;  %v13940_v40 = vcvt.s32.f32 %v8092_v44  ;;  %v13942_v41 = vcvt.s32.f32 %v8095_v45 }
  0x3e   :  { %v8422_v35 = vmul.f32 %v8208_v3, %v13939_v39  ;;  %v13944_v42 = vcvt.s32.f32 %v8098_v46  ;;  %v13947_v43 = vcvt.s32.f32 %v13946_v60  ;;  %v13950_v44 = vcvt.s32.f32 %v13949_v63 }
  0x3f   :  { %v8427_v36 = vmul.f32 %v8208_v3, %v13940_v40  ;;  %v8432_v37 = vmul.f32 %v8208_v3, %v13942_v41 }
  0x40   :  { %v8437_v38 = vmul.f32 %v8208_v3, %v13944_v42  ;;  %v8442_v39 = vmul.f32 %v8208_v3, %v13947_v43  ;;  %v8447_v40 = vmul.f32 %v8208_v3, %v13950_v44 }
  0x41   :  { %13941 = vst [vmem:[#allocation19_spill] sm:$0xff] %v8427_v36  ;;  %13943 = vst [vmem:[#allocation20_spill] sm:$0xff] %v8432_v37  ;;  %v13952_v36 = vld [vmem:[#allocation12_spill] sm:$0xff]  ;;  %v13955_v37 = vld [vmem:[#allocation13_spill] sm:$0xff] }
  0x42   :  { %13945 = vst [vmem:[#allocation21_spill] sm:$0xff] %v8437_v38  ;;  %13948 = vst [vmem:[#allocation22_spill] sm:$0xff] %v8442_v39  ;;  %v13953_v45 = vcvt.s32.f32 %v13952_v36  ;;  %v13956_v46 = vcvt.s32.f32 %v13955_v37  ;;  %v13958_v38 = vld [vmem:[#allocation14_spill] sm:$0xff]  ;;  %v13960_v39 = vld [vmem:[#allocation15_spill] sm:$0xff] }
  0x43   :  { %13951 = vst [vmem:[#allocation23_spill] sm:$0xff] %v8447_v40  ;;  %v13959_v60 = vcvt.s32.f32 %v13958_v38  ;;  %v13961_v63 = vcvt.s32.f32 %v13960_v39  ;;  %v13962_v40 = vld [vmem:[#allocation16_spill] sm:$0xff]  ;;  %v8485_v39 = vmul.f32 %v8208_v3, %v210_v61  ;;  %v13973_v61 = vcvt.s32.f32 %v13894_v50 }
  0x44   :  { %v8452_v41 = vmul.f32 %v8208_v3, %v13953_v45  ;;  %v8457_v42 = vmul.f32 %v8208_v3, %v13956_v46  ;;  %v13963_v36 = vcvt.s32.f32 %v13962_v40  ;;  %v8493_v40 = vld [vmem:[%s13790_s1] ss:$0 sm:$0xff]  ;;  %v13979_v50 = vcvt.s32.f32 %v13898_v54  ;;  %s7933_s1 = smov [#allocation5]  }
  0x45   :  { %v8462_v43 = vmul.f32 %v8208_v3, %v13959_v60  ;;  %v8467_v44 = vmul.f32 %v8208_v3, %v13961_v63  ;;  %13968 = vst [vmem:[#allocation26_spill] sm:$0xff] %v8485_v39  ;;  %v8488_v63 = vmul.f32 %v8208_v3, %v211_v62  ;;  %v8508_v62 = vmul.f32 %v8208_v3, %v13973_v61  ;;  %v13976_v39 = vld [vmem:[#allocation9_spill] sm:$0xff]  ;;  %s7086_s23 = sshll.u32 %s7933_s1, 4  ;;  %s7087_s23 = int_to_ptr.vmem [resolvable:$true] %s7086_s23 }
  0x46   :  { %13954 = vst [vmem:[#allocation24_spill] sm:$0xff] %v8452_v41  ;;  %13957 = vst [vmem:[#allocation25_spill] sm:$0xff] %v8457_v42  ;;  %v8472_v45 = vmul.f32 %v8208_v3, %v13963_v36  ;;  %v13964_v41 = vld [vmem:[#allocation17_spill] sm:$0xff]  ;;  %v13966_v42 = vld [vmem:[#allocation18_spill] sm:$0xff]  ;;  %v8529_v61 = vmul.f32 %v8208_v3, %v13979_v50  ;;  %v8550_v54 = vadd.f32 %v8493_v40, %v8237_v59  ;;  %s7900_s24 = scalar_lea.vmem %s7087_s23, 8192  ;;  %p7905_p9 = scmp.lt.s32.totalorder %s7087_s23, %s7087_s23 }
  0x47   :  { %v13965_v37 = vcvt.s32.f32 %v13964_v41  ;;  %v13967_v38 = vcvt.s32.f32 %v13966_v42  ;;  %13969 = vst [vmem:[#allocation27_spill] sm:$0xff] %v8488_v63  ;;  %v13970_v41 = vcvt.s32.f32 %v13892_v48  ;;  %v13972_v42 = vcvt.s32.f32 %v13893_v49  ;;  %p7901_p8 = scmp.ne.s32.totalorder %s7087_s23, %s7900_s24  ;;  %p7906_p10 = scmp.lt.s32.totalorder %s7900_s24, %s7900_s24 }
  0x48   :  { %v13978_v49 = vcvt.s32.f32 %v13897_v53  ;;  %v8542_v53 = vadd.f32 %v8493_v40, %v8227_v56  ;;  %v8562_v56 = vadd.f32 %v8493_v40, %v8252_v0  ;;  %v8570_v59 = vadd.f32 %v8493_v40, %v8262_v1  ;;  %v14005_v50 = vld [vmem:[#allocation19_spill] sm:$0xff] }
  0x49   :  { %v8477_v46 = vmul.f32 %v8208_v3, %v13965_v37  ;;  %v8482_v60 = vmul.f32 %v8208_v3, %v13967_v38  ;;  %v8498_v36 = vmul.f32 %v8208_v3, %v13970_v41  ;;  %v8503_v37 = vmul.f32 %v8208_v3, %v13972_v42  ;;  %v14011_v48 = vld [vmem:[#allocation22_spill] sm:$0xff]  ;;  %p7907_p11 = por %p7906_p10, %p7905_p9 }
  0x4a   :  { %v13974_v38 = vcvt.s32.f32 %v13895_v51  ;;  %v13977_v41 = vcvt.s32.f32 %v13896_v52  ;;  %v8524_v42 = vmul.f32 %v8208_v3, %v13978_v49  ;;  %v13980_v51 = vld [vmem:[#allocation8_spill] sm:$0xff]  ;;  %v8538_v52 = vadd.f32 %v8493_v40, %v8222_v57 }
  0x4b   :  { %13971 = vst [vmem:[#allocation10_spill] sm:$0xff] %v8498_v36  ;;  %v8554_v49 = vadd.f32 %v8493_v40, %v8242_v55  ;;  %v8558_v57 = vadd.f32 %v8493_v40, %v8247_v47  ;;  %v8574_v55 = vadd.f32 %v8493_v40, %v8267_v2  ;;  %v8578_v47 = vadd.f32 %v8493_v40, %v8272_v5  ;;  %p7908_p12 = pnand %p7907_p11, %p7901_p8 }
  0x4c   :  { %v8513_v63 = vmul.f32 %v8208_v3, %v13974_v38  ;;  %v8519_v36 = vmul.f32 %v8208_v3, %v13977_v41  ;;  %v13981_v38 = vcvt.s32.f32 %v13980_v51  ;;  %v8546_v41 = vadd.f32 %v8493_v40, %v8232_v4  ;;  %v14007_v51 = vld [vmem:[#allocation20_spill] sm:$0xff] }
  0x4d   :  { %v8566_v4 = vadd.f32 %v8493_v40, %v8257_v58  ;;  %v8582_v0 = vadd.f32 %v8493_v40, %v8277_v6  ;;  %v8586_v58 = vadd.f32 %v8493_v40, %v8282_v7  ;;  %v8590_v1 = vadd.f32 %v8493_v40, %v8287_v8 }
  0x4e   :  { %13975 = vst [vmem:[#allocation11_spill] sm:$0xff] %v8513_v63  ;;  %v8534_v63 = vmul.f32 %v8208_v3, %v13981_v38  ;;  %v8594_v2 = vadd.f32 %v8493_v40, %v8292_v9  ;;  %v8598_v5 = vadd.f32 %v8493_v40, %v8297_v10  ;;  %v8602_v6 = vadd.f32 %v8493_v40, %v8302_v11  ;;  %v14009_v38 = vld [vmem:[#allocation21_spill] sm:$0xff] }
  0x4f   :  { %v8606_v7 = vadd.f32 %v8493_v40, %v8307_v12  ;;  %v8610_v8 = vadd.f32 %v8493_v40, %v8312_v13  ;;  %v8614_v9 = vadd.f32 %v8493_v40, %v8317_v14  ;;  %v8618_v10 = vadd.f32 %v8493_v40, %v8322_v15 }
  0x50   :  { %v8622_v11 = vadd.f32 %v8493_v40, %v8327_v16  ;;  %v8626_v12 = vadd.f32 %v8493_v40, %v8332_v17  ;;  %v8630_v13 = vadd.f32 %v8493_v40, %v8337_v18  ;;  %v8634_v14 = vadd.f32 %v8493_v40, %v8342_v19 }
  0x51   :  { %13982 = vst [vmem:[#allocation12_spill] sm:$0xff] %v8610_v8  ;;  %13983 = vst [vmem:[#allocation13_spill] sm:$0xff] %v8614_v9  ;;  %v8638_v15 = vadd.f32 %v8493_v40, %v8347_v20  ;;  %v8642_v16 = vadd.f32 %v8493_v40, %v8352_v21  ;;  %v8646_v17 = vadd.f32 %v8493_v40, %v8357_v22  ;;  %vm363_vm13 = vcmp.lt.s32.totalorder %v8538_v52, 0 }
  0x52   :  { %13984 = vst [vmem:[#allocation14_spill] sm:$0xff] %v8618_v10  ;;  %13985 = vst [vmem:[#allocation15_spill] sm:$0xff] %v8622_v11  ;;  %v8650_v18 = vadd.f32 %v8493_v40, %v8362_v23  ;;  %v8654_v19 = vadd.f32 %v8493_v40, %v8367_v24  ;;  %v8658_v20 = vadd.f32 %v8493_v40, %v8372_v25  ;;  %vm467_vm15 = vcmp.lt.s32.totalorder %v8542_v53, 0 }
  0x53   :  { %13986 = vst [vmem:[#allocation16_spill] sm:$0xff] %v8626_v12  ;;  %13987 = vst [vmem:[#allocation17_spill] sm:$0xff] %v8630_v13  ;;  %v8662_v21 = vadd.f32 %v8493_v40, %v8377_v26  ;;  %v8666_v22 = vadd.f32 %v8493_v40, %v8382_v27  ;;  %v8670_v23 = vadd.f32 %v8493_v40, %v8387_v28 }
  0x54   :  { %13988 = vst [vmem:[#allocation18_spill] sm:$0xff] %v8634_v14  ;;  %13989 = vst [vmem:[#allocation9_spill] sm:$0xff] %v8638_v15  ;;  %v8674_v24 = vadd.f32 %v8493_v40, %v8392_v29  ;;  %v8678_v25 = vadd.f32 %v8493_v40, %v8397_v30  ;;  %v8682_v26 = vadd.f32 %v8493_v40, %v8402_v31 }
  0x55   :  { %13990 = vst [vmem:[#allocation8_spill] sm:$0xff] %v8642_v16  ;;  %13991 = vst [vmem:[#allocation28_spill] sm:$0xff] %v8646_v17  ;;  %v8686_v27 = vadd.f32 %v8493_v40, %v8407_v32  ;;  %v8690_v28 = vadd.f32 %v8493_v40, %v8412_v33  ;;  %v8694_v29 = vadd.f32 %v8493_v40, %v8417_v34  ;;  %v14045_v16 = vand.u32 2147483647, %v8538_v52 }
  0x56   :  { %13992 = vst [vmem:[#allocation29_spill] sm:$0xff] %v8650_v18  ;;  %13993 = vst [vmem:[#allocation30_spill] sm:$0xff] %v8654_v19  ;;  %v8698_v30 = vadd.f32 %v8493_v40, %v8422_v35  ;;  %v8702_v31 = vadd.f32 %v8493_v40, %v14005_v50  ;;  %v8706_v32 = vadd.f32 %v8493_v40, %v14007_v51  ;;  %v14038_v18 = vmov 2475754826  }
  0x57   :  { %13994 = vst [vmem:[#allocation31_spill] sm:$0xff] %v8658_v20  ;;  %13995 = vst [vmem:[#allocation32_spill] sm:$0xff] %v8662_v21  ;;  %v8710_v33 = vadd.f32 %v8493_v40, %v14009_v38  ;;  %v8714_v34 = vadd.f32 %v8493_v40, %v14011_v48  ;;  %v8730_v38 = vadd.f32 %v8493_v40, %v8462_v43  ;;  %vm8915_vm14 = vcmp.le.f32.partialorder %v14045_v16, 0.7853982 }
  0x58   :  { %13996 = vst [vmem:[#allocation33_spill] sm:$0xff] %v8666_v22  ;;  %13997 = vst [vmem:[#allocation34_spill] sm:$0xff] %v8670_v23  ;;  %v8734_v48 = vadd.f32 %v8493_v40, %v8467_v44 }
  0x59   :  { %13998 = vst [vmem:[#allocation35_spill] sm:$0xff] %v8674_v24  ;;  %13999 = vst [vmem:[#allocation36_spill] sm:$0xff] %v8678_v25 }
  0x5a   :  { %14000 = vst [vmem:[#allocation37_spill] sm:$0xff] %v8682_v26  ;;  %14001 = vst [vmem:[#allocation38_spill] sm:$0xff] %v8686_v27  ;;  %v13854_v26 = vmov 1326507024  }
  0x5b   :  { %14002 = vst [vmem:[#allocation39_spill] sm:$0xff] %v8690_v28  ;;  %14003 = vst [vmem:[#allocation40_spill] sm:$0xff] %v8694_v29  ;;  %v14013_v29 = vld [vmem:[#allocation23_spill] sm:$0xff] }
  0x5c   :  { %14004 = vst [vmem:[#allocation41_spill] sm:$0xff] %v8698_v30  ;;  %14006 = vst [vmem:[#allocation19_spill] sm:$0xff] %v8702_v31  ;;  %v8718_v35 = vadd.f32 %v8493_v40, %v14013_v29  ;;  %v14015_v30 = vld [vmem:[#allocation24_spill] sm:$0xff]  ;;  %v14017_v31 = vld [vmem:[#allocation25_spill] sm:$0xff]  ;;  %v8738_v29 = vadd.f32 %v8493_v40, %v8472_v45 }
  0x5d   :  { %14008 = vst [vmem:[#allocation20_spill] sm:$0xff] %v8706_v32  ;;  %14010 = vst [vmem:[#allocation21_spill] sm:$0xff] %v8710_v33  ;;  %v8722_v50 = vadd.f32 %v8493_v40, %v14015_v30  ;;  %v8726_v51 = vadd.f32 %v8493_v40, %v14017_v31  ;;  %v8742_v30 = vadd.f32 %v8493_v40, %v8477_v46 }
  0x5e   :  { %14012 = vst [vmem:[#allocation22_spill] sm:$0xff] %v8714_v34  ;;  %14014 = vst [vmem:[#allocation23_spill] sm:$0xff] %v8718_v35  ;;  %v8746_v31 = vadd.f32 %v8493_v40, %v8482_v60  ;;  %v8762_v46 = vadd.f32 %v8493_v40, %v8503_v37  ;;  %v8766_v60 = vadd.f32 %v8493_v40, %v8508_v62  ;;  %v13851_v34 = vmov 920167782  }
  0x5f   :  { %14016 = vst [vmem:[#allocation24_spill] sm:$0xff] %v8722_v50  ;;  %14018 = vst [vmem:[#allocation25_spill] sm:$0xff] %v8726_v51  ;;  %v14024_v51 = vld [vmem:[#allocation26_spill] sm:$0xff]  ;;  %v8782_v37 = vadd.f32 %v8493_v40, %v8529_v61  ;;  %v8787_v62 = vadd.f32 %v8493_v40, %v8534_v63 }
  0x60   :  { %14019 = vst [vmem:[#allocation42_spill] sm:$0xff] %v8730_v38  ;;  %14020 = vst [vmem:[#allocation43_spill] sm:$0xff] %v8734_v48  ;;  %v8750_v43 = vadd.f32 %v8493_v40, %v14024_v51  ;;  %v14026_v38 = vld [vmem:[#allocation27_spill] sm:$0xff]  ;;  %v14028_v48 = vld [vmem:[#allocation10_spill] sm:$0xff] }
  0x61   :  { %14021 = vst [vmem:[#allocation44_spill] sm:$0xff] %v8738_v29  ;;  %14022 = vst [vmem:[#allocation45_spill] sm:$0xff] %v8742_v30  ;;  %v8754_v44 = vadd.f32 %v8493_v40, %v14026_v38  ;;  %v8758_v45 = vadd.f32 %v8493_v40, %v14028_v48  ;;  %v8774_v38 = vadd.f32 %v8493_v40, %v8519_v36  ;;  %v13832_v29 = vand.u32 2147483647, %v8787_v62 }
  0x62   :  { %14023 = vst [vmem:[#allocation46_spill] sm:$0xff] %v8746_v31  ;;  %14025 = vst [vmem:[#allocation26_spill] sm:$0xff] %v8750_v43  ;;  %v14032_v31 = vld [vmem:[#allocation11_spill] sm:$0xff]  ;;  %v8778_v48 = vadd.f32 %v8493_v40, %v8524_v42  ;;  %v468_v42 = vand.u32 2139095040, %v8542_v53 }
  0x63   :  { %14027 = vst [vmem:[#allocation27_spill] sm:$0xff] %v8754_v44  ;;  %14029 = vst [vmem:[#allocation10_spill] sm:$0xff] %v8758_v45  ;;  %v8770_v51 = vadd.f32 %v8493_v40, %v14032_v31  ;;  %v364_v31 = vand.u32 2139095040, %v8538_v52  ;;  %v572_v45 = vand.u32 2139095040, %v8787_v62 }
  0x64   :  { %14030 = vst [vmem:[#allocation47_spill] sm:$0xff] %v8762_v46  ;;  %14031 = vst [vmem:[#allocation48_spill] sm:$0xff] %v8766_v60  ;;  %v13828_v46 = vand.u32 2147483647, %v8538_v52 }
  0x65   :  { %14033 = vst [vmem:[#allocation11_spill] sm:$0xff] %v8770_v51  ;;  %14034 = vst [vmem:[#allocation49_spill] sm:$0xff] %v8774_v38  ;;  %v13830_v51 = vand.u32 2147483647, %v8542_v53  ;;  %v14037_v38 = vcvt.s32.f32 %v13976_v39 }
  0x66   :  { %14035 = vst [vmem:[#allocation50_spill] sm:$0xff] %v8778_v48  ;;  %14036 = vst [vmem:[#allocation51_spill] sm:$0xff] %v8782_v37  ;;  %v368_v36 = vand.u32 8388607, %v13828_v46  ;;  %v365_v48 = vshrl.u32 %v364_v31, 23  ;;  %v469_v37 = vshrl.u32 %v468_v42, 23 }
  0x67   :  { %v229_v61 = vmul.f32 %v8208_v3, %v14037_v38  ;;  %v472_v60 = vand.u32 8388607, %v13830_v51  ;;  %v573_v46 = vshrl.u32 %v572_v45, 23 }
  0x68   :  { %v7100_v63 = vadd.s32 4294967169, %v365_v48  ;;  %v369_v44 = vor.u32 8388608, %v368_v36  ;;  %v7104_v43 = vadd.s32 4294967169, %v469_v37  ;;  %v8808_v37 = vand.u32 8388607, %v13832_v29 }
  0x69   :  { %v8802_v50 = vadd.f32 %v8493_v40, %v229_v61  ;;  %v473_v31 = vor.u32 8388608, %v472_v60  ;;  %v7108_v3 = vadd.s32 4294967169, %v573_v46  ;;  %v13857_v46 = vmov 683565275  }
  0x6a   :  { %v371_v30 = vadd.s32 1, %v7100_v63  ;;  %v475_v39 = vadd.s32 1, %v7104_v43  ;;  %v8804_v42 = vshll.u32 %v369_v44, 8  ;;  %v13844_v44 = vmov 2475754826  }
  0x6b   :  { %v8810_v45 = vshll.u32 %v473_v31, 8  ;;  %v8812_v40 = vadd.s32 1, %v7108_v3  ;;  %v13846_v63 = vmov 2131351028  }
  0x6c   :  { %vm372_vm0 = vcmp.gt.s32.totalorder %v371_v30, 0  ;;  %vm476_vm1 = vcmp.gt.s32.totalorder %v475_v39, 0 }
  0x6d   :  { %v373_v38 = vsel %vm372_vm0, %v371_v30, 0  ;;  %v477_v35 = vsel %vm476_vm1, %v475_v39, 0  ;;  %vm580_vm11 = vcmp.gt.s32.totalorder %v8812_v40, 0 }
  0x6e   :  { %v374_v48 = vshrl.u32 %v373_v38, 5  ;;  %v375_v51 = vand.u32 31, %v373_v38  ;;  %v479_v36 = vand.u32 31, %v477_v35  ;;  %v13849_v38 = vmov 2102212464  }
  0x6f   :  { %v8820_v3 = vshrl.u32 %v477_v35, 5 }
  0x70   :  { %v376_v60 = vsub.s32 32, %v375_v51  ;;  %v378_v30 = vshll.u32 %v13857_v46, %v375_v51  ;;  %v381_v61 = vshll.u32 %v13844_v44, %v375_v51  ;;  %v384_v39 = vshll.u32 %v13846_v63, %v375_v51 }
  0x71   :  { %v387_v29 = vshll.u32 %v13849_v38, %v375_v51  ;;  %v390_v31 = vshll.u32 %v13851_v34, %v375_v51  ;;  %vm393_vm2 = vcmp.lt.s32.totalorder %v374_v48, 1  ;;  %vm394_vm3 = vcmp.lt.s32.totalorder %v374_v48, 2 }
  0x72   :  { %v377_v43 = vshrl.u32 %v13857_v46, %v376_v60  ;;  %v379_v33 = vshrl.u32 %v13844_v44, %v376_v60  ;;  %v382_v32 = vshrl.u32 %v13846_v63, %v376_v60  ;;  %v385_v28 = vshrl.u32 %v13849_v38, %v376_v60 }
  0x73   :  { %v388_v27 = vshrl.u32 %v13851_v34, %v376_v60  ;;  %v391_v25 = vshrl.u32 %v13854_v26, %v376_v60  ;;  %vm396_vm4 = vcmp.lt.s32.totalorder %v374_v48, 4  ;;  %v480_v35 = vsub.s32 32, %v479_v36 }
  0x74   :  { %v380_v24 = vor.u32 %v379_v33, %v378_v30  ;;  %v383_v51 = vor.u32 %v382_v32, %v381_v61  ;;  %v386_v23 = vor.u32 %v385_v28, %v384_v39  ;;  %vm395_vm5 = vcmp.lt.s32.totalorder %v374_v48, 3 }
  0x75   :  { %v389_v22 = vor.u32 %v388_v27, %v387_v29  ;;  %v392_v21 = vor.u32 %v391_v25, %v390_v31  ;;  %v482_v44 = vshll.u32 %v13857_v46, %v479_v36  ;;  %v485_v33 = vshll.u32 %v14038_v18, %v479_v36 }
  0x76   :  { %v397_v63 = vsel %vm393_vm2, %v377_v43, %v380_v24  ;;  %v398_v20 = vsel %vm396_vm4, %v386_v23, 2102212464  ;;  %v401_v38 = vsel %vm393_vm2, %v380_v24, %v383_v51  ;;  %v405_v34 = vsel %vm393_vm2, %v383_v51, %v386_v23 }
  0x77   :  { %v399_v19 = vsel %vm395_vm5, %v383_v51, %v398_v20  ;;  %v402_v60 = vsel %vm396_vm4, %v389_v22, 920167782  ;;  %v406_v26 = vsel %vm396_vm4, %v392_v21, 1326507024  ;;  %v481_v27 = vshrl.u32 %v13857_v46, %v480_v35 }
  0x78   :  { %v403_v32 = vsel %vm395_vm5, %v386_v23, %v402_v60  ;;  %v407_v28 = vsel %vm395_vm5, %v389_v22, %v406_v26  ;;  %v483_v25 = vshrl.u32 %v14038_v18, %v480_v35  ;;  %v400_v29 = vsel %vm394_vm3, %v397_v63, %v399_v19 }
  0x79   :  { %v404_v43 = vsel %vm394_vm3, %v401_v38, %v403_v32  ;;  %v408_v30 = vsel %vm394_vm3, %v405_v34, %v407_v28  ;;  %v14039_v24 = vmov 2131351028   ;;  %v14040_v19 = vmov 2102212464  }
  0x7a   :  { %v486_v61 = vshrl.u32 %v14039_v24, %v480_v35  ;;  %v8840_v20 = vmul.u32.u64.low %v8804_v42, %v408_v30  ;;  %v8841_v39 = vmul.u32.u64.high %v8804_v42, %v408_v30, %v8840_v20  ;;  %v484_v22 = vor.u32 %v483_v25, %v482_v44 }
  0x7b   :  { %v8844_v21 = vmul.u32.u64.low %v8804_v42, %v404_v43  ;;  %v8845_v23 = vmul.u32.u64.high %v8804_v42, %v404_v43, %v8844_v21  ;;  %v488_v31 = vshll.u32 %v14039_v24, %v479_v36  ;;  %v489_v63 = vshrl.u32 %v14040_v19, %v480_v35 }
  0x7c   :  { %v487_v26 = vor.u32 %v486_v61, %v485_v33  ;;  %v491_v48 = vshll.u32 %v14040_v19, %v479_v36  ;;  %v14041_v34 = vmov 920167782   ;;  %v14042_v60 = vmov 1326507024  }
  0x7d   :  { %v492_v38 = vshrl.u32 %v14041_v34, %v480_v35  ;;  %v494_v51 = vshll.u32 %v14041_v34, %v479_v36  ;;  %v495_v32 = vshrl.u32 %v14042_v60, %v480_v35  ;;  %v416_v28 = vmul.u32 %v8804_v42, %v400_v29 }
  0x7e   :  { %v490_v30 = vor.u32 %v489_v63, %v488_v31  ;;  %vm497_vm6 = vcmp.lt.s32.totalorder %v8820_v3, 1  ;;  %vm498_vm7 = vcmp.lt.s32.totalorder %v8820_v3, 2  ;;  %vm418_vm8 = vc.u32 %v8841_v39, %v8844_v21 }
  0x7f   :  { %v419_v44 = vadd.s32 1, %v8845_v23  ;;  %v493_v33 = vor.u32 %v492_v38, %v491_v48  ;;  %vm499_vm9 = vcmp.lt.s32.totalorder %v8820_v3, 3  ;;  %v496_v25 = vor.u32 %v495_v32, %v494_v51 }
  0x80   :  { %vm500_vm10 = vcmp.lt.s32.totalorder %v8820_v3, 4  ;;  %v501_v36 = vsel %vm497_vm6, %v481_v27, %v484_v22  ;;  %v505_v35 = vsel %vm497_vm6, %v484_v22, %v487_v26  ;;  %v509_v61 = vsel %vm497_vm6, %v487_v26, %v490_v30 }
  0x81   :  { %v420_v42 = vsel %vm418_vm8, %v419_v44, %v8845_v23  ;;  %v502_v29 = vsel %vm500_vm10, %v490_v30, 2102212464  ;;  %v506_v43 = vsel %vm500_vm10, %v493_v33, 920167782  ;;  %v510_v46 = vsel %vm500_vm10, %v496_v25, 1326507024 }
  0x82   :  { %v421_v20 = vadd.s32 %v420_v42, %v416_v28  ;;  %v503_v31 = vsel %vm499_vm9, %v487_v26, %v502_v29  ;;  %v507_v63 = vsel %vm499_vm9, %v490_v30, %v506_v43  ;;  %v511_v38 = vsel %vm499_vm9, %v493_v33, %v510_v46 }
  0x83   :  { %v504_v17 = vsel %vm498_vm7, %v501_v36, %v503_v31  ;;  %v508_v48 = vsel %vm498_vm7, %v505_v35, %v507_v63  ;;  %v512_v23 = vsel %vm498_vm7, %v509_v61, %v511_v38  ;;  %v581_v28 = vsel %vm580_vm11, %v8812_v40, 0 }
  0x84   :  { %v422_v27 = vadd.s32 536870912, %v421_v20  ;;  %v8871_v22 = vmul.u32.u64.low %v8810_v45, %v508_v48  ;;  %v8872_v51 = vmul.u32.u64.high %v8810_v45, %v508_v48, %v8871_v22  ;;  %v583_v44 = vand.u32 31, %v581_v28 }
  0x85   :  { %v8876_v26 = vmul.u32.u64.low %v8810_v45, %v512_v23  ;;  %v8877_v32 = vmul.u32.u64.high %v8810_v45, %v512_v23, %v8876_v26  ;;  %v13860_v46 = vand.u32 2147483647, %v8802_v50  ;;  %v520_v33 = vmul.u32 %v8810_v45, %v504_v17 }
  0x86   :  { %v423_v30 = vshrl.u32 %v422_v27, 30  ;;  %v577_v3 = vor.u32 8388608, %v8808_v37  ;;  %v14043_v25 = vand.u32 2139095040, %v8802_v50  ;;  %v523_v42 = vadd.s32 1, %v8872_v51 }
  0x87   :  { %vm522_vm12 = vc.u32 %v8877_v32, %v8871_v22  ;;  %v584_v29 = vsub.s32 32, %v583_v44  ;;  %v8894_v17 = vand.u32 8388607, %v13860_v46  ;;  %v8896_v45 = vshrl.u32 %v581_v28, 5 }
  0x88   :  { %v677_v36 = vshrl.u32 %v14043_v25, 23  ;;  %v424_v35 = vshll.u32 %v423_v30, 30  ;;  %v524_v43 = vsel %vm522_vm12, %v523_v42, %v8872_v51  ;;  %v8898_v61 = vshll.u32 %v577_v3, 8 }
  0x89   :  { %v525_v37 = vadd.s32 %v524_v43, %v520_v33  ;;  %v447_v48 = vsub.s32 4, %v423_v30  ;;  %v14044_v38 = vmov 683565275   ;;  %v587_v51 = vshrl.u32 %v14038_v18, %v584_v29 }
  0x8a   :  { %v8889_v40 = vsub.s32 %v421_v20, %v424_v35  ;;  %v7112_v31 = vadd.s32 4294967169, %v677_v36  ;;  %v586_v27 = vshll.u32 %v14044_v38, %v583_v44  ;;  %v589_v20 = vshll.u32 %v14038_v18, %v583_v44 }
  0x8b   :  { %v526_v23 = vadd.s32 536870912, %v525_v37  ;;  %v590_v26 = vshrl.u32 %v14039_v24, %v584_v29  ;;  %v592_v25 = vshll.u32 %v14039_v24, %v583_v44  ;;  %v593_v33 = vshrl.u32 %v14040_v19, %v584_v29 }
  0x8c   :  { %v427_v63 = vsub.s32 0, %v8889_v40  ;;  %v595_v3 = vshll.u32 %v14040_v19, %v583_v44  ;;  %v596_v36 = vshrl.u32 %v14041_v34, %v584_v29  ;;  %v598_v42 = vshll.u32 %v14041_v34, %v583_v44 }
  0x8d   :  { %v527_v35 = vshrl.u32 %v526_v23, 30  ;;  %v599_v43 = vshrl.u32 %v14042_v60, %v584_v29  ;;  %v448_v13 = vsel %vm363_vm13, %v447_v48, %v423_v30  ;;  %v683_v44 = vadd.s32 1, %v7112_v31 }
  0x8e   :  { %v7101_v28 = vmin.u32 %v427_v63, %v8889_v40  ;;  %v417_v63 = vadd.s32 %v8844_v21, %v8841_v39  ;;  %v585_v12 = vshrl.u32 %v14044_v38, %v584_v29  ;;  %v588_v46 = vor.u32 %v587_v51, %v586_v27 }
  0x8f   :  { %v528_v23 = vshll.u32 %v527_v35, 30  ;;  %v591_v11 = vor.u32 %v590_v26, %v589_v20  ;;  %v594_v16 = vor.u32 %v593_v33, %v592_v25  ;;  %v597_v9 = vor.u32 %v596_v36, %v595_v3 }
  0x90   :  { %v429_v14 = vclz %v7101_v28  ;;  %vm601_vm0 = vcmp.lt.s32.totalorder %v8896_v45, 1  ;;  %v551_v39 = vsub.s32 4, %v527_v35  ;;  %v600_v21 = vor.u32 %v599_v43, %v598_v42 }
  0x91   :  { %v8926_v8 = vsub.s32 %v525_v37, %v528_v23  ;;  %vm604_vm1 = vcmp.lt.s32.totalorder %v8896_v45, 4  ;;  %v14048_v30 = vand.u32 2147483647, %v8542_v53  ;;  %vm602_vm4 = vcmp.lt.s32.totalorder %v8896_v45, 2 }
  0x92   :  { %v7102_v10 = vadd.s32 4294967294, %v429_v14  ;;  %vm603_vm5 = vcmp.lt.s32.totalorder %v8896_v45, 3  ;;  %v606_v14 = vsel %vm604_vm1, %v594_v16, 2102212464  ;;  %v605_v48 = vsel %vm601_vm0, %v585_v12, %v588_v46 }
  0x93   :  { %vm8931_vm3 = vcmp.le.f32.partialorder %v14048_v30, 0.7853982  ;;  %v531_v37 = vsub.s32 0, %v8926_v8  ;;  %v609_v27 = vsel %vm601_vm0, %v588_v46, %v591_v11  ;;  %v610_v25 = vsel %vm604_vm1, %v597_v9, 920167782 }
  0x94   :  { %vm7103_vm2 = vcmp.lt.s32.totalorder %v7102_v10, 0  ;;  %v611_v33 = vsel %vm603_vm5, %v594_v16, %v610_v25  ;;  %v613_v12 = vsel %vm601_vm0, %v591_v11, %v594_v16  ;;  %v614_v36 = vsel %vm604_vm1, %v600_v21, 1326507024 }
  0x95   :  { %v432_v29 = vsel %vm7103_vm2, 0, %v7102_v10  ;;  %v7105_v28 = vmin.u32 %v531_v37, %v8926_v8  ;;  %v607_v10 = vsel %vm603_vm5, %v591_v11, %v606_v14  ;;  %v450_v42 = vsel %vm8915_vm14, 0, %v448_v13 }
  0x96   :  { %v433_v20 = vsub.s32 32, %v432_v29  ;;  %v434_v51 = vshll.u32 %v8889_v40, %v432_v29  ;;  %v437_v26 = vsub.s32 4294967266, %v432_v29  ;;  %v612_v40 = vsel %vm602_vm4, %v609_v27, %v611_v33 }
  0x97   :  { %v521_v43 = vadd.s32 %v8871_v22, %v8877_v32  ;;  %v533_v23 = vclz %v7105_v28  ;;  %v552_v30 = vsel %vm467_vm15, %v551_v39, %v527_v35  ;;  %v615_v16 = vsel %vm603_vm5, %v597_v9, %v614_v36 }
  0x98   :  { %v435_v3 = vshrl.u32 %v417_v63, %v433_v20  ;;  %v438_v46 = vadd.s32 127, %v437_v26  ;;  %v608_v63 = vsel %vm602_vm4, %v605_v48, %v607_v10  ;;  %v616_v21 = vsel %vm602_vm4, %v613_v12, %v615_v16 }
  0x99   :  { %v7106_v29 = vadd.s32 4294967294, %v533_v23  ;;  %v8971_v13 = vmul.u32.u64.low %v8898_v61, %v612_v40  ;;  %v8972_v37 = vmul.u32.u64.high %v8898_v61, %v612_v40, %v8971_v13  ;;  %v454_v27 = vadd.s32 3, %v450_v42 }
  0x9a   :  { %v436_v14 = vor.u32 %v435_v3, %v434_v51  ;;  %v439_v11 = vshll.u32 %v438_v46, 23  ;;  %v8976_v35 = vmul.u32.u64.low %v8898_v61, %v616_v21  ;;  %v8977_v39 = vmul.u32.u64.high %v8898_v61, %v616_v21, %v8976_v35 }
  0x9b   :  { %vm7107_vm6 = vcmp.lt.s32.totalorder %v7106_v29, 0  ;;  %v554_v9 = vsel %vm8931_vm3, 0, %v552_v30  ;;  %vm684_vm7 = vcmp.gt.s32.totalorder %v683_v44, 0  ;;  %v624_v20 = vmul.u32 %v8898_v61, %v608_v63 }
  0x9c   :  { %v440_v22 = vor.u32 4788187, %v439_v11  ;;  %v443_v32 = vcvt.s32.f32 %v436_v14  ;;  %v536_v45 = vsel %vm7107_vm6, 0, %v7106_v29  ;;  %v685_v51 = vsel %vm684_vm7, %v683_v44, 0 }
  0x9d   :  { %v537_v26 = vsub.s32 32, %v536_v45  ;;  %v538_v25 = vshll.u32 %v8926_v8, %v536_v45  ;;  %v541_v28 = vsub.s32 4294967266, %v536_v45  ;;  %v627_v10 = vadd.s32 1, %v8972_v37 }
  0x9e   :  { %v441_v48 = vand.u32 2147483647, %v440_v22  ;;  %vm626_vm8 = vc.u32 %v8977_v39, %v8971_v13  ;;  %v14051_v12 = vor.u32 8388608, %v8894_v17  ;;  %v777_v46 = vand.u32 2147483647, %v8546_v41 }
  0x9f   :  { %v539_v40 = vshrl.u32 %v521_v43, %v537_v26  ;;  %v542_v36 = vadd.s32 127, %v541_v28  ;;  %v628_v61 = vsel %vm626_vm8, %v627_v10, %v8972_v37  ;;  %v687_v44 = vand.u32 31, %v685_v51 }
  0xa0   :  { %v444_v33 = vmul.f32 %v443_v32, %v441_v48  ;;  %v8988_v3 = vshll.u32 %v14051_v12, 8  ;;  %v8992_v8 = vand.u32 3, %v454_v27  ;;  %v558_v23 = vadd.s32 3, %v554_v9 }
  0xa1   :  { %v629_v30 = vadd.s32 %v628_v61, %v624_v20  ;;  %v540_v14 = vor.u32 %v539_v40, %v538_v25  ;;  %v543_v11 = vshll.u32 %v542_v36, 23  ;;  %v8994_v63 = vshrl.u32 %v685_v51, 5 }
  0xa2   :  { %v445_v42 = vxor.u32 2147483648, %v444_v33  ;;  %v688_v16 = vsub.s32 32, %v687_v44  ;;  %v690_v43 = vshll.u32 %v14044_v38, %v687_v44  ;;  %v693_v21 = vshll.u32 %v14038_v18, %v687_v44 }
  0xa3   :  { %v630_v29 = vadd.s32 536870912, %v629_v30  ;;  %v544_v22 = vor.u32 4788187, %v543_v11  ;;  %v547_v32 = vcvt.s32.f32 %v540_v14  ;;  %v696_v35 = vshll.u32 %v14039_v24, %v687_v44 }
  0xa4   :  { %v446_v17 = vsel %vm363_vm13, %v445_v42, %v444_v33  ;;  %v691_v9 = vshrl.u32 %v14038_v18, %v688_v16  ;;  %v694_v48 = vshrl.u32 %v14039_v24, %v688_v16  ;;  %v697_v20 = vshrl.u32 %v14040_v19, %v688_v16 }
  0xa5   :  { %v449_v37 = vsel %vm8915_vm14, %v8538_v52, %v446_v17  ;;  %v631_v27 = vshrl.u32 %v630_v29, 30  ;;  %v545_v45 = vand.u32 2147483647, %v544_v22  ;;  %v699_v51 = vshll.u32 %v14040_v19, %v687_v44 }
  0xa6   :  { %7622 = vcosq.f32 %v449_v37  ;;  %vm460_vm9 = vcmp.eq.s32.totalorder %v8992_v8, 2  ;;  %v9009_v15 = vand.u32 3, %v558_v23  ;;  %vm571_vm10 = vcmp.lt.s32.totalorder %v8787_v62, 0 }
  0xa7   :  { %7624 = vsinq.f32 %v449_v37  ;;  %v632_v26 = vshll.u32 %v631_v27, 30  ;;  %vm705_vm11 = vcmp.lt.s32.totalorder %v8994_v63, 1  ;;  %vm457_vm12 = vcmp.eq.s32.totalorder %v8992_v8, 0 }
  0xa8   :  { %v548_v25 = vmul.f32 %v547_v32, %v545_v45  ;;  %v689_v28 = vshrl.u32 %v14044_v38, %v688_v16  ;;  %v700_v10 = vshrl.u32 %v14041_v34, %v688_v16  ;;  %v702_v33 = vshll.u32 %v14041_v34, %v687_v44 }
  0xa9   :  { %vm456_vm13 = vcmp.lt.s32.totalorder %v8992_v8, 2  ;;  %v9018_v12 = vsub.s32 %v629_v30, %v632_v26  ;;  %v692_v40 = vor.u32 %v691_v9, %v690_v43  ;;  %v695_v36 = vor.u32 %v694_v48, %v693_v21 }
  0xaa   :  { %v703_v61 = vshrl.u32 %v14042_v60, %v688_v16  ;;  %vm453_vm14 = vweird.f32 %v8538_v52  ;;  %v549_v42 = vxor.u32 2147483648, %v548_v25  ;;  %v698_v23 = vor.u32 %v697_v20, %v696_v35 }
  0xab   :  { %v701_v14 = vor.u32 %v700_v10, %v699_v51  ;;  %vm708_vm0 = vcmp.lt.s32.totalorder %v8994_v63, 4  ;;  %v635_v11 = vsub.s32 0, %v9018_v12  ;;  %v655_v17 = vsub.s32 4, %v631_v27 }
  0xac   :  { %vm707_vm1 = vcmp.lt.s32.totalorder %v8994_v63, 3  ;;  %v780_v44 = vand.u32 2139095040, %v8546_v41  ;;  %v550_v30 = vsel %vm467_vm15, %v549_v42, %v548_v25  ;;  %v704_v29 = vor.u32 %v703_v61, %v702_v33 }
  0xad   :  { %v710_v16 = vsel %vm708_vm0, %v698_v23, 2102212464  ;;  %v714_v43 = vsel %vm708_vm0, %v701_v14, 920167782  ;;  %v553_v21 = vsel %vm8931_vm3, %v8542_v53, %v550_v30  ;;  %v7109_v37 = vmin.u32 %v635_v11, %v9018_v12 }
  0xae   :  { %vm706_vm2 = vcmp.lt.s32.totalorder %v8994_v63, 2  ;;  %v713_v22 = vsel %vm705_vm11, %v692_v40, %v695_v36  ;;  %7626 = vcosq.f32 %v553_v21  ;;  %v709_v32 = vsel %vm705_vm11, %v689_v28, %v692_v40 }
  0xaf   :  { %v711_v35 = vsel %vm707_vm1, %v695_v36, %v710_v16  ;;  %v715_v9 = vsel %vm707_vm1, %v698_v23, %v714_v43  ;;  %7628 = vsinq.f32 %v553_v21  ;;  %v625_v31 = vadd.s32 %v8971_v13, %v8977_v39 }
  0xb0   :  { %v7623_v48 = vpop.eup %7622  ;;  %v637_v45 = vclz %v7109_v37  ;;  %v717_v20 = vsel %vm705_vm11, %v695_v36, %v698_v23  ;;  %v656_v25 = vsel %vm571_vm10, %v655_v17, %v631_v27  ;;  %v716_v28 = vsel %vm706_vm2, %v713_v22, %v715_v9 }
  0xb1   :  { %v7625_v51 = vpop.eup %7624  ;;  %v461_v26 = vxor.u32 2147483648, %v7623_v48  ;;  %v718_v10 = vsel %vm708_vm0, %v704_v29, 1326507024  ;;  %v712_v13 = vsel %vm706_vm2, %v709_v32, %v711_v35  ;;  %v781_v29 = vshrl.u32 %v780_v44, 23 }
  0xb2   :  { %v458_v33 = vxor.u32 2147483648, %v7625_v51  ;;  %v7110_v40 = vadd.s32 4294967294, %v637_v45  ;;  %v719_v39 = vsel %vm707_vm1, %v701_v14, %v718_v10  ;;  %v728_v63 = vmul.u32 %v8988_v3, %v712_v13 }
  0xb3   :  { %v462_v36 = vsel %vm460_vm9, %v461_v26, %v7625_v51  ;;  %v720_v27 = vsel %vm706_vm2, %v717_v20, %v719_v39  ;;  %v9064_v61 = vmul.u32.u64.low %v8988_v3, %v716_v28  ;;  %v9065_v42 = vmul.u32.u64.high %v8988_v3, %v716_v28, %v9064_v61 }
  0xb4   :  { %v459_v23 = vsel %vm457_vm12, %v7623_v48, %v458_v33  ;;  %vm7111_vm15 = vcmp.lt.s32.totalorder %v7110_v40, 0  ;;  %v9071_v11 = vmul.u32.u64.low %v8988_v3, %v720_v27  ;;  %v9072_v17 = vmul.u32.u64.high %v8988_v3, %v720_v27, %v9071_v11 }
  0xb5   :  { %v463_v14 = vsel %vm456_vm13, %v459_v23, %v462_v36  ;;  %v640_v30 = vsel %vm7111_vm15, 0, %v7110_v40  ;;  %vm561_vm3 = vcmp.eq.s32.totalorder %v9009_v15, 0  ;;  %v14052_v22 = vand.u32 2147483647, %v8787_v62 }
  0xb6   :  { %v464_v16 = vsel %vm453_vm14, nan, %v463_v14  ;;  %v641_v43 = vsub.s32 32, %v640_v30  ;;  %v642_v21 = vshll.u32 %v9018_v12, %v640_v30  ;;  %v645_v37 = vsub.s32 4294967266, %v640_v30 }
  0xb7   :  { %vm9083_vm4 = vcmp.le.f32.partialorder %v14052_v22, 0.7853982  ;;  %v731_v8 = vadd.s32 1, %v9065_v42  ;;  %v7116_v35 = vadd.s32 4294967169, %v781_v29  ;;  %7017 = vst [vmem:[#allocation5] sm:$0xff] %v464_v16  ;;  %vm564_vm5 = vcmp.eq.s32.totalorder %v9009_v15, 2 }
  0xb8   :  { %v643_v52 = vshrl.u32 %v625_v31, %v641_v43  ;;  %v646_v3 = vadd.s32 127, %v645_v37  ;;  %vm730_vm6 = vc.u32 %v9072_v17, %v9064_v61  ;;  %v7627_v12 = vpop.eup %7626  ;;  %v658_v44 = vsel %vm9083_vm4, 0, %v656_v25 }
  0xb9   :  { %v732_v9 = vsel %vm730_vm6, %v731_v8, %v9065_v42  ;;  %v784_v48 = vand.u32 8388607, %v777_v46  ;;  %v787_v45 = vadd.s32 1, %v7116_v35  ;;  %v7629_v20 = vpop.eup %7628  ;;  %v565_v51 = vxor.u32 2147483648, %v7627_v12 }
  0xba   :  { %v644_v26 = vor.u32 %v643_v52, %v642_v21  ;;  %v647_v28 = vshll.u32 %v646_v3, 23  ;;  %v733_v10 = vadd.s32 %v732_v9, %v728_v63  ;;  %vm557_vm7 = vweird.f32 %v8542_v53 }
  0xbb   :  { %vm560_vm8 = vcmp.lt.s32.totalorder %v9009_v15, 2  ;;  %v562_v31 = vxor.u32 2147483648, %v7629_v20  ;;  %vm788_vm9 = vcmp.gt.s32.totalorder %v787_v45, 0  ;;  %v566_v25 = vsel %vm564_vm5, %v565_v51, %v7629_v20 }
  0xbc   :  { %v648_v33 = vor.u32 4788187, %v647_v28  ;;  %v651_v40 = vcvt.s32.f32 %v644_v26  ;;  %v734_v13 = vadd.s32 536870912, %v733_v10  ;;  %v662_v36 = vadd.s32 3, %v658_v44 }
  0xbd   :  { %v563_v39 = vsel %vm561_vm3, %v7627_v12, %v562_v31  ;;  %v785_v27 = vor.u32 8388608, %v784_v48  ;;  %v789_v42 = vsel %vm788_vm9, %v787_v45, 0  ;;  %v884_v63 = vand.u32 2139095040, %v8550_v54 }
  0xbe   :  { %v567_v23 = vsel %vm560_vm8, %v563_v39, %v566_v25  ;;  %v649_v11 = vand.u32 2147483647, %v648_v33  ;;  %v9102_v14 = vshrl.u32 %v734_v13, 30  ;;  %v791_v30 = vand.u32 31, %v789_v42 }
  0xbf   :  { %v568_v53 = vsel %vm557_vm7, nan, %v567_v23  ;;  %v790_v43 = vshrl.u32 %v789_v42, 5  ;;  %v9106_v21 = vand.u32 3, %v662_v36  ;;  %v9109_v22 = vshll.u32 %v785_v27, 8 }
  0xc0   :  { %v652_v29 = vmul.f32 %v651_v40, %v649_v11  ;;  %v736_v16 = vshll.u32 %v9102_v14, 30  ;;  %7018 = vst [vmem:[#allocation5 + $0x8] sm:$0xff] %v568_v53  ;;  %v792_v15 = vsub.s32 32, %v791_v30  ;;  %v794_v37 = vshll.u32 %v14044_v38, %v791_v30 }
  0xc1   :  { %v797_v52 = vshll.u32 %v14038_v18, %v791_v30  ;;  %v800_v3 = vshll.u32 %v14039_v24, %v791_v30  ;;  %v803_v9 = vshll.u32 %v14040_v19, %v791_v30  ;;  %v885_v48 = vshrl.u32 %v884_v63, 23 }
  0xc2   :  { %v653_v8 = vxor.u32 2147483648, %v652_v29  ;;  %v9111_v35 = vsub.s32 %v733_v10, %v736_v16  ;;  %v795_v12 = vshrl.u32 %v14038_v18, %v792_v15  ;;  %v798_v44 = vshrl.u32 %v14039_v24, %v792_v15 }
  0xc3   :  { %v801_v51 = vshrl.u32 %v14040_v19, %v792_v15  ;;  %vm809_vm11 = vcmp.lt.s32.totalorder %v790_v43, 1  ;;  %v793_v28 = vshrl.u32 %v14044_v38, %v792_v15  ;;  %v804_v31 = vshrl.u32 %v14041_v34, %v792_v15 }
  0xc4   :  { %v654_v45 = vsel %vm571_vm10, %v653_v8, %v652_v29  ;;  %v739_v20 = vsub.s32 0, %v9111_v35  ;;  %v796_v10 = vor.u32 %v795_v12, %v794_v37  ;;  %v799_v33 = vor.u32 %v798_v44, %v797_v52 }
  0xc5   :  { %v657_v26 = vsel %vm9083_vm4, %v8787_v62, %v654_v45  ;;  %v802_v40 = vor.u32 %v801_v51, %v800_v3  ;;  %v805_v13 = vor.u32 %v804_v31, %v803_v9  ;;  %v806_v39 = vshll.u32 %v14041_v34, %v791_v30 }
  0xc6   :  { %7630 = vcosq.f32 %v657_v26  ;;  %v7113_v25 = vmin.u32 %v739_v20, %v9111_v35  ;;  %v807_v36 = vshrl.u32 %v14042_v60, %v792_v15  ;;  %vm675_vm10 = vcmp.lt.s32.totalorder %v8802_v50, 0 }
  0xc7   :  { %7632 = vsinq.f32 %v657_v26  ;;  %v729_v32 = vadd.s32 %v9064_v61, %v9072_v17  ;;  %v881_v42 = vand.u32 2147483647, %v8550_v54  ;;  %v7120_v23 = vadd.s32 4294967169, %v885_v48 }
  0xc8   :  { %v741_v27 = vclz %v7113_v25  ;;  %vm665_vm12 = vcmp.eq.s32.totalorder %v9106_v21, 0  ;;  %v808_v11 = vor.u32 %v807_v36, %v806_v39  ;;  %vm810_vm13 = vcmp.lt.s32.totalorder %v790_v43, 2 }
  0xc9   :  { %vm811_vm14 = vcmp.lt.s32.totalorder %v790_v43, 3  ;;  %vm812_vm0 = vcmp.lt.s32.totalorder %v790_v43, 4  ;;  %vm664_vm1 = vcmp.lt.s32.totalorder %v9106_v21, 2  ;;  %v813_v30 = vsel %vm809_vm11, %v793_v28, %v796_v10 }
  0xca   :  { %v7114_v53 = vadd.s32 4294967294, %v741_v27  ;;  %v814_v63 = vsel %vm812_vm0, %v802_v40, 2102212464  ;;  %v817_v29 = vsel %vm809_vm11, %v796_v10, %v799_v33  ;;  %vm661_vm2 = vweird.f32 %v8787_v62 }
  0xcb   :  { %v815_v61 = vsel %vm811_vm14, %v799_v33, %v814_v63  ;;  %v818_v17 = vsel %vm812_vm0, %v805_v13, 920167782  ;;  %v821_v16 = vsel %vm809_vm11, %v799_v33, %v802_v40  ;;  %v822_v15 = vsel %vm812_vm0, %v808_v11, 1326507024 }
  0xcc   :  { %vm7115_vm15 = vcmp.lt.s32.totalorder %v7114_v53, 0  ;;  %v759_v37 = vsub.s32 4, %v9102_v14  ;;  %v819_v8 = vsel %vm811_vm14, %v802_v40, %v818_v17  ;;  %v823_v52 = vsel %vm811_vm14, %v805_v13, %v822_v15 }
  0xcd   :  { %v744_v3 = vsel %vm7115_vm15, 0, %v7114_v53  ;;  %v816_v12 = vsel %vm810_vm13, %v813_v30, %v815_v61  ;;  %v820_v44 = vsel %vm810_vm13, %v817_v29, %v819_v8  ;;  %v824_v9 = vsel %vm810_vm13, %v821_v16, %v823_v52 }
  0xce   :  { %v745_v48 = vsub.s32 32, %v744_v3  ;;  %v746_v45 = vshll.u32 %v9111_v35, %v744_v3  ;;  %v749_v20 = vsub.s32 4294967266, %v744_v3  ;;  %v891_v51 = vadd.s32 1, %v7120_v23 }
  0xcf   :  { %v9146_v26 = vmul.u32.u64.low %v9109_v22, %v824_v9  ;;  %v9147_v28 = vmul.u32.u64.high %v9109_v22, %v824_v9, %v9146_v26  ;;  %v9150_v10 = vmul.u32.u64.low %v9109_v22, %v820_v44  ;;  %v9151_v31 = vmul.u32.u64.high %v9109_v22, %v820_v44, %v9150_v10 }
  0xd0   :  { %v7631_v25 = vpop.eup %7630  ;;  %vm668_vm3 = vcmp.eq.s32.totalorder %v9106_v21, 2  ;;  %v747_v33 = vshrl.u32 %v729_v32, %v745_v48  ;;  %v750_v43 = vadd.s32 127, %v749_v20  ;;  %vm892_vm4 = vcmp.gt.s32.totalorder %v891_v51, 0 }
  0xd1   :  { %v7633_v40 = vpop.eup %7632  ;;  %v669_v13 = vxor.u32 2147483648, %v7631_v25  ;;  %v760_v35 = vsel %vm675_vm10, %v759_v37, %v9102_v14  ;;  %v888_v39 = vand.u32 8388607, %v881_v42  ;;  %v893_v36 = vsel %vm892_vm4, %v891_v51, 0 }
  0xd2   :  { %v666_v27 = vxor.u32 2147483648, %v7633_v40  ;;  %v748_v23 = vor.u32 %v747_v33, %v746_v45  ;;  %v751_v11 = vshll.u32 %v750_v43, 23  ;;  %v832_v53 = vmul.u32 %v9109_v22, %v816_v12 }
  0xd3   :  { %v670_v30 = vsel %vm668_vm3, %v669_v13, %v7633_v40  ;;  %v14055_v32 = vand.u32 2147483647, %v8802_v50  ;;  %vm834_vm6 = vc.u32 %v9147_v28, %v9150_v10  ;;  %v835_v14 = vadd.s32 1, %v9151_v31 }
  0xd4   :  { %v667_v29 = vsel %vm665_vm12, %v7631_v25, %v666_v27  ;;  %v752_v61 = vor.u32 4788187, %v751_v11  ;;  %v755_v17 = vcvt.s32.f32 %v748_v23  ;;  %v895_v16 = vand.u32 31, %v893_v36 }
  0xd5   :  { %vm9163_vm5 = vcmp.le.f32.partialorder %v14055_v32, 0.7853982  ;;  %v671_v22 = vsel %vm664_vm1, %v667_v29, %v670_v30  ;;  %v836_v37 = vsel %vm834_vm6, %v835_v14, %v9151_v31  ;;  %v889_v8 = vor.u32 8388608, %v888_v39 }
  0xd6   :  { %v762_v15 = vsel %vm9163_vm5, 0, %v760_v35  ;;  %v672_v52 = vsel %vm661_vm2, nan, %v671_v22  ;;  %v753_v3 = vand.u32 2147483647, %v752_v61  ;;  %v837_v12 = vadd.s32 %v836_v37, %v832_v53 }
  0xd7   :  { %v896_v44 = vsub.s32 32, %v895_v16  ;;  %v894_v9 = vshrl.u32 %v893_v36, 5  ;;  %v898_v48 = vshll.u32 %v14044_v38, %v895_v16  ;;  %v901_v45 = vshll.u32 %v14038_v18, %v895_v16  ;;  %7019 = vst [vmem:[#allocation5 + $0x10] sm:$0xff] %v672_v52 }
  0xd8   :  { %v907_v21 = vshll.u32 %v14040_v19, %v895_v16  ;;  %v756_v20 = vmul.f32 %v755_v17, %v753_v3  ;;  %v838_v51 = vadd.s32 536870912, %v837_v12  ;;  %v904_v31 = vshll.u32 %v14039_v24, %v895_v16 }
  0xd9   :  { %v899_v26 = vshrl.u32 %v14038_v18, %v896_v44  ;;  %v902_v62 = vshrl.u32 %v14039_v24, %v896_v44  ;;  %v905_v25 = vshrl.u32 %v14040_v19, %v896_v44  ;;  %v908_v33 = vshrl.u32 %v14041_v34, %v896_v44 }
  0xda   :  { %v910_v43 = vshll.u32 %v14041_v34, %v895_v16  ;;  %v757_v40 = vxor.u32 2147483648, %v756_v20  ;;  %v839_v13 = vshrl.u32 %v838_v51, 30  ;;  %v911_v39 = vshrl.u32 %v14042_v60, %v896_v44 }
  0xdb   :  { %v900_v35 = vor.u32 %v899_v26, %v898_v48  ;;  %v766_v36 = vadd.s32 3, %v762_v15  ;;  %v903_v27 = vor.u32 %v902_v62, %v901_v45  ;;  %v909_v23 = vor.u32 %v908_v33, %v907_v21 }
  0xdc   :  { %vm913_vm7 = vcmp.lt.s32.totalorder %v894_v9, 1  ;;  %v758_v11 = vsel %vm675_vm10, %v757_v40, %v756_v20  ;;  %v840_v53 = vshll.u32 %v839_v13, 30  ;;  %v906_v30 = vor.u32 %v905_v25, %v904_v31 }
  0xdd   :  { %vm914_vm8 = vcmp.lt.s32.totalorder %v894_v9, 2  ;;  %v761_v32 = vsel %vm9163_vm5, %v8802_v50, %v758_v11  ;;  %v912_v14 = vor.u32 %v911_v39, %v910_v43  ;;  %vm915_vm9 = vcmp.lt.s32.totalorder %v894_v9, 3 }
  0xde   :  { %vm916_vm11 = vcmp.lt.s32.totalorder %v894_v9, 4  ;;  %7634 = vcosq.f32 %v761_v32  ;;  %v9194_v29 = vsub.s32 %v837_v12, %v840_v53  ;;  %v897_v61 = vshrl.u32 %v14044_v38, %v896_v44 }
  0xdf   :  { %v921_v17 = vsel %vm913_vm7, %v900_v35, %v903_v27  ;;  %7636 = vsinq.f32 %v761_v32  ;;  %v918_v16 = vsel %vm916_vm11, %v906_v30, 2102212464  ;;  %v922_v22 = vsel %vm916_vm11, %v909_v23, 920167782 }
  0xe0   :  { %v929_v15 = vshll.u32 %v889_v8, 8  ;;  %v843_v37 = vsub.s32 0, %v9194_v29  ;;  %v863_v52 = vsub.s32 4, %v839_v13  ;;  %v923_v63 = vsel %vm915_vm9, %v906_v30, %v922_v22 }
  0xe1   :  { %v767_v3 = vand.u32 3, %v766_v36  ;;  %v924_v48 = vsel %vm914_vm8, %v921_v17, %v923_v63  ;;  %v925_v45 = vsel %vm913_vm7, %v903_v27, %v906_v30  ;;  %v926_v12 = vsel %vm916_vm11, %v912_v14, 1326507024 }
  0xe2   :  { %v7117_v21 = vmin.u32 %v843_v37, %v9194_v29  ;;  %v917_v44 = vsel %vm913_vm7, %v897_v61, %v900_v35  ;;  %v919_v20 = vsel %vm915_vm9, %v903_v27, %v918_v16  ;;  %v927_v51 = vsel %vm915_vm9, %v909_v23, %v926_v12 }
  0xe3   :  { %vm779_vm10 = vcmp.lt.s32.totalorder %v8546_v41, 0  ;;  %v928_v8 = vsel %vm914_vm8, %v925_v45, %v927_v51  ;;  %v9208_v26 = vmul.u32.u64.low %v929_v15, %v924_v48  ;;  %v9209_v31 = vmul.u32.u64.high %v929_v15, %v924_v48, %v9208_v26 }
  0xe4   :  { %v845_v62 = vclz %v7117_v21  ;;  %v864_v25 = vsel %vm779_vm10, %v863_v52, %v839_v13  ;;  %v985_v33 = vand.u32 2147483647, %v8554_v49  ;;  %v920_v43 = vsel %vm914_vm8, %v917_v44, %v919_v20 }
  0xe5   :  { %v9215_v40 = vmul.u32.u64.low %v929_v15, %v928_v8  ;;  %v9216_v35 = vmul.u32.u64.high %v929_v15, %v928_v8, %v9215_v40  ;;  %v988_v39 = vand.u32 2139095040, %v8554_v49  ;;  %vm765_vm12 = vweird.f32 %v8802_v50 }
  0xe6   :  { %vm768_vm13 = vcmp.lt.s32.totalorder %v767_v3, 2  ;;  %vm9222_vm14 = vcmp.le.f32.partialorder %v777_v46, 0.7853982  ;;  %v7118_v27 = vadd.s32 4294967294, %v845_v62  ;;  %vm769_vm0 = vcmp.eq.s32.totalorder %v767_v3, 0 }
  0xe7   :  { %vm772_vm1 = vcmp.eq.s32.totalorder %v767_v3, 2  ;;  %v939_v9 = vadd.s32 1, %v9209_v31  ;;  %v989_v13 = vshrl.u32 %v988_v39, 23  ;;  %v833_v11 = vadd.s32 %v9150_v10, %v9147_v28 }
  0xe8   :  { %v7635_v23 = vpop.eup %7634  ;;  %vm7119_vm2 = vcmp.lt.s32.totalorder %v7118_v27, 0  ;;  %v866_v53 = vsel %vm9222_vm14, 0, %v864_v25  ;;  %v936_v30 = vmul.u32 %v929_v15, %v920_v43  ;;  %vm938_vm15 = vc.u32 %v9216_v35, %v9208_v26 }
  0xe9   :  { %v7637_v32 = vpop.eup %7636  ;;  %v773_v46 = vxor.u32 2147483648, %v7635_v23  ;;  %v848_v14 = vsel %vm7119_vm2, 0, %v7118_v27  ;;  %v992_v61 = vand.u32 8388607, %v985_v33  ;;  %v940_v10 = vsel %vm938_vm15, %v939_v9, %v9209_v31 }
  0xea   :  { %v770_v17 = vxor.u32 2147483648, %v7637_v32  ;;  %v849_v16 = vsub.s32 32, %v848_v14  ;;  %v850_v22 = vshll.u32 %v9194_v29, %v848_v14  ;;  %v853_v37 = vsub.s32 4294967266, %v848_v14 }
  0xeb   :  { %v774_v28 = vsel %vm772_vm1, %v773_v46, %v7637_v32  ;;  %v7124_v52 = vadd.s32 4294967169, %v989_v13  ;;  %v1092_v15 = vand.u32 2139095040, %v8558_v57  ;;  %v941_v12 = vadd.s32 %v940_v10, %v936_v30 }
  0xec   :  { %v771_v63 = vsel %vm769_vm0, %v7635_v23, %v770_v17  ;;  %v851_v48 = vshrl.u32 %v833_v11, %v849_v16  ;;  %v854_v45 = vadd.s32 127, %v853_v37  ;;  %v870_v44 = vadd.s32 3, %v866_v53 }
  0xed   :  { %v775_v21 = vsel %vm768_vm13, %v771_v63, %v774_v28  ;;  %v995_v20 = vadd.s32 1, %v7124_v52  ;;  %v1089_v51 = vand.u32 2147483647, %v8558_v57  ;;  %v942_v31 = vadd.s32 536870912, %v941_v12 }
  0xee   :  { %v776_v29 = vsel %vm765_vm12, nan, %v775_v21  ;;  %v852_v8 = vor.u32 %v851_v48, %v850_v22  ;;  %v855_v62 = vshll.u32 %v854_v45, 23  ;;  %v993_v25 = vor.u32 8388608, %v992_v61 }
  0xef   :  { %vm996_vm3 = vcmp.gt.s32.totalorder %v995_v20, 0  ;;  %v1093_v43 = vshrl.u32 %v1092_v15, 23  ;;  %7020 = vst [vmem:[#allocation5 + $0x18] sm:$0xff] %v776_v29  ;;  %v9243_v27 = vshrl.u32 %v942_v31, 30  ;;  %v9245_v23 = vand.u32 3, %v870_v44 }
  0xf0   :  { %v856_v40 = vor.u32 4788187, %v855_v62  ;;  %v859_v39 = vcvt.s32.f32 %v852_v8  ;;  %v997_v3 = vsel %vm996_vm3, %v995_v20, 0  ;;  %v9250_v50 = vand.u32 8388607, %v1089_v51 }
  0xf1   :  { %v999_v9 = vand.u32 31, %v997_v3  ;;  %v944_v11 = vshll.u32 %v9243_v27, 30  ;;  %v937_v53 = vadd.s32 %v9208_v26, %v9216_v35  ;;  %v9253_v32 = vshll.u32 %v993_v25, 8 }
  0xf2   :  { %v857_v13 = vand.u32 2147483647, %v856_v40  ;;  %v7128_v46 = vadd.s32 4294967169, %v1093_v43  ;;  %v998_v52 = vshrl.u32 %v997_v3, 5  ;;  %vm883_vm4 = vcmp.lt.s32.totalorder %v8550_v54, 0 }
  0xf3   :  { %v1000_v30 = vsub.s32 32, %v999_v9  ;;  %v9255_v61 = vsub.s32 %v941_v12, %v944_v11  ;;  %v1002_v17 = vshll.u32 %v14044_v38, %v999_v9  ;;  %v1005_v16 = vshll.u32 %v14038_v18, %v999_v9 }
  0xf4   :  { %v860_v14 = vmul.f32 %v859_v39, %v857_v13  ;;  %v1008_v28 = vshll.u32 %v14039_v24, %v999_v9  ;;  %v1011_v10 = vshll.u32 %v14040_v19, %v999_v9  ;;  %v1014_v45 = vshll.u32 %v14041_v34, %v999_v9 }
  0xf5   :  { %v1003_v22 = vshrl.u32 %v14038_v18, %v1000_v30  ;;  %v1006_v37 = vshrl.u32 %v14039_v24, %v1000_v30  ;;  %v947_v35 = vsub.s32 0, %v9255_v61  ;;  %v1009_v15 = vshrl.u32 %v14040_v19, %v1000_v30 }
  0xf6   :  { %v861_v26 = vxor.u32 2147483648, %v860_v14  ;;  %v1001_v63 = vshrl.u32 %v14044_v38, %v1000_v30  ;;  %v1012_v48 = vshrl.u32 %v14041_v34, %v1000_v30  ;;  %v1097_v12 = vor.u32 8388608, %v9250_v50 }
  0xf7   :  { %v7121_v44 = vmin.u32 %v947_v35, %v9255_v61  ;;  %v1004_v20 = vor.u32 %v1003_v22, %v1002_v17  ;;  %v1007_v29 = vor.u32 %v1006_v37, %v1005_v16  ;;  %v1010_v62 = vor.u32 %v1009_v15, %v1008_v28 }
  0xf8   :  { %v862_v21 = vsel %vm779_vm10, %v861_v26, %v860_v14  ;;  %v1013_v31 = vor.u32 %v1012_v48, %v1011_v10  ;;  %v1015_v25 = vshrl.u32 %v14042_v60, %v1000_v30  ;;  %vm1017_vm5 = vcmp.lt.s32.totalorder %v998_v52, 1 }
  0xf9   :  { %v865_v8 = vsel %vm9222_vm14, %v8546_v41, %v862_v21  ;;  %v949_v43 = vclz %v7121_v44  ;;  %v1099_v40 = vadd.s32 1, %v7128_v46  ;;  %v967_v39 = vsub.s32 4, %v9243_v27 }
  0xfa   :  { %7638 = vcosq.f32 %v865_v8  ;;  %v1016_v3 = vor.u32 %v1015_v25, %v1014_v45  ;;  %vm1018_vm6 = vcmp.lt.s32.totalorder %v998_v52, 2  ;;  %vm1019_vm7 = vcmp.lt.s32.totalorder %v998_v52, 3 }
  0xfb   :  { %7640 = vsinq.f32 %v865_v8  ;;  %v7122_v9 = vadd.s32 4294967294, %v949_v43  ;;  %vm1020_vm8 = vcmp.lt.s32.totalorder %v998_v52, 4  ;;  %v1021_v36 = vsel %vm1017_vm5, %v1001_v63, %v1004_v20 }
  0xfc   :  { %v1022_v13 = vsel %vm1020_vm8, %v1010_v62, 2102212464  ;;  %v1025_v11 = vsel %vm1017_vm5, %v1004_v20, %v1007_v29  ;;  %v1026_v50 = vsel %vm1020_vm8, %v1013_v31, 920167782  ;;  %v1029_v14 = vsel %vm1017_vm5, %v1007_v29, %v1010_v62 }
  0xfd   :  { %vm9280_vm9 = vcmp.le.f32.partialorder %v881_v42, 0.7853982  ;;  %vm7123_vm11 = vcmp.lt.s32.totalorder %v7122_v9, 0  ;;  %v1023_v46 = vsel %vm1019_vm7, %v1007_v29, %v1022_v13  ;;  %v1027_v17 = vsel %vm1019_vm7, %v1010_v62, %v1026_v50 }
  0xfe   :  { %v1030_v16 = vsel %vm1020_vm8, %v1016_v3, 1326507024  ;;  %vm869_vm10 = vweird.f32 %v8546_v41  ;;  %v952_v22 = vsel %vm7123_vm11, 0, %v7122_v9  ;;  %v1024_v37 = vsel %vm1018_vm6, %v1021_v36, %v1023_v46 }
  0xff   :  { %v1028_v28 = vsel %vm1018_vm6, %v1025_v11, %v1027_v17  ;;  %v1031_v10 = vsel %vm1019_vm7, %v1013_v31, %v1030_v16  ;;  %v953_v26 = vsub.s32 32, %v952_v22  ;;  %v954_v42 = vshll.u32 %v9255_v61, %v952_v22 }
 0x100   :  { %v957_v35 = vsub.s32 4294967266, %v952_v22  ;;  %v1032_v15 = vsel %vm1018_vm6, %v1029_v14, %v1031_v10  ;;  %v9297_v45 = vmul.u32.u64.low %v9253_v32, %v1028_v28  ;;  %v9298_v21 = vmul.u32.u64.high %v9253_v32, %v1028_v28, %v9297_v45 }
 0x101   :  { %v9293_v63 = vmul.u32.u64.low %v9253_v32, %v1032_v15  ;;  %v9294_v48 = vmul.u32.u64.high %v9253_v32, %v1032_v15, %v9293_v63  ;;  %vm872_vm12 = vcmp.lt.s32.totalorder %v9245_v23, 2  ;;  %v955_v44 = vshrl.u32 %v937_v53, %v953_v26 }
 0x102   :  { %v958_v20 = vadd.s32 127, %v957_v35  ;;  %vm1100_vm13 = vcmp.gt.s32.totalorder %v1099_v40, 0  ;;  %vm873_vm14 = vcmp.eq.s32.totalorder %v9245_v23, 0  ;;  %vm876_vm0 = vcmp.eq.s32.totalorder %v9245_v23, 2 }
 0x103   :  { %v968_v61 = vsel %vm883_vm4, %v967_v39, %v9243_v27  ;;  %v1101_v52 = vsel %vm1100_vm13, %v1099_v40, 0  ;;  %v956_v8 = vor.u32 %v955_v44, %v954_v42  ;;  %v1040_v31 = vmul.u32 %v9253_v32, %v1024_v37 }
 0x104   :  { %v7639_v29 = vpop.eup %7638  ;;  %v959_v62 = vshll.u32 %v958_v20, 23  ;;  %v1103_v25 = vand.u32 31, %v1101_v52  ;;  %vm1042_vm1 = vc.u32 %v9294_v48, %v9297_v45  ;;  %v1043_v53 = vadd.s32 1, %v9298_v21 }
 0x105   :  { %v7641_v43 = vpop.eup %7640  ;;  %v877_v3 = vxor.u32 2147483648, %v7639_v29  ;;  %v9311_v9 = vshll.u32 %v1097_v12, 8  ;;  %v963_v11 = vcvt.s32.f32 %v956_v8  ;;  %v970_v32 = vsel %vm9280_vm9, 0, %v968_v61 }
 0x106   :  { %v874_v36 = vxor.u32 2147483648, %v7641_v43  ;;  %v960_v13 = vor.u32 4788187, %v959_v62  ;;  %v1104_v27 = vsub.s32 32, %v1103_v25  ;;  %v1044_v39 = vsel %vm1042_vm1, %v1043_v53, %v9298_v21 }
 0x107   :  { %v878_v40 = vsel %vm876_vm0, %v877_v3, %v7641_v43  ;;  %v1193_v50 = vand.u32 2147483647, %v8562_v56  ;;  %v1045_v12 = vadd.s32 %v1044_v39, %v1040_v31  ;;  %v1106_v17 = vshll.u32 %v14044_v38, %v1103_v25 }
 0x108   :  { %v875_v14 = vsel %vm873_vm14, %v7639_v29, %v874_v36  ;;  %v961_v46 = vand.u32 2147483647, %v960_v13  ;;  %v1107_v22 = vshrl.u32 %v14038_v18, %v1104_v27  ;;  %v1109_v37 = vshll.u32 %v14038_v18, %v1103_v25 }
 0x109   :  { %v879_v16 = vsel %vm872_vm12, %v875_v14, %v878_v40  ;;  %v1110_v28 = vshrl.u32 %v14039_v24, %v1104_v27  ;;  %v1046_v42 = vadd.s32 536870912, %v1045_v12  ;;  %v1102_v35 = vshrl.u32 %v1101_v52, 5 }
 0x10a   :  { %v880_v10 = vsel %vm869_vm10, nan, %v879_v16  ;;  %v964_v26 = vmul.f32 %v963_v11, %v961_v46  ;;  %v1112_v15 = vshll.u32 %v14039_v24, %v1103_v25  ;;  %v1113_v63 = vshrl.u32 %v14040_v19, %v1104_v27 }
 0x10b   :  { %v1115_v21 = vshll.u32 %v14040_v19, %v1103_v25  ;;  %v1116_v23 = vshrl.u32 %v14041_v34, %v1104_v27  ;;  %7021 = vst [vmem:[#allocation5 + $0x20] sm:$0xff] %v880_v10  ;;  %v974_v20 = vadd.s32 3, %v970_v32  ;;  %v1047_v61 = vshrl.u32 %v1046_v42, 30 }
 0x10c   :  { %v965_v44 = vxor.u32 2147483648, %v964_v26  ;;  %v1118_v29 = vshll.u32 %v14041_v34, %v1103_v25  ;;  %vm987_vm2 = vcmp.lt.s32.totalorder %v8554_v49, 0  ;;  %v1105_v41 = vshrl.u32 %v14044_v38, %v1104_v27 }
 0x10d   :  { %v1108_v8 = vor.u32 %v1107_v22, %v1106_v17  ;;  %v1111_v52 = vor.u32 %v1110_v28, %v1109_v37  ;;  %v1119_v62 = vshrl.u32 %v14042_v60, %v1104_v27  ;;  %v1048_v43 = vshll.u32 %v1047_v61, 30 }
 0x10e   :  { %v966_v31 = vsel %vm883_vm4, %v965_v44, %v964_v26  ;;  %v1117_v3 = vor.u32 %v1116_v23, %v1115_v21  ;;  %vm1121_vm15 = vcmp.lt.s32.totalorder %v1102_v35, 1  ;;  %v1114_v36 = vor.u32 %v1113_v63, %v1112_v15 }
 0x10f   :  { %v969_v53 = vsel %vm9280_vm9, %v8550_v54, %v966_v31  ;;  %v1120_v25 = vor.u32 %v1119_v62, %v1118_v29  ;;  %vm1124_vm3 = vcmp.lt.s32.totalorder %v1102_v35, 4  ;;  %v9342_v13 = vsub.s32 %v1045_v12, %v1048_v43 }
 0x110   :  { %7642 = vcosq.f32 %v969_v53  ;;  %vm1123_vm5 = vcmp.lt.s32.totalorder %v1102_v35, 3  ;;  %v1196_v11 = vand.u32 2139095040, %v8562_v56  ;;  %vm1122_vm6 = vcmp.lt.s32.totalorder %v1102_v35, 2 }
 0x111   :  { %7644 = vsinq.f32 %v969_v53  ;;  %v1126_v27 = vsel %vm1124_vm3, %v1114_v36, 2102212464  ;;  %v1129_v40 = vsel %vm1121_vm15, %v1108_v8, %v1111_v52  ;;  %v975_v32 = vand.u32 3, %v974_v20 }
 0x112   :  { %v1051_v39 = vsub.s32 0, %v9342_v13  ;;  %v1071_v30 = vsub.s32 4, %v1047_v61  ;;  %v1130_v14 = vsel %vm1124_vm3, %v1117_v3, 920167782  ;;  %v1125_v46 = vsel %vm1121_vm15, %v1105_v41, %v1108_v8 }
 0x113   :  { %v1131_v12 = vsel %vm1123_vm5, %v1114_v36, %v1130_v14  ;;  %v1133_v17 = vsel %vm1121_vm15, %v1111_v52, %v1114_v36  ;;  %v1134_v16 = vsel %vm1124_vm3, %v1120_v25, 1326507024  ;;  %v1127_v37 = vsel %vm1123_vm5, %v1111_v52, %v1126_v27 }
 0x114   :  { %v7125_v22 = vmin.u32 %v1051_v39, %v9342_v13  ;;  %v1132_v28 = vsel %vm1122_vm6, %v1129_v40, %v1131_v12  ;;  %v1135_v10 = vsel %vm1123_vm5, %v1117_v3, %v1134_v16  ;;  %v1197_v63 = vshrl.u32 %v1196_v11, 23 }
 0x115   :  { %v1136_v26 = vsel %vm1122_vm6, %v1133_v17, %v1135_v10  ;;  %v9359_v42 = vmul.u32.u64.low %v9311_v9, %v1132_v28  ;;  %v9360_v15 = vmul.u32.u64.high %v9311_v9, %v1132_v28, %v9359_v42  ;;  %vm973_vm4 = vweird.f32 %v8550_v54 }
 0x116   :  { %vm9366_vm7 = vcmp.le.f32.partialorder %v985_v33, 0.7853982  ;;  %v1053_v23 = vclz %v7125_v22  ;;  %v1072_v44 = vsel %vm987_vm2, %v1071_v30, %v1047_v61  ;;  %v1128_v20 = vsel %vm1122_vm6, %v1125_v46, %v1127_v37 }
 0x117   :  { %v9374_v29 = vmul.u32.u64.low %v9311_v9, %v1136_v26  ;;  %v9375_v41 = vmul.u32.u64.high %v9311_v9, %v1136_v26, %v9374_v29  ;;  %v7132_v8 = vadd.s32 4294967169, %v1197_v63  ;;  %vm976_vm8 = vcmp.lt.s32.totalorder %v975_v32, 2 }
 0x118   :  { %vm977_vm9 = vcmp.eq.s32.totalorder %v975_v32, 0  ;;  %v7126_v52 = vadd.s32 4294967294, %v1053_v23  ;;  %v1300_v62 = vand.u32 2139095040, %v8566_v4  ;;  %vm980_vm11 = vcmp.eq.s32.totalorder %v975_v32, 2 }
 0x119   :  { %v1147_v33 = vadd.s32 1, %v9360_v15  ;;  %v1200_v31 = vand.u32 8388607, %v1193_v50  ;;  %v1203_v43 = vadd.s32 1, %v7132_v8  ;;  %v1041_v35 = vadd.s32 %v9297_v45, %v9294_v48 }
 0x11a   :  { %v7643_v61 = vpop.eup %7642  ;;  %vm7127_vm10 = vcmp.lt.s32.totalorder %v7126_v52, 0  ;;  %v1074_v3 = vsel %vm9366_vm7, 0, %v1072_v44  ;;  %v1144_v53 = vmul.u32 %v9311_v9, %v1128_v20  ;;  %vm1146_vm12 = vc.u32 %v9375_v41, %v9359_v42 }
 0x11b   :  { %v7645_v36 = vpop.eup %7644  ;;  %v981_v25 = vxor.u32 2147483648, %v7643_v61  ;;  %v1056_v11 = vsel %vm7127_vm10, 0, %v7126_v52  ;;  %v1301_v27 = vshrl.u32 %v1300_v62, 23  ;;  %v1078_v45 = vadd.s32 3, %v1074_v3 }
 0x11c   :  { %v978_v40 = vxor.u32 2147483648, %v7645_v36  ;;  %v1057_v39 = vsub.s32 32, %v1056_v11  ;;  %v1058_v30 = vshll.u32 %v9342_v13, %v1056_v11  ;;  %v1061_v14 = vsub.s32 4294967266, %v1056_v11 }
 0x11d   :  { %v982_v48 = vsel %vm980_vm11, %v981_v25, %v7645_v36  ;;  %v1148_v46 = vsel %vm1146_vm12, %v1147_v33, %v9360_v15  ;;  %vm1204_vm13 = vcmp.gt.s32.totalorder %v1203_v43, 0  ;;  %v1297_v28 = vand.u32 2147483647, %v8566_v4 }
 0x11e   :  { %v979_v9 = vsel %vm977_vm9, %v7643_v61, %v978_v40  ;;  %v1059_v12 = vshrl.u32 %v1041_v35, %v1057_v39  ;;  %v1062_v17 = vadd.s32 127, %v1061_v14  ;;  %v1149_v16 = vadd.s32 %v1148_v46, %v1144_v53 }
 0x11f   :  { %v983_v22 = vsel %vm976_vm8, %v979_v9, %v982_v48  ;;  %v1205_v37 = vsel %vm1204_vm13, %v1203_v43, 0  ;;  %v7136_v10 = vadd.s32 4294967169, %v1301_v27  ;;  %v9396_v44 = vand.u32 3, %v1078_v45 }
 0x120   :  { %v984_v13 = vsel %vm973_vm4, nan, %v983_v22  ;;  %v1060_v26 = vor.u32 %v1059_v12, %v1058_v30  ;;  %v1063_v63 = vshll.u32 %v1062_v17, 23  ;;  %v1150_v23 = vadd.s32 536870912, %v1149_v16 }
 0x121   :  { %v1207_v15 = vand.u32 31, %v1205_v37  ;;  %7022 = vst [vmem:[#allocation5 + $0x28] sm:$0xff] %v984_v13  ;;  %v1201_v32 = vor.u32 8388608, %v1200_v31  ;;  %v9400_v52 = vshrl.u32 %v1205_v37, 5  ;;  %v9404_v33 = vand.u32 8388607, %v1297_v28 }
 0x122   :  { %v1064_v20 = vor.u32 4788187, %v1063_v63  ;;  %v1067_v29 = vcvt.s32.f32 %v1060_v26  ;;  %v9398_v8 = vshrl.u32 %v1150_v23, 30  ;;  %v1307_v54 = vadd.s32 1, %v7136_v10 }
 0x123   :  { %v1208_v62 = vsub.s32 32, %v1207_v15  ;;  %v1210_v35 = vshll.u32 %v14044_v38, %v1207_v15  ;;  %v1213_v3 = vshll.u32 %v14038_v18, %v1207_v15  ;;  %v1216_v31 = vshll.u32 %v14039_v24, %v1207_v15 }
 0x124   :  { %v1065_v43 = vand.u32 2147483647, %v1064_v20  ;;  %v1152_v61 = vshll.u32 %v9398_v8, 30  ;;  %v1219_v40 = vshll.u32 %v14040_v19, %v1207_v15  ;;  %v1145_v30 = vadd.s32 %v9359_v42, %v9375_v41 }
 0x125   :  { %v1211_v53 = vshrl.u32 %v14038_v18, %v1208_v62  ;;  %v1214_v36 = vshrl.u32 %v14039_v24, %v1208_v62  ;;  %v1217_v25 = vshrl.u32 %v14040_v19, %v1208_v62  ;;  %v1220_v39 = vshrl.u32 %v14041_v34, %v1208_v62 }
 0x126   :  { %v1068_v11 = vmul.f32 %v1067_v29, %v1065_v43  ;;  %v9413_v27 = vsub.s32 %v1149_v16, %v1152_v61  ;;  %v9419_v14 = vshll.u32 %v1201_v32, 8  ;;  %v1305_v48 = vor.u32 8388608, %v9404_v33 }
 0x127   :  { %vm1308_vm14 = vcmp.gt.s32.totalorder %v1307_v54, 0  ;;  %v1209_v9 = vshrl.u32 %v14044_v38, %v1208_v62  ;;  %v1212_v12 = vor.u32 %v1211_v53, %v1210_v35  ;;  %v1215_v17 = vor.u32 %v1214_v36, %v1213_v3 }
 0x128   :  { %v1069_v45 = vxor.u32 2147483648, %v1068_v11  ;;  %v1155_v46 = vsub.s32 0, %v9413_v27  ;;  %v1218_v16 = vor.u32 %v1217_v25, %v1216_v31  ;;  %v1222_v22 = vshll.u32 %v14041_v34, %v1207_v15 }
 0x129   :  { %v1223_v37 = vshrl.u32 %v14042_v60, %v1208_v62  ;;  %vm1091_vm0 = vcmp.lt.s32.totalorder %v8558_v57, 0  ;;  %v1221_v10 = vor.u32 %v1220_v39, %v1219_v40  ;;  %vm1225_vm1 = vcmp.lt.s32.totalorder %v9400_v52, 1 }
 0x12a   :  { %v1070_v42 = vsel %vm987_vm2, %v1069_v45, %v1068_v11  ;;  %v7129_v41 = vmin.u32 %v1155_v46, %v9413_v27  ;;  %vm1228_vm15 = vcmp.lt.s32.totalorder %v9400_v52, 4  ;;  %v1309_v63 = vsel %vm1308_vm14, %v1307_v54, 0 }
 0x12b   :  { %v1073_v13 = vsel %vm9366_vm7, %v8554_v49, %v1070_v42  ;;  %v1224_v26 = vor.u32 %v1223_v37, %v1222_v22  ;;  %vm1227_vm2 = vcmp.lt.s32.totalorder %v9400_v52, 3  ;;  %v1229_v15 = vsel %vm1225_vm1, %v1209_v9, %v1212_v12 }
 0x12c   :  { %7646 = vcosq.f32 %v1073_v13  ;;  %v1157_v23 = vclz %v7129_v41  ;;  %vm1226_vm3 = vcmp.lt.s32.totalorder %v9400_v52, 2  ;;  %v1230_v20 = vsel %vm1228_vm15, %v1218_v16, 2102212464 }
 0x12d   :  { %7648 = vsinq.f32 %v1073_v13  ;;  %v1233_v21 = vsel %vm1225_vm1, %v1212_v12, %v1215_v17  ;;  %vm1084_vm5 = vcmp.eq.s32.totalorder %v9396_v44, 2  ;;  %v1231_v32 = vsel %vm1227_vm2, %v1215_v17, %v1230_v20 }
 0x12e   :  { %v7130_v29 = vadd.s32 4294967294, %v1157_v23  ;;  %v1234_v62 = vsel %vm1228_vm15, %v1221_v10, 920167782  ;;  %v1237_v54 = vsel %vm1225_vm1, %v1215_v17, %v1218_v16  ;;  %vm1081_vm6 = vcmp.eq.s32.totalorder %v9396_v44, 0 }
 0x12f   :  { %v1175_v43 = vsub.s32 4, %v9398_v8  ;;  %v1232_v61 = vsel %vm1226_vm3, %v1229_v15, %v1231_v32  ;;  %v1235_v35 = vsel %vm1227_vm2, %v1218_v16, %v1234_v62  ;;  %v1238_v3 = vsel %vm1228_vm15, %v1224_v26, 1326507024 }
 0x130   :  { %vm1080_vm4 = vcmp.lt.s32.totalorder %v9396_v44, 2  ;;  %vm7131_vm7 = vcmp.lt.s32.totalorder %v7130_v29, 0  ;;  %v1236_v53 = vsel %vm1226_vm3, %v1233_v21, %v1235_v35  ;;  %v1239_v36 = vsel %vm1227_vm2, %v1221_v10, %v1238_v3 }
 0x131   :  { %v9464_v31 = vshrl.u32 %v1309_v63, 5  ;;  %vm1077_vm8 = vweird.f32 %v8554_v49  ;;  %v1160_v25 = vsel %vm7131_vm7, 0, %v7130_v29  ;;  %v1240_v11 = vsel %vm1226_vm3, %v1237_v54, %v1239_v36 }
 0x132   :  { %v9470_v40 = vmul.u32.u64.low %v9419_v14, %v1236_v53  ;;  %v9471_v39 = vmul.u32.u64.high %v9419_v14, %v1236_v53, %v9470_v40  ;;  %v1161_v45 = vsub.s32 32, %v1160_v25  ;;  %v1162_v46 = vshll.u32 %v9413_v27, %v1160_v25 }
 0x133   :  { %v1165_v9 = vsub.s32 4294967266, %v1160_v25  ;;  %v1311_v12 = vand.u32 31, %v1309_v63  ;;  %v9478_v17 = vsel %vm1091_vm0, %v1175_v43, %v9398_v8  ;;  %v1248_v52 = vmul.u32 %v9419_v14, %v1232_v61 }
 0x134   :  { %v9481_v16 = vmul.u32.u64.low %v9419_v14, %v1240_v11  ;;  %v9482_v22 = vmul.u32.u64.high %v9419_v14, %v1240_v11, %v9481_v16  ;;  %v1163_v37 = vshrl.u32 %v1145_v30, %v1161_v45  ;;  %vm1329_vm9 = vcmp.lt.s32.totalorder %v9464_v31, 1 }
 0x135   :  { %v1166_v42 = vadd.s32 127, %v1165_v9  ;;  %v1312_v41 = vsub.s32 32, %v1311_v12  ;;  %v1251_v27 = vadd.s32 1, %v9471_v39  ;;  %v1314_v10 = vshll.u32 %v14044_v38, %v1311_v12 }
 0x136   :  { %v1317_v13 = vshll.u32 %v14038_v18, %v1311_v12  ;;  %v1320_v8 = vshll.u32 %v14039_v24, %v1311_v12  ;;  %v7647_v26 = vpop.eup %7646  ;;  %vm9492_vm11 = vcmp.le.f32.partialorder %v1089_v51, 0.7853982  ;;  %v1164_v30 = vor.u32 %v1163_v37, %v1162_v46 }
 0x137   :  { %v1167_v14 = vshll.u32 %v1166_v42, 23  ;;  %v1315_v23 = vshrl.u32 %v14038_v18, %v1312_v41  ;;  %v1323_v15 = vshll.u32 %v14040_v19, %v1311_v12  ;;  %v7649_v20 = vpop.eup %7648  ;;  %v1085_v21 = vxor.u32 2147483648, %v7647_v26 }
 0x138   :  { %vm1250_vm10 = vc.u32 %v9482_v22, %v9470_v40  ;;  %v1313_v29 = vshrl.u32 %v14044_v38, %v1312_v41  ;;  %v1318_v32 = vshrl.u32 %v14039_v24, %v1312_v41  ;;  %v1082_v62 = vxor.u32 2147483648, %v7649_v20 }
 0x139   :  { %v1168_v51 = vor.u32 4788187, %v1167_v14  ;;  %v1171_v54 = vcvt.s32.f32 %v1164_v30  ;;  %v1252_v43 = vsel %vm1250_vm10, %v1251_v27, %v9471_v39  ;;  %v1086_v61 = vsel %vm1084_vm5, %v1085_v21, %v7649_v20 }
 0x13a   :  { %v1253_v35 = vadd.s32 %v1252_v43, %v1248_v52  ;;  %v1316_v3 = vor.u32 %v1315_v23, %v1314_v10  ;;  %v1319_v53 = vor.u32 %v1318_v32, %v1317_v13  ;;  %v1083_v36 = vsel %vm1081_vm6, %v7647_v26, %v1082_v62 }
 0x13b   :  { %v1169_v25 = vand.u32 2147483647, %v1168_v51  ;;  %v1321_v11 = vshrl.u32 %v14040_v19, %v1312_v41  ;;  %v1324_v45 = vshrl.u32 %v14041_v34, %v1312_v41  ;;  %v1087_v46 = vsel %vm1080_vm4, %v1083_v36, %v1086_v61 }
 0x13c   :  { %v1254_v9 = vadd.s32 536870912, %v1253_v35  ;;  %v1326_v39 = vshll.u32 %v14041_v34, %v1311_v12  ;;  %v1327_v16 = vshrl.u32 %v14042_v60, %v1312_v41  ;;  %v1088_v52 = vsel %vm1077_vm8, nan, %v1087_v46 }
 0x13d   :  { %v1172_v37 = vmul.f32 %v1171_v54, %v1169_v25  ;;  %v1322_v42 = vor.u32 %v1321_v11, %v1320_v8  ;;  %v1325_v27 = vor.u32 %v1324_v45, %v1323_v15  ;;  %vm1330_vm12 = vcmp.lt.s32.totalorder %v9464_v31, 2  ;;  %7023 = vst [vmem:[#allocation5 + $0x30] sm:$0xff] %v1088_v52 }
 0x13e   :  { %v1255_v10 = vshrl.u32 %v1254_v9, 30  ;;  %vm1331_vm13 = vcmp.lt.s32.totalorder %v9464_v31, 3  ;;  %vm1332_vm14 = vcmp.lt.s32.totalorder %v9464_v31, 4  ;;  %v1328_v13 = vor.u32 %v1327_v16, %v1326_v39 }
 0x13f   :  { %v1173_v44 = vxor.u32 2147483648, %v1172_v37  ;;  %v1334_v12 = vsel %vm1332_vm14, %v1322_v42, 2102212464  ;;  %v1337_v49 = vsel %vm1329_vm9, %v1316_v3, %v1319_v53  ;;  %v1178_v41 = vsel %vm9492_vm11, 0, %v9478_v17 }
 0x140   :  { %v1256_v8 = vshll.u32 %v1255_v10, 30  ;;  %v1338_v26 = vsel %vm1332_vm14, %v1325_v27, 920167782  ;;  %v1345_v30 = vshll.u32 %v1305_v48, 8  ;;  %v1333_v23 = vsel %vm1329_vm9, %v1313_v29, %v1316_v3 }
 0x141   :  { %v1174_v14 = vsel %vm1091_vm0, %v1173_v44, %v1172_v37  ;;  %v1335_v15 = vsel %vm1331_vm13, %v1319_v53, %v1334_v12  ;;  %v1339_v20 = vsel %vm1331_vm13, %v1322_v42, %v1338_v26  ;;  %v1341_v48 = vsel %vm1329_vm9, %v1319_v53, %v1322_v42 }
 0x142   :  { %v1177_v17 = vsel %vm9492_vm11, %v8558_v57, %v1174_v14  ;;  %v1257_v21 = vsub.s32 %v1253_v35, %v1256_v8  ;;  %v1340_v33 = vsel %vm1330_vm12, %v1337_v49, %v1339_v20  ;;  %v1182_v32 = vadd.s32 3, %v1178_v41 }
 0x143   :  { %7650 = vcosq.f32 %v1177_v17  ;;  %v1279_v29 = vsub.s32 4, %v1255_v10  ;;  %v1342_v62 = vsel %vm1332_vm14, %v1328_v13, 1326507024  ;;  %v1336_v63 = vsel %vm1330_vm12, %v1333_v23, %v1335_v15 }
 0x144   :  { %7652 = vsinq.f32 %v1177_v17  ;;  %v1259_v51 = vsub.s32 0, %v1257_v21  ;;  %v1343_v54 = vsel %vm1331_vm13, %v1325_v27, %v1342_v62  ;;  %vm1195_vm0 = vcmp.lt.s32.totalorder %v8562_v56, 0 }
 0x145   :  { %v1344_v43 = vsel %vm1330_vm12, %v1341_v48, %v1343_v54  ;;  %v9552_v61 = vmul.u32.u64.low %v1345_v30, %v1340_v33  ;;  %v9553_v35 = vmul.u32.u64.high %v1345_v30, %v1340_v33, %v9552_v61  ;;  %v1183_v25 = vand.u32 3, %v1182_v32 }
 0x146   :  { %v7133_v3 = vmin.u32 %v1259_v51, %v1257_v21  ;;  %v9556_v53 = vmul.u32.u64.low %v1345_v30, %v1344_v43  ;;  %v9557_v36 = vmul.u32.u64.high %v1345_v30, %v1344_v43, %v9556_v53  ;;  %v1280_v11 = vsel %vm1195_vm0, %v1279_v29, %v1255_v10 }
 0x147   :  { %v1404_v45 = vand.u32 2139095040, %v8570_v59  ;;  %v1352_v9 = vmul.u32 %v1345_v30, %v1336_v63  ;;  %vm9564_vm1 = vcmp.le.f32.partialorder %v1193_v50, 0.7853982  ;;  %v1355_v39 = vadd.s32 1, %v9553_v35 }
 0x148   :  { %v1261_v46 = vclz %v7133_v3  ;;  %vm1181_vm15 = vweird.f32 %v8558_v57  ;;  %v1282_v37 = vsel %vm9564_vm1, 0, %v1280_v11  ;;  %vm1354_vm2 = vc.u32 %v9557_v36, %v9552_v61 }
 0x149   :  { %v1405_v16 = vshrl.u32 %v1404_v45, 23  ;;  %vm1184_vm3 = vcmp.lt.s32.totalorder %v1183_v25, 2  ;;  %v1356_v42 = vsel %vm1354_vm2, %v1355_v39, %v9553_v35  ;;  %v1401_v27 = vand.u32 2147483647, %v8570_v59 }
 0x14a   :  { %v7134_v52 = vadd.s32 4294967294, %v1261_v46  ;;  %vm1185_vm5 = vcmp.eq.s32.totalorder %v1183_v25, 0  ;;  %v1249_v10 = vadd.s32 %v9470_v40, %v9482_v22  ;;  %v1357_v44 = vadd.s32 %v1356_v42, %v1352_v9 }
 0x14b   :  { %v7140_v50 = vadd.s32 4294967169, %v1405_v16  ;;  %vm1188_vm4 = vcmp.eq.s32.totalorder %v1183_v25, 2  ;;  %v1286_v49 = vadd.s32 3, %v1282_v37  ;;  %v1408_v17 = vand.u32 8388607, %v1401_v27 }
 0x14c   :  { %vm7135_vm6 = vcmp.lt.s32.totalorder %v7134_v52, 0  ;;  %v1358_v20 = vadd.s32 536870912, %v1357_v44  ;;  %v1508_v51 = vand.u32 2139095040, %v8574_v55  ;;  %v1353_v46 = vadd.s32 %v9552_v61, %v9557_v36 }
 0x14d   :  { %v7651_v13 = vpop.eup %7650  ;;  %v1264_v12 = vsel %vm7135_vm6, 0, %v7134_v52  ;;  %v1411_v41 = vadd.s32 1, %v7140_v50  ;;  %v9586_v35 = vand.u32 3, %v1286_v49  ;;  %v1409_v9 = vor.u32 8388608, %v1408_v17 }
 0x14e   :  { %v7653_v8 = vpop.eup %7652  ;;  %v1189_v26 = vxor.u32 2147483648, %v7651_v13  ;;  %v1265_v30 = vsub.s32 32, %v1264_v12  ;;  %v1266_v14 = vshll.u32 %v1257_v21, %v1264_v12  ;;  %v1269_v23 = vsub.s32 4294967266, %v1264_v12 }
 0x14f   :  { %v1186_v15 = vxor.u32 2147483648, %v7653_v8  ;;  %vm1412_vm7 = vcmp.gt.s32.totalorder %v1411_v41, 0  ;;  %v9580_v29 = vshrl.u32 %v1358_v20, 30  ;;  %v1509_v52 = vshrl.u32 %v1508_v51, 23 }
 0x150   :  { %v1190_v33 = vsel %vm1188_vm4, %v1189_v26, %v7653_v8  ;;  %v1267_v40 = vshrl.u32 %v1249_v10, %v1265_v30  ;;  %v1270_v22 = vadd.s32 127, %v1269_v23  ;;  %v1413_v48 = vsel %vm1412_vm7, %v1411_v41, 0 }
 0x151   :  { %v1187_v32 = vsel %vm1185_vm5, %v7651_v13, %v1186_v15  ;;  %v1415_v62 = vand.u32 31, %v1413_v48  ;;  %v1360_v3 = vshll.u32 %v9580_v29, 30  ;;  %v1505_v50 = vand.u32 2147483647, %v8574_v55 }
 0x152   :  { %v1191_v21 = vsel %vm1184_vm3, %v1187_v32, %v1190_v33  ;;  %v1268_v54 = vor.u32 %v1267_v40, %v1266_v14  ;;  %v1271_v63 = vshll.u32 %v1270_v22, 23  ;;  %v1414_v13 = vshrl.u32 %v1413_v48, 5 }
 0x153   :  { %v1192_v43 = vsel %vm1181_vm15, nan, %v1191_v21  ;;  %v1416_v53 = vsub.s32 32, %v1415_v62  ;;  %v9590_v39 = vsub.s32 %v1357_v44, %v1360_v3  ;;  %v1418_v25 = vshll.u32 %v14044_v38, %v1415_v62 }
 0x154   :  { %v1272_v11 = vor.u32 4788187, %v1271_v63  ;;  %v1275_v45 = vcvt.s32.f32 %v1268_v54  ;;  %7024 = vst [vmem:[#allocation5 + $0x38] sm:$0xff] %v1192_v43  ;;  %v1421_v37 = vshll.u32 %v14038_v18, %v1415_v62  ;;  %v1424_v61 = vshll.u32 %v14039_v24, %v1415_v62 }
 0x155   :  { %v1419_v16 = vshrl.u32 %v14038_v18, %v1416_v53  ;;  %v1422_v42 = vshrl.u32 %v14039_v24, %v1416_v53  ;;  %v1363_v10 = vsub.s32 0, %v9590_v39  ;;  %v1425_v36 = vshrl.u32 %v14040_v19, %v1416_v53 }
 0x156   :  { %v1273_v57 = vand.u32 2147483647, %v1272_v11  ;;  %v1427_v12 = vshll.u32 %v14040_v19, %v1415_v62  ;;  %v1428_v49 = vshrl.u32 %v14041_v34, %v1416_v53  ;;  %v9602_v41 = vshll.u32 %v1409_v9, 8 }
 0x157   :  { %vm1299_vm8 = vcmp.lt.s32.totalorder %v8566_v4, 0  ;;  %v7137_v8 = vmin.u32 %v1363_v10, %v9590_v39  ;;  %v1420_v26 = vor.u32 %v1419_v16, %v1418_v25  ;;  %v1430_v30 = vshll.u32 %v14041_v34, %v1415_v62 }
 0x158   :  { %v1276_v44 = vmul.f32 %v1275_v45, %v1273_v57  ;;  %v7144_v14 = vadd.s32 4294967169, %v1509_v52  ;;  %v1423_v15 = vor.u32 %v1422_v42, %v1421_v37  ;;  %v1429_v20 = vor.u32 %v1428_v49, %v1427_v12 }
 0x159   :  { %v1431_v17 = vshrl.u32 %v14042_v60, %v1416_v53  ;;  %v1365_v33 = vclz %v7137_v8  ;;  %v1417_v40 = vshrl.u32 %v14044_v38, %v1416_v53  ;;  %v1426_v22 = vor.u32 %v1425_v36, %v1424_v61 }
 0x15a   :  { %v1277_v23 = vxor.u32 2147483648, %v1276_v44  ;;  %vm1433_vm9 = vcmp.lt.s32.totalorder %v1414_v13, 1  ;;  %v1383_v32 = vsub.s32 4, %v9580_v29  ;;  %vm1435_vm11 = vcmp.lt.s32.totalorder %v1414_v13, 3 }
 0x15b   :  { %v1432_v51 = vor.u32 %v1431_v17, %v1430_v30  ;;  %v7138_v21 = vadd.s32 4294967294, %v1365_v33  ;;  %vm1434_vm10 = vcmp.lt.s32.totalorder %v1414_v13, 2  ;;  %vm1436_vm12 = vcmp.lt.s32.totalorder %v1414_v13, 4 }
 0x15c   :  { %v1278_v48 = vsel %vm1195_vm0, %v1277_v23, %v1276_v44  ;;  %v1438_v54 = vsel %vm1436_vm12, %v1426_v22, 2102212464  ;;  %v1441_v63 = vsel %vm1433_vm9, %v1420_v26, %v1423_v15  ;;  %v1442_v43 = vsel %vm1436_vm12, %v1429_v20, 920167782 }
 0x15d   :  { %v1281_v62 = vsel %vm9564_vm1, %v8562_v56, %v1278_v48  ;;  %vm7139_vm13 = vcmp.lt.s32.totalorder %v7138_v21, 0  ;;  %v1437_v3 = vsel %vm1433_vm9, %v1417_v40, %v1420_v26  ;;  %v1443_v53 = vsel %vm1435_vm11, %v1426_v22, %v1442_v43 }
 0x15e   :  { %7654 = vcosq.f32 %v1281_v62  ;;  %v1368_v11 = vsel %vm7139_vm13, 0, %v7138_v21  ;;  %v1439_v31 = vsel %vm1435_vm11, %v1423_v15, %v1438_v54  ;;  %v1444_v45 = vsel %vm1434_vm10, %v1441_v63, %v1443_v53 }
 0x15f   :  { %7656 = vsinq.f32 %v1281_v62  ;;  %v1445_v9 = vsel %vm1433_vm9, %v1423_v15, %v1426_v22  ;;  %v1369_v25 = vsub.s32 32, %v1368_v11  ;;  %v1370_v16 = vshll.u32 %v9590_v39, %v1368_v11 }
 0x160   :  { %v1373_v52 = vsub.s32 4294967266, %v1368_v11  ;;  %v1446_v57 = vsel %vm1436_vm12, %v1432_v51, 1326507024  ;;  %v1384_v37 = vsel %vm1299_vm8, %v1383_v32, %v9580_v29  ;;  %v1440_v12 = vsel %vm1434_vm10, %v1437_v3, %v1439_v31 }
 0x161   :  { %v1447_v42 = vsel %vm1435_vm11, %v1429_v20, %v1446_v57  ;;  %v9630_v10 = vmul.u32.u64.low %v9602_v41, %v1444_v45  ;;  %v9631_v61 = vmul.u32.u64.high %v9602_v41, %v1444_v45, %v9630_v10  ;;  %v1371_v36 = vshrl.u32 %v1353_v46, %v1369_v25 }
 0x162   :  { %v1374_v44 = vadd.s32 127, %v1373_v52  ;;  %v1448_v39 = vsel %vm1434_vm10, %v1445_v9, %v1447_v42  ;;  %vm1285_vm14 = vweird.f32 %v8562_v56  ;;  %v1515_v29 = vadd.s32 1, %v7144_v14 }
 0x163   :  { %v9638_v49 = vmul.u32.u64.low %v9602_v41, %v1448_v39  ;;  %v9639_v8 = vmul.u32.u64.high %v9602_v41, %v1448_v39, %v9638_v49  ;;  %vm9643_vm0 = vcmp.le.f32.partialorder %v1297_v28, 0.7853982  ;;  %v1372_v30 = vor.u32 %v1371_v36, %v1370_v16 }
 0x164   :  { %v1375_v46 = vshll.u32 %v1374_v44, 23  ;;  %v9649_v23 = vand.u32 8388607, %v1505_v50  ;;  %v1386_v13 = vsel %vm9643_vm0, 0, %v1384_v37  ;;  %v1456_v15 = vmul.u32 %v9602_v41, %v1440_v12 }
 0x165   :  { %v1459_v20 = vadd.s32 1, %v9631_v61  ;;  %vm1516_vm1 = vcmp.gt.s32.totalorder %v1515_v29, 0  ;;  %vm1288_vm15 = vcmp.lt.s32.totalorder %v9586_v35, 2  ;;  %v1379_v14 = vcvt.s32.f32 %v1372_v30 }
 0x166   :  { %v1376_v28 = vor.u32 4788187, %v1375_v46  ;;  %v1517_v17 = vsel %vm1516_vm1, %v1515_v29, 0  ;;  %vm1289_vm2 = vcmp.eq.s32.totalorder %v9586_v35, 0  ;;  %vm1292_vm3 = vcmp.eq.s32.totalorder %v9586_v35, 2 }
 0x167   :  { %vm1458_vm5 = vc.u32 %v9639_v8, %v9630_v10  ;;  %v1519_v40 = vand.u32 31, %v1517_v17  ;;  %v1390_v32 = vadd.s32 3, %v1386_v13  ;;  %v1513_v54 = vor.u32 8388608, %v9649_v23 }
 0x168   :  { %v7655_v33 = vpop.eup %7654  ;;  %v1377_v41 = vand.u32 2147483647, %v1376_v28  ;;  %v1460_v51 = vsel %vm1458_vm5, %v1459_v20, %v9631_v61  ;;  %v9662_v53 = vshrl.u32 %v1517_v17, 5  ;;  %v1612_v49 = vand.u32 2139095040, %v8578_v47 }
 0x169   :  { %v7657_v22 = vpop.eup %7656  ;;  %v1293_v48 = vxor.u32 2147483648, %v7655_v33  ;;  %v1461_v21 = vadd.s32 %v1460_v51, %v1456_v15  ;;  %v1520_v63 = vsub.s32 32, %v1519_v40  ;;  %v1522_v11 = vshll.u32 %v14044_v38, %v1519_v40 }
 0x16a   :  { %v1290_v62 = vxor.u32 2147483648, %v7657_v22  ;;  %v1380_v3 = vmul.f32 %v1379_v14, %v1377_v41  ;;  %v1525_v25 = vshll.u32 %v14038_v18, %v1519_v40  ;;  %v1528_v37 = vshll.u32 %v14039_v24, %v1519_v40 }
 0x16b   :  { %v1294_v43 = vsel %vm1292_vm3, %v1293_v48, %v7657_v22  ;;  %v1462_v45 = vadd.s32 536870912, %v1461_v21  ;;  %v1523_v9 = vshrl.u32 %v14038_v18, %v1520_v63  ;;  %v1526_v57 = vshrl.u32 %v14039_v24, %v1520_v63 }
 0x16c   :  { %v1291_v31 = vsel %vm1289_vm2, %v7655_v33, %v1290_v62  ;;  %v1381_v52 = vxor.u32 2147483648, %v1380_v3  ;;  %v1529_v36 = vshrl.u32 %v14040_v19, %v1520_v63  ;;  %v1531_v44 = vshll.u32 %v14040_v19, %v1519_v40 }
 0x16d   :  { %v1295_v16 = vsel %vm1288_vm15, %v1291_v31, %v1294_v43  ;;  %v9675_v61 = vshrl.u32 %v1462_v45, 30  ;;  %v1521_v35 = vshrl.u32 %v14044_v38, %v1520_v63  ;;  %v1532_v39 = vshrl.u32 %v14041_v34, %v1520_v63 }
 0x16e   :  { %v1296_v42 = vsel %vm1285_vm14, nan, %v1295_v16  ;;  %v1382_v12 = vsel %vm1299_vm8, %v1381_v52, %v1380_v3  ;;  %v1524_v30 = vor.u32 %v1523_v9, %v1522_v11  ;;  %v1534_v46 = vshll.u32 %v14041_v34, %v1519_v40 }
 0x16f   :  { %7025 = vst [vmem:[#allocation5 + $0x40] sm:$0xff] %v1296_v42  ;;  %v1385_v56 = vsel %vm9643_vm0, %v8566_v4, %v1382_v12  ;;  %v1464_v29 = vshll.u32 %v9675_v61, 30  ;;  %v1527_v23 = vor.u32 %v1526_v57, %v1525_v25  ;;  %v1533_v13 = vor.u32 %v1532_v39, %v1531_v44 }
 0x170   :  { %7658 = vcosq.f32 %v1385_v56  ;;  %v1535_v15 = vshrl.u32 %v14042_v60, %v1520_v63  ;;  %v1530_v28 = vor.u32 %v1529_v36, %v1528_v37  ;;  %vm1537_vm6 = vcmp.lt.s32.totalorder %v9662_v53, 1 }
 0x171   :  { %7660 = vsinq.f32 %v1385_v56  ;;  %v9690_v20 = vsub.s32 %v1461_v21, %v1464_v29  ;;  %vm1539_vm4 = vcmp.lt.s32.totalorder %v9662_v53, 3  ;;  %vm1540_vm7 = vcmp.lt.s32.totalorder %v9662_v53, 4 }
 0x172   :  { %v1536_v14 = vor.u32 %v1535_v15, %v1534_v46  ;;  %v1613_v26 = vshrl.u32 %v1612_v49, 23  ;;  %v1391_v17 = vand.u32 3, %v1390_v32  ;;  %vm1538_vm8 = vcmp.lt.s32.totalorder %v9662_v53, 2 }
 0x173   :  { %v1467_v33 = vsub.s32 0, %v9690_v20  ;;  %v1542_v40 = vsel %vm1540_vm7, %v1530_v28, 2102212464  ;;  %v1545_v22 = vsel %vm1537_vm6, %v1524_v30, %v1527_v23  ;;  %v1546_v48 = vsel %vm1540_vm7, %v1533_v13, 920167782 }
 0x174   :  { %v1553_v41 = vshll.u32 %v1513_v54, 8  ;;  %v1609_v51 = vand.u32 2147483647, %v8578_v47  ;;  %vm1389_vm9 = vweird.f32 %v8566_v4  ;;  %vm1403_vm11 = vcmp.lt.s32.totalorder %v8570_v59, 0 }
 0x175   :  { %v7141_v32 = vmin.u32 %v1467_v33, %v9690_v20  ;;  %v1541_v62 = vsel %vm1537_vm6, %v1521_v35, %v1524_v30  ;;  %v1543_v21 = vsel %vm1539_vm4, %v1527_v23, %v1542_v40  ;;  %v1547_v63 = vsel %vm1539_vm4, %v1530_v28, %v1546_v48 }
 0x176   :  { %v1548_v54 = vsel %vm1538_vm8, %v1545_v22, %v1547_v63  ;;  %v1549_v43 = vsel %vm1537_vm6, %v1527_v23, %v1530_v28  ;;  %v1550_v3 = vsel %vm1540_vm7, %v1536_v14, 1326507024  ;;  %v7148_v11 = vadd.s32 4294967169, %v1613_v26 }
 0x177   :  { %vm1392_vm10 = vcmp.lt.s32.totalorder %v1391_v17, 2  ;;  %vm1393_vm12 = vcmp.eq.s32.totalorder %v1391_v17, 0  ;;  %vm1396_vm13 = vcmp.eq.s32.totalorder %v1391_v17, 2  ;;  %v1469_v31 = vclz %v7141_v32 }
 0x178   :  { %v1544_v45 = vsel %vm1538_vm8, %v1541_v62, %v1543_v21  ;;  %v1551_v9 = vsel %vm1539_vm4, %v1533_v13, %v1550_v3  ;;  %v9723_v25 = vmul.u32.u64.low %v1553_v41, %v1548_v54  ;;  %v9724_v16 = vmul.u32.u64.high %v1553_v41, %v1548_v54, %v9723_v25 }
 0x179   :  { %v7142_v52 = vadd.s32 4294967294, %v1469_v31  ;;  %v1552_v57 = vsel %vm1538_vm8, %v1549_v43, %v1551_v9  ;;  %v9731_v37 = vand.u32 8388607, %v1609_v51  ;;  %v1619_v42 = vadd.s32 1, %v7148_v11 }
 0x17a   :  { %v7659_v36 = vpop.eup %7658  ;;  %v1457_v44 = vadd.s32 %v9630_v10, %v9639_v8  ;;  %v1487_v12 = vsub.s32 4, %v9675_v61  ;;  %v9736_v35 = vmul.u32.u64.low %v1553_v41, %v1552_v57  ;;  %v9737_v39 = vmul.u32.u64.high %v1553_v41, %v1552_v57, %v9736_v35 }
 0x17b   :  { %v7661_v49 = vpop.eup %7660  ;;  %v1397_v56 = vxor.u32 2147483648, %v7659_v36  ;;  %vm7143_vm14 = vcmp.lt.s32.totalorder %v7142_v52, 0  ;;  %v1560_v29 = vmul.u32 %v1553_v41, %v1544_v45  ;;  %vm1620_vm0 = vcmp.gt.s32.totalorder %v1619_v42, 0 }
 0x17c   :  { %v1394_v53 = vxor.u32 2147483648, %v7661_v49  ;;  %v1472_v30 = vsel %vm7143_vm14, 0, %v7142_v52  ;;  %v1563_v46 = vadd.s32 1, %v9724_v16  ;;  %v1621_v23 = vsel %vm1620_vm0, %v1619_v42, 0 }
 0x17d   :  { %v1398_v13 = vsel %vm1396_vm13, %v1397_v56, %v7661_v49  ;;  %v1473_v15 = vsub.s32 32, %v1472_v30  ;;  %v1474_v10 = vshll.u32 %v9690_v20, %v1472_v30  ;;  %v1477_v8 = vsub.s32 4294967266, %v1472_v30 }
 0x17e   :  { %v1395_v28 = vsel %vm1393_vm12, %v7659_v36, %v1394_v53  ;;  %vm9745_vm1 = vcmp.le.f32.partialorder %v1401_v27, 0.7853982  ;;  %v1488_v26 = vsel %vm1403_vm11, %v1487_v12, %v9675_v61  ;;  %vm1562_vm15 = vc.u32 %v9737_v39, %v9723_v25 }
 0x17f   :  { %v1399_v33 = vsel %vm1392_vm10, %v1395_v28, %v1398_v13  ;;  %v1475_v40 = vshrl.u32 %v1457_v44, %v1473_v15  ;;  %v1478_v20 = vadd.s32 127, %v1477_v8  ;;  %v1564_v22 = vsel %vm1562_vm15, %v1563_v46, %v9724_v16 }
 0x180   :  { %v1400_v48 = vsel %vm1389_vm9, nan, %v1399_v33  ;;  %v1565_v27 = vadd.s32 %v1564_v22, %v1560_v29  ;;  %v9758_v41 = vshrl.u32 %v1621_v23, 5  ;;  %v1623_v32 = vand.u32 31, %v1621_v23 }
 0x181   :  { %v1476_v62 = vor.u32 %v1475_v40, %v1474_v10  ;;  %v1479_v21 = vshll.u32 %v1478_v20, 23  ;;  %v1490_v61 = vsel %vm9745_vm1, 0, %v1488_v26  ;;  %v1617_v63 = vor.u32 8388608, %v9731_v37  ;;  %7026 = vst [vmem:[#allocation5 + $0x48] sm:$0xff] %v1400_v48 }
 0x182   :  { %v1566_v17 = vadd.s32 536870912, %v1565_v27  ;;  %v1624_v54 = vsub.s32 32, %v1623_v32  ;;  %v1626_v43 = vshll.u32 %v14044_v38, %v1623_v32  ;;  %v1629_v3 = vshll.u32 %v14038_v18, %v1623_v32 }
 0x183   :  { %v1480_v4 = vor.u32 4788187, %v1479_v21  ;;  %v1483_v11 = vcvt.s32.f32 %v1476_v62  ;;  %v1632_v31 = vshll.u32 %v14039_v24, %v1623_v32  ;;  %v1635_v45 = vshll.u32 %v14040_v19, %v1623_v32 }
 0x184   :  { %v1567_v9 = vshrl.u32 %v1566_v17, 30  ;;  %v1627_v16 = vshrl.u32 %v14038_v18, %v1624_v54  ;;  %v1630_v52 = vshrl.u32 %v14039_v24, %v1624_v54  ;;  %vm1641_vm2 = vcmp.lt.s32.totalorder %v9758_v41, 1 }
 0x185   :  { %v1481_v57 = vand.u32 2147483647, %v1480_v4  ;;  %v1633_v37 = vshrl.u32 %v14040_v19, %v1624_v54  ;;  %v1636_v42 = vshrl.u32 %v14041_v34, %v1624_v54  ;;  %v1638_v36 = vshll.u32 %v14041_v34, %v1623_v32 }
 0x186   :  { %v1568_v44 = vshll.u32 %v1567_v9, 30  ;;  %v1625_v12 = vshrl.u32 %v14044_v38, %v1624_v54  ;;  %v1628_v35 = vor.u32 %v1627_v16, %v1626_v43  ;;  %v1631_v49 = vor.u32 %v1630_v52, %v1629_v3 }
 0x187   :  { %v1484_v56 = vmul.f32 %v1483_v11, %v1481_v57  ;;  %v1634_v29 = vor.u32 %v1633_v37, %v1632_v31  ;;  %v1637_v53 = vor.u32 %v1636_v42, %v1635_v45  ;;  %v1639_v30 = vshrl.u32 %v14042_v60, %v1624_v54 }
 0x188   :  { %v1494_v46 = vadd.s32 3, %v1490_v61  ;;  %v9775_v23 = vsub.s32 %v1565_v27, %v1568_v44  ;;  %vm1644_vm3 = vcmp.lt.s32.totalorder %v9758_v41, 4  ;;  %vm1643_vm5 = vcmp.lt.s32.totalorder %v9758_v41, 3 }
 0x189   :  { %v1485_v13 = vxor.u32 2147483648, %v1484_v56  ;;  %v1640_v15 = vor.u32 %v1639_v30, %v1638_v36  ;;  %v1646_v10 = vsel %vm1644_vm3, %v1634_v29, 2102212464  ;;  %vm1642_vm6 = vcmp.lt.s32.totalorder %v9758_v41, 2 }
 0x18a   :  { %v1571_v8 = vsub.s32 0, %v9775_v23  ;;  %v1649_v28 = vsel %vm1641_vm2, %v1628_v35, %v1631_v49  ;;  %v1657_v26 = vshll.u32 %v1617_v63, 8  ;;  %v1591_v40 = vsub.s32 4, %v1567_v9 }
 0x18b   :  { %v1486_v33 = vsel %vm1403_vm11, %v1485_v13, %v1484_v56  ;;  %v1645_v20 = vsel %vm1641_vm2, %v1625_v12, %v1628_v35  ;;  %v1650_v22 = vsel %vm1644_vm3, %v1637_v53, 920167782  ;;  %v1647_v32 = vsel %vm1643_vm5, %v1631_v49, %v1646_v10 }
 0x18c   :  { %v1489_v48 = vsel %vm9745_vm1, %v8570_v59, %v1486_v33  ;;  %v7145_v27 = vmin.u32 %v1571_v8, %v9775_v23  ;;  %v1651_v62 = vsel %vm1643_vm5, %v1634_v29, %v1650_v22  ;;  %v1653_v61 = vsel %vm1641_vm2, %v1631_v49, %v1634_v29 }
 0x18d   :  { %7662 = vcosq.f32 %v1489_v48  ;;  %v1652_v21 = vsel %vm1642_vm6, %v1649_v28, %v1651_v62  ;;  %v1654_v63 = vsel %vm1644_vm3, %v1640_v15, 1326507024  ;;  %vm1507_vm4 = vcmp.lt.s32.totalorder %v8574_v55, 0 }
 0x18e   :  { %7664 = vsinq.f32 %v1489_v48  ;;  %v1573_v14 = vclz %v7145_v27  ;;  %v1592_v17 = vsel %vm1507_vm4, %v1591_v40, %v1567_v9  ;;  %v1655_v54 = vsel %vm1643_vm5, %v1637_v53, %v1654_v63 }
 0x18f   :  { %v9810_v43 = vmul.u32.u64.low %v1657_v26, %v1652_v21  ;;  %v9811_v3 = vmul.u32.u64.high %v1657_v26, %v1652_v21, %v9810_v43  ;;  %v1648_v11 = vsel %vm1642_vm6, %v1645_v20, %v1647_v32  ;;  %v1656_v31 = vsel %vm1642_vm6, %v1653_v61, %v1655_v54 }
 0x190   :  { %v7146_v4 = vadd.s32 4294967294, %v1573_v14  ;;  %v1716_v45 = vand.u32 2139095040, %v8582_v0  ;;  %v1495_v16 = vand.u32 3, %v1494_v46  ;;  %vm9820_vm7 = vcmp.le.f32.partialorder %v1505_v50, 0.7853982 }
 0x191   :  { %v9824_v52 = vmul.u32.u64.low %v1657_v26, %v1656_v31  ;;  %v9825_v57 = vmul.u32.u64.high %v1657_v26, %v1656_v31, %v9824_v52  ;;  %v1561_v37 = vadd.s32 %v9723_v25, %v9737_v39  ;;  %v1713_v42 = vand.u32 2147483647, %v8582_v0 }
 0x192   :  { %vm7147_vm8 = vcmp.lt.s32.totalorder %v7146_v4, 0  ;;  %v1717_v41 = vshrl.u32 %v1716_v45, 23  ;;  %v1594_v44 = vsel %vm9820_vm7, 0, %v1592_v17  ;;  %v1664_v12 = vmul.u32 %v1657_v26, %v1648_v11 }
 0x193   :  { %v1576_v36 = vsel %vm7147_vm8, 0, %v7146_v4  ;;  %v1667_v50 = vadd.s32 1, %v9811_v3  ;;  %vm1497_vm9 = vcmp.eq.s32.totalorder %v1495_v16, 0  ;;  %vm1666_vm11 = vc.u32 %v9825_v57, %v9810_v43 }
 0x194   :  { %v1577_v35 = vsub.s32 32, %v1576_v36  ;;  %v1578_v49 = vshll.u32 %v9775_v23, %v1576_v36  ;;  %v1581_v56 = vsub.s32 4294967266, %v1576_v36  ;;  %v7152_v29 = vadd.s32 4294967169, %v1717_v41 }
 0x195   :  { %v1668_v53 = vsel %vm1666_vm11, %v1667_v50, %v9811_v3  ;;  %vm1500_vm10 = vcmp.eq.s32.totalorder %v1495_v16, 2  ;;  %v1598_v13 = vadd.s32 3, %v1594_v44  ;;  %v1720_v10 = vand.u32 8388607, %v1713_v42 }
 0x196   :  { %v1579_v25 = vshrl.u32 %v1561_v37, %v1577_v35  ;;  %v1582_v39 = vadd.s32 127, %v1581_v56  ;;  %v1723_v30 = vadd.s32 1, %v7152_v29  ;;  %v1669_v15 = vadd.s32 %v1668_v53, %v1664_v12 }
 0x197   :  { %v7663_v46 = vpop.eup %7662  ;;  %vm1496_vm13 = vcmp.lt.s32.totalorder %v1495_v16, 2  ;;  %vm1493_vm14 = vweird.f32 %v8570_v59  ;;  %v1721_v21 = vor.u32 8388608, %v1720_v10  ;;  %v9842_v17 = vand.u32 3, %v1598_v13 }
 0x198   :  { %v7665_v8 = vpop.eup %7664  ;;  %v1501_v28 = vxor.u32 2147483648, %v7663_v46  ;;  %v1580_v23 = vor.u32 %v1579_v25, %v1578_v49  ;;  %v1583_v26 = vshll.u32 %v1582_v39, 23  ;;  %vm1724_vm12 = vcmp.gt.s32.totalorder %v1723_v30, 0 }
 0x199   :  { %v1498_v33 = vxor.u32 2147483648, %v7665_v8  ;;  %v1670_v40 = vadd.s32 536870912, %v1669_v15  ;;  %v1725_v20 = vsel %vm1724_vm12, %v1723_v30, 0  ;;  %v1820_v54 = vand.u32 2139095040, %v8586_v58 }
 0x19a   :  { %v1502_v22 = vsel %vm1500_vm10, %v1501_v28, %v7665_v8  ;;  %v1584_v48 = vor.u32 4788187, %v1583_v26  ;;  %v1587_v27 = vcvt.s32.f32 %v1580_v23  ;;  %v1727_v61 = vand.u32 31, %v1725_v20 }
 0x19b   :  { %v1499_v32 = vsel %vm1497_vm9, %v7663_v46, %v1498_v33  ;;  %v9840_v62 = vshrl.u32 %v1670_v40, 30  ;;  %v1726_v11 = vshrl.u32 %v1725_v20, 5  ;;  %v1665_v45 = vadd.s32 %v9810_v43, %v9825_v57 }
 0x19c   :  { %v1503_v63 = vsel %vm1496_vm13, %v1499_v32, %v1502_v22  ;;  %v1585_v14 = vand.u32 2147483647, %v1584_v48  ;;  %v1728_v59 = vsub.s32 32, %v1727_v61  ;;  %v1730_v16 = vshll.u32 %v14044_v38, %v1727_v61 }
 0x19d   :  { %v1504_v3 = vsel %vm1493_vm14, nan, %v1503_v63  ;;  %v1672_v4 = vshll.u32 %v9840_v62, 30  ;;  %v1817_v52 = vand.u32 2147483647, %v8586_v58  ;;  %v1733_v36 = vshll.u32 %v14038_v18, %v1727_v61 }
 0x19e   :  { %v1588_v31 = vmul.f32 %v1587_v27, %v1585_v14  ;;  %7027 = vst [vmem:[#allocation5 + $0x50] sm:$0xff] %v1504_v3  ;;  %v1731_v41 = vshrl.u32 %v14038_v18, %v1728_v59  ;;  %v9853_v44 = vshll.u32 %v1721_v21, 8  ;;  %v1734_v50 = vshrl.u32 %v14039_v24, %v1728_v59 }
 0x19f   :  { %v9849_v37 = vsub.s32 %v1669_v15, %v1672_v4  ;;  %v1736_v35 = vshll.u32 %v14039_v24, %v1727_v61  ;;  %v1737_v43 = vshrl.u32 %v14040_v19, %v1728_v59  ;;  %v1739_v49 = vshll.u32 %v14040_v19, %v1727_v61 }
 0x1a0   :  { %v1589_v12 = vxor.u32 2147483648, %v1588_v31  ;;  %vm1745_vm0 = vcmp.lt.s32.totalorder %v1726_v11, 1  ;;  %v1821_v56 = vshrl.u32 %v1820_v54, 23  ;;  %v1729_v25 = vshrl.u32 %v14044_v38, %v1728_v59 }
 0x1a1   :  { %v1675_v57 = vsub.s32 0, %v9849_v37  ;;  %v1732_v39 = vor.u32 %v1731_v41, %v1730_v16  ;;  %v1740_v53 = vshrl.u32 %v14041_v34, %v1728_v59  ;;  %v1735_v13 = vor.u32 %v1734_v50, %v1733_v36 }
 0x1a2   :  { %v1590_v29 = vsel %vm1507_vm4, %v1589_v12, %v1588_v31  ;;  %v1742_v15 = vshll.u32 %v14041_v34, %v1727_v61  ;;  %v1738_v10 = vor.u32 %v1737_v43, %v1736_v35  ;;  %v1743_v28 = vshrl.u32 %v14042_v60, %v1728_v59 }
 0x1a3   :  { %v1593_v30 = vsel %vm9820_vm7, %v8574_v55, %v1590_v29  ;;  %v7149_v46 = vmin.u32 %v1675_v57, %v9849_v37  ;;  %v1741_v8 = vor.u32 %v1740_v53, %v1739_v49  ;;  %vm1611_vm1 = vcmp.lt.s32.totalorder %v8578_v47, 0 }
 0x1a4   :  { %7666 = vcosq.f32 %v1593_v30  ;;  %vm1747_vm15 = vcmp.lt.s32.totalorder %v1726_v11, 3  ;;  %v7156_v26 = vadd.s32 4294967169, %v1821_v56  ;;  %v1744_v33 = vor.u32 %v1743_v28, %v1742_v15 }
 0x1a5   :  { %7668 = vsinq.f32 %v1593_v30  ;;  %v1677_v23 = vclz %v7149_v46  ;;  %vm1746_vm2 = vcmp.lt.s32.totalorder %v1726_v11, 2  ;;  %vm1748_vm3 = vcmp.lt.s32.totalorder %v1726_v11, 4 }
 0x1a6   :  { %v1749_v9 = vsel %vm1745_vm0, %v1729_v25, %v1732_v39  ;;  %v1750_v20 = vsel %vm1748_vm3, %v1738_v10, 2102212464  ;;  %v1753_v22 = vsel %vm1745_vm0, %v1732_v39, %v1735_v13  ;;  %v1754_v48 = vsel %vm1748_vm3, %v1741_v8, 920167782 }
 0x1a7   :  { %v7150_v40 = vadd.s32 4294967294, %v1677_v23  ;;  %v1751_v27 = vsel %vm1747_vm15, %v1735_v13, %v1750_v20  ;;  %v1755_v32 = vsel %vm1747_vm15, %v1738_v10, %v1754_v48  ;;  %v1757_v21 = vsel %vm1745_vm0, %v1735_v13, %v1738_v10 }
 0x1a8   :  { %v1758_v61 = vsel %vm1748_vm3, %v1744_v33, 1326507024  ;;  %vm1597_vm5 = vweird.f32 %v8574_v55  ;;  %v1695_v63 = vsub.s32 4, %v9840_v62  ;;  %v1756_v14 = vsel %vm1746_vm2, %v1753_v22, %v1755_v32 }
 0x1a9   :  { %vm7151_vm6 = vcmp.lt.s32.totalorder %v7150_v40, 0  ;;  %v1759_v54 = vsel %vm1747_vm15, %v1741_v8, %v1758_v61  ;;  %v9882_v59 = vmul.u32.u64.low %v9853_v44, %v1756_v14  ;;  %v9883_v31 = vmul.u32.u64.high %v9853_v44, %v1756_v14, %v9882_v59 }
 0x1aa   :  { %v1680_v3 = vsel %vm7151_vm6, 0, %v7150_v40  ;;  %v1760_v4 = vsel %vm1746_vm2, %v1757_v21, %v1759_v54  ;;  %v1752_v12 = vsel %vm1746_vm2, %v1749_v9, %v1751_v27  ;;  %vm1601_vm4 = vcmp.eq.s32.totalorder %v9842_v17, 0 }
 0x1ab   :  { %v1681_v16 = vsub.s32 32, %v1680_v3  ;;  %v1682_v41 = vshll.u32 %v9849_v37, %v1680_v3  ;;  %v1685_v36 = vsub.s32 4294967266, %v1680_v3  ;;  %v1827_v43 = vadd.s32 1, %v7156_v26 }
 0x1ac   :  { %v9890_v50 = vmul.u32.u64.low %v9853_v44, %v1760_v4  ;;  %v9891_v35 = vmul.u32.u64.high %v9853_v44, %v1760_v4, %v9890_v50  ;;  %vm1604_vm7 = vcmp.eq.s32.totalorder %v9842_v17, 2  ;;  %v9896_v56 = vand.u32 8388607, %v1817_v52 }
 0x1ad   :  { %v1683_v57 = vshrl.u32 %v1665_v45, %v1681_v16  ;;  %v1686_v49 = vadd.s32 127, %v1685_v36  ;;  %v1696_v11 = vsel %vm1611_vm1, %v1695_v63, %v9840_v62  ;;  %v1768_v37 = vmul.u32 %v9853_v44, %v1752_v12 }
 0x1ae   :  { %v7667_v29 = vpop.eup %7666  ;;  %v1771_v25 = vadd.s32 1, %v9883_v31  ;;  %vm1828_vm8 = vcmp.gt.s32.totalorder %v1827_v43, 0  ;;  %vm1600_vm9 = vcmp.lt.s32.totalorder %v9842_v17, 2  ;;  %vm9906_vm11 = vcmp.le.f32.partialorder %v1609_v51, 0.7853982 }
 0x1af   :  { %v7669_v39 = vpop.eup %7668  ;;  %v1605_v53 = vxor.u32 2147483648, %v7667_v29  ;;  %v1684_v30 = vor.u32 %v1683_v57, %v1682_v41  ;;  %v1687_v46 = vshll.u32 %v1686_v49, 23  ;;  %v1829_v45 = vsel %vm1828_vm8, %v1827_v43, 0 }
 0x1b0   :  { %v1602_v13 = vxor.u32 2147483648, %v7669_v39  ;;  %vm1770_vm10 = vc.u32 %v9891_v35, %v9882_v59  ;;  %v1698_v23 = vsel %vm9906_vm11, 0, %v1696_v11  ;;  %v1831_v26 = vand.u32 31, %v1829_v45 }
 0x1b1   :  { %v1606_v62 = vsel %vm1604_vm7, %v1605_v53, %v7669_v39  ;;  %v1688_v44 = vor.u32 4788187, %v1687_v46  ;;  %v1691_v10 = vcvt.s32.f32 %v1684_v30  ;;  %v1772_v8 = vsel %vm1770_vm10, %v1771_v25, %v9883_v31 }
 0x1b2   :  { %v1603_v28 = vsel %vm1601_vm4, %v7667_v29, %v1602_v13  ;;  %v1773_v51 = vadd.s32 %v1772_v8, %v1768_v37  ;;  %v1825_v40 = vor.u32 8388608, %v9896_v56  ;;  %v9920_v20 = vshrl.u32 %v1829_v45, 5 }
 0x1b3   :  { %v1607_v33 = vsel %vm1600_vm9, %v1603_v28, %v1606_v62  ;;  %v1689_v9 = vand.u32 2147483647, %v1688_v44  ;;  %v1832_v27 = vsub.s32 32, %v1831_v26  ;;  %v1834_v32 = vshll.u32 %v14044_v38, %v1831_v26 }
 0x1b4   :  { %v1608_v22 = vsel %vm1597_vm5, nan, %v1607_v33  ;;  %v1774_v48 = vadd.s32 536870912, %v1773_v51  ;;  %v1702_v21 = vadd.s32 3, %v1698_v23  ;;  %v1837_v61 = vshll.u32 %v14038_v18, %v1831_v26 }
 0x1b5   :  { %v1692_v17 = vmul.f32 %v1691_v10, %v1689_v9  ;;  %v1843_v63 = vshll.u32 %v14040_v19, %v1831_v26  ;;  %7028 = vst [vmem:[#allocation5 + $0x58] sm:$0xff] %v1608_v22  ;;  %v1835_v54 = vshrl.u32 %v14038_v18, %v1832_v27  ;;  %v1838_v3 = vshrl.u32 %v14039_v24, %v1832_v27 }
 0x1b6   :  { %v1775_v14 = vshrl.u32 %v1774_v48, 30  ;;  %v1840_v4 = vshll.u32 %v14039_v24, %v1831_v26  ;;  %v1841_v31 = vshrl.u32 %v14040_v19, %v1832_v27  ;;  %v1844_v16 = vshrl.u32 %v14041_v34, %v1832_v27 }
 0x1b7   :  { %v1693_v55 = vxor.u32 2147483648, %v1692_v17  ;;  %v1846_v41 = vshll.u32 %v14041_v34, %v1831_v26  ;;  %v1833_v12 = vshrl.u32 %v14044_v38, %v1832_v27  ;;  %v1836_v50 = vor.u32 %v1835_v54, %v1834_v32 }
 0x1b8   :  { %v1776_v36 = vshll.u32 %v1775_v14, 30  ;;  %vm1849_vm12 = vcmp.lt.s32.totalorder %v9920_v20, 1  ;;  %v1839_v57 = vor.u32 %v1838_v3, %v1837_v61  ;;  %v1845_v49 = vor.u32 %v1844_v16, %v1843_v63 }
 0x1b9   :  { %v1694_v43 = vsel %vm1611_vm1, %v1693_v55, %v1692_v17  ;;  %v1847_v56 = vshrl.u32 %v14042_v60, %v1832_v27  ;;  %v1842_v37 = vor.u32 %v1841_v31, %v1840_v4  ;;  %vm1852_vm13 = vcmp.lt.s32.totalorder %v9920_v20, 4 }
 0x1ba   :  { %v1697_v29 = vsel %vm9906_vm11, %v8578_v47, %v1694_v43  ;;  %v9941_v11 = vsub.s32 %v1773_v51, %v1776_v36  ;;  %v9944_v25 = vand.u32 3, %v1702_v21  ;;  %vm1851_vm14 = vcmp.lt.s32.totalorder %v9920_v20, 3 }
 0x1bb   :  { %7670 = vcosq.f32 %v1697_v29  ;;  %v1848_v39 = vor.u32 %v1847_v56, %v1846_v41  ;;  %vm1850_vm0 = vcmp.lt.s32.totalorder %v9920_v20, 2  ;;  %v1854_v30 = vsel %vm1852_vm13, %v1842_v37, 2102212464 }
 0x1bc   :  { %7672 = vsinq.f32 %v1697_v29  ;;  %v1779_v53 = vsub.s32 0, %v9941_v11  ;;  %v1857_v46 = vsel %vm1849_vm12, %v1836_v50, %v1839_v57  ;;  %v1858_v45 = vsel %vm1852_vm13, %v1845_v49, 920167782 }
 0x1bd   :  { %v1865_v13 = vshll.u32 %v1825_v40, 8  ;;  %v1924_v15 = vand.u32 2139095040, %v8590_v1  ;;  %vm1715_vm1 = vcmp.lt.s32.totalorder %v8582_v0, 0  ;;  %v1853_v44 = vsel %vm1849_vm12, %v1833_v12, %v1836_v50 }
 0x1be   :  { %v7153_v62 = vmin.u32 %v1779_v53, %v9941_v11  ;;  %v1859_v10 = vsel %vm1851_vm14, %v1842_v37, %v1858_v45  ;;  %v1855_v8 = vsel %vm1851_vm14, %v1839_v57, %v1854_v30  ;;  %v1861_v23 = vsel %vm1849_vm12, %v1839_v57, %v1842_v37 }
 0x1bf   :  { %v1860_v28 = vsel %vm1850_vm0, %v1857_v46, %v1859_v10  ;;  %v1862_v51 = vsel %vm1852_vm13, %v1848_v39, 1326507024  ;;  %vm1701_vm15 = vweird.f32 %v8578_v47  ;;  %vm1704_vm2 = vcmp.lt.s32.totalorder %v9944_v25, 2 }
 0x1c0   :  { %vm9974_vm3 = vcmp.le.f32.partialorder %v1713_v42, 0.7853982  ;;  %v1781_v33 = vclz %v7153_v62  ;;  %v1799_v9 = vsub.s32 4, %v1775_v14  ;;  %v1863_v40 = vsel %vm1851_vm14, %v1845_v49, %v1862_v51 }
 0x1c1   :  { %v9980_v22 = vmul.u32.u64.low %v1865_v13, %v1860_v28  ;;  %v9981_v48 = vmul.u32.u64.high %v1865_v13, %v1860_v28, %v9980_v22  ;;  %v1925_v27 = vshrl.u32 %v1924_v15, 23  ;;  %vm1705_vm5 = vcmp.eq.s32.totalorder %v9944_v25, 0 }
 0x1c2   :  { %v7154_v32 = vadd.s32 4294967294, %v1781_v33  ;;  %v1856_v17 = vsel %vm1850_vm0, %v1853_v44, %v1855_v8  ;;  %v1864_v42 = vsel %vm1850_vm0, %v1861_v23, %v1863_v40  ;;  %v1921_v63 = vand.u32 2147483647, %v8590_v1 }
 0x1c3   :  { %v9989_v21 = vmul.u32.u64.low %v1865_v13, %v1864_v42  ;;  %v9990_v61 = vmul.u32.u64.high %v1865_v13, %v1864_v42, %v9989_v21  ;;  %v7160_v54 = vadd.s32 4294967169, %v1925_v27  ;;  %vm1708_vm6 = vcmp.eq.s32.totalorder %v9944_v25, 2 }
 0x1c4   :  { %v1769_v3 = vadd.s32 %v9882_v59, %v9891_v35  ;;  %vm7155_vm4 = vcmp.lt.s32.totalorder %v7154_v32, 0  ;;  %v1800_v4 = vsel %vm1715_vm1, %v1799_v9, %v1775_v14  ;;  %v1872_v16 = vmul.u32 %v1865_v13, %v1856_v17 }
 0x1c5   :  { %v7671_v55 = vpop.eup %7670  ;;  %v1784_v31 = vsel %vm7155_vm4, 0, %v7154_v32  ;;  %v1875_v20 = vadd.s32 1, %v9981_v48  ;;  %v1931_v41 = vadd.s32 1, %v7160_v54  ;;  %vm1874_vm7 = vc.u32 %v9990_v61, %v9980_v22 }
 0x1c6   :  { %v7673_v36 = vpop.eup %7672  ;;  %v1709_v12 = vxor.u32 2147483648, %v7671_v55  ;;  %v1785_v50 = vsub.s32 32, %v1784_v31  ;;  %v1786_v43 = vshll.u32 %v9941_v11, %v1784_v31  ;;  %v1789_v57 = vsub.s32 4294967266, %v1784_v31 }
 0x1c7   :  { %v1706_v49 = vxor.u32 2147483648, %v7673_v36  ;;  %v1928_v59 = vand.u32 8388607, %v1921_v63  ;;  %vm1932_vm8 = vcmp.gt.s32.totalorder %v1931_v41, 0  ;;  %v1876_v29 = vsel %vm1874_vm7, %v1875_v20, %v9981_v48 }
 0x1c8   :  { %v1710_v35 = vsel %vm1708_vm6, %v1709_v12, %v7673_v36  ;;  %v1787_v14 = vshrl.u32 %v1769_v3, %v1785_v50  ;;  %v1790_v56 = vadd.s32 127, %v1789_v57  ;;  %v1802_v11 = vsel %vm9974_vm3, 0, %v1800_v4 }
 0x1c9   :  { %v1707_v37 = vsel %vm1705_vm5, %v7671_v55, %v1706_v49  ;;  %v1877_v39 = vadd.s32 %v1876_v29, %v1872_v16  ;;  %v1933_v53 = vsel %vm1932_vm8, %v1931_v41, 0  ;;  %v1806_v8 = vadd.s32 3, %v1802_v11 }
 0x1ca   :  { %v1711_v30 = vsel %vm1704_vm2, %v1707_v37, %v1710_v35  ;;  %v1788_v46 = vor.u32 %v1787_v14, %v1786_v43  ;;  %v1791_v45 = vshll.u32 %v1790_v56, 23  ;;  %v1935_v62 = vand.u32 31, %v1933_v53 }
 0x1cb   :  { %v1712_v13 = vsel %vm1701_vm15, nan, %v1711_v30  ;;  %v1878_v15 = vadd.s32 536870912, %v1877_v39  ;;  %v1929_v28 = vor.u32 8388608, %v1928_v59  ;;  %v1934_v51 = vshrl.u32 %v1933_v53, 5 }
 0x1cc   :  { %v1792_v44 = vor.u32 4788187, %v1791_v45  ;;  %v1795_v10 = vcvt.s32.f32 %v1788_v46  ;;  %7029 = vst [vmem:[#allocation5 + $0x60] sm:$0xff] %v1712_v13  ;;  %v1936_v33 = vsub.s32 32, %v1935_v62  ;;  %v2028_v9 = vand.u32 2139095040, %v8594_v2 }
 0x1cd   :  { %v1879_v23 = vshrl.u32 %v1878_v15, 30  ;;  %v1938_v25 = vshll.u32 %v14044_v38, %v1935_v62  ;;  %v1941_v48 = vshll.u32 %v14038_v18, %v1935_v62  ;;  %v1944_v47 = vshll.u32 %v14039_v24, %v1935_v62 }
 0x1ce   :  { %v1793_v40 = vand.u32 2147483647, %v1792_v44  ;;  %v1939_v32 = vshrl.u32 %v14038_v18, %v1936_v33  ;;  %v1947_v17 = vshll.u32 %v14040_v19, %v1935_v62  ;;  %v1950_v42 = vshll.u32 %v14041_v34, %v1935_v62 }
 0x1cf   :  { %v1880_v27 = vshll.u32 %v1879_v23, 30  ;;  %v1942_v54 = vshrl.u32 %v14039_v24, %v1936_v33  ;;  %v1945_v3 = vshrl.u32 %v14040_v19, %v1936_v33  ;;  %v1948_v4 = vshrl.u32 %v14041_v34, %v1936_v33 }
 0x1d0   :  { %v1796_v21 = vmul.f32 %v1795_v10, %v1793_v40  ;;  %v10025_v55 = vand.u32 3, %v1806_v8  ;;  %v1951_v16 = vshrl.u32 %v14042_v60, %v1936_v33  ;;  %v10030_v20 = vshll.u32 %v1929_v28, 8 }
 0x1d1   :  { %v10027_v31 = vsub.s32 %v1877_v39, %v1880_v27  ;;  %vm1819_vm9 = vcmp.lt.s32.totalorder %v8586_v58, 0  ;;  %v1940_v36 = vor.u32 %v1939_v32, %v1938_v25  ;;  %v1943_v12 = vor.u32 %v1942_v54, %v1941_v48 }
 0x1d2   :  { %v1797_v41 = vxor.u32 2147483648, %v1796_v21  ;;  %v2029_v50 = vshrl.u32 %v2028_v9, 23  ;;  %v1946_v57 = vor.u32 %v1945_v3, %v1944_v47  ;;  %v1949_v49 = vor.u32 %v1948_v4, %v1947_v17 }
 0x1d3   :  { %v1883_v43 = vsub.s32 0, %v10027_v31  ;;  %vm1953_vm11 = vcmp.lt.s32.totalorder %v1934_v51, 1  ;;  %v1937_v35 = vshrl.u32 %v14044_v38, %v1936_v33  ;;  %v1952_v14 = vor.u32 %v1951_v16, %v1950_v42 }
 0x1d4   :  { %v1798_v59 = vsel %vm1715_vm1, %v1797_v41, %v1796_v21  ;;  %vm1956_vm10 = vcmp.lt.s32.totalorder %v1934_v51, 4  ;;  %vm1955_vm12 = vcmp.lt.s32.totalorder %v1934_v51, 3  ;;  %vm10044_vm13 = vcmp.le.f32.partialorder %v1817_v52, 0.7853982 }
 0x1d5   :  { %v1801_v56 = vsel %vm9974_vm3, %v8582_v0, %v1798_v59  ;;  %v7157_v29 = vmin.u32 %v1883_v43, %v10027_v31  ;;  %v1958_v37 = vsel %vm1956_vm10, %v1946_v57, 2102212464  ;;  %vm1954_vm14 = vcmp.lt.s32.totalorder %v1934_v51, 2 }
 0x1d6   :  { %7674 = vcosq.f32 %v1801_v56  ;;  %v1961_v39 = vsel %vm1953_vm11, %v1940_v36, %v1943_v12  ;;  %v1962_v53 = vsel %vm1956_vm10, %v1949_v49, 920167782  ;;  %v1903_v30 = vsub.s32 4, %v1879_v23 }
 0x1d7   :  { %7676 = vsinq.f32 %v1801_v56  ;;  %v1885_v26 = vclz %v7157_v29  ;;  %v2025_v46 = vand.u32 2147483647, %v8594_v2  ;;  %v1957_v45 = vsel %vm1953_vm11, %v1937_v35, %v1940_v36 }
 0x1d8   :  { %v1959_v13 = vsel %vm1955_vm12, %v1943_v12, %v1958_v37  ;;  %v1963_v15 = vsel %vm1955_vm12, %v1946_v57, %v1962_v53  ;;  %v1965_v52 = vsel %vm1953_vm11, %v1943_v12, %v1946_v57  ;;  %v1873_v62 = vadd.s32 %v9980_v22, %v9990_v61 }
 0x1d9   :  { %v7158_v44 = vadd.s32 4294967294, %v1885_v26  ;;  %v1964_v10 = vsel %vm1954_vm14, %v1961_v39, %v1963_v15  ;;  %v1966_v8 = vsel %vm1956_vm10, %v1952_v14, 1326507024  ;;  %v7164_v40 = vadd.s32 4294967169, %v2029_v50 }
 0x1da   :  { %v1967_v28 = vsel %vm1955_vm12, %v1949_v49, %v1966_v8  ;;  %v10061_v33 = vmul.u32.u64.low %v10030_v20, %v1964_v10  ;;  %v10062_v9 = vmul.u32.u64.high %v10030_v20, %v1964_v10, %v10061_v33  ;;  %vm1805_vm0 = vweird.f32 %v8582_v0 }
 0x1db   :  { %vm7159_vm1 = vcmp.lt.s32.totalorder %v7158_v44, 0  ;;  %v1904_v25 = vsel %vm1819_vm9, %v1903_v30, %v1879_v23  ;;  %v1960_v22 = vsel %vm1954_vm14, %v1957_v45, %v1959_v13  ;;  %v1968_v61 = vsel %vm1954_vm14, %v1965_v52, %v1967_v28 }
 0x1dc   :  { %v1888_v48 = vsel %vm7159_vm1, 0, %v7158_v44  ;;  %v10071_v47 = vmul.u32.u64.low %v10030_v20, %v1968_v61  ;;  %v10072_v27 = vmul.u32.u64.high %v10030_v20, %v1968_v61, %v10071_v47  ;;  %v2035_v32 = vadd.s32 1, %v7164_v40 }
 0x1dd   :  { %vm1808_vm15 = vcmp.lt.s32.totalorder %v10025_v55, 2  ;;  %v1889_v17 = vsub.s32 32, %v1888_v48  ;;  %v1890_v42 = vshll.u32 %v10027_v31, %v1888_v48  ;;  %v1893_v21 = vsub.s32 4294967266, %v1888_v48 }
 0x1de   :  { %v1976_v54 = vmul.u32 %v10030_v20, %v1960_v22  ;;  %v1979_v23 = vadd.s32 1, %v10062_v9  ;;  %v2032_v51 = vand.u32 8388607, %v2025_v46  ;;  %vm2036_vm2 = vcmp.gt.s32.totalorder %v2035_v32, 0 }
 0x1df   :  { %v1891_v3 = vshrl.u32 %v1873_v62, %v1889_v17  ;;  %v1894_v4 = vadd.s32 127, %v1893_v21  ;;  %v1906_v16 = vsel %vm10044_vm13, 0, %v1904_v25  ;;  %v2037_v41 = vsel %vm2036_vm2, %v2035_v32, 0 }
 0x1e0   :  { %v7675_v36 = vpop.eup %7674  ;;  %vm1809_vm3 = vcmp.eq.s32.totalorder %v10025_v55, 0  ;;  %vm1812_vm5 = vcmp.eq.s32.totalorder %v10025_v55, 2  ;;  %vm1978_vm6 = vc.u32 %v10072_v27, %v10061_v33  ;;  %v2039_v31 = vand.u32 31, %v2037_v41 }
 0x1e1   :  { %v7677_v20 = vpop.eup %7676  ;;  %v1813_v12 = vxor.u32 2147483648, %v7675_v36  ;;  %v1892_v50 = vor.u32 %v1891_v3, %v1890_v42  ;;  %v1895_v43 = vshll.u32 %v1894_v4, 23  ;;  %v1980_v57 = vsel %vm1978_vm6, %v1979_v23, %v10062_v9 }
 0x1e2   :  { %v1810_v49 = vxor.u32 2147483648, %v7677_v20  ;;  %v1910_v59 = vadd.s32 3, %v1906_v16  ;;  %v1981_v35 = vadd.s32 %v1980_v57, %v1976_v54  ;;  %v2040_v14 = vsub.s32 32, %v2039_v31 }
 0x1e3   :  { %v1814_v56 = vsel %vm1812_vm5, %v1813_v12, %v7677_v20  ;;  %v1896_v29 = vor.u32 4788187, %v1895_v43  ;;  %v1899_v37 = vcvt.s32.f32 %v1892_v50  ;;  %v2033_v39 = vor.u32 8388608, %v2032_v51 }
 0x1e4   :  { %v1811_v53 = vsel %vm1809_vm3, %v7675_v36, %v1810_v49  ;;  %v1982_v26 = vadd.s32 536870912, %v1981_v35  ;;  %v2042_v30 = vshll.u32 %v14044_v38, %v2039_v31  ;;  %v2045_v45 = vshll.u32 %v14038_v18, %v2039_v31 }
 0x1e5   :  { %v1815_v13 = vsel %vm1808_vm15, %v1811_v53, %v1814_v56  ;;  %v1897_v15 = vand.u32 2147483647, %v1896_v29  ;;  %v2043_v52 = vshrl.u32 %v14038_v18, %v2040_v14  ;;  %v2046_v62 = vshrl.u32 %v14039_v24, %v2040_v14 }
 0x1e6   :  { %v1816_v44 = vsel %vm1805_vm0, nan, %v1815_v13  ;;  %v1983_v10 = vshrl.u32 %v1982_v26, 30  ;;  %v2048_v8 = vshll.u32 %v14039_v24, %v2039_v31  ;;  %v2049_v28 = vshrl.u32 %v14040_v19, %v2040_v14 }
 0x1e7   :  { %v1900_v9 = vmul.f32 %v1899_v37, %v1897_v15  ;;  %v2038_v40 = vshrl.u32 %v2037_v41, 5  ;;  %v2051_v25 = vshll.u32 %v14040_v19, %v2039_v31  ;;  %v2052_v55 = vshrl.u32 %v14041_v34, %v2040_v14  ;;  %7030 = vst [vmem:[#allocation5 + $0x68] sm:$0xff] %v1816_v44 }
 0x1e8   :  { %v10101_v22 = vand.u32 3, %v1910_v59  ;;  %v1984_v61 = vshll.u32 %v1983_v10, 30  ;;  %v2054_v48 = vshll.u32 %v14041_v34, %v2039_v31  ;;  %v10104_v47 = vshll.u32 %v2033_v39, 8 }
 0x1e9   :  { %v1901_v0 = vxor.u32 2147483648, %v1900_v9  ;;  %v2041_v32 = vshrl.u32 %v14044_v38, %v2040_v14  ;;  %v2053_v17 = vor.u32 %v2052_v55, %v2051_v25  ;;  %v2055_v42 = vshrl.u32 %v14042_v60, %v2040_v14 }
 0x1ea   :  { %v10108_v21 = vsub.s32 %v1981_v35, %v1984_v61  ;;  %v2044_v54 = vor.u32 %v2043_v52, %v2042_v30  ;;  %v2047_v23 = vor.u32 %v2046_v62, %v2045_v45  ;;  %v2050_v51 = vor.u32 %v2049_v28, %v2048_v8 }
 0x1eb   :  { %v1902_v3 = vsel %vm1819_vm9, %v1901_v0, %v1900_v9  ;;  %v2056_v4 = vor.u32 %v2055_v42, %v2054_v48  ;;  %vm2057_vm4 = vcmp.lt.s32.totalorder %v2038_v40, 1  ;;  %vm2060_vm7 = vcmp.lt.s32.totalorder %v2038_v40, 4 }
 0x1ec   :  { %v1905_v16 = vsel %vm10044_vm13, %v8586_v58, %v1902_v3  ;;  %v1987_v41 = vsub.s32 0, %v10108_v21  ;;  %vm2058_vm8 = vcmp.lt.s32.totalorder %v2038_v40, 2  ;;  %vm2059_vm11 = vcmp.lt.s32.totalorder %v2038_v40, 3 }
 0x1ed   :  { %7678 = vcosq.f32 %v1905_v16  ;;  %v2061_v36 = vsel %vm2057_vm4, %v2041_v32, %v2044_v54  ;;  %v2062_v31 = vsel %vm2060_vm7, %v2050_v51, 2102212464  ;;  %v2066_v20 = vsel %vm2060_vm7, %v2053_v17, 920167782 }
 0x1ee   :  { %7680 = vsinq.f32 %v1905_v16  ;;  %v7161_v12 = vmin.u32 %v1987_v41, %v10108_v21  ;;  %v2063_v50 = vsel %vm2059_vm11, %v2047_v23, %v2062_v31  ;;  %v2065_v43 = vsel %vm2057_vm4, %v2044_v54, %v2047_v23 }
 0x1ef   :  { %v2067_v57 = vsel %vm2059_vm11, %v2050_v51, %v2066_v20  ;;  %v2069_v49 = vsel %vm2057_vm4, %v2047_v23, %v2050_v51  ;;  %v2070_v59 = vsel %vm2060_vm7, %v2056_v4, 1326507024  ;;  %v2132_v11 = vand.u32 2139095040, %v8598_v5 }
 0x1f0   :  { %vm1923_vm9 = vcmp.lt.s32.totalorder %v8590_v1, 0  ;;  %v1989_v35 = vclz %v7161_v12  ;;  %v2007_v14 = vsub.s32 4, %v1983_v10  ;;  %vm10123_vm10 = vcmp.le.f32.partialorder %v1921_v63, 0.7853982 }
 0x1f1   :  { %v2064_v29 = vsel %vm2058_vm8, %v2061_v36, %v2063_v50  ;;  %v2068_v37 = vsel %vm2058_vm8, %v2065_v43, %v2067_v57  ;;  %v2071_v39 = vsel %vm2059_vm11, %v2053_v17, %v2070_v59  ;;  %vm1909_vm12 = vweird.f32 %v8586_v58 }
 0x1f2   :  { %v7162_v53 = vadd.s32 4294967294, %v1989_v35  ;;  %v2072_v26 = vsel %vm2058_vm8, %v2069_v49, %v2071_v39  ;;  %v10133_v30 = vmul.u32.u64.low %v10104_v47, %v2068_v37  ;;  %v10134_v45 = vmul.u32.u64.high %v10104_v47, %v2068_v37, %v10133_v30 }
 0x1f3   :  { %vm1912_vm13 = vcmp.lt.s32.totalorder %v10101_v22, 2  ;;  %v10139_v63 = vmul.u32.u64.low %v10104_v47, %v2072_v26  ;;  %v10140_v13 = vmul.u32.u64.high %v10104_v47, %v2072_v26, %v10139_v63  ;;  %v2133_v15 = vshrl.u32 %v2132_v11, 23 }
 0x1f4   :  { %vm1913_vm14 = vcmp.eq.s32.totalorder %v10101_v22, 0  ;;  %v1977_v52 = vadd.s32 %v10061_v33, %v10072_v27  ;;  %vm7163_vm0 = vcmp.lt.s32.totalorder %v7162_v53, 0  ;;  %v2008_v62 = vsel %vm1923_vm9, %v2007_v14, %v1983_v10 }
 0x1f5   :  { %v1992_v44 = vsel %vm7163_vm0, 0, %v7162_v53  ;;  %v2080_v8 = vmul.u32 %v10104_v47, %v2064_v29  ;;  %v2129_v28 = vand.u32 2147483647, %v8598_v5  ;;  %v7168_v9 = vadd.s32 4294967169, %v2133_v15 }
 0x1f6   :  { %v1993_v40 = vsub.s32 32, %v1992_v44  ;;  %v1994_v25 = vshll.u32 %v10108_v21, %v1992_v44  ;;  %v1997_v55 = vsub.s32 4294967266, %v1992_v44  ;;  %v2083_v61 = vadd.s32 1, %v10134_v45 }
 0x1f7   :  { %v7679_v48 = vpop.eup %7678  ;;  %vm1916_vm1 = vcmp.eq.s32.totalorder %v10101_v22, 2  ;;  %v2010_v33 = vsel %vm10123_vm10, 0, %v2008_v62  ;;  %vm2082_vm15 = vc.u32 %v10140_v13, %v10133_v30  ;;  %v2139_v27 = vadd.s32 1, %v7168_v9 }
 0x1f8   :  { %v7681_v10 = vpop.eup %7680  ;;  %v1917_v47 = vxor.u32 2147483648, %v7679_v48  ;;  %v1995_v0 = vshrl.u32 %v1977_v52, %v1993_v40  ;;  %v1998_v32 = vadd.s32 127, %v1997_v55  ;;  %v2084_v17 = vsel %vm2082_vm15, %v2083_v61, %v10134_v45 }
 0x1f9   :  { %v1914_v42 = vxor.u32 2147483648, %v7681_v10  ;;  %v2085_v21 = vadd.s32 %v2084_v17, %v2080_v8  ;;  %v2136_v54 = vand.u32 8388607, %v2129_v28  ;;  %vm2140_vm2 = vcmp.gt.s32.totalorder %v2139_v27, 0 }
 0x1fa   :  { %v1918_v23 = vsel %vm1916_vm1, %v1917_v47, %v7681_v10  ;;  %v1996_v51 = vor.u32 %v1995_v0, %v1994_v25  ;;  %v1999_v3 = vshll.u32 %v1998_v32, 23  ;;  %v2141_v4 = vsel %vm2140_vm2, %v2139_v27, 0 }
 0x1fb   :  { %v1915_v16 = vsel %vm1913_vm14, %v7679_v48, %v1914_v42  ;;  %v2086_v41 = vadd.s32 536870912, %v2085_v21  ;;  %v2143_v36 = vand.u32 31, %v2141_v4  ;;  %v2014_v50 = vadd.s32 3, %v2010_v33 }
 0x1fc   :  { %v1919_v31 = vsel %vm1912_vm13, %v1915_v16, %v1918_v23  ;;  %v2000_v20 = vor.u32 4788187, %v1999_v3  ;;  %v2003_v12 = vcvt.s32.f32 %v1996_v51  ;;  %v2137_v49 = vor.u32 8388608, %v2136_v54 }
 0x1fd   :  { %v1920_v43 = vsel %vm1909_vm12, nan, %v1919_v31  ;;  %v10165_v57 = vshrl.u32 %v2086_v41, 30  ;;  %v2144_v59 = vsub.s32 32, %v2143_v36  ;;  %v2142_v35 = vshrl.u32 %v2141_v4, 5 }
 0x1fe   :  { %v2001_v11 = vand.u32 2147483647, %v2000_v20  ;;  %v2146_v14 = vshll.u32 %v14044_v38, %v2143_v36  ;;  %v2149_v29 = vshll.u32 %v14038_v18, %v2143_v36  ;;  %7031 = vst [vmem:[#allocation5 + $0x70] sm:$0xff] %v1920_v43  ;;  %v2152_v39 = vshll.u32 %v14039_v24, %v2143_v36 }
 0x1ff   :  { %v2088_v22 = vshll.u32 %v10165_v57, 30  ;;  %v2147_v37 = vshrl.u32 %v14038_v18, %v2144_v59  ;;  %v2155_v58 = vshll.u32 %v14040_v19, %v2143_v36  ;;  %v2150_v26 = vshrl.u32 %v14039_v24, %v2144_v59 }
 0x200   :  { %v2004_v53 = vmul.f32 %v2003_v12, %v2001_v11  ;;  %v2153_v45 = vshrl.u32 %v14040_v19, %v2144_v59  ;;  %v2156_v63 = vshrl.u32 %v14041_v34, %v2144_v59  ;;  %v10176_v15 = vand.u32 3, %v2014_v50 }
 0x201   :  { %v10178_v52 = vsub.s32 %v2085_v21, %v2088_v22  ;;  %v2158_v62 = vshll.u32 %v14041_v34, %v2143_v36  ;;  %v2236_v44 = vand.u32 2139095040, %v8602_v6  ;;  %v2081_v9 = vadd.s32 %v10133_v30, %v10140_v13 }
 0x202   :  { %v2005_v8 = vxor.u32 2147483648, %v2004_v53  ;;  %v2145_v40 = vshrl.u32 %v14044_v38, %v2144_v59  ;;  %v10185_v25 = vshll.u32 %v2137_v49, 8  ;;  %v2148_v61 = vor.u32 %v2147_v37, %v2146_v14 }
 0x203   :  { %v2091_v55 = vsub.s32 0, %v10178_v52  ;;  %v2151_v48 = vor.u32 %v2150_v26, %v2149_v29  ;;  %v2159_v33 = vshrl.u32 %v14042_v60, %v2144_v59  ;;  %v2154_v10 = vor.u32 %v2153_v45, %v2152_v39 }
 0x204   :  { %v2006_v27 = vsel %vm1923_vm9, %v2005_v8, %v2004_v53  ;;  %v2157_v47 = vor.u32 %v2156_v63, %v2155_v58  ;;  %vm2161_vm3 = vcmp.lt.s32.totalorder %v2142_v35, 1  ;;  %v2237_v32 = vshrl.u32 %v2236_v44, 23 }
 0x205   :  { %v2009_v30 = vsel %vm10123_vm10, %v8590_v1, %v2006_v27  ;;  %v7165_v13 = vmin.u32 %v2091_v55, %v10178_v52  ;;  %v2160_v0 = vor.u32 %v2159_v33, %v2158_v62  ;;  %vm2027_vm5 = vcmp.lt.s32.totalorder %v8594_v2, 0 }
 0x206   :  { %7682 = vcosq.f32 %v2009_v30  ;;  %vm2162_vm6 = vcmp.lt.s32.totalorder %v2142_v35, 2  ;;  %vm2163_vm4 = vcmp.lt.s32.totalorder %v2142_v35, 3  ;;  %vm2164_vm7 = vcmp.lt.s32.totalorder %v2142_v35, 4 }
 0x207   :  { %7684 = vsinq.f32 %v2009_v30  ;;  %v2093_v17 = vclz %v7165_v13  ;;  %v2165_v42 = vsel %vm2161_vm3, %v2145_v40, %v2148_v61  ;;  %v2169_v21 = vsel %vm2161_vm3, %v2148_v61, %v2151_v48 }
 0x208   :  { %v2111_v54 = vsub.s32 4, %v10165_v57  ;;  %v2166_v56 = vsel %vm2164_vm7, %v2154_v10, 2102212464  ;;  %v2170_v23 = vsel %vm2164_vm7, %v2157_v47, 920167782  ;;  %v2173_v51 = vsel %vm2161_vm3, %v2151_v48, %v2154_v10 }
 0x209   :  { %v7166_v3 = vadd.s32 4294967294, %v2093_v17  ;;  %v2167_v4 = vsel %vm2163_vm4, %v2151_v48, %v2166_v56  ;;  %v2171_v16 = vsel %vm2163_vm4, %v2154_v10, %v2170_v23  ;;  %v2174_v41 = vsel %vm2164_vm7, %v2160_v0, 1326507024 }
 0x20a   :  { %v2168_v36 = vsel %vm2162_vm6, %v2165_v42, %v2167_v4  ;;  %v2172_v31 = vsel %vm2162_vm6, %v2169_v21, %v2171_v16  ;;  %v2175_v20 = vsel %vm2163_vm4, %v2157_v47, %v2174_v41  ;;  %v7172_v12 = vadd.s32 4294967169, %v2237_v32 }
 0x20b   :  { %vm7167_vm8 = vcmp.lt.s32.totalorder %v7166_v3, 0  ;;  %v2176_v50 = vsel %vm2162_vm6, %v2173_v51, %v2175_v20  ;;  %v10207_v43 = vmul.u32.u64.low %v10185_v25, %v2172_v31  ;;  %v10208_v49 = vmul.u32.u64.high %v10185_v25, %v2172_v31, %v10207_v43 }
 0x20c   :  { %v2096_v59 = vsel %vm7167_vm8, 0, %v7166_v3  ;;  %v10212_v11 = vmul.u32.u64.low %v10185_v25, %v2176_v50  ;;  %v10213_v14 = vmul.u32.u64.high %v10185_v25, %v2176_v50, %v10212_v11  ;;  %v2233_v29 = vand.u32 2147483647, %v8602_v6 }
 0x20d   :  { %vm10218_vm11 = vcmp.le.f32.partialorder %v2025_v46, 0.7853982  ;;  %v2097_v35 = vsub.s32 32, %v2096_v59  ;;  %v2098_v37 = vshll.u32 %v10178_v52, %v2096_v59  ;;  %v2101_v39 = vsub.s32 4294967266, %v2096_v59 }
 0x20e   :  { %vm2016_vm9 = vcmp.lt.s32.totalorder %v10176_v15, 2  ;;  %vm2017_vm10 = vcmp.eq.s32.totalorder %v10176_v15, 0  ;;  %v2184_v58 = vmul.u32 %v10185_v25, %v2168_v36  ;;  %v2243_v53 = vadd.s32 1, %v7172_v12 }
 0x20f   :  { %v2099_v26 = vshrl.u32 %v2081_v9, %v2097_v35  ;;  %v2102_v45 = vadd.s32 127, %v2101_v39  ;;  %v2112_v46 = vsel %vm2027_vm5, %v2111_v54, %v10165_v57  ;;  %v2187_v63 = vadd.s32 1, %v10208_v49 }
 0x210   :  { %v7683_v62 = vpop.eup %7682  ;;  %vm2020_vm12 = vcmp.eq.s32.totalorder %v10176_v15, 2  ;;  %vm2186_vm13 = vc.u32 %v10213_v14, %v10207_v43  ;;  %v2240_v52 = vand.u32 8388607, %v2233_v29  ;;  %vm2244_vm14 = vcmp.gt.s32.totalorder %v2243_v53, 0 }
 0x211   :  { %v7685_v44 = vpop.eup %7684  ;;  %v2021_v8 = vxor.u32 2147483648, %v7683_v62  ;;  %v2100_v9 = vor.u32 %v2099_v26, %v2098_v37  ;;  %v2103_v40 = vshll.u32 %v2102_v45, 23  ;;  %v2188_v25 = vsel %vm2186_vm13, %v2187_v63, %v10208_v49 }
 0x212   :  { %v2018_v55 = vxor.u32 2147483648, %v7685_v44  ;;  %v2114_v57 = vsel %vm10218_vm11, 0, %v2112_v46  ;;  %v2189_v61 = vadd.s32 %v2188_v25, %v2184_v58  ;;  %v2245_v48 = vsel %vm2244_vm14, %v2243_v53, 0 }
 0x213   :  { %vm2013_vm0 = vweird.f32 %v8590_v1  ;;  %v2022_v33 = vsel %vm2020_vm12, %v2021_v8, %v7685_v44  ;;  %v2104_v27 = vor.u32 4788187, %v2103_v40  ;;  %v2107_v10 = vcvt.s32.f32 %v2100_v9 }
 0x214   :  { %v2019_v47 = vsel %vm2017_vm10, %v7683_v62, %v2018_v55  ;;  %v2190_v30 = vadd.s32 536870912, %v2189_v61  ;;  %v2247_v13 = vand.u32 31, %v2245_v48  ;;  %v2118_v17 = vadd.s32 3, %v2114_v57 }
 0x215   :  { %v2023_v0 = vsel %vm2016_vm9, %v2019_v47, %v2022_v33  ;;  %v2105_v32 = vand.u32 2147483647, %v2104_v27  ;;  %v2241_v42 = vor.u32 8388608, %v2240_v52  ;;  %v2246_v56 = vshrl.u32 %v2245_v48, 5 }
 0x216   :  { %v2024_v21 = vsel %vm2013_vm0, nan, %v2023_v0  ;;  %v10243_v54 = vshrl.u32 %v2190_v30, 30  ;;  %v2248_v23 = vsub.s32 32, %v2247_v13  ;;  %v2250_v51 = vshll.u32 %v14044_v38, %v2247_v13 }
 0x217   :  { %v2108_v1 = vmul.f32 %v2107_v10, %v2105_v32  ;;  %v2253_v3 = vshll.u32 %v14038_v18, %v2247_v13  ;;  %7032 = vst [vmem:[#allocation5 + $0x78] sm:$0xff] %v2024_v21  ;;  %v2256_v15 = vshll.u32 %v14039_v24, %v2247_v13  ;;  %v2259_v41 = vshll.u32 %v14040_v19, %v2247_v13 }
 0x218   :  { %v2192_v4 = vshll.u32 %v10243_v54, 30  ;;  %v2251_v16 = vshrl.u32 %v14038_v18, %v2248_v23  ;;  %v2254_v31 = vshrl.u32 %v14039_v24, %v2248_v23  ;;  %v2257_v20 = vshrl.u32 %v14040_v19, %v2248_v23 }
 0x219   :  { %v2109_v36 = vxor.u32 2147483648, %v2108_v1  ;;  %v2260_v12 = vshrl.u32 %v14041_v34, %v2248_v23  ;;  %v10254_v50 = vand.u32 3, %v2118_v17  ;;  %vm2265_vm1 = vcmp.lt.s32.totalorder %v2246_v56, 1 }
 0x21a   :  { %v10256_v49 = vsub.s32 %v2189_v61, %v2192_v4  ;;  %v10258_v59 = vshll.u32 %v2241_v42, 8  ;;  %v2252_v35 = vor.u32 %v2251_v16, %v2250_v51  ;;  %v2255_v37 = vor.u32 %v2254_v31, %v2253_v3 }
 0x21b   :  { %v2110_v11 = vsel %vm2027_vm5, %v2109_v36, %v2108_v1  ;;  %v2262_v39 = vshll.u32 %v14041_v34, %v2247_v13  ;;  %v2249_v26 = vshrl.u32 %v14044_v38, %v2248_v23  ;;  %v2261_v45 = vor.u32 %v2260_v12, %v2259_v41 }
 0x21c   :  { %v2113_v58 = vsel %vm10218_vm11, %v8594_v2, %v2110_v11  ;;  %v2195_v53 = vsub.s32 0, %v10256_v49  ;;  %v2258_v46 = vor.u32 %v2257_v20, %v2256_v15  ;;  %v2263_v63 = vshrl.u32 %v14042_v60, %v2248_v23 }
 0x21d   :  { %7686 = vcosq.f32 %v2113_v58  ;;  %vm2268_vm15 = vcmp.lt.s32.totalorder %v2246_v56, 4  ;;  %vm2266_vm2 = vcmp.lt.s32.totalorder %v2246_v56, 2  ;;  %vm2267_vm3 = vcmp.lt.s32.totalorder %v2246_v56, 3 }
 0x21e   :  { %7688 = vsinq.f32 %v2113_v58  ;;  %v7169_v62 = vmin.u32 %v2195_v53, %v10256_v49  ;;  %v2264_v52 = vor.u32 %v2263_v63, %v2262_v39  ;;  %v2270_v44 = vsel %vm2268_vm15, %v2258_v46, 2102212464 }
 0x21f   :  { %v2273_v22 = vsel %vm2265_vm1, %v2252_v35, %v2255_v37  ;;  %v2274_v8 = vsel %vm2268_vm15, %v2261_v45, 920167782  ;;  %v2185_v9 = vadd.s32 %v10207_v43, %v10213_v14  ;;  %v2269_v25 = vsel %vm2265_vm1, %v2249_v26, %v2252_v35 }
 0x220   :  { %v2197_v40 = vclz %v7169_v62  ;;  %v2340_v55 = vand.u32 2139095040, %v8606_v7  ;;  %v2271_v57 = vsel %vm2267_vm3, %v2255_v37, %v2270_v44  ;;  %v2275_v61 = vsel %vm2267_vm3, %v2258_v46, %v2274_v8 }
 0x221   :  { %v2277_v48 = vsel %vm2265_vm1, %v2255_v37, %v2258_v46  ;;  %v2278_v33 = vsel %vm2268_vm15, %v2264_v52, 1326507024  ;;  %vm2117_vm5 = vweird.f32 %v8594_v2  ;;  %v2215_v10 = vsub.s32 4, %v10243_v54 }
 0x222   :  { %v7170_v27 = vadd.s32 4294967294, %v2197_v40  ;;  %v2276_v43 = vsel %vm2266_vm2, %v2273_v22, %v2275_v61  ;;  %v2279_v14 = vsel %vm2267_vm3, %v2261_v45, %v2278_v33  ;;  %v2272_v47 = vsel %vm2266_vm2, %v2269_v25, %v2271_v57 }
 0x223   :  { %v2280_v30 = vsel %vm2266_vm2, %v2277_v48, %v2279_v14  ;;  %v10288_v13 = vmul.u32.u64.low %v10258_v59, %v2276_v43  ;;  %v10289_v0 = vmul.u32.u64.high %v10258_v59, %v2276_v43, %v10288_v13  ;;  %v2341_v42 = vshrl.u32 %v2340_v55, 23 }
 0x224   :  { %vm7171_vm6 = vcmp.lt.s32.totalorder %v7170_v27, 0  ;;  %v10293_v32 = vmul.u32.u64.low %v10258_v59, %v2280_v30  ;;  %v10294_v17 = vmul.u32.u64.high %v10258_v59, %v2280_v30, %v10293_v32  ;;  %vm2120_vm4 = vcmp.lt.s32.totalorder %v10254_v50, 2 }
 0x225   :  { %vm10299_vm7 = vcmp.le.f32.partialorder %v2129_v28, 0.7853982  ;;  %vm2131_vm8 = vcmp.lt.s32.totalorder %v8598_v5, 0  ;;  %v2200_v56 = vsel %vm7171_vm6, 0, %v7170_v27  ;;  %v7176_v3 = vadd.s32 4294967169, %v2341_v42 }
 0x226   :  { %v2201_v23 = vsub.s32 32, %v2200_v56  ;;  %v2202_v1 = vshll.u32 %v10256_v49, %v2200_v56  ;;  %v2205_v51 = vsub.s32 4294967266, %v2200_v56  ;;  %vm2121_vm11 = vcmp.eq.s32.totalorder %v10254_v50, 0 }
 0x227   :  { %v7687_v4 = vpop.eup %7686  ;;  %vm2124_vm9 = vcmp.eq.s32.totalorder %v10254_v50, 2  ;;  %v2288_v16 = vmul.u32 %v10258_v59, %v2272_v47  ;;  %v2291_v28 = vadd.s32 1, %v10289_v0  ;;  %v2216_v20 = vsel %vm2131_vm8, %v2215_v10, %v10243_v54 }
 0x228   :  { %v7689_v15 = vpop.eup %7688  ;;  %v2125_v41 = vxor.u32 2147483648, %v7687_v4  ;;  %v2203_v36 = vshrl.u32 %v2185_v9, %v2201_v23  ;;  %v2206_v31 = vadd.s32 127, %v2205_v51  ;;  %vm2290_vm10 = vc.u32 %v10294_v17, %v10288_v13 }
 0x229   :  { %v2122_v12 = vxor.u32 2147483648, %v7689_v15  ;;  %v2337_v49 = vand.u32 2147483647, %v8606_v7  ;;  %v2347_v11 = vadd.s32 1, %v7176_v3  ;;  %v2292_v39 = vsel %vm2290_vm10, %v2291_v28, %v10289_v0  ;;  %v14086_v3 = vld [vmem:[#allocation12_spill] sm:$0xff] }
 0x22a   :  { %v2126_v35 = vsel %vm2124_vm9, %v2125_v41, %v7689_v15  ;;  %v2204_v37 = vor.u32 %v2203_v36, %v2202_v1  ;;  %v2207_v59 = vshll.u32 %v2206_v31, 23  ;;  %v2218_v53 = vsel %vm10299_vm7, 0, %v2216_v20 }
 0x22b   :  { %v2123_v58 = vsel %vm2121_vm11, %v7687_v4, %v2122_v12  ;;  %v2293_v26 = vadd.s32 %v2292_v39, %v2288_v16  ;;  %vm2348_vm12 = vcmp.gt.s32.totalorder %v2347_v11, 0  ;;  %v2222_v8 = vadd.s32 3, %v2218_v53 }
 0x22c   :  { %v2127_v54 = vsel %vm2120_vm4, %v2123_v58, %v2126_v35  ;;  %v2208_v45 = vor.u32 4788187, %v2207_v59  ;;  %v2211_v46 = vcvt.s32.f32 %v2204_v37  ;;  %v2349_v63 = vsel %vm2348_vm12, %v2347_v11, 0 }
 0x22d   :  { %v2128_v62 = vsel %vm2117_vm5, nan, %v2127_v54  ;;  %v2294_v52 = vadd.s32 536870912, %v2293_v26  ;;  %v2351_v44 = vand.u32 31, %v2349_v63  ;;  %v2344_v40 = vand.u32 8388607, %v2337_v49 }
 0x22e   :  { %v2209_v22 = vand.u32 2147483647, %v2208_v45  ;;  %7033 = vst [vmem:[#allocation5 + $0x80] sm:$0xff] %v2128_v62  ;;  %v10326_v25 = vshrl.u32 %v2349_v63, 5  ;;  %v10337_v0 = vand.u32 3, %v2222_v8  ;;  %vm2235_vm13 = vcmp.lt.s32.totalorder %v8602_v6, 0 }
 0x22f   :  { %v2295_v9 = vshrl.u32 %v2294_v52, 30  ;;  %v2352_v55 = vsub.s32 32, %v2351_v44  ;;  %v2354_v57 = vshll.u32 %v14044_v38, %v2351_v44  ;;  %v2357_v61 = vshll.u32 %v14038_v18, %v2351_v44 }
 0x230   :  { %v2212_v50 = vmul.f32 %v2211_v46, %v2209_v22  ;;  %v2360_v2 = vshll.u32 %v14039_v24, %v2351_v44  ;;  %v2363_v27 = vshll.u32 %v14040_v19, %v2351_v44  ;;  %v2366_v10 = vshll.u32 %v14041_v34, %v2351_v44 }
 0x231   :  { %v2296_v48 = vshll.u32 %v2295_v9, 30  ;;  %v2355_v33 = vshrl.u32 %v14038_v18, %v2352_v55  ;;  %v2358_v14 = vshrl.u32 %v14039_v24, %v2352_v55  ;;  %v2361_v47 = vshrl.u32 %v14040_v19, %v2352_v55 }
 0x232   :  { %v2213_v43 = vxor.u32 2147483648, %v2212_v50  ;;  %v2364_v30 = vshrl.u32 %v14041_v34, %v2352_v55  ;;  %v2345_v42 = vor.u32 8388608, %v2344_v40  ;;  %v2367_v56 = vshrl.u32 %v14042_v60, %v2352_v55 }
 0x233   :  { %v10339_v32 = vsub.s32 %v2293_v26, %v2296_v48  ;;  %v2353_v1 = vshrl.u32 %v14044_v38, %v2352_v55  ;;  %v2356_v51 = vor.u32 %v2355_v33, %v2354_v57  ;;  %v2444_v4 = vand.u32 2139095040, %v14086_v3 }
 0x234   :  { %v2214_v23 = vsel %vm2131_vm8, %v2213_v43, %v2212_v50  ;;  %v2359_v15 = vor.u32 %v2358_v14, %v2357_v61  ;;  %v2362_v41 = vor.u32 %v2361_v47, %v2360_v2  ;;  %v2365_v36 = vor.u32 %v2364_v30, %v2363_v27 }
 0x235   :  { %v2217_v16 = vsel %vm10299_vm7, %v8598_v5, %v2214_v23  ;;  %v2299_v28 = vsub.s32 0, %v10339_v32  ;;  %v2368_v31 = vor.u32 %v2367_v56, %v2366_v10  ;;  %vm2369_vm14 = vcmp.lt.s32.totalorder %v10326_v25, 1 }
 0x236   :  { %7690 = vcosq.f32 %v2217_v16  ;;  %vm10354_vm0 = vcmp.le.f32.partialorder %v2233_v29, 0.7853982  ;;  %v2385_v21 = vshll.u32 %v2345_v42, 8  ;;  %v2319_v11 = vsub.s32 4, %v2295_v9 }
 0x237   :  { %7692 = vsinq.f32 %v2217_v16  ;;  %v7173_v12 = vmin.u32 %v2299_v28, %v10339_v32  ;;  %vm2371_vm1 = vcmp.lt.s32.totalorder %v10326_v25, 3  ;;  %vm2372_vm15 = vcmp.lt.s32.totalorder %v10326_v25, 4 }
 0x238   :  { %v2445_v35 = vshrl.u32 %v2444_v4, 23  ;;  %vm2370_vm2 = vcmp.lt.s32.totalorder %v10326_v25, 2  ;;  %v2377_v59 = vsel %vm2369_vm14, %v2356_v51, %v2359_v15  ;;  %v2381_v39 = vsel %vm2369_vm14, %v2359_v15, %v2362_v41 }
 0x239   :  { %v2301_v37 = vclz %v7173_v12  ;;  %vm2224_vm3 = vcmp.lt.s32.totalorder %v10337_v0, 2  ;;  %v2373_v29 = vsel %vm2369_vm14, %v2353_v1, %v2356_v51  ;;  %v2374_v58 = vsel %vm2372_vm15, %v2362_v41, 2102212464 }
 0x23a   :  { %v2378_v53 = vsel %vm2372_vm15, %v2365_v36, 920167782  ;;  %v2382_v26 = vsel %vm2372_vm15, %v2368_v31, 1326507024  ;;  %vm2221_vm5 = vweird.f32 %v8598_v5  ;;  %v2375_v45 = vsel %vm2371_vm1, %v2359_v15, %v2374_v58 }
 0x23b   :  { %v7174_v54 = vadd.s32 4294967294, %v2301_v37  ;;  %v2379_v46 = vsel %vm2371_vm1, %v2362_v41, %v2378_v53  ;;  %v2383_v63 = vsel %vm2371_vm1, %v2365_v36, %v2382_v26  ;;  %v2289_v62 = vadd.s32 %v10288_v13, %v10294_v17 }
 0x23c   :  { %v2380_v52 = vsel %vm2370_vm2, %v2377_v59, %v2379_v46  ;;  %v2384_v44 = vsel %vm2370_vm2, %v2381_v39, %v2383_v63  ;;  %v7180_v22 = vadd.s32 4294967169, %v2445_v35  ;;  %v2320_v8 = vsel %vm2235_vm13, %v2319_v11, %v2295_v9 }
 0x23d   :  { %vm7175_vm6 = vcmp.lt.s32.totalorder %v7174_v54, 0  ;;  %v10378_v40 = vmul.u32.u64.low %v2385_v21, %v2384_v44  ;;  %v10379_v55 = vmul.u32.u64.high %v2385_v21, %v2384_v44, %v10378_v40  ;;  %v2376_v57 = vsel %vm2370_vm2, %v2373_v29, %v2375_v45 }
 0x23e   :  { %v2304_v50 = vsel %vm7175_vm6, 0, %v7174_v54  ;;  %v10383_v61 = vmul.u32.u64.low %v2385_v21, %v2380_v52  ;;  %v10384_v13 = vmul.u32.u64.high %v2385_v21, %v2380_v52, %v10383_v61  ;;  %v2451_v33 = vadd.s32 1, %v7180_v22 }
 0x23f   :  { %v2305_v17 = vsub.s32 32, %v2304_v50  ;;  %v2306_v2 = vshll.u32 %v10339_v32, %v2304_v50  ;;  %v2309_v48 = vsub.s32 4294967266, %v2304_v50  ;;  %vm2225_vm4 = vcmp.eq.s32.totalorder %v10337_v0, 0 }
 0x240   :  { %v7691_v27 = vpop.eup %7690  ;;  %vm2228_vm7 = vcmp.eq.s32.totalorder %v10337_v0, 2  ;;  %v2322_v9 = vsel %vm10354_vm0, 0, %v2320_v8  ;;  %v2441_v25 = vand.u32 2147483647, %v14086_v3  ;;  %v2392_v30 = vmul.u32 %v2385_v21, %v2376_v57 }
 0x241   :  { %v7693_v10 = vpop.eup %7692  ;;  %v2229_v43 = vxor.u32 2147483648, %v7691_v27  ;;  %v2307_v14 = vshrl.u32 %v2289_v62, %v2305_v17  ;;  %v2310_v47 = vadd.s32 127, %v2309_v48  ;;  %vm2394_vm8 = vc.u32 %v10379_v55, %v10383_v61 }
 0x242   :  { %v2226_v42 = vxor.u32 2147483648, %v7693_v10  ;;  %v2395_v32 = vadd.s32 1, %v10384_v13  ;;  %vm2452_vm11 = vcmp.gt.s32.totalorder %v2451_v33, 0  ;;  %v2448_v28 = vand.u32 8388607, %v2441_v25 }
 0x243   :  { %v2230_v56 = vsel %vm2228_vm7, %v2229_v43, %v7693_v10  ;;  %v2308_v23 = vor.u32 %v2307_v14, %v2306_v2  ;;  %v2311_v1 = vshll.u32 %v2310_v47, 23  ;;  %v2453_v51 = vsel %vm2452_vm11, %v2451_v33, 0 }
 0x244   :  { %v2227_v4 = vsel %vm2225_vm4, %v7691_v27, %v2226_v42  ;;  %v2396_v16 = vsel %vm2394_vm8, %v2395_v32, %v10384_v13  ;;  %v2455_v15 = vand.u32 31, %v2453_v51  ;;  %v2326_v11 = vadd.s32 3, %v2322_v9  ;;  %v14089_v42 = vld [vmem:[#allocation13_spill] sm:$0xff] }
 0x245   :  { %v2231_v41 = vsel %vm2224_vm3, %v2227_v4, %v2230_v56  ;;  %v2312_v36 = vor.u32 4788187, %v2311_v1  ;;  %v2315_v31 = vcvt.s32.f32 %v2308_v23  ;;  %v2397_v12 = vadd.s32 %v2396_v16, %v2392_v30 }
 0x246   :  { %v2232_v21 = vsel %vm2221_vm5, nan, %v2231_v41  ;;  %v2456_v35 = vsub.s32 32, %v2455_v15  ;;  %v2458_v37 = vshll.u32 %v14044_v38, %v2455_v15  ;;  %v2461_v29 = vshll.u32 %v14038_v18, %v2455_v15 }
 0x247   :  { %v2313_v59 = vand.u32 2147483647, %v2312_v36  ;;  %v2398_v39 = vadd.s32 536870912, %v2397_v12  ;;  %v2464_v58 = vshll.u32 %v14039_v24, %v2455_v15  ;;  %7034 = vst [vmem:[#allocation5 + $0x88] sm:$0xff] %v2232_v21  ;;  %v2467_v5 = vshll.u32 %v14040_v19, %v2455_v15 }
 0x248   :  { %v2459_v0 = vshrl.u32 %v14038_v18, %v2456_v35  ;;  %v2462_v53 = vshrl.u32 %v14039_v24, %v2456_v35  ;;  %v2465_v26 = vshrl.u32 %v14040_v19, %v2456_v35  ;;  %v2454_v46 = vshrl.u32 %v2453_v51, 5 }
 0x249   :  { %v2316_v54 = vmul.f32 %v2315_v31, %v2313_v59  ;;  %v10412_v45 = vshrl.u32 %v2398_v39, 30  ;;  %v2468_v63 = vshrl.u32 %v14041_v34, %v2456_v35  ;;  %v2449_v62 = vor.u32 8388608, %v2448_v28 }
 0x24a   :  { %v2470_v52 = vshll.u32 %v14041_v34, %v2455_v15  ;;  %v2471_v44 = vshrl.u32 %v14042_v60, %v2456_v35  ;;  %v10417_v8 = vand.u32 3, %v2326_v11  ;;  %v2457_v50 = vshrl.u32 %v14044_v38, %v2456_v35 }
 0x24b   :  { %v2317_v22 = vxor.u32 2147483648, %v2316_v54  ;;  %v2400_v40 = vshll.u32 %v10412_v45, 30  ;;  %v2460_v57 = vor.u32 %v2459_v0, %v2458_v37  ;;  %v2463_v13 = vor.u32 %v2462_v53, %v2461_v29 }
 0x24c   :  { %v2466_v17 = vor.u32 %v2465_v26, %v2464_v58  ;;  %v2469_v2 = vor.u32 %v2468_v63, %v2467_v5  ;;  %vm2473_vm9 = vcmp.lt.s32.totalorder %v2454_v46, 1  ;;  %vm2476_vm10 = vcmp.lt.s32.totalorder %v2454_v46, 4 }
 0x24d   :  { %v2318_v48 = vsel %vm2235_vm13, %v2317_v22, %v2316_v54  ;;  %v10423_v33 = vsub.s32 %v2397_v12, %v2400_v40  ;;  %v2472_v9 = vor.u32 %v2471_v44, %v2470_v52  ;;  %vm2475_vm12 = vcmp.lt.s32.totalorder %v2454_v46, 3 }
 0x24e   :  { %v2321_v27 = vsel %vm10354_vm0, %v8602_v6, %v2318_v48  ;;  %v2489_v10 = vshll.u32 %v2449_v62, 8  ;;  %vm2474_vm14 = vcmp.lt.s32.totalorder %v2454_v46, 2  ;;  %v2478_v14 = vsel %vm2476_vm10, %v2466_v17, 2102212464 }
 0x24f   :  { %7694 = vcosq.f32 %v2321_v27  ;;  %v2403_v43 = vsub.s32 0, %v10423_v33  ;;  %v2481_v47 = vsel %vm2473_vm9, %v2460_v57, %v2463_v13  ;;  %v2482_v30 = vsel %vm2476_vm10, %v2469_v2, 920167782 }
 0x250   :  { %7696 = vsinq.f32 %v2321_v27  ;;  %v2548_v32 = vand.u32 2139095040, %v14089_v42  ;;  %v2477_v20 = vsel %vm2473_vm9, %v2457_v50, %v2460_v57  ;;  %v2483_v23 = vsel %vm2475_vm12, %v2466_v17, %v2482_v30 }
 0x251   :  { %v7177_v56 = vmin.u32 %v2403_v43, %v10423_v33  ;;  %v2479_v1 = vsel %vm2475_vm12, %v2463_v13, %v2478_v14  ;;  %v2484_v51 = vsel %vm2474_vm14, %v2481_v47, %v2483_v23  ;;  %v2485_v4 = vsel %vm2473_vm9, %v2463_v13, %v2466_v17  ;;  %v14092_v23 = vld [vmem:[#allocation14_spill] sm:$0xff] }
 0x252   :  { %v2486_v16 = vsel %vm2476_vm10, %v2472_v9, 1326507024  ;;  %vm2328_vm13 = vcmp.lt.s32.totalorder %v10417_v8, 2  ;;  %vm2339_vm0 = vcmp.lt.s32.totalorder %v8606_v7, 0  ;;  %v2549_v31 = vshrl.u32 %v2548_v32, 23 }
 0x253   :  { %v2405_v28 = vclz %v7177_v56  ;;  %v2487_v15 = vsel %vm2475_vm12, %v2469_v2, %v2486_v16  ;;  %v10443_v41 = vmul.u32.u64.low %v2489_v10, %v2484_v51  ;;  %v10444_v36 = vmul.u32.u64.high %v2489_v10, %v2484_v51, %v10443_v41 }
 0x254   :  { %v2423_v21 = vsub.s32 4, %v10412_v45  ;;  %v2480_v11 = vsel %vm2474_vm14, %v2477_v20, %v2479_v1  ;;  %v2488_v35 = vsel %vm2474_vm14, %v2485_v4, %v2487_v15  ;;  %v2545_v39 = vand.u32 2147483647, %v14089_v42 }
 0x255   :  { %v7178_v12 = vadd.s32 4294967294, %v2405_v28  ;;  %v10450_v37 = vmul.u32.u64.low %v2489_v10, %v2488_v35  ;;  %v10451_v59 = vmul.u32.u64.high %v2489_v10, %v2488_v35, %v10450_v37  ;;  %v7184_v29 = vadd.s32 4294967169, %v2549_v31 }
 0x256   :  { %vm2329_vm1 = vcmp.eq.s32.totalorder %v10417_v8, 0  ;;  %vm2332_vm15 = vcmp.eq.s32.totalorder %v10417_v8, 2  ;;  %v2393_v58 = vadd.s32 %v10383_v61, %v10379_v55  ;;  %v2496_v53 = vmul.u32 %v2489_v10, %v2480_v11 }
 0x257   :  { %vm7179_vm2 = vcmp.lt.s32.totalorder %v7178_v12, 0  ;;  %v2499_v26 = vadd.s32 1, %v10444_v36  ;;  %v2555_v5 = vadd.s32 1, %v7184_v29  ;;  %v2424_v52 = vsel %vm2339_vm0, %v2423_v21, %v10412_v45 }
 0x258   :  { %v2408_v0 = vsel %vm7179_vm2, 0, %v7178_v12  ;;  %vm2498_vm3 = vc.u32 %v10451_v59, %v10443_v41  ;;  %v2552_v55 = vand.u32 8388607, %v2545_v39  ;;  %vm2325_vm6 = vweird.f32 %v8602_v6 }
 0x259   :  { %v7695_v54 = vpop.eup %7694  ;;  %v2409_v46 = vsub.s32 32, %v2408_v0  ;;  %v2410_v63 = vshll.u32 %v10423_v33, %v2408_v0  ;;  %v2413_v62 = vsub.s32 4294967266, %v2408_v0  ;;  %vm2556_vm5 = vcmp.gt.s32.totalorder %v2555_v5, 0 }
 0x25a   :  { %v7697_v44 = vpop.eup %7696  ;;  %v2333_v22 = vxor.u32 2147483648, %v7695_v54  ;;  %v2500_v57 = vsel %vm2498_vm3, %v2499_v26, %v10444_v36  ;;  %v2557_v17 = vsel %vm2556_vm5, %v2555_v5, 0  ;;  %vm10475_vm4 = vcmp.le.f32.partialorder %v2337_v49, 0.7853982 }
 0x25b   :  { %v2330_v61 = vxor.u32 2147483648, %v7697_v44  ;;  %v2411_v40 = vshrl.u32 %v2393_v58, %v2409_v46  ;;  %v2414_v50 = vadd.s32 127, %v2413_v62  ;;  %v2501_v45 = vadd.s32 %v2500_v57, %v2496_v53 }
 0x25c   :  { %v2334_v13 = vsel %vm2332_vm15, %v2333_v22, %v7697_v44  ;;  %v2426_v6 = vsel %vm10475_vm4, 0, %v2424_v52  ;;  %v2559_v43 = vand.u32 31, %v2557_v17  ;;  %v2553_v32 = vor.u32 8388608, %v2552_v55 }
 0x25d   :  { %v2331_v2 = vsel %vm2329_vm1, %v7695_v54, %v2330_v61  ;;  %v2412_v33 = vor.u32 %v2411_v40, %v2410_v63  ;;  %v2415_v27 = vshll.u32 %v2414_v50, 23  ;;  %v2502_v10 = vadd.s32 536870912, %v2501_v45 }
 0x25e   :  { %v2335_v9 = vsel %vm2328_vm13, %v2331_v2, %v2334_v13  ;;  %v2558_v49 = vshrl.u32 %v2557_v17, 5  ;;  %v2560_v20 = vsub.s32 32, %v2559_v43  ;;  %v2652_v1 = vand.u32 2139095040, %v14092_v23 }
 0x25f   :  { %v2336_v14 = vsel %vm2325_vm6, nan, %v2335_v9  ;;  %v2416_v47 = vor.u32 4788187, %v2415_v27  ;;  %v2419_v30 = vcvt.s32.f32 %v2412_v33  ;;  %v10483_v56 = vshrl.u32 %v2502_v10, 30 }
 0x260   :  { %7035 = vst [vmem:[#allocation5 + $0x90] sm:$0xff] %v2336_v14  ;;  %v2562_v8 = vshll.u32 %v14044_v38, %v2559_v43  ;;  %v2565_v4 = vshll.u32 %v14038_v18, %v2559_v43  ;;  %v2568_v16 = vshll.u32 %v14039_v24, %v2559_v43  ;;  %v2563_v15 = vshrl.u32 %v14038_v18, %v2560_v20 }
 0x261   :  { %v2417_v51 = vand.u32 2147483647, %v2416_v47  ;;  %v2504_v28 = vshll.u32 %v10483_v56, 30  ;;  %v2571_v36 = vshll.u32 %v14040_v19, %v2559_v43  ;;  %v2574_v31 = vshll.u32 %v14041_v34, %v2559_v43 }
 0x262   :  { %v2566_v21 = vshrl.u32 %v14039_v24, %v2560_v20  ;;  %v2569_v11 = vshrl.u32 %v14040_v19, %v2560_v20  ;;  %v2572_v35 = vshrl.u32 %v14041_v34, %v2560_v20  ;;  %v2430_v37 = vadd.s32 3, %v2426_v6 }
 0x263   :  { %v2420_v12 = vmul.f32 %v2419_v30, %v2417_v51  ;;  %v10496_v29 = vsub.s32 %v2501_v45, %v2504_v28  ;;  %v2575_v58 = vshrl.u32 %v14042_v60, %v2560_v20  ;;  %v10499_v0 = vshll.u32 %v2553_v32, 8 }
 0x264   :  { %v2564_v26 = vor.u32 %v2563_v15, %v2562_v8  ;;  %v2567_v5 = vor.u32 %v2566_v21, %v2565_v4  ;;  %v2653_v54 = vshrl.u32 %v2652_v1, 23  ;;  %v2561_v63 = vshrl.u32 %v14044_v38, %v2560_v20 }
 0x265   :  { %v2421_v53 = vxor.u32 2147483648, %v2420_v12  ;;  %v2507_v46 = vsub.s32 0, %v10496_v29  ;;  %v2573_v62 = vor.u32 %v2572_v35, %v2571_v36  ;;  %vm2577_vm7 = vcmp.lt.s32.totalorder %v2558_v49, 1 }
 0x266   :  { %v2570_v44 = vor.u32 %v2569_v11, %v2568_v16  ;;  %v2576_v22 = vor.u32 %v2575_v58, %v2574_v31  ;;  %vm2580_vm8 = vcmp.lt.s32.totalorder %v2558_v49, 4  ;;  %vm2578_vm11 = vcmp.lt.s32.totalorder %v2558_v49, 2 }
 0x267   :  { %v2422_v52 = vsel %vm2339_vm0, %v2421_v53, %v2420_v12  ;;  %v7181_v61 = vmin.u32 %v2507_v46, %v10496_v29  ;;  %vm2579_vm9 = vcmp.lt.s32.totalorder %v2558_v49, 3  ;;  %vm2443_vm10 = vcmp.lt.s32.totalorder %v14086_v3, 0 }
 0x268   :  { %v2425_v55 = vsel %vm10475_vm4, %v8606_v7, %v2422_v52  ;;  %v2582_v40 = vsel %vm2580_vm8, %v2570_v44, 2102212464  ;;  %v2585_v50 = vsel %vm2577_vm7, %v2564_v26, %v2567_v5  ;;  %v2586_v57 = vsel %vm2580_vm8, %v2573_v62, 920167782 }
 0x269   :  { %7698 = vcosq.f32 %v2425_v55  ;;  %v2509_v13 = vclz %v7181_v61  ;;  %v2649_v45 = vand.u32 2147483647, %v14092_v23  ;;  %v7188_v17 = vadd.s32 4294967169, %v2653_v54 }
 0x26a   :  { %7700 = vsinq.f32 %v2425_v55  ;;  %v2581_v2 = vsel %vm2577_vm7, %v2561_v63, %v2564_v26  ;;  %v2583_v48 = vsel %vm2579_vm9, %v2567_v5, %v2582_v40  ;;  %v2587_v33 = vsel %vm2579_vm9, %v2570_v44, %v2586_v57 }
 0x26b   :  { %v2589_v27 = vsel %vm2577_vm7, %v2567_v5, %v2570_v44  ;;  %vm10520_vm12 = vcmp.le.f32.partialorder %v2441_v25, 0.7853982  ;;  %v2497_v6 = vadd.s32 %v10443_v41, %v10451_v59  ;;  %v7182_v10 = vadd.s32 4294967294, %v2509_v13 }
 0x26c   :  { %v2588_v43 = vsel %vm2578_vm11, %v2585_v50, %v2587_v33  ;;  %v2590_v14 = vsel %vm2580_vm8, %v2576_v22, 1326507024  ;;  %v2527_v47 = vsub.s32 4, %v10483_v56  ;;  %vm2429_vm14 = vweird.f32 %v8606_v7 }
 0x26d   :  { %v2591_v30 = vsel %vm2579_vm9, %v2573_v62, %v2590_v14  ;;  %v10531_v32 = vmul.u32.u64.low %v10499_v0, %v2588_v43  ;;  %v10532_v20 = vmul.u32.u64.high %v10499_v0, %v2588_v43, %v10531_v32  ;;  %vm7183_vm13 = vcmp.lt.s32.totalorder %v7182_v10, 0 }
 0x26e   :  { %v2584_v25 = vsel %vm2578_vm11, %v2581_v2, %v2583_v48  ;;  %v2592_v41 = vsel %vm2578_vm11, %v2589_v27, %v2591_v30  ;;  %v2659_v59 = vadd.s32 1, %v7188_v17  ;;  %v2431_v1 = vand.u32 3, %v2430_v37 }
 0x26f   :  { %v2512_v51 = vsel %vm7183_vm13, 0, %v7182_v10  ;;  %v10539_v8 = vmul.u32.u64.low %v10499_v0, %v2592_v41  ;;  %v10540_v4 = vmul.u32.u64.high %v10499_v0, %v2592_v41, %v10539_v8  ;;  %v2600_v36 = vmul.u32 %v10499_v0, %v2584_v25 }
 0x270   :  { %v2513_v16 = vsub.s32 32, %v2512_v51  ;;  %v2514_v28 = vshll.u32 %v10496_v29, %v2512_v51  ;;  %v2517_v15 = vsub.s32 4294967266, %v2512_v51  ;;  %vm2660_vm0 = vcmp.gt.s32.totalorder %v2659_v59, 0 }
 0x271   :  { %v2603_v31 = vadd.s32 1, %v10532_v20  ;;  %v2656_v49 = vand.u32 8388607, %v2649_v45  ;;  %v2661_v12 = vsel %vm2660_vm0, %v2659_v59, 0  ;;  %v2528_v35 = vsel %vm2443_vm10, %v2527_v47, %v10483_v56 }
 0x272   :  { %v2515_v21 = vshrl.u32 %v2497_v6, %v2513_v16  ;;  %v2518_v11 = vadd.s32 127, %v2517_v15  ;;  %v2663_v37 = vand.u32 31, %v2661_v12  ;;  %vm2432_vm1 = vcmp.lt.s32.totalorder %v2431_v1, 2 }
 0x273   :  { %v7699_v58 = vpop.eup %7698  ;;  %vm2433_vm15 = vcmp.eq.s32.totalorder %v2431_v1, 0  ;;  %vm2436_vm2 = vcmp.eq.s32.totalorder %v2431_v1, 2  ;;  %vm2602_vm3 = vc.u32 %v10540_v4, %v10531_v32  ;;  %v2530_v46 = vsel %vm10520_vm12, 0, %v2528_v35 }
 0x274   :  { %v7701_v29 = vpop.eup %7700  ;;  %v2437_v0 = vxor.u32 2147483648, %v7699_v58  ;;  %v2516_v53 = vor.u32 %v2515_v21, %v2514_v28  ;;  %v2519_v26 = vshll.u32 %v2518_v11, 23  ;;  %v2604_v5 = vsel %vm2602_vm3, %v2603_v31, %v10532_v20 }
 0x275   :  { %v2434_v54 = vxor.u32 2147483648, %v7701_v29  ;;  %v2605_v63 = vadd.s32 %v2604_v5, %v2600_v36  ;;  %v2664_v56 = vsub.s32 32, %v2663_v37  ;;  %v2657_v22 = vor.u32 8388608, %v2656_v49 }
 0x276   :  { %v2438_v62 = vsel %vm2436_vm2, %v2437_v0, %v7701_v29  ;;  %v2520_v52 = vor.u32 4788187, %v2519_v26  ;;  %v2523_v44 = vcvt.s32.f32 %v2516_v53  ;;  %v2666_v40 = vshll.u32 %v14044_v38, %v2663_v37 }
 0x277   :  { %v2435_v55 = vsel %vm2433_vm15, %v7699_v58, %v2434_v54  ;;  %v2606_v61 = vadd.s32 536870912, %v2605_v63  ;;  %v2669_v50 = vshll.u32 %v14038_v18, %v2663_v37  ;;  %v2667_v17 = vshrl.u32 %v14038_v18, %v2664_v56 }
 0x278   :  { %v2439_v57 = vsel %vm2432_vm1, %v2435_v55, %v2438_v62  ;;  %v2521_v13 = vand.u32 2147483647, %v2520_v52  ;;  %v2670_v2 = vshrl.u32 %v14039_v24, %v2664_v56  ;;  %v2672_v27 = vshll.u32 %v14039_v24, %v2663_v37  ;;  %v14097_v52 = vld [vmem:[#allocation15_spill] sm:$0xff] }
 0x279   :  { %v2440_v48 = vsel %vm2429_vm14, nan, %v2439_v57  ;;  %v2607_v33 = vshrl.u32 %v2606_v61, 30  ;;  %v2673_v6 = vshrl.u32 %v14040_v19, %v2664_v56  ;;  %v2662_v43 = vshrl.u32 %v2661_v12, 5 }
 0x27a   :  { %v2524_v10 = vmul.f32 %v2523_v44, %v2521_v13  ;;  %v2675_v14 = vshll.u32 %v14040_v19, %v2663_v37  ;;  %v2676_v47 = vshrl.u32 %v14041_v34, %v2664_v56  ;;  %7036 = vst [vmem:[#allocation5 + $0x98] sm:$0xff] %v2440_v48  ;;  %v2534_v30 = vadd.s32 3, %v2530_v46 }
 0x27b   :  { %v2608_v20 = vshll.u32 %v2607_v33, 30  ;;  %v2678_v25 = vshll.u32 %v14041_v34, %v2663_v37  ;;  %v10568_v41 = vshll.u32 %v2657_v22, 8  ;;  %v2665_v59 = vshrl.u32 %v14044_v38, %v2664_v56 }
 0x27c   :  { %v2525_v7 = vxor.u32 2147483648, %v2524_v10  ;;  %v2677_v1 = vor.u32 %v2676_v47, %v2675_v14  ;;  %v2679_v51 = vshrl.u32 %v14042_v60, %v2664_v56  ;;  %v2668_v16 = vor.u32 %v2667_v17, %v2666_v40 }
 0x27d   :  { %v10572_v8 = vsub.s32 %v2605_v63, %v2608_v20  ;;  %v2671_v28 = vor.u32 %v2670_v2, %v2669_v50  ;;  %v2674_v15 = vor.u32 %v2673_v6, %v2672_v27  ;;  %vm2681_vm5 = vcmp.lt.s32.totalorder %v2662_v43, 1 }
 0x27e   :  { %v2526_v36 = vsel %vm2443_vm10, %v2525_v7, %v2524_v10  ;;  %v2680_v31 = vor.u32 %v2679_v51, %v2678_v25  ;;  %vm2684_vm6 = vcmp.lt.s32.totalorder %v2662_v43, 4  ;;  %vm2682_vm4 = vcmp.lt.s32.totalorder %v2662_v43, 2 }
 0x27f   :  { %v2529_v49 = vsel %vm10520_vm12, %v14086_v3, %v2526_v36  ;;  %v2611_v12 = vsub.s32 0, %v10572_v8  ;;  %vm2683_vm7 = vcmp.lt.s32.totalorder %v2662_v43, 3  ;;  %v2685_v21 = vsel %vm2681_vm5, %v2665_v59, %v2668_v16 }
 0x280   :  { %7702 = vcosq.f32 %v2529_v49  ;;  %v2686_v11 = vsel %vm2684_vm6, %v2674_v15, 2102212464  ;;  %v2690_v35 = vsel %vm2684_vm6, %v2677_v1, 920167782  ;;  %v2689_v29 = vsel %vm2681_vm5, %v2668_v16, %v2671_v28 }
 0x281   :  { %7704 = vsinq.f32 %v2529_v49  ;;  %v7185_v37 = vmin.u32 %v2611_v12, %v10572_v8  ;;  %v2687_v58 = vsel %vm2683_vm7, %v2671_v28, %v2686_v11  ;;  %v2535_v9 = vand.u32 3, %v2534_v30 }
 0x282   :  { %v2691_v0 = vsel %vm2683_vm7, %v2674_v15, %v2690_v35  ;;  %v2693_v53 = vsel %vm2681_vm5, %v2671_v28, %v2674_v15  ;;  %v2694_v26 = vsel %vm2684_vm6, %v2680_v31, 1326507024  ;;  %vm10591_vm8 = vcmp.le.f32.partialorder %v2545_v39, 0.7853982 }
 0x283   :  { %vm2547_vm11 = vcmp.lt.s32.totalorder %v14089_v42, 0  ;;  %v2613_v54 = vclz %v7185_v37  ;;  %v2631_v46 = vsub.s32 4, %v2607_v33  ;;  %v2688_v63 = vsel %vm2682_vm4, %v2685_v21, %v2687_v58 }
 0x284   :  { %v2692_v56 = vsel %vm2682_vm4, %v2689_v29, %v2691_v0  ;;  %v2695_v62 = vsel %vm2683_vm7, %v2677_v1, %v2694_v26  ;;  %v2756_v44 = vand.u32 2139095040, %v14097_v52  ;;  %vm2533_vm9 = vweird.f32 %v14086_v3 }
 0x285   :  { %v7186_v22 = vadd.s32 4294967294, %v2613_v54  ;;  %v2696_v39 = vsel %vm2682_vm4, %v2693_v53, %v2695_v62  ;;  %v10603_v55 = vmul.u32.u64.low %v10568_v41, %v2692_v56  ;;  %v10604_v61 = vmul.u32.u64.high %v10568_v41, %v2692_v56, %v10603_v55 }
 0x286   :  { %vm2536_vm10 = vcmp.lt.s32.totalorder %v2535_v9, 2  ;;  %v10608_v40 = vmul.u32.u64.low %v10568_v41, %v2696_v39  ;;  %v10609_v50 = vmul.u32.u64.high %v10568_v41, %v2696_v39, %v10608_v40  ;;  %v2757_v57 = vshrl.u32 %v2756_v44, 23 }
 0x287   :  { %vm2537_vm12 = vcmp.eq.s32.totalorder %v2535_v9, 0  ;;  %v2601_v13 = vadd.s32 %v10531_v32, %v10540_v4  ;;  %vm7187_vm14 = vcmp.lt.s32.totalorder %v7186_v22, 0  ;;  %v2632_v17 = vsel %vm2547_vm11, %v2631_v46, %v2607_v33 }
 0x288   :  { %v2616_v2 = vsel %vm7187_vm14, 0, %v7186_v22  ;;  %v2704_v48 = vmul.u32 %v10568_v41, %v2688_v63  ;;  %v2753_v27 = vand.u32 2147483647, %v14097_v52  ;;  %v7192_v6 = vadd.s32 4294967169, %v2757_v57 }
 0x289   :  { %v2617_v10 = vsub.s32 32, %v2616_v2  ;;  %v2618_v43 = vshll.u32 %v10572_v8, %v2616_v2  ;;  %v2621_v14 = vsub.s32 4294967266, %v2616_v2  ;;  %v2707_v47 = vadd.s32 1, %v10604_v61 }
 0x28a   :  { %v7703_v30 = vpop.eup %7702  ;;  %vm2540_vm13 = vcmp.eq.s32.totalorder %v2535_v9, 2  ;;  %v2634_v32 = vsel %vm10591_vm8, 0, %v2632_v17  ;;  %vm2706_vm0 = vc.u32 %v10609_v50, %v10603_v55  ;;  %v2763_v4 = vadd.s32 1, %v7192_v6 }
 0x28b   :  { %v7705_v33 = vpop.eup %7704  ;;  %v2541_v20 = vxor.u32 2147483648, %v7703_v30  ;;  %v2619_v25 = vshrl.u32 %v2601_v13, %v2617_v10  ;;  %v2622_v41 = vadd.s32 127, %v2621_v14  ;;  %v2708_v7 = vsel %vm2706_vm0, %v2707_v47, %v10604_v61  ;;  %v14098_v13 = vld [vmem:[#allocation16_spill] sm:$0xff] }
 0x28c   :  { %v2538_v59 = vxor.u32 2147483648, %v7705_v33  ;;  %v2709_v1 = vadd.s32 %v2708_v7, %v2704_v48  ;;  %v2760_v51 = vand.u32 8388607, %v2753_v27  ;;  %vm2764_vm1 = vcmp.gt.s32.totalorder %v2763_v4, 0 }
 0x28d   :  { %v2542_v8 = vsel %vm2540_vm13, %v2541_v20, %v7705_v33  ;;  %v2620_v16 = vor.u32 %v2619_v25, %v2618_v43  ;;  %v2623_v28 = vshll.u32 %v2622_v41, 23  ;;  %v2765_v15 = vsel %vm2764_vm1, %v2763_v4, 0 }
 0x28e   :  { %v2539_v36 = vsel %vm2537_vm12, %v7703_v30, %v2538_v59  ;;  %v2710_v31 = vadd.s32 536870912, %v2709_v1  ;;  %v2767_v49 = vand.u32 31, %v2765_v15  ;;  %v2638_v35 = vadd.s32 3, %v2634_v32 }
 0x28f   :  { %v2543_v12 = vsel %vm2536_vm10, %v2539_v36, %v2542_v8  ;;  %v2624_v21 = vor.u32 4788187, %v2623_v28  ;;  %v2627_v11 = vcvt.s32.f32 %v2620_v16  ;;  %v2761_v29 = vor.u32 8388608, %v2760_v51 }
 0x290   :  { %v2544_v37 = vsel %vm2533_vm9, nan, %v2543_v12  ;;  %v10630_v58 = vshrl.u32 %v2710_v31, 30  ;;  %v2768_v0 = vsub.s32 32, %v2767_v49  ;;  %v2766_v26 = vshrl.u32 %v2765_v15, 5 }
 0x291   :  { %v2625_v53 = vand.u32 2147483647, %v2624_v21  ;;  %v2770_v54 = vshll.u32 %v14044_v38, %v2767_v49  ;;  %v2773_v46 = vshll.u32 %v14038_v18, %v2767_v49  ;;  %7037 = vst [vmem:[#allocation5 + $0xa0] sm:$0xff] %v2544_v37  ;;  %v2776_v56 = vshll.u32 %v14039_v24, %v2767_v49 }
 0x292   :  { %v2712_v9 = vshll.u32 %v10630_v58, 30  ;;  %v2771_v63 = vshrl.u32 %v14038_v18, %v2768_v0  ;;  %v2779_v3 = vshll.u32 %v14040_v19, %v2767_v49  ;;  %v2774_v44 = vshrl.u32 %v14039_v24, %v2768_v0 }
 0x293   :  { %v2628_v62 = vmul.f32 %v2627_v11, %v2625_v53  ;;  %v2777_v22 = vshrl.u32 %v14040_v19, %v2768_v0  ;;  %v2780_v39 = vshrl.u32 %v14041_v34, %v2768_v0  ;;  %v10641_v61 = vand.u32 3, %v2638_v35 }
 0x294   :  { %v10643_v40 = vsub.s32 %v2709_v1, %v2712_v9  ;;  %v2782_v57 = vshll.u32 %v14041_v34, %v2767_v49  ;;  %v2860_v17 = vand.u32 2139095040, %v14098_v13  ;;  %v2705_v48 = vadd.s32 %v10603_v55, %v10609_v50 }
 0x295   :  { %v2629_v2 = vxor.u32 2147483648, %v2628_v62  ;;  %v2769_v6 = vshrl.u32 %v14044_v38, %v2768_v0  ;;  %v10650_v10 = vshll.u32 %v2761_v29, 8  ;;  %v2772_v14 = vor.u32 %v2771_v63, %v2770_v54 }
 0x296   :  { %v2715_v43 = vsub.s32 0, %v10643_v40  ;;  %v2775_v47 = vor.u32 %v2774_v44, %v2773_v46  ;;  %v2783_v30 = vshrl.u32 %v14042_v60, %v2768_v0  ;;  %v2778_v4 = vor.u32 %v2777_v22, %v2776_v56 }
 0x297   :  { %v2630_v32 = vsel %vm2547_vm11, %v2629_v2, %v2628_v62  ;;  %v2781_v33 = vor.u32 %v2780_v39, %v2779_v3  ;;  %vm2785_vm15 = vcmp.lt.s32.totalorder %v2766_v26, 1  ;;  %v2861_v25 = vshrl.u32 %v2860_v17, 23 }
 0x298   :  { %v2633_v55 = vsel %vm10591_vm8, %v14089_v42, %v2630_v32  ;;  %v7189_v50 = vmin.u32 %v2715_v43, %v10643_v40  ;;  %v2784_v20 = vor.u32 %v2783_v30, %v2782_v57  ;;  %vm2651_vm2 = vcmp.lt.s32.totalorder %v14092_v23, 0 }
 0x299   :  { %7706 = vcosq.f32 %v2633_v55  ;;  %vm2786_vm3 = vcmp.lt.s32.totalorder %v2766_v26, 2  ;;  %vm2787_vm5 = vcmp.lt.s32.totalorder %v2766_v26, 3  ;;  %vm2788_vm6 = vcmp.lt.s32.totalorder %v2766_v26, 4 }
 0x29a   :  { %7708 = vsinq.f32 %v2633_v55  ;;  %v2717_v41 = vclz %v7189_v50  ;;  %v2789_v7 = vsel %vm2785_vm15, %v2769_v6, %v2772_v14  ;;  %v2793_v59 = vsel %vm2785_vm15, %v2772_v14, %v2775_v47 }
 0x29b   :  { %v2735_v1 = vsub.s32 4, %v10630_v58  ;;  %v2790_v5 = vsel %vm2788_vm6, %v2778_v4, 2102212464  ;;  %v2794_v51 = vsel %vm2788_vm6, %v2781_v33, 920167782  ;;  %v2797_v8 = vsel %vm2785_vm15, %v2775_v47, %v2778_v4 }
 0x29c   :  { %v7190_v16 = vadd.s32 4294967294, %v2717_v41  ;;  %v2791_v28 = vsel %vm2787_vm5, %v2775_v47, %v2790_v5  ;;  %v2795_v15 = vsel %vm2787_vm5, %v2778_v4, %v2794_v51  ;;  %v2798_v36 = vsel %vm2788_vm6, %v2784_v20, 1326507024 }
 0x29d   :  { %v2792_v31 = vsel %vm2786_vm3, %v2789_v7, %v2791_v28  ;;  %v2796_v49 = vsel %vm2786_vm3, %v2793_v59, %v2795_v15  ;;  %v2799_v12 = vsel %vm2787_vm5, %v2781_v33, %v2798_v36  ;;  %v7196_v21 = vadd.s32 4294967169, %v2861_v25 }
 0x29e   :  { %vm7191_vm4 = vcmp.lt.s32.totalorder %v7190_v16, 0  ;;  %v2800_v11 = vsel %vm2786_vm3, %v2797_v8, %v2799_v12  ;;  %v10672_v35 = vmul.u32.u64.low %v10650_v10, %v2796_v49  ;;  %v10673_v37 = vmul.u32.u64.high %v10650_v10, %v2796_v49, %v10672_v35 }
 0x29f   :  { %v2720_v29 = vsel %vm7191_vm4, 0, %v7190_v16  ;;  %v10677_v0 = vmul.u32.u64.low %v10650_v10, %v2800_v11  ;;  %v10678_v53 = vmul.u32.u64.high %v10650_v10, %v2800_v11, %v10677_v0  ;;  %v2857_v54 = vand.u32 2147483647, %v14098_v13 }
 0x2a0   :  { %vm10683_vm7 = vcmp.le.f32.partialorder %v2649_v45, 0.7853982  ;;  %v2721_v26 = vsub.s32 32, %v2720_v29  ;;  %v2722_v9 = vshll.u32 %v10643_v40, %v2720_v29  ;;  %v2725_v63 = vsub.s32 4294967266, %v2720_v29 }
 0x2a1   :  { %vm2640_vm8 = vcmp.lt.s32.totalorder %v10641_v61, 2  ;;  %vm2641_vm11 = vcmp.eq.s32.totalorder %v10641_v61, 0  ;;  %v2808_v56 = vmul.u32 %v10650_v10, %v2792_v31  ;;  %v2867_v3 = vadd.s32 1, %v7196_v21 }
 0x2a2   :  { %v2723_v62 = vshrl.u32 %v2705_v48, %v2721_v26  ;;  %v2726_v44 = vadd.s32 127, %v2725_v63  ;;  %v2736_v45 = vsel %vm2651_vm2, %v2735_v1, %v10630_v58  ;;  %v2811_v22 = vadd.s32 1, %v10673_v37 }
 0x2a3   :  { %v7707_v39 = vpop.eup %7706  ;;  %vm2644_vm9 = vcmp.eq.s32.totalorder %v10641_v61, 2  ;;  %vm2810_vm10 = vc.u32 %v10678_v53, %v10672_v35  ;;  %v2864_v40 = vand.u32 8388607, %v2857_v54  ;;  %vm2868_vm12 = vcmp.gt.s32.totalorder %v2867_v3, 0 }
 0x2a4   :  { %v7709_v57 = vpop.eup %7708  ;;  %v2645_v17 = vxor.u32 2147483648, %v7707_v39  ;;  %v2724_v2 = vor.u32 %v2723_v62, %v2722_v9  ;;  %v2727_v48 = vshll.u32 %v2726_v44, 23  ;;  %v2812_v6 = vsel %vm2810_vm10, %v2811_v22, %v10673_v37 }
 0x2a5   :  { %v2642_v10 = vxor.u32 2147483648, %v7709_v57  ;;  %v2738_v58 = vsel %vm10683_vm7, 0, %v2736_v45  ;;  %v2813_v43 = vadd.s32 %v2812_v6, %v2808_v56  ;;  %v2869_v14 = vsel %vm2868_vm12, %v2867_v3, 0  ;;  %v14101_v6 = vld [vmem:[#allocation17_spill] sm:$0xff] }
 0x2a6   :  { %vm2637_vm14 = vweird.f32 %v14089_v42  ;;  %v2646_v47 = vsel %vm2644_vm9, %v2645_v17, %v7709_v57  ;;  %v2728_v30 = vor.u32 4788187, %v2727_v48  ;;  %v2731_v32 = vcvt.s32.f32 %v2724_v2 }
 0x2a7   :  { %v2643_v4 = vsel %vm2641_vm11, %v7707_v39, %v2642_v10  ;;  %v2814_v33 = vadd.s32 536870912, %v2813_v43  ;;  %v2871_v55 = vand.u32 31, %v2869_v14  ;;  %v2742_v25 = vadd.s32 3, %v2738_v58 }
 0x2a8   :  { %v2647_v50 = vsel %vm2640_vm8, %v2643_v4, %v2646_v47  ;;  %v2729_v20 = vand.u32 2147483647, %v2728_v30  ;;  %v2865_v41 = vor.u32 8388608, %v2864_v40  ;;  %v2870_v1 = vshrl.u32 %v2869_v14, 5 }
 0x2a9   :  { %v2648_v7 = vsel %vm2637_vm14, nan, %v2647_v50  ;;  %v10708_v59 = vshrl.u32 %v2814_v33, 30  ;;  %v2872_v5 = vsub.s32 32, %v2871_v55  ;;  %v2874_v51 = vshll.u32 %v14044_v38, %v2871_v55 }
 0x2aa   :  { %v2732_v42 = vmul.f32 %v2731_v32, %v2729_v20  ;;  %v2877_v8 = vshll.u32 %v14038_v18, %v2871_v55  ;;  %7038 = vst [vmem:[#allocation5 + $0xa8] sm:$0xff] %v2648_v7  ;;  %v2880_v61 = vshll.u32 %v14039_v24, %v2871_v55  ;;  %v2883_v15 = vshll.u32 %v14040_v19, %v2871_v55 }
 0x2ab   :  { %v2816_v16 = vshll.u32 %v10708_v59, 30  ;;  %v2875_v28 = vshrl.u32 %v14038_v18, %v2872_v5  ;;  %v2878_v31 = vshrl.u32 %v14039_v24, %v2872_v5  ;;  %v2881_v49 = vshrl.u32 %v14040_v19, %v2872_v5 }
 0x2ac   :  { %v2733_v36 = vxor.u32 2147483648, %v2732_v42  ;;  %v2884_v12 = vshrl.u32 %v14041_v34, %v2872_v5  ;;  %v10719_v21 = vand.u32 3, %v2742_v25  ;;  %vm2889_vm13 = vcmp.lt.s32.totalorder %v2870_v1, 1 }
 0x2ad   :  { %v10721_v11 = vsub.s32 %v2813_v43, %v2816_v16  ;;  %v10723_v37 = vshll.u32 %v2865_v41, 8  ;;  %v2876_v0 = vor.u32 %v2875_v28, %v2874_v51  ;;  %v2879_v26 = vor.u32 %v2878_v31, %v2877_v8 }
 0x2ae   :  { %v2734_v29 = vsel %vm2651_vm2, %v2733_v36, %v2732_v42  ;;  %v2886_v9 = vshll.u32 %v14041_v34, %v2871_v55  ;;  %v2873_v3 = vshrl.u32 %v14044_v38, %v2872_v5  ;;  %v2885_v62 = vor.u32 %v2884_v12, %v2883_v15 }
 0x2af   :  { %v2737_v63 = vsel %vm10683_vm7, %v14092_v23, %v2734_v29  ;;  %v2819_v56 = vsub.s32 0, %v10721_v11  ;;  %v2882_v44 = vor.u32 %v2881_v49, %v2880_v61  ;;  %v2887_v45 = vshrl.u32 %v14042_v60, %v2872_v5 }
 0x2b0   :  { %7710 = vcosq.f32 %v2737_v63  ;;  %vm2892_vm0 = vcmp.lt.s32.totalorder %v2870_v1, 4  ;;  %vm2890_vm1 = vcmp.lt.s32.totalorder %v2870_v1, 2  ;;  %vm2891_vm15 = vcmp.lt.s32.totalorder %v2870_v1, 3 }
 0x2b1   :  { %7712 = vsinq.f32 %v2737_v63  ;;  %v7193_v22 = vmin.u32 %v2819_v56, %v10721_v11  ;;  %v2888_v39 = vor.u32 %v2887_v45, %v2886_v9  ;;  %v2894_v40 = vsel %vm2892_vm0, %v2882_v44, 2102212464 }
 0x2b2   :  { %v2897_v46 = vsel %vm2889_vm13, %v2876_v0, %v2879_v26  ;;  %v2898_v57 = vsel %vm2892_vm0, %v2885_v62, 920167782  ;;  %v2809_v17 = vadd.s32 %v10672_v35, %v10678_v53  ;;  %v2893_v48 = vsel %vm2889_vm13, %v2873_v3, %v2876_v0 }
 0x2b3   :  { %v2821_v2 = vclz %v7193_v22  ;;  %v2964_v10 = vand.u32 2139095040, %v14101_v6  ;;  %v2895_v58 = vsel %vm2891_vm15, %v2879_v26, %v2894_v40  ;;  %v2899_v43 = vsel %vm2891_vm15, %v2882_v44, %v2898_v57 }
 0x2b4   :  { %v2901_v14 = vsel %vm2889_vm13, %v2879_v26, %v2882_v44  ;;  %v2902_v47 = vsel %vm2892_vm0, %v2888_v39, 1326507024  ;;  %vm2741_vm2 = vweird.f32 %v14092_v23  ;;  %v2839_v32 = vsub.s32 4, %v10708_v59 }
 0x2b5   :  { %v7194_v30 = vadd.s32 4294967294, %v2821_v2  ;;  %v2900_v35 = vsel %vm2890_vm1, %v2897_v46, %v2899_v43  ;;  %v2903_v53 = vsel %vm2891_vm15, %v2885_v62, %v2902_v47  ;;  %v2896_v4 = vsel %vm2890_vm1, %v2893_v48, %v2895_v58 }
 0x2b6   :  { %v2904_v33 = vsel %vm2890_vm1, %v2901_v14, %v2903_v53  ;;  %v10753_v55 = vmul.u32.u64.low %v10723_v37, %v2900_v35  ;;  %v10754_v50 = vmul.u32.u64.high %v10723_v37, %v2900_v35, %v10753_v55  ;;  %v2965_v41 = vshrl.u32 %v2964_v10, 23 }
 0x2b7   :  { %vm7195_vm3 = vcmp.lt.s32.totalorder %v7194_v30, 0  ;;  %v10758_v20 = vmul.u32.u64.low %v10723_v37, %v2904_v33  ;;  %v10759_v25 = vmul.u32.u64.high %v10723_v37, %v2904_v33, %v10758_v20  ;;  %vm2744_vm5 = vcmp.lt.s32.totalorder %v10719_v21, 2 }
 0x2b8   :  { %vm10764_vm6 = vcmp.le.f32.partialorder %v2753_v27, 0.7853982  ;;  %vm2755_vm4 = vcmp.lt.s32.totalorder %v14097_v52, 0  ;;  %v2824_v1 = vsel %vm7195_vm3, 0, %v7194_v30  ;;  %v7200_v8 = vadd.s32 4294967169, %v2965_v41 }
 0x2b9   :  { %v2825_v5 = vsub.s32 32, %v2824_v1  ;;  %v2826_v42 = vshll.u32 %v10721_v11, %v2824_v1  ;;  %v2829_v51 = vsub.s32 4294967266, %v2824_v1  ;;  %vm2745_vm7 = vcmp.eq.s32.totalorder %v10719_v21, 0 }
 0x2ba   :  { %v7711_v16 = vpop.eup %7710  ;;  %vm2748_vm8 = vcmp.eq.s32.totalorder %v10719_v21, 2  ;;  %v2912_v28 = vmul.u32 %v10723_v37, %v2896_v4  ;;  %v2915_v27 = vadd.s32 1, %v10754_v50  ;;  %v2840_v49 = vsel %vm2755_vm4, %v2839_v32, %v10708_v59 }
 0x2bb   :  { %v7713_v61 = vpop.eup %7712  ;;  %v2749_v15 = vxor.u32 2147483648, %v7711_v16  ;;  %v2827_v36 = vshrl.u32 %v2809_v17, %v2825_v5  ;;  %v2830_v31 = vadd.s32 127, %v2829_v51  ;;  %vm2914_vm11 = vc.u32 %v10759_v25, %v10753_v55 }
 0x2bc   :  { %v2746_v12 = vxor.u32 2147483648, %v7713_v61  ;;  %v2961_v11 = vand.u32 2147483647, %v14101_v6  ;;  %v2971_v29 = vadd.s32 1, %v7200_v8  ;;  %v2916_v9 = vsel %vm2914_vm11, %v2915_v27, %v10754_v50  ;;  %v14104_v8 = vld [vmem:[#allocation18_spill] sm:$0xff] }
 0x2bd   :  { %v2750_v0 = vsel %vm2748_vm8, %v2749_v15, %v7713_v61  ;;  %v2828_v26 = vor.u32 %v2827_v36, %v2826_v42  ;;  %v2831_v37 = vshll.u32 %v2830_v31, 23  ;;  %v2842_v56 = vsel %vm10764_vm6, 0, %v2840_v49 }
 0x2be   :  { %v2747_v63 = vsel %vm2745_vm7, %v7711_v16, %v2746_v12  ;;  %v2917_v3 = vadd.s32 %v2916_v9, %v2912_v28  ;;  %vm2972_vm9 = vcmp.gt.s32.totalorder %v2971_v29, 0  ;;  %v2846_v57 = vadd.s32 3, %v2842_v56 }
 0x2bf   :  { %v2751_v59 = vsel %vm2744_vm5, %v2747_v63, %v2750_v0  ;;  %v2832_v62 = vor.u32 4788187, %v2831_v37  ;;  %v2835_v44 = vcvt.s32.f32 %v2828_v26  ;;  %v2973_v45 = vsel %vm2972_vm9, %v2971_v29, 0 }
 0x2c0   :  { %v2752_v22 = vsel %vm2741_vm2, nan, %v2751_v59  ;;  %v2918_v39 = vadd.s32 536870912, %v2917_v3  ;;  %v2975_v40 = vand.u32 31, %v2973_v45  ;;  %v2968_v2 = vand.u32 8388607, %v2961_v11 }
 0x2c1   :  { %v2833_v46 = vand.u32 2147483647, %v2832_v62  ;;  %7039 = vst [vmem:[#allocation5 + $0xb0] sm:$0xff] %v2752_v22  ;;  %v10791_v48 = vshrl.u32 %v2973_v45, 5  ;;  %v10802_v50 = vand.u32 3, %v2846_v57  ;;  %vm2859_vm10 = vcmp.lt.s32.totalorder %v14098_v13, 0 }
 0x2c2   :  { %v2919_v17 = vshrl.u32 %v2918_v39, 30  ;;  %v2976_v10 = vsub.s32 32, %v2975_v40  ;;  %v2978_v58 = vshll.u32 %v14044_v38, %v2975_v40  ;;  %v2981_v43 = vshll.u32 %v14038_v18, %v2975_v40 }
 0x2c3   :  { %v2836_v21 = vmul.f32 %v2835_v44, %v2833_v46  ;;  %v2984_v23 = vshll.u32 %v14039_v24, %v2975_v40  ;;  %v2987_v30 = vshll.u32 %v14040_v19, %v2975_v40  ;;  %v2990_v32 = vshll.u32 %v14041_v34, %v2975_v40 }
 0x2c4   :  { %v2920_v14 = vshll.u32 %v2919_v17, 30  ;;  %v2979_v47 = vshrl.u32 %v14038_v18, %v2976_v10  ;;  %v2982_v53 = vshrl.u32 %v14039_v24, %v2976_v10  ;;  %v2985_v4 = vshrl.u32 %v14040_v19, %v2976_v10 }
 0x2c5   :  { %v2837_v35 = vxor.u32 2147483648, %v2836_v21  ;;  %v2988_v33 = vshrl.u32 %v14041_v34, %v2976_v10  ;;  %v2969_v41 = vor.u32 8388608, %v2968_v2  ;;  %v2991_v1 = vshrl.u32 %v14042_v60, %v2976_v10 }
 0x2c6   :  { %v10804_v20 = vsub.s32 %v2917_v3, %v2920_v14  ;;  %v2977_v42 = vshrl.u32 %v14044_v38, %v2976_v10  ;;  %v2980_v51 = vor.u32 %v2979_v47, %v2978_v58  ;;  %v3068_v16 = vand.u32 2139095040, %v14104_v8 }
 0x2c7   :  { %v2838_v5 = vsel %vm2755_vm4, %v2837_v35, %v2836_v21  ;;  %v2983_v61 = vor.u32 %v2982_v53, %v2981_v43  ;;  %v2986_v15 = vor.u32 %v2985_v4, %v2984_v23  ;;  %v2989_v36 = vor.u32 %v2988_v33, %v2987_v30 }
 0x2c8   :  { %v2841_v28 = vsel %vm10764_vm6, %v14097_v52, %v2838_v5  ;;  %v2923_v27 = vsub.s32 0, %v10804_v20  ;;  %v2992_v31 = vor.u32 %v2991_v1, %v2990_v32  ;;  %vm2993_vm12 = vcmp.lt.s32.totalorder %v10791_v48, 1 }
 0x2c9   :  { %7714 = vcosq.f32 %v2841_v28  ;;  %vm10819_vm14 = vcmp.le.f32.partialorder %v2857_v54, 0.7853982  ;;  %v3009_v7 = vshll.u32 %v2969_v41, 8  ;;  %v2943_v29 = vsub.s32 4, %v2919_v17 }
 0x2ca   :  { %7716 = vsinq.f32 %v2841_v28  ;;  %v7197_v12 = vmin.u32 %v2923_v27, %v10804_v20  ;;  %vm2995_vm13 = vcmp.lt.s32.totalorder %v10791_v48, 3  ;;  %vm2996_vm0 = vcmp.lt.s32.totalorder %v10791_v48, 4 }
 0x2cb   :  { %v3069_v0 = vshrl.u32 %v3068_v16, 23  ;;  %vm2994_vm1 = vcmp.lt.s32.totalorder %v10791_v48, 2  ;;  %v3001_v37 = vsel %vm2993_vm12, %v2980_v51, %v2983_v61  ;;  %v3005_v9 = vsel %vm2993_vm12, %v2983_v61, %v2986_v15 }
 0x2cc   :  { %v2925_v26 = vclz %v7197_v12  ;;  %vm2848_vm15 = vcmp.lt.s32.totalorder %v10802_v50, 2  ;;  %v2997_v54 = vsel %vm2993_vm12, %v2977_v42, %v2980_v51  ;;  %v2998_v63 = vsel %vm2996_vm0, %v2986_v15, 2102212464 }
 0x2cd   :  { %v3002_v56 = vsel %vm2996_vm0, %v2989_v36, 920167782  ;;  %v3006_v3 = vsel %vm2996_vm0, %v2992_v31, 1326507024  ;;  %vm2845_vm2 = vweird.f32 %v14097_v52  ;;  %v2999_v62 = vsel %vm2995_vm13, %v2983_v61, %v2998_v63 }
 0x2ce   :  { %v7198_v59 = vadd.s32 4294967294, %v2925_v26  ;;  %v3003_v44 = vsel %vm2995_vm13, %v2986_v15, %v3002_v56  ;;  %v3007_v45 = vsel %vm2995_vm13, %v2989_v36, %v3006_v3  ;;  %v2913_v22 = vadd.s32 %v10753_v55, %v10759_v25 }
 0x2cf   :  { %v3004_v39 = vsel %vm2994_vm1, %v3001_v37, %v3003_v44  ;;  %v3008_v40 = vsel %vm2994_vm1, %v3005_v9, %v3007_v45  ;;  %v7204_v46 = vadd.s32 4294967169, %v3069_v0  ;;  %v2944_v57 = vsel %vm2859_vm10, %v2943_v29, %v2919_v17 }
 0x2d0   :  { %vm7199_vm3 = vcmp.lt.s32.totalorder %v7198_v59, 0  ;;  %v10843_v2 = vmul.u32.u64.low %v3009_v7, %v3008_v40  ;;  %v10844_v10 = vmul.u32.u64.high %v3009_v7, %v3008_v40, %v10843_v2  ;;  %v3000_v58 = vsel %vm2994_vm1, %v2997_v54, %v2999_v62 }
 0x2d1   :  { %v2928_v21 = vsel %vm7199_vm3, 0, %v7198_v59  ;;  %v10848_v43 = vmul.u32.u64.low %v3009_v7, %v3004_v39  ;;  %v10849_v55 = vmul.u32.u64.high %v3009_v7, %v3004_v39, %v10848_v43  ;;  %v3075_v47 = vadd.s32 1, %v7204_v46 }
 0x2d2   :  { %v2929_v25 = vsub.s32 32, %v2928_v21  ;;  %v2930_v23 = vshll.u32 %v10804_v20, %v2928_v21  ;;  %v2933_v14 = vsub.s32 4294967266, %v2928_v21  ;;  %vm2849_vm5 = vcmp.eq.s32.totalorder %v10802_v50, 0 }
 0x2d3   :  { %v7715_v30 = vpop.eup %7714  ;;  %vm2852_vm6 = vcmp.eq.s32.totalorder %v10802_v50, 2  ;;  %v2946_v17 = vsel %vm10819_vm14, 0, %v2944_v57  ;;  %v3065_v48 = vand.u32 2147483647, %v14104_v8  ;;  %v3016_v33 = vmul.u32 %v3009_v7, %v3000_v58 }
 0x2d4   :  { %v7717_v32 = vpop.eup %7716  ;;  %v2853_v35 = vxor.u32 2147483648, %v7715_v30  ;;  %v2931_v53 = vshrl.u32 %v2913_v22, %v2929_v25  ;;  %v2934_v4 = vadd.s32 127, %v2933_v14  ;;  %vm3018_vm4 = vc.u32 %v10844_v10, %v10848_v43 }
 0x2d5   :  { %v2850_v41 = vxor.u32 2147483648, %v7717_v32  ;;  %v3019_v20 = vadd.s32 1, %v10849_v55  ;;  %vm3076_vm7 = vcmp.gt.s32.totalorder %v3075_v47, 0  ;;  %v3072_v27 = vand.u32 8388607, %v3065_v48 }
 0x2d6   :  { %v2854_v1 = vsel %vm2852_vm6, %v2853_v35, %v7717_v32  ;;  %v2932_v5 = vor.u32 %v2931_v53, %v2930_v23  ;;  %v2935_v42 = vshll.u32 %v2934_v4, 23  ;;  %v3077_v51 = vsel %vm3076_vm7, %v3075_v47, 0 }
 0x2d7   :  { %v2851_v16 = vsel %vm2849_vm5, %v7715_v30, %v2850_v41  ;;  %v3020_v28 = vsel %vm3018_vm4, %v3019_v20, %v10849_v55  ;;  %v3079_v61 = vand.u32 31, %v3077_v51  ;;  %v2950_v29 = vadd.s32 3, %v2946_v17  ;;  %v14107_v41 = vld [vmem:[#allocation9_spill] sm:$0xff] }
 0x2d8   :  { %v2855_v15 = vsel %vm2848_vm15, %v2851_v16, %v2854_v1  ;;  %v2936_v36 = vor.u32 4788187, %v2935_v42  ;;  %v2939_v31 = vcvt.s32.f32 %v2932_v5  ;;  %v3021_v12 = vadd.s32 %v3020_v28, %v3016_v33 }
 0x2d9   :  { %v2856_v7 = vsel %vm2845_vm2, nan, %v2855_v15  ;;  %v3080_v0 = vsub.s32 32, %v3079_v61  ;;  %v3082_v26 = vshll.u32 %v14044_v38, %v3079_v61  ;;  %v3085_v54 = vshll.u32 %v14038_v18, %v3079_v61 }
 0x2da   :  { %v2937_v37 = vand.u32 2147483647, %v2936_v36  ;;  %v3022_v9 = vadd.s32 536870912, %v3021_v12  ;;  %v3088_v63 = vshll.u32 %v14039_v24, %v3079_v61  ;;  %7040 = vst [vmem:[#allocation5 + $0xb8] sm:$0xff] %v2856_v7  ;;  %v3091_v52 = vshll.u32 %v14040_v19, %v3079_v61 }
 0x2db   :  { %v3083_v50 = vshrl.u32 %v14038_v18, %v3080_v0  ;;  %v3086_v56 = vshrl.u32 %v14039_v24, %v3080_v0  ;;  %v3089_v3 = vshrl.u32 %v14040_v19, %v3080_v0  ;;  %v3078_v44 = vshrl.u32 %v3077_v51, 5 }
 0x2dc   :  { %v2940_v59 = vmul.f32 %v2939_v31, %v2937_v37  ;;  %v10877_v62 = vshrl.u32 %v3022_v9, 30  ;;  %v3092_v45 = vshrl.u32 %v14041_v34, %v3080_v0  ;;  %v3073_v22 = vor.u32 8388608, %v3072_v27 }
 0x2dd   :  { %v3094_v39 = vshll.u32 %v14041_v34, %v3079_v61  ;;  %v3095_v40 = vshrl.u32 %v14042_v60, %v3080_v0  ;;  %v10882_v57 = vand.u32 3, %v2950_v29  ;;  %v3081_v21 = vshrl.u32 %v14044_v38, %v3080_v0 }
 0x2de   :  { %v2941_v46 = vxor.u32 2147483648, %v2940_v59  ;;  %v3024_v2 = vshll.u32 %v10877_v62, 30  ;;  %v3084_v58 = vor.u32 %v3083_v50, %v3082_v26  ;;  %v3087_v55 = vor.u32 %v3086_v56, %v3085_v54 }
 0x2df   :  { %v3090_v25 = vor.u32 %v3089_v3, %v3088_v63  ;;  %v3093_v23 = vor.u32 %v3092_v45, %v3091_v52  ;;  %vm3097_vm8 = vcmp.lt.s32.totalorder %v3078_v44, 1  ;;  %vm3100_vm11 = vcmp.lt.s32.totalorder %v3078_v44, 4 }
 0x2e0   :  { %v2942_v14 = vsel %vm2859_vm10, %v2941_v46, %v2940_v59  ;;  %v10888_v47 = vsub.s32 %v3021_v12, %v3024_v2  ;;  %v3096_v17 = vor.u32 %v3095_v40, %v3094_v39  ;;  %vm3099_vm9 = vcmp.lt.s32.totalorder %v3078_v44, 3 }
 0x2e1   :  { %v2945_v30 = vsel %vm10819_vm14, %v14098_v13, %v2942_v14  ;;  %v3113_v32 = vshll.u32 %v3073_v22, 8  ;;  %vm3098_vm12 = vcmp.lt.s32.totalorder %v3078_v44, 2  ;;  %v3102_v53 = vsel %vm3100_vm11, %v3090_v25, 2102212464 }
 0x2e2   :  { %7718 = vcosq.f32 %v2945_v30  ;;  %v3027_v35 = vsub.s32 0, %v10888_v47  ;;  %v3105_v4 = vsel %vm3097_vm8, %v3084_v58, %v3087_v55  ;;  %v3106_v33 = vsel %vm3100_vm11, %v3093_v23, 920167782 }
 0x2e3   :  { %7720 = vsinq.f32 %v2945_v30  ;;  %v3172_v20 = vand.u32 2139095040, %v14107_v41  ;;  %v3101_v49 = vsel %vm3097_vm8, %v3081_v21, %v3084_v58  ;;  %v3107_v5 = vsel %vm3099_vm9, %v3090_v25, %v3106_v33 }
 0x2e4   :  { %v7201_v1 = vmin.u32 %v3027_v35, %v10888_v47  ;;  %v3103_v42 = vsel %vm3099_vm9, %v3087_v55, %v3102_v53  ;;  %v3108_v51 = vsel %vm3098_vm12, %v3105_v4, %v3107_v5  ;;  %v3109_v16 = vsel %vm3097_vm8, %v3087_v55, %v3090_v25  ;;  %v14110_v5 = vld [vmem:[#allocation8_spill] sm:$0xff] }
 0x2e5   :  { %v3110_v28 = vsel %vm3100_vm11, %v3096_v17, 1326507024  ;;  %vm2952_vm10 = vcmp.lt.s32.totalorder %v10882_v57, 2  ;;  %vm2963_vm14 = vcmp.lt.s32.totalorder %v14101_v6, 0  ;;  %v3173_v31 = vshrl.u32 %v3172_v20, 23 }
 0x2e6   :  { %v3029_v27 = vclz %v7201_v1  ;;  %v3111_v61 = vsel %vm3099_vm9, %v3093_v23, %v3110_v28  ;;  %v10908_v15 = vmul.u32.u64.low %v3113_v32, %v3108_v51  ;;  %v10909_v36 = vmul.u32.u64.high %v3113_v32, %v3108_v51, %v10908_v15 }
 0x2e7   :  { %v3047_v7 = vsub.s32 4, %v10877_v62  ;;  %v3104_v29 = vsel %vm3098_vm12, %v3101_v49, %v3103_v42  ;;  %v3112_v0 = vsel %vm3098_vm12, %v3109_v16, %v3111_v61  ;;  %v3169_v9 = vand.u32 2147483647, %v14107_v41 }
 0x2e8   :  { %v7202_v12 = vadd.s32 4294967294, %v3029_v27  ;;  %v10915_v26 = vmul.u32.u64.low %v3113_v32, %v3112_v0  ;;  %v10916_v37 = vmul.u32.u64.high %v3113_v32, %v3112_v0, %v10915_v26  ;;  %v7208_v54 = vadd.s32 4294967169, %v3173_v31 }
 0x2e9   :  { %vm2953_vm13 = vcmp.eq.s32.totalorder %v10882_v57, 0  ;;  %vm2956_vm0 = vcmp.eq.s32.totalorder %v10882_v57, 2  ;;  %v3017_v63 = vadd.s32 %v10848_v43, %v10844_v10  ;;  %v3120_v56 = vmul.u32 %v3113_v32, %v3104_v29 }
 0x2ea   :  { %vm7203_vm1 = vcmp.lt.s32.totalorder %v7202_v12, 0  ;;  %v3123_v3 = vadd.s32 1, %v10909_v36  ;;  %v3179_v52 = vadd.s32 1, %v7208_v54  ;;  %v3048_v39 = vsel %vm2963_vm14, %v3047_v7, %v10877_v62 }
 0x2eb   :  { %v3032_v50 = vsel %vm7203_vm1, 0, %v7202_v12  ;;  %vm3122_vm15 = vc.u32 %v10916_v37, %v10908_v15  ;;  %v3176_v10 = vand.u32 8388607, %v3169_v9  ;;  %vm2949_vm3 = vweird.f32 %v14098_v13 }
 0x2ec   :  { %v7719_v59 = vpop.eup %7718  ;;  %v3033_v44 = vsub.s32 32, %v3032_v50  ;;  %v3034_v45 = vshll.u32 %v10888_v47, %v3032_v50  ;;  %v3037_v22 = vsub.s32 4294967266, %v3032_v50  ;;  %vm3180_vm2 = vcmp.gt.s32.totalorder %v3179_v52, 0 }
 0x2ed   :  { %v7721_v40 = vpop.eup %7720  ;;  %v2957_v46 = vxor.u32 2147483648, %v7719_v59  ;;  %v3124_v58 = vsel %vm3122_vm15, %v3123_v3, %v10909_v36  ;;  %v3181_v25 = vsel %vm3180_vm2, %v3179_v52, 0  ;;  %vm10940_vm5 = vcmp.le.f32.partialorder %v2961_v11, 0.7853982 }
 0x2ee   :  { %v2954_v43 = vxor.u32 2147483648, %v7721_v40  ;;  %v3035_v2 = vshrl.u32 %v3017_v63, %v3033_v44  ;;  %v3038_v21 = vadd.s32 127, %v3037_v22  ;;  %v3125_v62 = vadd.s32 %v3124_v58, %v3120_v56 }
 0x2ef   :  { %v2958_v55 = vsel %vm2956_vm0, %v2957_v46, %v7721_v40  ;;  %v3050_v13 = vsel %vm10940_vm5, 0, %v3048_v39  ;;  %v3183_v35 = vand.u32 31, %v3181_v25  ;;  %v3177_v20 = vor.u32 8388608, %v3176_v10 }
 0x2f0   :  { %v2955_v23 = vsel %vm2953_vm13, %v7719_v59, %v2954_v43  ;;  %v3036_v47 = vor.u32 %v3035_v2, %v3034_v45  ;;  %v3039_v30 = vshll.u32 %v3038_v21, 23  ;;  %v3126_v32 = vadd.s32 536870912, %v3125_v62 }
 0x2f1   :  { %v2959_v17 = vsel %vm2952_vm10, %v2955_v23, %v2958_v55  ;;  %v3182_v11 = vshrl.u32 %v3181_v25, 5  ;;  %v3184_v49 = vsub.s32 32, %v3183_v35  ;;  %v3276_v42 = vand.u32 2139095040, %v14110_v5 }
 0x2f2   :  { %v2960_v53 = vsel %vm2949_vm3, nan, %v2959_v17  ;;  %v3040_v4 = vor.u32 4788187, %v3039_v30  ;;  %v3043_v33 = vcvt.s32.f32 %v3036_v47  ;;  %v10948_v1 = vshrl.u32 %v3126_v32, 30 }
 0x2f3   :  { %7041 = vst [vmem:[#allocation5 + $0xc0] sm:$0xff] %v2960_v53  ;;  %v3186_v57 = vshll.u32 %v14044_v38, %v3183_v35  ;;  %v3189_v16 = vshll.u32 %v14038_v18, %v3183_v35  ;;  %v3192_v28 = vshll.u32 %v14039_v24, %v3183_v35  ;;  %v3187_v61 = vshrl.u32 %v14038_v18, %v3184_v49 }
 0x2f4   :  { %v3041_v51 = vand.u32 2147483647, %v3040_v4  ;;  %v3128_v27 = vshll.u32 %v10948_v1, 30  ;;  %v3195_v36 = vshll.u32 %v14040_v19, %v3183_v35  ;;  %v3198_v31 = vshll.u32 %v14041_v34, %v3183_v35 }
 0x2f5   :  { %v3190_v7 = vshrl.u32 %v14039_v24, %v3184_v49  ;;  %v3193_v29 = vshrl.u32 %v14040_v19, %v3184_v49  ;;  %v3196_v0 = vshrl.u32 %v14041_v34, %v3184_v49  ;;  %v3054_v26 = vadd.s32 3, %v3050_v13 }
 0x2f6   :  { %v3044_v12 = vmul.f32 %v3043_v33, %v3041_v51  ;;  %v10961_v54 = vsub.s32 %v3125_v62, %v3128_v27  ;;  %v3199_v63 = vshrl.u32 %v14042_v60, %v3184_v49  ;;  %v10964_v50 = vshll.u32 %v3177_v20, 8 }
 0x2f7   :  { %v3188_v3 = vor.u32 %v3187_v61, %v3186_v57  ;;  %v3191_v52 = vor.u32 %v3190_v7, %v3189_v16  ;;  %v3277_v59 = vshrl.u32 %v3276_v42, 23  ;;  %v3185_v45 = vshrl.u32 %v14044_v38, %v3184_v49 }
 0x2f8   :  { %v3045_v56 = vxor.u32 2147483648, %v3044_v12  ;;  %v3131_v44 = vsub.s32 0, %v10961_v54  ;;  %v3197_v22 = vor.u32 %v3196_v0, %v3195_v36  ;;  %vm3201_vm6 = vcmp.lt.s32.totalorder %v3182_v11, 1 }
 0x2f9   :  { %v3194_v40 = vor.u32 %v3193_v29, %v3192_v28  ;;  %v3200_v46 = vor.u32 %v3199_v63, %v3198_v31  ;;  %vm3204_vm4 = vcmp.lt.s32.totalorder %v3182_v11, 4  ;;  %vm3202_vm7 = vcmp.lt.s32.totalorder %v3182_v11, 2 }
 0x2fa   :  { %v3046_v39 = vsel %vm2963_vm14, %v3045_v56, %v3044_v12  ;;  %v7205_v43 = vmin.u32 %v3131_v44, %v10961_v54  ;;  %vm3203_vm8 = vcmp.lt.s32.totalorder %v3182_v11, 3  ;;  %vm3067_vm11 = vcmp.lt.s32.totalorder %v14104_v8, 0 }
 0x2fb   :  { %v3049_v10 = vsel %vm10940_vm5, %v14101_v6, %v3046_v39  ;;  %v3206_v2 = vsel %vm3204_vm4, %v3194_v40, 2102212464  ;;  %v3209_v21 = vsel %vm3201_vm6, %v3188_v3, %v3191_v52  ;;  %v3210_v58 = vsel %vm3204_vm4, %v3197_v22, 920167782 }
 0x2fc   :  { %7722 = vcosq.f32 %v3049_v10  ;;  %v3133_v55 = vclz %v7205_v43  ;;  %v3273_v62 = vand.u32 2147483647, %v14110_v5  ;;  %v7212_v25 = vadd.s32 4294967169, %v3277_v59 }
 0x2fd   :  { %7724 = vsinq.f32 %v3049_v10  ;;  %v3205_v23 = vsel %vm3201_vm6, %v3185_v45, %v3188_v3  ;;  %v3207_v14 = vsel %vm3203_vm8, %v3191_v52, %v3206_v2  ;;  %v3211_v47 = vsel %vm3203_vm8, %v3194_v40, %v3210_v58 }
 0x2fe   :  { %v3213_v30 = vsel %vm3201_vm6, %v3191_v52, %v3194_v40  ;;  %vm10985_vm9 = vcmp.le.f32.partialorder %v3065_v48, 0.7853982  ;;  %v3121_v13 = vadd.s32 %v10908_v15, %v10916_v37  ;;  %v7206_v32 = vadd.s32 4294967294, %v3133_v55 }
 0x2ff   :  { %v3212_v35 = vsel %vm3202_vm7, %v3209_v21, %v3211_v47  ;;  %v3214_v53 = vsel %vm3204_vm4, %v3200_v46, 1326507024  ;;  %v3151_v4 = vsub.s32 4, %v10948_v1  ;;  %vm3053_vm12 = vweird.f32 %v14101_v6 }
 0x300   :  { %v3215_v33 = vsel %vm3203_vm8, %v3197_v22, %v3214_v53  ;;  %v10996_v20 = vmul.u32.u64.low %v10964_v50, %v3212_v35  ;;  %v10997_v49 = vmul.u32.u64.high %v10964_v50, %v3212_v35, %v10996_v20  ;;  %vm7207_vm10 = vcmp.lt.s32.totalorder %v7206_v32, 0 }
 0x301   :  { %v3208_v48 = vsel %vm3202_vm7, %v3205_v23, %v3207_v14  ;;  %v3216_v15 = vsel %vm3202_vm7, %v3213_v30, %v3215_v33  ;;  %v3283_v37 = vadd.s32 1, %v7212_v25  ;;  %v3055_v42 = vand.u32 3, %v3054_v26 }
 0x302   :  { %v3136_v51 = vsel %vm7207_vm10, 0, %v7206_v32  ;;  %v11004_v57 = vmul.u32.u64.low %v10964_v50, %v3216_v15  ;;  %v11005_v16 = vmul.u32.u64.high %v10964_v50, %v3216_v15, %v11004_v57  ;;  %v3224_v36 = vmul.u32 %v10964_v50, %v3208_v48 }
 0x303   :  { %v3137_v28 = vsub.s32 32, %v3136_v51  ;;  %v3138_v27 = vshll.u32 %v10961_v54, %v3136_v51  ;;  %v3141_v61 = vsub.s32 4294967266, %v3136_v51  ;;  %vm3284_vm14 = vcmp.gt.s32.totalorder %v3283_v37, 0 }
 0x304   :  { %v3227_v31 = vadd.s32 1, %v10997_v49  ;;  %v3280_v11 = vand.u32 8388607, %v3273_v62  ;;  %v3285_v12 = vsel %vm3284_vm14, %v3283_v37, 0  ;;  %v3152_v0 = vsel %vm3067_vm11, %v3151_v4, %v10948_v1 }
 0x305   :  { %v3139_v7 = vshrl.u32 %v3121_v13, %v3137_v28  ;;  %v3142_v29 = vadd.s32 127, %v3141_v61  ;;  %v3287_v26 = vand.u32 31, %v3285_v12  ;;  %vm3056_vm13 = vcmp.lt.s32.totalorder %v3055_v42, 2 }
 0x306   :  { %v7723_v63 = vpop.eup %7722  ;;  %vm3057_vm0 = vcmp.eq.s32.totalorder %v3055_v42, 0  ;;  %vm3060_vm1 = vcmp.eq.s32.totalorder %v3055_v42, 2  ;;  %vm3226_vm15 = vc.u32 %v11005_v16, %v10996_v20  ;;  %v3154_v44 = vsel %vm10985_vm9, 0, %v3152_v0 }
 0x307   :  { %v7725_v54 = vpop.eup %7724  ;;  %v3061_v50 = vxor.u32 2147483648, %v7723_v63  ;;  %v3140_v56 = vor.u32 %v3139_v7, %v3138_v27  ;;  %v3143_v3 = vshll.u32 %v3142_v29, 23  ;;  %v3228_v52 = vsel %vm3226_vm15, %v3227_v31, %v10997_v49 }
 0x308   :  { %v3058_v59 = vxor.u32 2147483648, %v7725_v54  ;;  %v3229_v45 = vadd.s32 %v3228_v52, %v3224_v36  ;;  %v3288_v1 = vsub.s32 32, %v3287_v26  ;;  %v3281_v46 = vor.u32 8388608, %v3280_v11 }
 0x309   :  { %v3062_v22 = vsel %vm3060_vm1, %v3061_v50, %v7725_v54  ;;  %v3144_v39 = vor.u32 4788187, %v3143_v3  ;;  %v3147_v40 = vcvt.s32.f32 %v3140_v56  ;;  %v3290_v2 = vshll.u32 %v14044_v38, %v3287_v26 }
 0x30a   :  { %v3059_v10 = vsel %vm3057_vm0, %v7723_v63, %v3058_v59  ;;  %v3230_v43 = vadd.s32 536870912, %v3229_v45  ;;  %v3293_v21 = vshll.u32 %v14038_v18, %v3287_v26  ;;  %v3291_v25 = vshrl.u32 %v14038_v18, %v3288_v1 }
 0x30b   :  { %v3063_v58 = vsel %vm3056_vm13, %v3059_v10, %v3062_v22  ;;  %v3145_v55 = vand.u32 2147483647, %v3144_v39  ;;  %v3294_v23 = vshrl.u32 %v14039_v24, %v3288_v1  ;;  %v3296_v30 = vshll.u32 %v14039_v24, %v3287_v26  ;;  %v14115_v39 = vld [vmem:[#allocation28_spill] sm:$0xff] }
 0x30c   :  { %v3064_v14 = vsel %vm3053_vm12, nan, %v3063_v58  ;;  %v3231_v47 = vshrl.u32 %v3230_v43, 30  ;;  %v3297_v13 = vshrl.u32 %v14040_v19, %v3288_v1  ;;  %v3286_v35 = vshrl.u32 %v3285_v12, 5 }
 0x30d   :  { %v3148_v32 = vmul.f32 %v3147_v40, %v3145_v55  ;;  %v3299_v53 = vshll.u32 %v14040_v19, %v3287_v26  ;;  %v3300_v4 = vshrl.u32 %v14041_v34, %v3288_v1  ;;  %7042 = vst [vmem:[#allocation5 + $0xc8] sm:$0xff] %v3064_v14  ;;  %v3158_v33 = vadd.s32 3, %v3154_v44 }
 0x30e   :  { %v3232_v49 = vshll.u32 %v3231_v47, 30  ;;  %v3302_v48 = vshll.u32 %v14041_v34, %v3287_v26  ;;  %v11033_v15 = vshll.u32 %v3281_v46, 8  ;;  %v3289_v37 = vshrl.u32 %v14044_v38, %v3288_v1 }
 0x30f   :  { %v3149_v6 = vxor.u32 2147483648, %v3148_v32  ;;  %v3301_v42 = vor.u32 %v3300_v4, %v3299_v53  ;;  %v3303_v51 = vshrl.u32 %v14042_v60, %v3288_v1  ;;  %v3292_v28 = vor.u32 %v3291_v25, %v3290_v2 }
 0x310   :  { %v11037_v57 = vsub.s32 %v3229_v45, %v3232_v49  ;;  %v3295_v27 = vor.u32 %v3294_v23, %v3293_v21  ;;  %v3298_v61 = vor.u32 %v3297_v13, %v3296_v30  ;;  %vm3305_vm2 = vcmp.lt.s32.totalorder %v3286_v35, 1 }
 0x311   :  { %v3150_v36 = vsel %vm3067_vm11, %v3149_v6, %v3148_v32  ;;  %v3304_v31 = vor.u32 %v3303_v51, %v3302_v48  ;;  %vm3308_vm3 = vcmp.lt.s32.totalorder %v3286_v35, 4  ;;  %vm3306_vm5 = vcmp.lt.s32.totalorder %v3286_v35, 2 }
 0x312   :  { %v3153_v11 = vsel %vm10985_vm9, %v14104_v8, %v3150_v36  ;;  %v3235_v12 = vsub.s32 0, %v11037_v57  ;;  %vm3307_vm6 = vcmp.lt.s32.totalorder %v3286_v35, 3  ;;  %v3309_v7 = vsel %vm3305_vm2, %v3289_v37, %v3292_v28 }
 0x313   :  { %7726 = vcosq.f32 %v3153_v11  ;;  %v3310_v29 = vsel %vm3308_vm3, %v3298_v61, 2102212464  ;;  %v3314_v0 = vsel %vm3308_vm3, %v3301_v42, 920167782  ;;  %v3313_v54 = vsel %vm3305_vm2, %v3292_v28, %v3295_v27 }
 0x314   :  { %7728 = vsinq.f32 %v3153_v11  ;;  %v7209_v26 = vmin.u32 %v3235_v12, %v11037_v57  ;;  %v3311_v63 = vsel %vm3307_vm6, %v3295_v27, %v3310_v29  ;;  %v3159_v17 = vand.u32 3, %v3158_v33 }
 0x315   :  { %v3315_v50 = vsel %vm3307_vm6, %v3298_v61, %v3314_v0  ;;  %v3317_v56 = vsel %vm3305_vm2, %v3295_v27, %v3298_v61  ;;  %v3318_v3 = vsel %vm3308_vm3, %v3304_v31, 1326507024  ;;  %vm11056_vm4 = vcmp.le.f32.partialorder %v3169_v9, 0.7853982 }
 0x316   :  { %vm3171_vm7 = vcmp.lt.s32.totalorder %v14107_v41, 0  ;;  %v3237_v59 = vclz %v7209_v26  ;;  %v3255_v44 = vsub.s32 4, %v3231_v47  ;;  %v3312_v45 = vsel %vm3306_vm5, %v3309_v7, %v3311_v63 }
 0x317   :  { %v3316_v1 = vsel %vm3306_vm5, %v3313_v54, %v3315_v50  ;;  %v3319_v22 = vsel %vm3307_vm6, %v3301_v42, %v3318_v3  ;;  %v3380_v40 = vand.u32 2139095040, %v14115_v39  ;;  %vm3157_vm8 = vweird.f32 %v14104_v8 }
 0x318   :  { %v7210_v46 = vadd.s32 4294967294, %v3237_v59  ;;  %v3320_v9 = vsel %vm3306_vm5, %v3317_v56, %v3319_v22  ;;  %v11068_v10 = vmul.u32.u64.low %v11033_v15, %v3316_v1  ;;  %v11069_v43 = vmul.u32.u64.high %v11033_v15, %v3316_v1, %v11068_v10 }
 0x319   :  { %vm3160_vm11 = vcmp.lt.s32.totalorder %v3159_v17, 2  ;;  %v11073_v2 = vmul.u32.u64.low %v11033_v15, %v3320_v9  ;;  %v11074_v21 = vmul.u32.u64.high %v11033_v15, %v3320_v9, %v11073_v2  ;;  %v3381_v58 = vshrl.u32 %v3380_v40, 23 }
 0x31a   :  { %vm3161_vm9 = vcmp.eq.s32.totalorder %v3159_v17, 0  ;;  %v3225_v55 = vadd.s32 %v10996_v20, %v11005_v16  ;;  %vm7211_vm12 = vcmp.lt.s32.totalorder %v7210_v46, 0  ;;  %v3256_v25 = vsel %vm3171_vm7, %v3255_v44, %v3231_v47 }
 0x31b   :  { %v3240_v23 = vsel %vm7211_vm12, 0, %v7210_v46  ;;  %v3328_v14 = vmul.u32 %v11033_v15, %v3312_v45  ;;  %v3377_v30 = vand.u32 2147483647, %v14115_v39  ;;  %v7216_v13 = vadd.s32 4294967169, %v3381_v58 }
 0x31c   :  { %v3241_v32 = vsub.s32 32, %v3240_v23  ;;  %v3242_v35 = vshll.u32 %v11037_v57, %v3240_v23  ;;  %v3245_v53 = vsub.s32 4294967266, %v3240_v23  ;;  %v3331_v4 = vadd.s32 1, %v11069_v43 }
 0x31d   :  { %v7727_v33 = vpop.eup %7726  ;;  %vm3164_vm10 = vcmp.eq.s32.totalorder %v3159_v17, 2  ;;  %v3258_v20 = vsel %vm11056_vm4, 0, %v3256_v25  ;;  %vm3330_vm14 = vc.u32 %v11074_v21, %v11068_v10  ;;  %v3387_v16 = vadd.s32 1, %v7216_v13 }
 0x31e   :  { %v7729_v47 = vpop.eup %7728  ;;  %v3165_v49 = vxor.u32 2147483648, %v7727_v33  ;;  %v3243_v48 = vshrl.u32 %v3225_v55, %v3241_v32  ;;  %v3246_v15 = vadd.s32 127, %v3245_v53  ;;  %v3332_v6 = vsel %vm3330_vm14, %v3331_v4, %v11069_v43  ;;  %v14116_v55 = vld [vmem:[#allocation29_spill] sm:$0xff] }
 0x31f   :  { %v3162_v37 = vxor.u32 2147483648, %v7729_v47  ;;  %v3333_v42 = vadd.s32 %v3332_v6, %v3328_v14  ;;  %v3384_v51 = vand.u32 8388607, %v3377_v30  ;;  %vm3388_vm13 = vcmp.gt.s32.totalorder %v3387_v16, 0 }
 0x320   :  { %v3166_v57 = vsel %vm3164_vm10, %v3165_v49, %v7729_v47  ;;  %v3244_v28 = vor.u32 %v3243_v48, %v3242_v35  ;;  %v3247_v27 = vshll.u32 %v3246_v15, 23  ;;  %v3389_v61 = vsel %vm3388_vm13, %v3387_v16, 0 }
 0x321   :  { %v3163_v36 = vsel %vm3161_vm9, %v7727_v33, %v3162_v37  ;;  %v3334_v31 = vadd.s32 536870912, %v3333_v42  ;;  %v3391_v11 = vand.u32 31, %v3389_v61  ;;  %v3262_v0 = vadd.s32 3, %v3258_v20 }
 0x322   :  { %v3167_v12 = vsel %vm3160_vm11, %v3163_v36, %v3166_v57  ;;  %v3248_v7 = vor.u32 4788187, %v3247_v27  ;;  %v3251_v29 = vcvt.s32.f32 %v3244_v28  ;;  %v3385_v54 = vor.u32 8388608, %v3384_v51 }
 0x323   :  { %v3168_v26 = vsel %vm3157_vm8, nan, %v3167_v12  ;;  %v11095_v63 = vshrl.u32 %v3334_v31, 30  ;;  %v3392_v50 = vsub.s32 32, %v3391_v11  ;;  %v3390_v3 = vshrl.u32 %v3389_v61, 5 }
 0x324   :  { %v3249_v56 = vand.u32 2147483647, %v3248_v7  ;;  %v3394_v59 = vshll.u32 %v14044_v38, %v3391_v11  ;;  %v3397_v44 = vshll.u32 %v14038_v18, %v3391_v11  ;;  %7043 = vst [vmem:[#allocation5 + $0xd0] sm:$0xff] %v3168_v26  ;;  %v3400_v1 = vshll.u32 %v14039_v24, %v3391_v11 }
 0x325   :  { %v3336_v17 = vshll.u32 %v11095_v63, 30  ;;  %v3395_v45 = vshrl.u32 %v14038_v18, %v3392_v50  ;;  %v3403_v8 = vshll.u32 %v14040_v19, %v3391_v11  ;;  %v3398_v40 = vshrl.u32 %v14039_v24, %v3392_v50 }
 0x326   :  { %v3252_v22 = vmul.f32 %v3251_v29, %v3249_v56  ;;  %v3401_v46 = vshrl.u32 %v14040_v19, %v3392_v50  ;;  %v3404_v9 = vshrl.u32 %v14041_v34, %v3392_v50  ;;  %v11106_v43 = vand.u32 3, %v3262_v0 }
 0x327   :  { %v11108_v2 = vsub.s32 %v3333_v42, %v3336_v17  ;;  %v3406_v58 = vshll.u32 %v14041_v34, %v3391_v11  ;;  %v3484_v25 = vand.u32 2139095040, %v14116_v55  ;;  %v3329_v14 = vadd.s32 %v11068_v10, %v11074_v21 }
 0x328   :  { %v3253_v23 = vxor.u32 2147483648, %v3252_v22  ;;  %v3393_v13 = vshrl.u32 %v14044_v38, %v3392_v50  ;;  %v11115_v32 = vshll.u32 %v3385_v54, 8  ;;  %v3396_v53 = vor.u32 %v3395_v45, %v3394_v59 }
 0x329   :  { %v3339_v35 = vsub.s32 0, %v11108_v2  ;;  %v3399_v4 = vor.u32 %v3398_v40, %v3397_v44  ;;  %v3407_v33 = vshrl.u32 %v14042_v60, %v3392_v50  ;;  %v3402_v16 = vor.u32 %v3401_v46, %v3400_v1 }
 0x32a   :  { %v3254_v20 = vsel %vm3171_vm7, %v3253_v23, %v3252_v22  ;;  %v3405_v47 = vor.u32 %v3404_v9, %v3403_v8  ;;  %vm3409_vm0 = vcmp.lt.s32.totalorder %v3390_v3, 1  ;;  %v3485_v48 = vshrl.u32 %v3484_v25, 23 }
 0x32b   :  { %v3257_v10 = vsel %vm11056_vm4, %v14107_v41, %v3254_v20  ;;  %v7213_v21 = vmin.u32 %v3339_v35, %v11108_v2  ;;  %v3408_v49 = vor.u32 %v3407_v33, %v3406_v58  ;;  %vm3275_vm1 = vcmp.lt.s32.totalorder %v14110_v5, 0 }
 0x32c   :  { %7730 = vcosq.f32 %v3257_v10  ;;  %vm3410_vm15 = vcmp.lt.s32.totalorder %v3390_v3, 2  ;;  %vm3411_vm2 = vcmp.lt.s32.totalorder %v3390_v3, 3  ;;  %vm3412_vm3 = vcmp.lt.s32.totalorder %v3390_v3, 4 }
 0x32d   :  { %7732 = vsinq.f32 %v3257_v10  ;;  %v3341_v15 = vclz %v7213_v21  ;;  %v3413_v6 = vsel %vm3409_vm0, %v3393_v13, %v3396_v53  ;;  %v3417_v37 = vsel %vm3409_vm0, %v3396_v53, %v3399_v4 }
 0x32e   :  { %v3359_v42 = vsub.s32 4, %v11095_v63  ;;  %v3414_v52 = vsel %vm3412_vm3, %v3402_v16, 2102212464  ;;  %v3418_v51 = vsel %vm3412_vm3, %v3405_v47, 920167782  ;;  %v3421_v57 = vsel %vm3409_vm0, %v3399_v4, %v3402_v16 }
 0x32f   :  { %v7214_v28 = vadd.s32 4294967294, %v3341_v15  ;;  %v3415_v27 = vsel %vm3411_vm2, %v3399_v4, %v3414_v52  ;;  %v3419_v61 = vsel %vm3411_vm2, %v3402_v16, %v3418_v51  ;;  %v3422_v36 = vsel %vm3412_vm3, %v3408_v49, 1326507024 }
 0x330   :  { %v3416_v31 = vsel %vm3410_vm15, %v3413_v6, %v3415_v27  ;;  %v3420_v11 = vsel %vm3410_vm15, %v3417_v37, %v3419_v61  ;;  %v3423_v12 = vsel %vm3411_vm2, %v3405_v47, %v3422_v36  ;;  %v7220_v7 = vadd.s32 4294967169, %v3485_v48 }
 0x331   :  { %vm7215_vm5 = vcmp.lt.s32.totalorder %v7214_v28, 0  ;;  %v3424_v29 = vsel %vm3410_vm15, %v3421_v57, %v3423_v12  ;;  %v11137_v0 = vmul.u32.u64.low %v11115_v32, %v3420_v11  ;;  %v11138_v26 = vmul.u32.u64.high %v11115_v32, %v3420_v11, %v11137_v0 }
 0x332   :  { %v3344_v54 = vsel %vm7215_vm5, 0, %v7214_v28  ;;  %v11142_v50 = vmul.u32.u64.low %v11115_v32, %v3424_v29  ;;  %v11143_v56 = vmul.u32.u64.high %v11115_v32, %v3424_v29, %v11142_v50  ;;  %v3481_v59 = vand.u32 2147483647, %v14116_v55 }
 0x333   :  { %vm11148_vm6 = vcmp.le.f32.partialorder %v3273_v62, 0.7853982  ;;  %v3345_v3 = vsub.s32 32, %v3344_v54  ;;  %v3346_v17 = vshll.u32 %v11108_v2, %v3344_v54  ;;  %v3349_v45 = vsub.s32 4294967266, %v3344_v54 }
 0x334   :  { %vm3264_vm4 = vcmp.lt.s32.totalorder %v11106_v43, 2  ;;  %vm3265_vm7 = vcmp.eq.s32.totalorder %v11106_v43, 0  ;;  %v3432_v1 = vmul.u32 %v11115_v32, %v3416_v31  ;;  %v3491_v8 = vadd.s32 1, %v7220_v7 }
 0x335   :  { %v3347_v22 = vshrl.u32 %v3329_v14, %v3345_v3  ;;  %v3350_v40 = vadd.s32 127, %v3349_v45  ;;  %v3360_v62 = vsel %vm3275_vm1, %v3359_v42, %v11095_v63  ;;  %v3435_v46 = vadd.s32 1, %v11138_v26 }
 0x336   :  { %v7731_v9 = vpop.eup %7730  ;;  %vm3268_vm8 = vcmp.eq.s32.totalorder %v11106_v43, 2  ;;  %vm3434_vm11 = vc.u32 %v11143_v56, %v11137_v0  ;;  %v3488_v2 = vand.u32 8388607, %v3481_v59  ;;  %vm3492_vm9 = vcmp.gt.s32.totalorder %v3491_v8, 0 }
 0x337   :  { %v7733_v58 = vpop.eup %7732  ;;  %v3269_v25 = vxor.u32 2147483648, %v7731_v9  ;;  %v3348_v23 = vor.u32 %v3347_v22, %v3346_v17  ;;  %v3351_v14 = vshll.u32 %v3350_v40, 23  ;;  %v3436_v13 = vsel %vm3434_vm11, %v3435_v46, %v11138_v26 }
 0x338   :  { %v3266_v32 = vxor.u32 2147483648, %v7733_v58  ;;  %v3362_v63 = vsel %vm11148_vm6, 0, %v3360_v62  ;;  %v3437_v35 = vadd.s32 %v3436_v13, %v3432_v1  ;;  %v3493_v53 = vsel %vm3492_vm9, %v3491_v8, 0  ;;  %v14119_v13 = vld [vmem:[#allocation30_spill] sm:$0xff] }
 0x339   :  { %vm3261_vm12 = vweird.f32 %v14107_v41  ;;  %v3270_v4 = vsel %vm3268_vm8, %v3269_v25, %v7733_v58  ;;  %v3352_v33 = vor.u32 4788187, %v3351_v14  ;;  %v3355_v20 = vcvt.s32.f32 %v3348_v23 }
 0x33a   :  { %v3267_v16 = vsel %vm3265_vm7, %v7731_v9, %v3266_v32  ;;  %v3438_v47 = vadd.s32 536870912, %v3437_v35  ;;  %v3495_v10 = vand.u32 31, %v3493_v53  ;;  %v3366_v48 = vadd.s32 3, %v3362_v63 }
 0x33b   :  { %v3271_v21 = vsel %vm3264_vm4, %v3267_v16, %v3270_v4  ;;  %v3353_v49 = vand.u32 2147483647, %v3352_v33  ;;  %v3489_v15 = vor.u32 8388608, %v3488_v2  ;;  %v3494_v42 = vshrl.u32 %v3493_v53, 5 }
 0x33c   :  { %v3272_v6 = vsel %vm3261_vm12, nan, %v3271_v21  ;;  %v11173_v37 = vshrl.u32 %v3438_v47, 30  ;;  %v3496_v52 = vsub.s32 32, %v3495_v10  ;;  %v3498_v51 = vshll.u32 %v14044_v38, %v3495_v10 }
 0x33d   :  { %v3356_v41 = vmul.f32 %v3355_v20, %v3353_v49  ;;  %v3501_v57 = vshll.u32 %v14038_v18, %v3495_v10  ;;  %7044 = vst [vmem:[#allocation5 + $0xd8] sm:$0xff] %v3272_v6  ;;  %v3504_v43 = vshll.u32 %v14039_v24, %v3495_v10  ;;  %v3507_v61 = vshll.u32 %v14040_v19, %v3495_v10 }
 0x33e   :  { %v3440_v28 = vshll.u32 %v11173_v37, 30  ;;  %v3499_v27 = vshrl.u32 %v14038_v18, %v3496_v52  ;;  %v3502_v31 = vshrl.u32 %v14039_v24, %v3496_v52  ;;  %v3505_v11 = vshrl.u32 %v14040_v19, %v3496_v52 }
 0x33f   :  { %v3357_v36 = vxor.u32 2147483648, %v3356_v41  ;;  %v3508_v12 = vshrl.u32 %v14041_v34, %v3496_v52  ;;  %v11184_v7 = vand.u32 3, %v3366_v48  ;;  %vm3513_vm10 = vcmp.lt.s32.totalorder %v3494_v42, 1 }
 0x340   :  { %v11186_v29 = vsub.s32 %v3437_v35, %v3440_v28  ;;  %v11188_v26 = vshll.u32 %v3489_v15, 8  ;;  %v3500_v50 = vor.u32 %v3499_v27, %v3498_v51  ;;  %v3503_v3 = vor.u32 %v3502_v31, %v3501_v57 }
 0x341   :  { %v3358_v54 = vsel %vm3275_vm1, %v3357_v36, %v3356_v41  ;;  %v3510_v17 = vshll.u32 %v14041_v34, %v3495_v10  ;;  %v3497_v8 = vshrl.u32 %v14044_v38, %v3496_v52  ;;  %v3509_v22 = vor.u32 %v3508_v12, %v3507_v61 }
 0x342   :  { %v3361_v45 = vsel %vm11148_vm6, %v14110_v5, %v3358_v54  ;;  %v3443_v1 = vsub.s32 0, %v11186_v29  ;;  %v3506_v40 = vor.u32 %v3505_v11, %v3504_v43  ;;  %v3511_v62 = vshrl.u32 %v14042_v60, %v3496_v52 }
 0x343   :  { %7734 = vcosq.f32 %v3361_v45  ;;  %vm3516_vm14 = vcmp.lt.s32.totalorder %v3494_v42, 4  ;;  %vm3514_vm13 = vcmp.lt.s32.totalorder %v3494_v42, 2  ;;  %vm3515_vm0 = vcmp.lt.s32.totalorder %v3494_v42, 3 }
 0x344   :  { %7736 = vsinq.f32 %v3361_v45  ;;  %v7217_v46 = vmin.u32 %v3443_v1, %v11186_v29  ;;  %v3512_v9 = vor.u32 %v3511_v62, %v3510_v17  ;;  %v3518_v2 = vsel %vm3516_vm14, %v3506_v40, 2102212464 }
 0x345   :  { %v3521_v44 = vsel %vm3513_vm10, %v3500_v50, %v3503_v3  ;;  %v3522_v58 = vsel %vm3516_vm14, %v3509_v22, 920167782  ;;  %v3433_v25 = vadd.s32 %v11137_v0, %v11143_v56  ;;  %v3517_v14 = vsel %vm3513_vm10, %v3497_v8, %v3500_v50 }
 0x346   :  { %v3445_v23 = vclz %v7217_v46  ;;  %v3588_v32 = vand.u32 2139095040, %v14119_v13  ;;  %v3519_v63 = vsel %vm3515_vm0, %v3503_v3, %v3518_v2  ;;  %v3523_v35 = vsel %vm3515_vm0, %v3506_v40, %v3522_v58 }
 0x347   :  { %v3525_v53 = vsel %vm3513_vm10, %v3503_v3, %v3506_v40  ;;  %v3526_v4 = vsel %vm3516_vm14, %v3512_v9, 1326507024  ;;  %vm3365_vm1 = vweird.f32 %v14110_v5  ;;  %v3463_v20 = vsub.s32 4, %v11173_v37 }
 0x348   :  { %v7218_v33 = vadd.s32 4294967294, %v3445_v23  ;;  %v3524_v0 = vsel %vm3514_vm13, %v3521_v44, %v3523_v35  ;;  %v3527_v56 = vsel %vm3515_vm0, %v3509_v22, %v3526_v4  ;;  %v3520_v16 = vsel %vm3514_vm13, %v3517_v14, %v3519_v63 }
 0x349   :  { %v3528_v47 = vsel %vm3514_vm13, %v3525_v53, %v3527_v56  ;;  %v11218_v10 = vmul.u32.u64.low %v11188_v26, %v3524_v0  ;;  %v11219_v21 = vmul.u32.u64.high %v11188_v26, %v3524_v0, %v11218_v10  ;;  %v3589_v15 = vshrl.u32 %v3588_v32, 23 }
 0x34a   :  { %vm7219_vm15 = vcmp.lt.s32.totalorder %v7218_v33, 0  ;;  %v11223_v49 = vmul.u32.u64.low %v11188_v26, %v3528_v47  ;;  %v11224_v48 = vmul.u32.u64.high %v11188_v26, %v3528_v47, %v11223_v49  ;;  %vm3368_vm2 = vcmp.lt.s32.totalorder %v11184_v7, 2 }
 0x34b   :  { %vm11229_vm3 = vcmp.le.f32.partialorder %v3377_v30, 0.7853982  ;;  %vm3379_vm5 = vcmp.lt.s32.totalorder %v14115_v39, 0  ;;  %v3448_v42 = vsel %vm7219_vm15, 0, %v7218_v33  ;;  %v7224_v57 = vadd.s32 4294967169, %v3589_v15 }
 0x34c   :  { %v3449_v52 = vsub.s32 32, %v3448_v42  ;;  %v3450_v41 = vshll.u32 %v11186_v29, %v3448_v42  ;;  %v3453_v51 = vsub.s32 4294967266, %v3448_v42  ;;  %vm3369_vm6 = vcmp.eq.s32.totalorder %v11184_v7, 0 }
 0x34d   :  { %v7735_v28 = vpop.eup %7734  ;;  %vm3372_vm4 = vcmp.eq.s32.totalorder %v11184_v7, 2  ;;  %v3536_v27 = vmul.u32 %v11188_v26, %v3520_v16  ;;  %v3539_v30 = vadd.s32 1, %v11219_v21  ;;  %v3464_v11 = vsel %vm3379_vm5, %v3463_v20, %v11173_v37 }
 0x34e   :  { %v7737_v43 = vpop.eup %7736  ;;  %v3373_v61 = vxor.u32 2147483648, %v7735_v28  ;;  %v3451_v36 = vshrl.u32 %v3433_v25, %v3449_v52  ;;  %v3454_v31 = vadd.s32 127, %v3453_v51  ;;  %vm3538_vm7 = vc.u32 %v11224_v48, %v11218_v10 }
 0x34f   :  { %v3370_v12 = vxor.u32 2147483648, %v7737_v43  ;;  %v3585_v29 = vand.u32 2147483647, %v14119_v13  ;;  %v3595_v54 = vadd.s32 1, %v7224_v57  ;;  %v3540_v17 = vsel %vm3538_vm7, %v3539_v30, %v11219_v21  ;;  %v14122_v57 = vld [vmem:[#allocation31_spill] sm:$0xff] }
 0x350   :  { %v3374_v50 = vsel %vm3372_vm4, %v3373_v61, %v7737_v43  ;;  %v3452_v3 = vor.u32 %v3451_v36, %v3450_v41  ;;  %v3455_v26 = vshll.u32 %v3454_v31, 23  ;;  %v3466_v1 = vsel %vm11229_vm3, 0, %v3464_v11 }
 0x351   :  { %v3371_v45 = vsel %vm3369_vm6, %v7735_v28, %v3370_v12  ;;  %v3541_v8 = vadd.s32 %v3540_v17, %v3536_v27  ;;  %vm3596_vm8 = vcmp.gt.s32.totalorder %v3595_v54, 0  ;;  %v3470_v58 = vadd.s32 3, %v3466_v1 }
 0x352   :  { %v3375_v37 = vsel %vm3368_vm2, %v3371_v45, %v3374_v50  ;;  %v3456_v22 = vor.u32 4788187, %v3455_v26  ;;  %v3459_v40 = vcvt.s32.f32 %v3452_v3  ;;  %v3597_v62 = vsel %vm3596_vm8, %v3595_v54, 0 }
 0x353   :  { %v3376_v46 = vsel %vm3365_vm1, nan, %v3375_v37  ;;  %v3542_v9 = vadd.s32 536870912, %v3541_v8  ;;  %v3599_v2 = vand.u32 31, %v3597_v62  ;;  %v3592_v23 = vand.u32 8388607, %v3585_v29 }
 0x354   :  { %v3457_v44 = vand.u32 2147483647, %v3456_v22  ;;  %7045 = vst [vmem:[#allocation5 + $0xe0] sm:$0xff] %v3376_v46  ;;  %v11256_v14 = vshrl.u32 %v3597_v62, 5  ;;  %v11267_v21 = vand.u32 3, %v3470_v58  ;;  %vm3483_vm11 = vcmp.lt.s32.totalorder %v14116_v55, 0 }
 0x355   :  { %v3543_v25 = vshrl.u32 %v3542_v9, 30  ;;  %v3600_v32 = vsub.s32 32, %v3599_v2  ;;  %v3602_v63 = vshll.u32 %v14044_v38, %v3599_v2  ;;  %v3605_v35 = vshll.u32 %v14038_v18, %v3599_v2 }
 0x356   :  { %v3460_v7 = vmul.f32 %v3459_v40, %v3457_v44  ;;  %v3608_v5 = vshll.u32 %v14039_v24, %v3599_v2  ;;  %v3611_v33 = vshll.u32 %v14040_v19, %v3599_v2  ;;  %v3614_v20 = vshll.u32 %v14041_v34, %v3599_v2 }
 0x357   :  { %v3544_v53 = vshll.u32 %v3543_v25, 30  ;;  %v3603_v4 = vshrl.u32 %v14038_v18, %v3600_v32  ;;  %v3606_v56 = vshrl.u32 %v14039_v24, %v3600_v32  ;;  %v3609_v16 = vshrl.u32 %v14040_v19, %v3600_v32 }
 0x358   :  { %v3461_v0 = vxor.u32 2147483648, %v3460_v7  ;;  %v3612_v47 = vshrl.u32 %v14041_v34, %v3600_v32  ;;  %v3593_v15 = vor.u32 8388608, %v3592_v23  ;;  %v3615_v42 = vshrl.u32 %v14042_v60, %v3600_v32 }
 0x359   :  { %v11269_v49 = vsub.s32 %v3541_v8, %v3544_v53  ;;  %v3601_v41 = vshrl.u32 %v14044_v38, %v3600_v32  ;;  %v3604_v51 = vor.u32 %v3603_v4, %v3602_v63  ;;  %v3692_v28 = vand.u32 2139095040, %v14122_v57 }
 0x35a   :  { %v3462_v52 = vsel %vm3379_vm5, %v3461_v0, %v3460_v7  ;;  %v3607_v43 = vor.u32 %v3606_v56, %v3605_v35  ;;  %v3610_v61 = vor.u32 %v3609_v16, %v3608_v5  ;;  %v3613_v36 = vor.u32 %v3612_v47, %v3611_v33 }
 0x35b   :  { %v3465_v27 = vsel %vm11229_vm3, %v14115_v39, %v3462_v52  ;;  %v3547_v30 = vsub.s32 0, %v11269_v49  ;;  %v3616_v31 = vor.u32 %v3615_v42, %v3614_v20  ;;  %vm3617_vm9 = vcmp.lt.s32.totalorder %v11256_v14, 1 }
 0x35c   :  { %7738 = vcosq.f32 %v3465_v27  ;;  %vm11284_vm12 = vcmp.le.f32.partialorder %v3481_v59, 0.7853982  ;;  %v3633_v6 = vshll.u32 %v3593_v15, 8  ;;  %v3567_v54 = vsub.s32 4, %v3543_v25 }
 0x35d   :  { %7740 = vsinq.f32 %v3465_v27  ;;  %v7221_v12 = vmin.u32 %v3547_v30, %v11269_v49  ;;  %vm3619_vm10 = vcmp.lt.s32.totalorder %v11256_v14, 3  ;;  %vm3620_vm14 = vcmp.lt.s32.totalorder %v11256_v14, 4 }
 0x35e   :  { %v3693_v50 = vshrl.u32 %v3692_v28, 23  ;;  %vm3618_vm13 = vcmp.lt.s32.totalorder %v11256_v14, 2  ;;  %v3625_v26 = vsel %vm3617_vm9, %v3604_v51, %v3607_v43  ;;  %v3629_v17 = vsel %vm3617_vm9, %v3607_v43, %v3610_v61 }
 0x35f   :  { %v3549_v3 = vclz %v7221_v12  ;;  %vm3472_vm0 = vcmp.lt.s32.totalorder %v11267_v21, 2  ;;  %v3621_v59 = vsel %vm3617_vm9, %v3601_v41, %v3604_v51  ;;  %v3622_v45 = vsel %vm3620_vm14, %v3610_v61, 2102212464 }
 0x360   :  { %v3626_v1 = vsel %vm3620_vm14, %v3613_v36, 920167782  ;;  %v3630_v8 = vsel %vm3620_vm14, %v3616_v31, 1326507024  ;;  %vm3469_vm1 = vweird.f32 %v14115_v39  ;;  %v3623_v22 = vsel %vm3619_vm10, %v3607_v43, %v3622_v45 }
 0x361   :  { %v7222_v37 = vadd.s32 4294967294, %v3549_v3  ;;  %v3627_v40 = vsel %vm3619_vm10, %v3610_v61, %v3626_v1  ;;  %v3631_v62 = vsel %vm3619_vm10, %v3613_v36, %v3630_v8  ;;  %v3537_v46 = vadd.s32 %v11218_v10, %v11224_v48 }
 0x362   :  { %v3628_v9 = vsel %vm3618_vm13, %v3625_v26, %v3627_v40  ;;  %v3632_v2 = vsel %vm3618_vm13, %v3629_v17, %v3631_v62  ;;  %v7228_v44 = vadd.s32 4294967169, %v3693_v50  ;;  %v3568_v58 = vsel %vm3483_vm11, %v3567_v54, %v3543_v25 }
 0x363   :  { %vm7223_vm15 = vcmp.lt.s32.totalorder %v7222_v37, 0  ;;  %v11308_v23 = vmul.u32.u64.low %v3633_v6, %v3632_v2  ;;  %v11309_v32 = vmul.u32.u64.high %v3633_v6, %v3632_v2, %v11308_v23  ;;  %v3624_v63 = vsel %vm3618_vm13, %v3621_v59, %v3623_v22 }
 0x364   :  { %v3552_v7 = vsel %vm7223_vm15, 0, %v7222_v37  ;;  %v11313_v35 = vmul.u32.u64.low %v3633_v6, %v3628_v9  ;;  %v11314_v10 = vmul.u32.u64.high %v3633_v6, %v3628_v9, %v11313_v35  ;;  %v3699_v4 = vadd.s32 1, %v7228_v44 }
 0x365   :  { %v3553_v48 = vsub.s32 32, %v3552_v7  ;;  %v3554_v5 = vshll.u32 %v11269_v49, %v3552_v7  ;;  %v3557_v53 = vsub.s32 4294967266, %v3552_v7  ;;  %vm3473_vm2 = vcmp.eq.s32.totalorder %v11267_v21, 0 }
 0x366   :  { %v7739_v33 = vpop.eup %7738  ;;  %vm3476_vm3 = vcmp.eq.s32.totalorder %v11267_v21, 2  ;;  %v3570_v25 = vsel %vm11284_vm12, 0, %v3568_v58  ;;  %v3689_v14 = vand.u32 2147483647, %v14122_v57  ;;  %v3640_v47 = vmul.u32 %v3633_v6, %v3624_v63 }
 0x367   :  { %v7741_v20 = vpop.eup %7740  ;;  %v3477_v0 = vxor.u32 2147483648, %v7739_v33  ;;  %v3555_v56 = vshrl.u32 %v3537_v46, %v3553_v48  ;;  %v3558_v16 = vadd.s32 127, %v3557_v53  ;;  %vm3642_vm5 = vc.u32 %v11309_v32, %v11313_v35 }
 0x368   :  { %v3474_v15 = vxor.u32 2147483648, %v7741_v20  ;;  %v3643_v49 = vadd.s32 1, %v11314_v10  ;;  %vm3700_vm6 = vcmp.gt.s32.totalorder %v3699_v4, 0  ;;  %v3696_v30 = vand.u32 8388607, %v3689_v14 }
 0x369   :  { %v3478_v42 = vsel %vm3476_vm3, %v3477_v0, %v7741_v20  ;;  %v3556_v52 = vor.u32 %v3555_v56, %v3554_v5  ;;  %v3559_v41 = vshll.u32 %v3558_v16, 23  ;;  %v3701_v51 = vsel %vm3700_vm6, %v3699_v4, 0 }
 0x36a   :  { %v3475_v28 = vsel %vm3473_vm2, %v7739_v33, %v3474_v15  ;;  %v3644_v27 = vsel %vm3642_vm5, %v3643_v49, %v11314_v10  ;;  %v3703_v43 = vand.u32 31, %v3701_v51  ;;  %v3574_v54 = vadd.s32 3, %v3570_v25  ;;  %v14125_v15 = vld [vmem:[#allocation32_spill] sm:$0xff] }
 0x36b   :  { %v3479_v61 = vsel %vm3472_vm0, %v3475_v28, %v3478_v42  ;;  %v3560_v36 = vor.u32 4788187, %v3559_v41  ;;  %v3563_v31 = vcvt.s32.f32 %v3556_v52  ;;  %v3645_v12 = vadd.s32 %v3644_v27, %v3640_v47 }
 0x36c   :  { %v3480_v6 = vsel %vm3469_vm1, nan, %v3479_v61  ;;  %v3704_v50 = vsub.s32 32, %v3703_v43  ;;  %v3706_v3 = vshll.u32 %v14044_v38, %v3703_v43  ;;  %v3709_v59 = vshll.u32 %v14038_v18, %v3703_v43 }
 0x36d   :  { %v3561_v26 = vand.u32 2147483647, %v3560_v36  ;;  %v3646_v17 = vadd.s32 536870912, %v3645_v12  ;;  %v3712_v45 = vshll.u32 %v14039_v24, %v3703_v43  ;;  %7046 = vst [vmem:[#allocation5 + $0xe8] sm:$0xff] %v3480_v6  ;;  %v3715_v39 = vshll.u32 %v14040_v19, %v3703_v43 }
 0x36e   :  { %v3707_v21 = vshrl.u32 %v14038_v18, %v3704_v50  ;;  %v3710_v1 = vshrl.u32 %v14039_v24, %v3704_v50  ;;  %v3713_v8 = vshrl.u32 %v14040_v19, %v3704_v50  ;;  %v3702_v40 = vshrl.u32 %v3701_v51, 5 }
 0x36f   :  { %v3564_v37 = vmul.f32 %v3563_v31, %v3561_v26  ;;  %v11342_v22 = vshrl.u32 %v3646_v17, 30  ;;  %v3716_v62 = vshrl.u32 %v14041_v34, %v3704_v50  ;;  %v3697_v46 = vor.u32 8388608, %v3696_v30 }
 0x370   :  { %v3718_v9 = vshll.u32 %v14041_v34, %v3703_v43  ;;  %v3719_v2 = vshrl.u32 %v14042_v60, %v3704_v50  ;;  %v11347_v58 = vand.u32 3, %v3574_v54  ;;  %v3705_v7 = vshrl.u32 %v14044_v38, %v3704_v50 }
 0x371   :  { %v3565_v44 = vxor.u32 2147483648, %v3564_v37  ;;  %v3648_v23 = vshll.u32 %v11342_v22, 30  ;;  %v3708_v63 = vor.u32 %v3707_v21, %v3706_v3  ;;  %v3711_v10 = vor.u32 %v3710_v1, %v3709_v59 }
 0x372   :  { %v3714_v48 = vor.u32 %v3713_v8, %v3712_v45  ;;  %v3717_v5 = vor.u32 %v3716_v62, %v3715_v39  ;;  %vm3721_vm4 = vcmp.lt.s32.totalorder %v3702_v40, 1  ;;  %vm3724_vm7 = vcmp.lt.s32.totalorder %v3702_v40, 4 }
 0x373   :  { %v3566_v53 = vsel %vm3483_vm11, %v3565_v44, %v3564_v37  ;;  %v11353_v4 = vsub.s32 %v3645_v12, %v3648_v23  ;;  %v3720_v25 = vor.u32 %v3719_v2, %v3718_v9  ;;  %vm3723_vm8 = vcmp.lt.s32.totalorder %v3702_v40, 3 }
 0x374   :  { %v3569_v33 = vsel %vm11284_vm12, %v14116_v55, %v3566_v53  ;;  %v3737_v20 = vshll.u32 %v3697_v46, 8  ;;  %vm3722_vm9 = vcmp.lt.s32.totalorder %v3702_v40, 2  ;;  %v3726_v56 = vsel %vm3724_vm7, %v3714_v48, 2102212464 }
 0x375   :  { %7742 = vcosq.f32 %v3569_v33  ;;  %v3651_v0 = vsub.s32 0, %v11353_v4  ;;  %v3729_v16 = vsel %vm3721_vm4, %v3708_v63, %v3711_v10  ;;  %v3730_v47 = vsel %vm3724_vm7, %v3717_v5, 920167782 }
 0x376   :  { %7744 = vsinq.f32 %v3569_v33  ;;  %v3796_v49 = vand.u32 2139095040, %v14125_v15  ;;  %v3725_v11 = vsel %vm3721_vm4, %v3705_v7, %v3708_v63  ;;  %v3731_v52 = vsel %vm3723_vm8, %v3714_v48, %v3730_v47 }
 0x377   :  { %v7225_v42 = vmin.u32 %v3651_v0, %v11353_v4  ;;  %v3727_v41 = vsel %vm3723_vm8, %v3711_v10, %v3726_v56  ;;  %v3732_v51 = vsel %vm3722_vm9, %v3729_v16, %v3731_v52  ;;  %v3733_v28 = vsel %vm3721_vm4, %v3711_v10, %v3714_v48  ;;  %v14128_v52 = vld [vmem:[#allocation33_spill] sm:$0xff] }
 0x378   :  { %v3734_v27 = vsel %vm3724_vm7, %v3720_v25, 1326507024  ;;  %vm3576_vm11 = vcmp.lt.s32.totalorder %v11347_v58, 2  ;;  %vm3587_vm12 = vcmp.lt.s32.totalorder %v14119_v13, 0  ;;  %v3797_v31 = vshrl.u32 %v3796_v49, 23 }
 0x379   :  { %v3653_v30 = vclz %v7225_v42  ;;  %v3735_v43 = vsel %vm3723_vm8, %v3717_v5, %v3734_v27  ;;  %v11373_v61 = vmul.u32.u64.low %v3737_v20, %v3732_v51  ;;  %v11374_v36 = vmul.u32.u64.high %v3737_v20, %v3732_v51, %v11373_v61 }
 0x37a   :  { %v3671_v6 = vsub.s32 4, %v11342_v22  ;;  %v3728_v54 = vsel %vm3722_vm9, %v3725_v11, %v3727_v41  ;;  %v3736_v50 = vsel %vm3722_vm9, %v3733_v28, %v3735_v43  ;;  %v3793_v17 = vand.u32 2147483647, %v14125_v15 }
 0x37b   :  { %v7226_v12 = vadd.s32 4294967294, %v3653_v30  ;;  %v11380_v3 = vmul.u32.u64.low %v3737_v20, %v3736_v50  ;;  %v11381_v26 = vmul.u32.u64.high %v3737_v20, %v3736_v50, %v11380_v3  ;;  %v7232_v59 = vadd.s32 4294967169, %v3797_v31 }
 0x37c   :  { %vm3577_vm10 = vcmp.eq.s32.totalorder %v11347_v58, 0  ;;  %vm3580_vm14 = vcmp.eq.s32.totalorder %v11347_v58, 2  ;;  %v3641_v45 = vadd.s32 %v11313_v35, %v11309_v32  ;;  %v3744_v1 = vmul.u32 %v3737_v20, %v3728_v54 }
 0x37d   :  { %vm7227_vm13 = vcmp.lt.s32.totalorder %v7226_v12, 0  ;;  %v3747_v8 = vadd.s32 1, %v11374_v36  ;;  %v3803_v39 = vadd.s32 1, %v7232_v59  ;;  %v3672_v9 = vsel %vm3587_vm12, %v3671_v6, %v11342_v22 }
 0x37e   :  { %v3656_v21 = vsel %vm7227_vm13, 0, %v7226_v12  ;;  %vm3746_vm0 = vc.u32 %v11381_v26, %v11373_v61  ;;  %v3800_v32 = vand.u32 8388607, %v3793_v17  ;;  %vm3573_vm15 = vweird.f32 %v14116_v55 }
 0x37f   :  { %v7743_v37 = vpop.eup %7742  ;;  %v3657_v40 = vsub.s32 32, %v3656_v21  ;;  %v3658_v62 = vshll.u32 %v11353_v4, %v3656_v21  ;;  %v3661_v46 = vsub.s32 4294967266, %v3656_v21  ;;  %vm3804_vm1 = vcmp.gt.s32.totalorder %v3803_v39, 0 }
 0x380   :  { %v7745_v2 = vpop.eup %7744  ;;  %v3581_v44 = vxor.u32 2147483648, %v7743_v37  ;;  %v3748_v63 = vsel %vm3746_vm0, %v3747_v8, %v11374_v36  ;;  %v3805_v48 = vsel %vm3804_vm1, %v3803_v39, 0  ;;  %vm11405_vm2 = vcmp.le.f32.partialorder %v3585_v29, 0.7853982 }
 0x381   :  { %v3578_v35 = vxor.u32 2147483648, %v7745_v2  ;;  %v3659_v23 = vshrl.u32 %v3641_v45, %v3657_v40  ;;  %v3662_v7 = vadd.s32 127, %v3661_v46  ;;  %v3749_v22 = vadd.s32 %v3748_v63, %v3744_v1 }
 0x382   :  { %v3582_v10 = vsel %vm3580_vm14, %v3581_v44, %v7745_v2  ;;  %v3674_v55 = vsel %vm11405_vm2, 0, %v3672_v9  ;;  %v3807_v0 = vand.u32 31, %v3805_v48  ;;  %v3801_v49 = vor.u32 8388608, %v3800_v32 }
 0x383   :  { %v3579_v5 = vsel %vm3577_vm10, %v7743_v37, %v3578_v35  ;;  %v3660_v4 = vor.u32 %v3659_v23, %v3658_v62  ;;  %v3663_v33 = vshll.u32 %v3662_v7, 23  ;;  %v3750_v20 = vadd.s32 536870912, %v3749_v22 }
 0x384   :  { %v3583_v25 = vsel %vm3576_vm11, %v3579_v5, %v3582_v10  ;;  %v3806_v29 = vshrl.u32 %v3805_v48, 5  ;;  %v3808_v11 = vsub.s32 32, %v3807_v0  ;;  %v3900_v41 = vand.u32 2139095040, %v14128_v52 }
 0x385   :  { %v3584_v56 = vsel %vm3573_vm15, nan, %v3583_v25  ;;  %v3664_v16 = vor.u32 4788187, %v3663_v33  ;;  %v3667_v47 = vcvt.s32.f32 %v3660_v4  ;;  %v11413_v42 = vshrl.u32 %v3750_v20, 30 }
 0x386   :  { %7047 = vst [vmem:[#allocation5 + $0xf0] sm:$0xff] %v3584_v56  ;;  %v3810_v58 = vshll.u32 %v14044_v38, %v3807_v0  ;;  %v3813_v28 = vshll.u32 %v14038_v18, %v3807_v0  ;;  %v3816_v27 = vshll.u32 %v14039_v24, %v3807_v0  ;;  %v3811_v43 = vshrl.u32 %v14038_v18, %v3808_v11 }
 0x387   :  { %v3665_v51 = vand.u32 2147483647, %v3664_v16  ;;  %v3752_v30 = vshll.u32 %v11413_v42, 30  ;;  %v3819_v36 = vshll.u32 %v14040_v19, %v3807_v0  ;;  %v3822_v31 = vshll.u32 %v14041_v34, %v3807_v0 }
 0x388   :  { %v3814_v6 = vshrl.u32 %v14039_v24, %v3808_v11  ;;  %v3817_v54 = vshrl.u32 %v14040_v19, %v3808_v11  ;;  %v3820_v50 = vshrl.u32 %v14041_v34, %v3808_v11  ;;  %v3678_v3 = vadd.s32 3, %v3674_v55 }
 0x389   :  { %v3668_v12 = vmul.f32 %v3667_v47, %v3665_v51  ;;  %v11426_v59 = vsub.s32 %v3749_v22, %v3752_v30  ;;  %v3823_v45 = vshrl.u32 %v14042_v60, %v3808_v11  ;;  %v11429_v21 = vshll.u32 %v3801_v49, 8 }
 0x38a   :  { %v3812_v8 = vor.u32 %v3811_v43, %v3810_v58  ;;  %v3815_v39 = vor.u32 %v3814_v6, %v3813_v28  ;;  %v3901_v37 = vshrl.u32 %v3900_v41, 23  ;;  %v3809_v62 = vshrl.u32 %v14044_v38, %v3808_v11 }
 0x38b   :  { %v3669_v1 = vxor.u32 2147483648, %v3668_v12  ;;  %v3755_v40 = vsub.s32 0, %v11426_v59  ;;  %v3821_v46 = vor.u32 %v3820_v50, %v3819_v36  ;;  %vm3825_vm3 = vcmp.lt.s32.totalorder %v3806_v29, 1 }
 0x38c   :  { %v3818_v2 = vor.u32 %v3817_v54, %v3816_v27  ;;  %v3824_v44 = vor.u32 %v3823_v45, %v3822_v31  ;;  %vm3828_vm5 = vcmp.lt.s32.totalorder %v3806_v29, 4  ;;  %vm3826_vm6 = vcmp.lt.s32.totalorder %v3806_v29, 2 }
 0x38d   :  { %v3670_v9 = vsel %vm3587_vm12, %v3669_v1, %v3668_v12  ;;  %v7229_v35 = vmin.u32 %v3755_v40, %v11426_v59  ;;  %vm3827_vm4 = vcmp.lt.s32.totalorder %v3806_v29, 3  ;;  %vm3691_vm7 = vcmp.lt.s32.totalorder %v14122_v57, 0 }
 0x38e   :  { %v3673_v32 = vsel %vm11405_vm2, %v14119_v13, %v3670_v9  ;;  %v3830_v23 = vsel %vm3828_vm5, %v3818_v2, 2102212464  ;;  %v3833_v7 = vsel %vm3825_vm3, %v3812_v8, %v3815_v39  ;;  %v3834_v63 = vsel %vm3828_vm5, %v3821_v46, 920167782 }
 0x38f   :  { %7746 = vcosq.f32 %v3673_v32  ;;  %v3757_v10 = vclz %v7229_v35  ;;  %v3897_v22 = vand.u32 2147483647, %v14128_v52  ;;  %v7236_v48 = vadd.s32 4294967169, %v3901_v37 }
 0x390   :  { %7748 = vsinq.f32 %v3673_v32  ;;  %v3829_v5 = vsel %vm3825_vm3, %v3809_v62, %v3812_v8  ;;  %v3831_v53 = vsel %vm3827_vm4, %v3815_v39, %v3830_v23  ;;  %v3835_v4 = vsel %vm3827_vm4, %v3818_v2, %v3834_v63 }
 0x391   :  { %v3837_v33 = vsel %vm3825_vm3, %v3815_v39, %v3818_v2  ;;  %vm11450_vm8 = vcmp.le.f32.partialorder %v3689_v14, 0.7853982  ;;  %v3745_v55 = vadd.s32 %v11373_v61, %v11381_v26  ;;  %v7230_v20 = vadd.s32 4294967294, %v3757_v10 }
 0x392   :  { %v3836_v0 = vsel %vm3826_vm6, %v3833_v7, %v3835_v4  ;;  %v3838_v56 = vsel %vm3828_vm5, %v3824_v44, 1326507024  ;;  %v3775_v16 = vsub.s32 4, %v11413_v42  ;;  %vm3677_vm9 = vweird.f32 %v14119_v13 }
 0x393   :  { %v3839_v47 = vsel %vm3827_vm4, %v3821_v46, %v3838_v56  ;;  %v11461_v49 = vmul.u32.u64.low %v11429_v21, %v3836_v0  ;;  %v11462_v11 = vmul.u32.u64.high %v11429_v21, %v3836_v0, %v11461_v49  ;;  %vm7231_vm11 = vcmp.lt.s32.totalorder %v7230_v20, 0 }
 0x394   :  { %v3832_v14 = vsel %vm3826_vm6, %v3829_v5, %v3831_v53  ;;  %v3840_v61 = vsel %vm3826_vm6, %v3837_v33, %v3839_v47  ;;  %v3907_v26 = vadd.s32 1, %v7236_v48  ;;  %v3679_v41 = vand.u32 3, %v3678_v3 }
 0x395   :  { %v3760_v51 = vsel %vm7231_vm11, 0, %v7230_v20  ;;  %v11469_v58 = vmul.u32.u64.low %v11429_v21, %v3840_v61  ;;  %v11470_v28 = vmul.u32.u64.high %v11429_v21, %v3840_v61, %v11469_v58  ;;  %v3848_v36 = vmul.u32 %v11429_v21, %v3832_v14 }
 0x396   :  { %v3761_v27 = vsub.s32 32, %v3760_v51  ;;  %v3762_v30 = vshll.u32 %v11426_v59, %v3760_v51  ;;  %v3765_v43 = vsub.s32 4294967266, %v3760_v51  ;;  %vm3908_vm12 = vcmp.gt.s32.totalorder %v3907_v26, 0 }
 0x397   :  { %v3851_v31 = vadd.s32 1, %v11462_v11  ;;  %v3904_v29 = vand.u32 8388607, %v3897_v22  ;;  %v3909_v12 = vsel %vm3908_vm12, %v3907_v26, 0  ;;  %v3776_v50 = vsel %vm3691_vm7, %v3775_v16, %v11413_v42 }
 0x398   :  { %v3763_v6 = vshrl.u32 %v3745_v55, %v3761_v27  ;;  %v3766_v54 = vadd.s32 127, %v3765_v43  ;;  %v3911_v3 = vand.u32 31, %v3909_v12  ;;  %vm3680_vm10 = vcmp.lt.s32.totalorder %v3679_v41, 2 }
 0x399   :  { %v7747_v45 = vpop.eup %7746  ;;  %vm3681_vm14 = vcmp.eq.s32.totalorder %v3679_v41, 0  ;;  %vm3684_vm13 = vcmp.eq.s32.totalorder %v3679_v41, 2  ;;  %vm3850_vm0 = vc.u32 %v11470_v28, %v11461_v49  ;;  %v3778_v40 = vsel %vm11450_vm8, 0, %v3776_v50 }
 0x39a   :  { %v7749_v59 = vpop.eup %7748  ;;  %v3685_v21 = vxor.u32 2147483648, %v7747_v45  ;;  %v3764_v1 = vor.u32 %v3763_v6, %v3762_v30  ;;  %v3767_v8 = vshll.u32 %v3766_v54, 23  ;;  %v3852_v39 = vsel %vm3850_vm0, %v3851_v31, %v11462_v11 }
 0x39b   :  { %v3682_v37 = vxor.u32 2147483648, %v7749_v59  ;;  %v3853_v62 = vadd.s32 %v3852_v39, %v3848_v36  ;;  %v3912_v42 = vsub.s32 32, %v3911_v3  ;;  %v3905_v44 = vor.u32 8388608, %v3904_v29 }
 0x39c   :  { %v3686_v46 = vsel %vm3684_vm13, %v3685_v21, %v7749_v59  ;;  %v3768_v9 = vor.u32 4788187, %v3767_v8  ;;  %v3771_v2 = vcvt.s32.f32 %v3764_v1  ;;  %v3914_v23 = vshll.u32 %v14044_v38, %v3911_v3 }
 0x39d   :  { %v3683_v32 = vsel %vm3681_vm14, %v7747_v45, %v3682_v37  ;;  %v3854_v35 = vadd.s32 536870912, %v3853_v62  ;;  %v3917_v7 = vshll.u32 %v14038_v18, %v3911_v3  ;;  %v3915_v48 = vshrl.u32 %v14038_v18, %v3912_v42 }
 0x39e   :  { %v3687_v63 = vsel %vm3680_vm10, %v3683_v32, %v3686_v46  ;;  %v3769_v10 = vand.u32 2147483647, %v3768_v9  ;;  %v3918_v5 = vshrl.u32 %v14039_v24, %v3912_v42  ;;  %v3920_v33 = vshll.u32 %v14039_v24, %v3911_v3  ;;  %v14133_v9 = vld [vmem:[#allocation34_spill] sm:$0xff] }
 0x39f   :  { %v3688_v53 = vsel %vm3677_vm9, nan, %v3687_v63  ;;  %v3855_v4 = vshrl.u32 %v3854_v35, 30  ;;  %v3921_v55 = vshrl.u32 %v14040_v19, %v3912_v42  ;;  %v3910_v0 = vshrl.u32 %v3909_v12, 5 }
 0x3a0   :  { %v3772_v20 = vmul.f32 %v3771_v2, %v3769_v10  ;;  %v3923_v56 = vshll.u32 %v14040_v19, %v3911_v3  ;;  %v3924_v16 = vshrl.u32 %v14041_v34, %v3912_v42  ;;  %7048 = vst [vmem:[#allocation5 + $0xf8] sm:$0xff] %v3688_v53  ;;  %v3782_v47 = vadd.s32 3, %v3778_v40 }
 0x3a1   :  { %v3856_v11 = vshll.u32 %v3855_v4, 30  ;;  %v3926_v14 = vshll.u32 %v14041_v34, %v3911_v3  ;;  %v11498_v61 = vshll.u32 %v3905_v44, 8  ;;  %v3913_v26 = vshrl.u32 %v14044_v38, %v3912_v42 }
 0x3a2   :  { %v3773_v13 = vxor.u32 2147483648, %v3772_v20  ;;  %v3925_v41 = vor.u32 %v3924_v16, %v3923_v56  ;;  %v3927_v51 = vshrl.u32 %v14042_v60, %v3912_v42  ;;  %v3916_v27 = vor.u32 %v3915_v48, %v3914_v23 }
 0x3a3   :  { %v11502_v58 = vsub.s32 %v3853_v62, %v3856_v11  ;;  %v3919_v30 = vor.u32 %v3918_v5, %v3917_v7  ;;  %v3922_v43 = vor.u32 %v3921_v55, %v3920_v33  ;;  %vm3929_vm1 = vcmp.lt.s32.totalorder %v3910_v0, 1 }
 0x3a4   :  { %v3774_v36 = vsel %vm3691_vm7, %v3773_v13, %v3772_v20  ;;  %v3928_v31 = vor.u32 %v3927_v51, %v3926_v14  ;;  %vm3932_vm15 = vcmp.lt.s32.totalorder %v3910_v0, 4  ;;  %vm3930_vm2 = vcmp.lt.s32.totalorder %v3910_v0, 2 }
 0x3a5   :  { %v3777_v29 = vsel %vm11450_vm8, %v14122_v57, %v3774_v36  ;;  %v3859_v12 = vsub.s32 0, %v11502_v58  ;;  %vm3931_vm3 = vcmp.lt.s32.totalorder %v3910_v0, 3  ;;  %v3933_v6 = vsel %vm3929_vm1, %v3913_v26, %v3916_v27 }
 0x3a6   :  { %7750 = vcosq.f32 %v3777_v29  ;;  %v3934_v54 = vsel %vm3932_vm15, %v3922_v43, 2102212464  ;;  %v3938_v50 = vsel %vm3932_vm15, %v3925_v41, 920167782  ;;  %v3937_v59 = vsel %vm3929_vm1, %v3916_v27, %v3919_v30 }
 0x3a7   :  { %7752 = vsinq.f32 %v3777_v29  ;;  %v7233_v3 = vmin.u32 %v3859_v12, %v11502_v58  ;;  %v3935_v45 = vsel %vm3931_vm3, %v3919_v30, %v3934_v54  ;;  %v3783_v25 = vand.u32 3, %v3782_v47 }
 0x3a8   :  { %v3939_v21 = vsel %vm3931_vm3, %v3922_v43, %v3938_v50  ;;  %v3941_v1 = vsel %vm3929_vm1, %v3919_v30, %v3922_v43  ;;  %v3942_v8 = vsel %vm3932_vm15, %v3928_v31, 1326507024  ;;  %vm11521_vm5 = vcmp.le.f32.partialorder %v3793_v17, 0.7853982 }
 0x3a9   :  { %vm3795_vm6 = vcmp.lt.s32.totalorder %v14125_v15, 0  ;;  %v3861_v37 = vclz %v7233_v3  ;;  %v3879_v40 = vsub.s32 4, %v3855_v4  ;;  %v3936_v62 = vsel %vm3930_vm2, %v3933_v6, %v3935_v45 }
 0x3aa   :  { %v3940_v42 = vsel %vm3930_vm2, %v3937_v59, %v3939_v21  ;;  %v3943_v46 = vsel %vm3931_vm3, %v3925_v41, %v3942_v8  ;;  %v4004_v2 = vand.u32 2139095040, %v14133_v9  ;;  %vm3781_vm4 = vweird.f32 %v14122_v57 }
 0x3ab   :  { %v7234_v44 = vadd.s32 4294967294, %v3861_v37  ;;  %v3944_v17 = vsel %vm3930_vm2, %v3941_v1, %v3943_v46  ;;  %v11533_v32 = vmul.u32.u64.low %v11498_v61, %v3940_v42  ;;  %v11534_v35 = vmul.u32.u64.high %v11498_v61, %v3940_v42, %v11533_v32 }
 0x3ac   :  { %vm3784_vm7 = vcmp.lt.s32.totalorder %v3783_v25, 2  ;;  %v11538_v23 = vmul.u32.u64.low %v11498_v61, %v3944_v17  ;;  %v11539_v7 = vmul.u32.u64.high %v11498_v61, %v3944_v17, %v11538_v23  ;;  %v4005_v63 = vshrl.u32 %v4004_v2, 23 }
 0x3ad   :  { %vm3785_vm8 = vcmp.eq.s32.totalorder %v3783_v25, 0  ;;  %v3849_v10 = vadd.s32 %v11461_v49, %v11470_v28  ;;  %vm7235_vm9 = vcmp.lt.s32.totalorder %v7234_v44, 0  ;;  %v3880_v48 = vsel %vm3795_vm6, %v3879_v40, %v3855_v4 }
 0x3ae   :  { %v3864_v5 = vsel %vm7235_vm9, 0, %v7234_v44  ;;  %v3952_v53 = vmul.u32 %v11498_v61, %v3936_v62  ;;  %v4001_v33 = vand.u32 2147483647, %v14133_v9  ;;  %v7240_v55 = vadd.s32 4294967169, %v4005_v63 }
 0x3af   :  { %v3865_v20 = vsub.s32 32, %v3864_v5  ;;  %v3866_v0 = vshll.u32 %v11502_v58, %v3864_v5  ;;  %v3869_v56 = vsub.s32 4294967266, %v3864_v5  ;;  %v3955_v16 = vadd.s32 1, %v11534_v35 }
 0x3b0   :  { %v7751_v47 = vpop.eup %7750  ;;  %vm3788_vm11 = vcmp.eq.s32.totalorder %v3783_v25, 2  ;;  %v3882_v49 = vsel %vm11521_vm5, 0, %v3880_v48  ;;  %vm3954_vm12 = vc.u32 %v11539_v7, %v11533_v32  ;;  %v4011_v28 = vadd.s32 1, %v7240_v55 }
 0x3b1   :  { %v7753_v4 = vpop.eup %7752  ;;  %v3789_v11 = vxor.u32 2147483648, %v7751_v47  ;;  %v3867_v14 = vshrl.u32 %v3849_v10, %v3865_v20  ;;  %v3870_v61 = vadd.s32 127, %v3869_v56  ;;  %v3956_v13 = vsel %vm3954_vm12, %v3955_v16, %v11534_v35  ;;  %v14134_v10 = vld [vmem:[#allocation35_spill] sm:$0xff] }
 0x3b2   :  { %v3786_v26 = vxor.u32 2147483648, %v7753_v4  ;;  %v3957_v41 = vadd.s32 %v3956_v13, %v3952_v53  ;;  %v4008_v51 = vand.u32 8388607, %v4001_v33  ;;  %vm4012_vm10 = vcmp.gt.s32.totalorder %v4011_v28, 0 }
 0x3b3   :  { %v3790_v58 = vsel %vm3788_vm11, %v3789_v11, %v7753_v4  ;;  %v3868_v27 = vor.u32 %v3867_v14, %v3866_v0  ;;  %v3871_v30 = vshll.u32 %v3870_v61, 23  ;;  %v4013_v43 = vsel %vm4012_vm10, %v4011_v28, 0 }
 0x3b4   :  { %v3787_v36 = vsel %vm3785_vm8, %v7751_v47, %v3786_v26  ;;  %v3958_v31 = vadd.s32 536870912, %v3957_v41  ;;  %v4015_v29 = vand.u32 31, %v4013_v43  ;;  %v3886_v50 = vadd.s32 3, %v3882_v49 }
 0x3b5   :  { %v3791_v12 = vsel %vm3784_vm7, %v3787_v36, %v3790_v58  ;;  %v3872_v6 = vor.u32 4788187, %v3871_v30  ;;  %v3875_v54 = vcvt.s32.f32 %v3868_v27  ;;  %v4009_v59 = vor.u32 8388608, %v4008_v51 }
 0x3b6   :  { %v3792_v3 = vsel %vm3781_vm4, nan, %v3791_v12  ;;  %v11560_v45 = vshrl.u32 %v3958_v31, 30  ;;  %v4016_v21 = vsub.s32 32, %v4015_v29  ;;  %v4014_v8 = vshrl.u32 %v4013_v43, 5 }
 0x3b7   :  { %v3873_v1 = vand.u32 2147483647, %v3872_v6  ;;  %v4018_v37 = vshll.u32 %v14044_v38, %v4015_v29  ;;  %v4021_v40 = vshll.u32 %v14038_v18, %v4015_v29  ;;  %7049 = vst [vmem:[#allocation5 + $0x100] sm:$0xff] %v3792_v3  ;;  %v4024_v42 = vshll.u32 %v14039_v24, %v4015_v29 }
 0x3b8   :  { %v3960_v25 = vshll.u32 %v11560_v45, 30  ;;  %v4019_v62 = vshrl.u32 %v14038_v18, %v4016_v21  ;;  %v4027_v57 = vshll.u32 %v14040_v19, %v4015_v29  ;;  %v4022_v2 = vshrl.u32 %v14039_v24, %v4016_v21 }
 0x3b9   :  { %v3876_v46 = vmul.f32 %v3875_v54, %v3873_v1  ;;  %v4025_v44 = vshrl.u32 %v14040_v19, %v4016_v21  ;;  %v4028_v17 = vshrl.u32 %v14041_v34, %v4016_v21  ;;  %v11571_v35 = vand.u32 3, %v3886_v50 }
 0x3ba   :  { %v11573_v23 = vsub.s32 %v3957_v41, %v3960_v25  ;;  %v4030_v63 = vshll.u32 %v14041_v34, %v4015_v29  ;;  %v4108_v48 = vand.u32 2139095040, %v14134_v10  ;;  %v3953_v53 = vadd.s32 %v11533_v32, %v11539_v7 }
 0x3bb   :  { %v3877_v5 = vxor.u32 2147483648, %v3876_v46  ;;  %v4017_v55 = vshrl.u32 %v14044_v38, %v4016_v21  ;;  %v11580_v20 = vshll.u32 %v4009_v59, 8  ;;  %v4020_v56 = vor.u32 %v4019_v62, %v4018_v37 }
 0x3bc   :  { %v3963_v0 = vsub.s32 0, %v11573_v23  ;;  %v4023_v16 = vor.u32 %v4022_v2, %v4021_v40  ;;  %v4031_v47 = vshrl.u32 %v14042_v60, %v4016_v21  ;;  %v4026_v28 = vor.u32 %v4025_v44, %v4024_v42 }
 0x3bd   :  { %v3878_v49 = vsel %vm3795_vm6, %v3877_v5, %v3876_v46  ;;  %v4029_v4 = vor.u32 %v4028_v17, %v4027_v57  ;;  %vm4033_vm14 = vcmp.lt.s32.totalorder %v4014_v8, 1  ;;  %v4109_v14 = vshrl.u32 %v4108_v48, 23 }
 0x3be   :  { %v3881_v32 = vsel %vm11521_vm5, %v14125_v15, %v3878_v49  ;;  %v7237_v7 = vmin.u32 %v3963_v0, %v11573_v23  ;;  %v4032_v11 = vor.u32 %v4031_v47, %v4030_v63  ;;  %vm3899_vm13 = vcmp.lt.s32.totalorder %v14128_v52, 0 }
 0x3bf   :  { %7754 = vcosq.f32 %v3881_v32  ;;  %vm4034_vm0 = vcmp.lt.s32.totalorder %v4014_v8, 2  ;;  %vm4035_vm1 = vcmp.lt.s32.totalorder %v4014_v8, 3  ;;  %vm4036_vm15 = vcmp.lt.s32.totalorder %v4014_v8, 4 }
 0x3c0   :  { %7756 = vsinq.f32 %v3881_v32  ;;  %v3965_v61 = vclz %v7237_v7  ;;  %v4037_v13 = vsel %vm4033_vm14, %v4017_v55, %v4020_v56  ;;  %v4041_v26 = vsel %vm4033_vm14, %v4020_v56, %v4023_v16 }
 0x3c1   :  { %v3983_v41 = vsub.s32 4, %v11560_v45  ;;  %v4038_v39 = vsel %vm4036_vm15, %v4026_v28, 2102212464  ;;  %v4042_v51 = vsel %vm4036_vm15, %v4029_v4, 920167782  ;;  %v4045_v58 = vsel %vm4033_vm14, %v4023_v16, %v4026_v28 }
 0x3c2   :  { %v7238_v27 = vadd.s32 4294967294, %v3965_v61  ;;  %v4039_v30 = vsel %vm4035_vm1, %v4023_v16, %v4038_v39  ;;  %v4043_v43 = vsel %vm4035_vm1, %v4026_v28, %v4042_v51  ;;  %v4046_v36 = vsel %vm4036_vm15, %v4032_v11, 1326507024 }
 0x3c3   :  { %v4040_v31 = vsel %vm4034_vm0, %v4037_v13, %v4039_v30  ;;  %v4044_v29 = vsel %vm4034_vm0, %v4041_v26, %v4043_v43  ;;  %v4047_v12 = vsel %vm4035_vm1, %v4029_v4, %v4046_v36  ;;  %v7244_v6 = vadd.s32 4294967169, %v4109_v14 }
 0x3c4   :  { %vm7239_vm2 = vcmp.lt.s32.totalorder %v7238_v27, 0  ;;  %v4048_v54 = vsel %vm4034_vm0, %v4045_v58, %v4047_v12  ;;  %v11602_v50 = vmul.u32.u64.low %v11580_v20, %v4044_v29  ;;  %v11603_v3 = vmul.u32.u64.high %v11580_v20, %v4044_v29, %v11602_v50 }
 0x3c5   :  { %v3968_v59 = vsel %vm7239_vm2, 0, %v7238_v27  ;;  %v11607_v21 = vmul.u32.u64.low %v11580_v20, %v4048_v54  ;;  %v11608_v1 = vmul.u32.u64.high %v11580_v20, %v4048_v54, %v11607_v21  ;;  %v4105_v37 = vand.u32 2147483647, %v14134_v10 }
 0x3c6   :  { %vm11613_vm3 = vcmp.le.f32.partialorder %v3897_v22, 0.7853982  ;;  %v3969_v8 = vsub.s32 32, %v3968_v59  ;;  %v3970_v25 = vshll.u32 %v11573_v23, %v3968_v59  ;;  %v3973_v62 = vsub.s32 4294967266, %v3968_v59 }
 0x3c7   :  { %vm3888_vm5 = vcmp.lt.s32.totalorder %v11571_v35, 2  ;;  %vm3889_vm6 = vcmp.eq.s32.totalorder %v11571_v35, 0  ;;  %v4056_v42 = vmul.u32 %v11580_v20, %v4040_v31  ;;  %v4115_v57 = vadd.s32 1, %v7244_v6 }
 0x3c8   :  { %v3971_v46 = vshrl.u32 %v3953_v53, %v3969_v8  ;;  %v3974_v2 = vadd.s32 127, %v3973_v62  ;;  %v3984_v22 = vsel %vm3899_vm13, %v3983_v41, %v11560_v45  ;;  %v4059_v44 = vadd.s32 1, %v11603_v3 }
 0x3c9   :  { %v7755_v17 = vpop.eup %7754  ;;  %vm3892_vm4 = vcmp.eq.s32.totalorder %v11571_v35, 2  ;;  %vm4058_vm7 = vc.u32 %v11608_v1, %v11602_v50  ;;  %v4112_v23 = vand.u32 8388607, %v4105_v37  ;;  %vm4116_vm8 = vcmp.gt.s32.totalorder %v4115_v57, 0 }
 0x3ca   :  { %v7757_v63 = vpop.eup %7756  ;;  %v3893_v48 = vxor.u32 2147483648, %v7755_v17  ;;  %v3972_v5 = vor.u32 %v3971_v46, %v3970_v25  ;;  %v3975_v53 = vshll.u32 %v3974_v2, 23  ;;  %v4060_v55 = vsel %vm4058_vm7, %v4059_v44, %v11603_v3 }
 0x3cb   :  { %v3890_v20 = vxor.u32 2147483648, %v7757_v63  ;;  %v3986_v45 = vsel %vm11613_vm3, 0, %v3984_v22  ;;  %v4061_v0 = vadd.s32 %v4060_v55, %v4056_v42  ;;  %v4117_v56 = vsel %vm4116_vm8, %v4115_v57, 0  ;;  %v14137_v55 = vld [vmem:[#allocation36_spill] sm:$0xff] }
 0x3cc   :  { %vm3885_vm9 = vweird.f32 %v14125_v15  ;;  %v3894_v16 = vsel %vm3892_vm4, %v3893_v48, %v7757_v63  ;;  %v3976_v47 = vor.u32 4788187, %v3975_v53  ;;  %v3979_v49 = vcvt.s32.f32 %v3972_v5 }
 0x3cd   :  { %v3891_v28 = vsel %vm3889_vm6, %v7755_v17, %v3890_v20  ;;  %v4062_v4 = vadd.s32 536870912, %v4061_v0  ;;  %v4119_v32 = vand.u32 31, %v4117_v56  ;;  %v3990_v14 = vadd.s32 3, %v3986_v45 }
 0x3ce   :  { %v3895_v7 = vsel %vm3888_vm5, %v3891_v28, %v3894_v16  ;;  %v3977_v11 = vand.u32 2147483647, %v3976_v47  ;;  %v4113_v61 = vor.u32 8388608, %v4112_v23  ;;  %v4118_v41 = vshrl.u32 %v4117_v56, 5 }
 0x3cf   :  { %v3896_v13 = vsel %vm3885_vm9, nan, %v3895_v7  ;;  %v11638_v26 = vshrl.u32 %v4062_v4, 30  ;;  %v4120_v39 = vsub.s32 32, %v4119_v32  ;;  %v4122_v51 = vshll.u32 %v14044_v38, %v4119_v32 }
 0x3d0   :  { %v3980_v15 = vmul.f32 %v3979_v49, %v3977_v11  ;;  %v4125_v58 = vshll.u32 %v14038_v18, %v4119_v32  ;;  %7050 = vst [vmem:[#allocation5 + $0x108] sm:$0xff] %v3896_v13  ;;  %v4128_v35 = vshll.u32 %v14039_v24, %v4119_v32  ;;  %v4131_v43 = vshll.u32 %v14040_v19, %v4119_v32 }
 0x3d1   :  { %v4064_v27 = vshll.u32 %v11638_v26, 30  ;;  %v4123_v30 = vshrl.u32 %v14038_v18, %v4120_v39  ;;  %v4126_v31 = vshrl.u32 %v14039_v24, %v4120_v39  ;;  %v4129_v29 = vshrl.u32 %v14040_v19, %v4120_v39 }
 0x3d2   :  { %v3981_v36 = vxor.u32 2147483648, %v3980_v15  ;;  %v4132_v12 = vshrl.u32 %v14041_v34, %v4120_v39  ;;  %v11649_v6 = vand.u32 3, %v3990_v14  ;;  %vm4137_vm11 = vcmp.lt.s32.totalorder %v4118_v41, 1 }
 0x3d3   :  { %v11651_v54 = vsub.s32 %v4061_v0, %v4064_v27  ;;  %v11653_v3 = vshll.u32 %v4113_v61, 8  ;;  %v4124_v21 = vor.u32 %v4123_v30, %v4122_v51  ;;  %v4127_v8 = vor.u32 %v4126_v31, %v4125_v58 }
 0x3d4   :  { %v3982_v59 = vsel %vm3899_vm13, %v3981_v36, %v3980_v15  ;;  %v4134_v25 = vshll.u32 %v14041_v34, %v4119_v32  ;;  %v4121_v57 = vshrl.u32 %v14044_v38, %v4120_v39  ;;  %v4133_v46 = vor.u32 %v4132_v12, %v4131_v43 }
 0x3d5   :  { %v3985_v62 = vsel %vm11613_vm3, %v14128_v52, %v3982_v59  ;;  %v4067_v42 = vsub.s32 0, %v11651_v54  ;;  %v4130_v2 = vor.u32 %v4129_v29, %v4128_v35  ;;  %v4135_v22 = vshrl.u32 %v14042_v60, %v4120_v39 }
 0x3d6   :  { %7758 = vcosq.f32 %v3985_v62  ;;  %vm4140_vm12 = vcmp.lt.s32.totalorder %v4118_v41, 4  ;;  %vm4138_vm10 = vcmp.lt.s32.totalorder %v4118_v41, 2  ;;  %vm4139_vm14 = vcmp.lt.s32.totalorder %v4118_v41, 3 }
 0x3d7   :  { %7760 = vsinq.f32 %v3985_v62  ;;  %v7241_v44 = vmin.u32 %v4067_v42, %v11651_v54  ;;  %v4136_v17 = vor.u32 %v4135_v22, %v4134_v25  ;;  %v4142_v23 = vsel %vm4140_vm12, %v4130_v2, 2102212464 }
 0x3d8   :  { %v4145_v40 = vsel %vm4137_vm11, %v4124_v21, %v4127_v8  ;;  %v4146_v63 = vsel %vm4140_vm12, %v4133_v46, 920167782  ;;  %v4057_v48 = vadd.s32 %v11602_v50, %v11608_v1  ;;  %v4141_v53 = vsel %vm4137_vm11, %v4121_v57, %v4124_v21 }
 0x3d9   :  { %v4069_v5 = vclz %v7241_v44  ;;  %v4212_v20 = vand.u32 2139095040, %v14137_v55  ;;  %v4143_v45 = vsel %vm4139_vm14, %v4127_v8, %v4142_v23  ;;  %v4147_v0 = vsel %vm4139_vm14, %v4130_v2, %v4146_v63 }
 0x3da   :  { %v4149_v56 = vsel %vm4137_vm11, %v4127_v8, %v4130_v2  ;;  %v4150_v16 = vsel %vm4140_vm12, %v4136_v17, 1326507024  ;;  %vm3989_vm13 = vweird.f32 %v14128_v52  ;;  %v4087_v49 = vsub.s32 4, %v11638_v26 }
 0x3db   :  { %v7242_v47 = vadd.s32 4294967294, %v4069_v5  ;;  %v4148_v50 = vsel %vm4138_vm10, %v4145_v40, %v4147_v0  ;;  %v4151_v1 = vsel %vm4139_vm14, %v4133_v46, %v4150_v16  ;;  %v4144_v28 = vsel %vm4138_vm10, %v4141_v53, %v4143_v45 }
 0x3dc   :  { %v4152_v4 = vsel %vm4138_vm10, %v4149_v56, %v4151_v1  ;;  %v11683_v32 = vmul.u32.u64.low %v11653_v3, %v4148_v50  ;;  %v11684_v7 = vmul.u32.u64.high %v11653_v3, %v4148_v50, %v11683_v32  ;;  %v4213_v61 = vshrl.u32 %v4212_v20, 23 }
 0x3dd   :  { %vm7243_vm0 = vcmp.lt.s32.totalorder %v7242_v47, 0  ;;  %v11688_v11 = vmul.u32.u64.low %v11653_v3, %v4152_v4  ;;  %v11689_v14 = vmul.u32.u64.high %v11653_v3, %v4152_v4, %v11688_v11  ;;  %vm3992_vm1 = vcmp.lt.s32.totalorder %v11649_v6, 2 }
 0x3de   :  { %vm11694_vm15 = vcmp.le.f32.partialorder %v4001_v33, 0.7853982  ;;  %vm4003_vm2 = vcmp.lt.s32.totalorder %v14133_v9, 0  ;;  %v4072_v41 = vsel %vm7243_vm0, 0, %v7242_v47  ;;  %v7248_v58 = vadd.s32 4294967169, %v4213_v61 }
 0x3df   :  { %v4073_v39 = vsub.s32 32, %v4072_v41  ;;  %v4074_v15 = vshll.u32 %v11651_v54, %v4072_v41  ;;  %v4077_v51 = vsub.s32 4294967266, %v4072_v41  ;;  %vm3993_vm3 = vcmp.eq.s32.totalorder %v11649_v6, 0 }
 0x3e0   :  { %v7759_v27 = vpop.eup %7758  ;;  %vm3996_vm5 = vcmp.eq.s32.totalorder %v11649_v6, 2  ;;  %v4160_v30 = vmul.u32 %v11653_v3, %v4144_v28  ;;  %v4163_v33 = vadd.s32 1, %v11684_v7  ;;  %v4088_v29 = vsel %vm4003_vm2, %v4087_v49, %v11638_v26 }
 0x3e1   :  { %v7761_v35 = vpop.eup %7760  ;;  %v3997_v43 = vxor.u32 2147483648, %v7759_v27  ;;  %v4075_v36 = vshrl.u32 %v4057_v48, %v4073_v39  ;;  %v4078_v31 = vadd.s32 127, %v4077_v51  ;;  %vm4162_vm6 = vc.u32 %v11689_v14, %v11683_v32 }
 0x3e2   :  { %v3994_v12 = vxor.u32 2147483648, %v7761_v35  ;;  %v4209_v54 = vand.u32 2147483647, %v14137_v55  ;;  %v4219_v59 = vadd.s32 1, %v7248_v58  ;;  %v4164_v25 = vsel %vm4162_vm6, %v4163_v33, %v11684_v7  ;;  %v14140_v58 = vld [vmem:[#allocation37_spill] sm:$0xff] }
 0x3e3   :  { %v3998_v21 = vsel %vm3996_vm5, %v3997_v43, %v7761_v35  ;;  %v4076_v8 = vor.u32 %v4075_v36, %v4074_v15  ;;  %v4079_v3 = vshll.u32 %v4078_v31, 23  ;;  %v4090_v42 = vsel %vm11694_vm15, 0, %v4088_v29 }
 0x3e4   :  { %v3995_v62 = vsel %vm3993_vm3, %v7759_v27, %v3994_v12  ;;  %v4165_v57 = vadd.s32 %v4164_v25, %v4160_v30  ;;  %vm4220_vm4 = vcmp.gt.s32.totalorder %v4219_v59, 0  ;;  %v4094_v63 = vadd.s32 3, %v4090_v42 }
 0x3e5   :  { %v3999_v26 = vsel %vm3992_vm1, %v3995_v62, %v3998_v21  ;;  %v4080_v46 = vor.u32 4788187, %v4079_v3  ;;  %v4083_v2 = vcvt.s32.f32 %v4076_v8  ;;  %v4221_v22 = vsel %vm4220_vm4, %v4219_v59, 0 }
 0x3e6   :  { %v4000_v44 = vsel %vm3989_vm13, nan, %v3999_v26  ;;  %v4166_v17 = vadd.s32 536870912, %v4165_v57  ;;  %v4223_v23 = vand.u32 31, %v4221_v22  ;;  %v4216_v5 = vand.u32 8388607, %v4209_v54 }
 0x3e7   :  { %v4081_v40 = vand.u32 2147483647, %v4080_v46  ;;  %7051 = vst [vmem:[#allocation5 + $0x110] sm:$0xff] %v4000_v44  ;;  %v11721_v53 = vshrl.u32 %v4221_v22, 5  ;;  %v11732_v7 = vand.u32 3, %v4094_v63  ;;  %vm4107_vm7 = vcmp.lt.s32.totalorder %v14134_v10, 0 }
 0x3e8   :  { %v4167_v48 = vshrl.u32 %v4166_v17, 30  ;;  %v4224_v20 = vsub.s32 32, %v4223_v23  ;;  %v4226_v45 = vshll.u32 %v14044_v38, %v4223_v23  ;;  %v4229_v0 = vshll.u32 %v14038_v18, %v4223_v23 }
 0x3e9   :  { %v4084_v6 = vmul.f32 %v4083_v2, %v4081_v40  ;;  %v4232_v52 = vshll.u32 %v14039_v24, %v4223_v23  ;;  %v4235_v47 = vshll.u32 %v14040_v19, %v4223_v23  ;;  %v4238_v49 = vshll.u32 %v14041_v34, %v4223_v23 }
 0x3ea   :  { %v4168_v56 = vshll.u32 %v4167_v48, 30  ;;  %v4227_v16 = vshrl.u32 %v14038_v18, %v4224_v20  ;;  %v4230_v1 = vshrl.u32 %v14039_v24, %v4224_v20  ;;  %v4233_v28 = vshrl.u32 %v14040_v19, %v4224_v20 }
 0x3eb   :  { %v4085_v50 = vxor.u32 2147483648, %v4084_v6  ;;  %v4236_v4 = vshrl.u32 %v14041_v34, %v4224_v20  ;;  %v4217_v61 = vor.u32 8388608, %v4216_v5  ;;  %v4239_v41 = vshrl.u32 %v14042_v60, %v4224_v20 }
 0x3ec   :  { %v11734_v11 = vsub.s32 %v4165_v57, %v4168_v56  ;;  %v4225_v15 = vshrl.u32 %v14044_v38, %v4224_v20  ;;  %v4228_v51 = vor.u32 %v4227_v16, %v4226_v45  ;;  %v4316_v27 = vand.u32 2139095040, %v14140_v58 }
 0x3ed   :  { %v4086_v39 = vsel %vm4003_vm2, %v4085_v50, %v4084_v6  ;;  %v4231_v35 = vor.u32 %v4230_v1, %v4229_v0  ;;  %v4234_v43 = vor.u32 %v4233_v28, %v4232_v52  ;;  %v4237_v36 = vor.u32 %v4236_v4, %v4235_v47 }
 0x3ee   :  { %v4089_v30 = vsel %vm11694_vm15, %v14133_v9, %v4086_v39  ;;  %v4171_v33 = vsub.s32 0, %v11734_v11  ;;  %v4240_v31 = vor.u32 %v4239_v41, %v4238_v49  ;;  %vm4241_vm8 = vcmp.lt.s32.totalorder %v11721_v53, 1 }
 0x3ef   :  { %7762 = vcosq.f32 %v4089_v30  ;;  %vm11749_vm9 = vcmp.le.f32.partialorder %v4105_v37, 0.7853982  ;;  %v4257_v13 = vshll.u32 %v4217_v61, 8  ;;  %v4191_v59 = vsub.s32 4, %v4167_v48 }
 0x3f0   :  { %7764 = vsinq.f32 %v4089_v30  ;;  %v7245_v12 = vmin.u32 %v4171_v33, %v11734_v11  ;;  %vm4243_vm11 = vcmp.lt.s32.totalorder %v11721_v53, 3  ;;  %vm4244_vm12 = vcmp.lt.s32.totalorder %v11721_v53, 4 }
 0x3f1   :  { %v4317_v21 = vshrl.u32 %v4316_v27, 23  ;;  %vm4242_vm10 = vcmp.lt.s32.totalorder %v11721_v53, 2  ;;  %v4249_v3 = vsel %vm4241_vm8, %v4228_v51, %v4231_v35  ;;  %v4253_v25 = vsel %vm4241_vm8, %v4231_v35, %v4234_v43 }
 0x3f2   :  { %v4173_v8 = vclz %v7245_v12  ;;  %vm4096_vm14 = vcmp.lt.s32.totalorder %v11732_v7, 2  ;;  %v4245_v37 = vsel %vm4241_vm8, %v4225_v15, %v4228_v51  ;;  %v4246_v62 = vsel %vm4244_vm12, %v4234_v43, 2102212464 }
 0x3f3   :  { %v4250_v42 = vsel %vm4244_vm12, %v4237_v36, 920167782  ;;  %v4254_v57 = vsel %vm4244_vm12, %v4240_v31, 1326507024  ;;  %vm4093_vm13 = vweird.f32 %v14133_v9  ;;  %v4247_v46 = vsel %vm4243_vm11, %v4231_v35, %v4246_v62 }
 0x3f4   :  { %v7246_v26 = vadd.s32 4294967294, %v4173_v8  ;;  %v4251_v2 = vsel %vm4243_vm11, %v4234_v43, %v4250_v42  ;;  %v4255_v22 = vsel %vm4243_vm11, %v4237_v36, %v4254_v57  ;;  %v4161_v44 = vadd.s32 %v11683_v32, %v11689_v14 }
 0x3f5   :  { %v4252_v17 = vsel %vm4242_vm10, %v4249_v3, %v4251_v2  ;;  %v4256_v23 = vsel %vm4242_vm10, %v4253_v25, %v4255_v22  ;;  %v7252_v40 = vadd.s32 4294967169, %v4317_v21  ;;  %v4192_v63 = vsel %vm4107_vm7, %v4191_v59, %v4167_v48 }
 0x3f6   :  { %vm7247_vm0 = vcmp.lt.s32.totalorder %v7246_v26, 0  ;;  %v11773_v5 = vmul.u32.u64.low %v4257_v13, %v4256_v23  ;;  %v11774_v20 = vmul.u32.u64.high %v4257_v13, %v4256_v23, %v11773_v5  ;;  %v4248_v45 = vsel %vm4242_vm10, %v4245_v37, %v4247_v46 }
 0x3f7   :  { %v4176_v6 = vsel %vm7247_vm0, 0, %v7246_v26  ;;  %v11778_v0 = vmul.u32.u64.low %v4257_v13, %v4252_v17  ;;  %v11779_v32 = vmul.u32.u64.high %v4257_v13, %v4252_v17, %v11778_v0  ;;  %v4323_v16 = vadd.s32 1, %v7252_v40 }
 0x3f8   :  { %v4177_v14 = vsub.s32 32, %v4176_v6  ;;  %v4178_v52 = vshll.u32 %v11734_v11, %v4176_v6  ;;  %v4181_v56 = vsub.s32 4294967266, %v4176_v6  ;;  %vm4097_vm1 = vcmp.eq.s32.totalorder %v11732_v7, 0 }
 0x3f9   :  { %v7763_v47 = vpop.eup %7762  ;;  %vm4100_vm15 = vcmp.eq.s32.totalorder %v11732_v7, 2  ;;  %v4194_v48 = vsel %vm11749_vm9, 0, %v4192_v63  ;;  %v4313_v53 = vand.u32 2147483647, %v14140_v58  ;;  %v4264_v4 = vmul.u32 %v4257_v13, %v4248_v45 }
 0x3fa   :  { %v7765_v49 = vpop.eup %7764  ;;  %v4101_v50 = vxor.u32 2147483648, %v7763_v47  ;;  %v4179_v1 = vshrl.u32 %v4161_v44, %v4177_v14  ;;  %v4182_v28 = vadd.s32 127, %v4181_v56  ;;  %vm4266_vm2 = vc.u32 %v11774_v20, %v11778_v0 }
 0x3fb   :  { %v4098_v61 = vxor.u32 2147483648, %v7765_v49  ;;  %v4267_v11 = vadd.s32 1, %v11779_v32  ;;  %vm4324_vm3 = vcmp.gt.s32.totalorder %v4323_v16, 0  ;;  %v4320_v33 = vand.u32 8388607, %v4313_v53 }
 0x3fc   :  { %v4102_v41 = vsel %vm4100_vm15, %v4101_v50, %v7765_v49  ;;  %v4180_v39 = vor.u32 %v4179_v1, %v4178_v52  ;;  %v4183_v15 = vshll.u32 %v4182_v28, 23  ;;  %v4325_v51 = vsel %vm4324_vm3, %v4323_v16, 0 }
 0x3fd   :  { %v4099_v27 = vsel %vm4097_vm1, %v7763_v47, %v4098_v61  ;;  %v4268_v30 = vsel %vm4266_vm2, %v4267_v11, %v11779_v32  ;;  %v4327_v35 = vand.u32 31, %v4325_v51  ;;  %v4198_v59 = vadd.s32 3, %v4194_v48  ;;  %v14143_v61 = vld [vmem:[#allocation38_spill] sm:$0xff] }
 0x3fe   :  { %v4103_v43 = vsel %vm4096_vm14, %v4099_v27, %v4102_v41  ;;  %v4184_v36 = vor.u32 4788187, %v4183_v15  ;;  %v4187_v31 = vcvt.s32.f32 %v4180_v39  ;;  %v4269_v12 = vadd.s32 %v4268_v30, %v4264_v4 }
 0x3ff   :  { %v4104_v13 = vsel %vm4093_vm13, nan, %v4103_v43  ;;  %v4328_v21 = vsub.s32 32, %v4327_v35  ;;  %v4330_v8 = vshll.u32 %v14044_v38, %v4327_v35  ;;  %v4333_v37 = vshll.u32 %v14038_v18, %v4327_v35 }
 0x400   :  { %v4185_v3 = vand.u32 2147483647, %v4184_v36  ;;  %v4270_v25 = vadd.s32 536870912, %v4269_v12  ;;  %v4336_v62 = vshll.u32 %v14039_v24, %v4327_v35  ;;  %7052 = vst [vmem:[#allocation5 + $0x118] sm:$0xff] %v4104_v13  ;;  %v4339_v9 = vshll.u32 %v14040_v19, %v4327_v35 }
 0x401   :  { %v4331_v7 = vshrl.u32 %v14038_v18, %v4328_v21  ;;  %v4334_v42 = vshrl.u32 %v14039_v24, %v4328_v21  ;;  %v4337_v57 = vshrl.u32 %v14040_v19, %v4328_v21  ;;  %v4326_v2 = vshrl.u32 %v4325_v51, 5 }
 0x402   :  { %v4188_v26 = vmul.f32 %v4187_v31, %v4185_v3  ;;  %v11807_v46 = vshrl.u32 %v4270_v25, 30  ;;  %v4340_v22 = vshrl.u32 %v14041_v34, %v4328_v21  ;;  %v4321_v44 = vor.u32 8388608, %v4320_v33 }
 0x403   :  { %v4342_v17 = vshll.u32 %v14041_v34, %v4327_v35  ;;  %v4343_v23 = vshrl.u32 %v14042_v60, %v4328_v21  ;;  %v11812_v63 = vand.u32 3, %v4198_v59  ;;  %v4329_v6 = vshrl.u32 %v14044_v38, %v4328_v21 }
 0x404   :  { %v4189_v40 = vxor.u32 2147483648, %v4188_v26  ;;  %v4272_v5 = vshll.u32 %v11807_v46, 30  ;;  %v4332_v45 = vor.u32 %v4331_v7, %v4330_v8  ;;  %v4335_v32 = vor.u32 %v4334_v42, %v4333_v37 }
 0x405   :  { %v4338_v14 = vor.u32 %v4337_v57, %v4336_v62  ;;  %v4341_v52 = vor.u32 %v4340_v22, %v4339_v9  ;;  %vm4345_vm5 = vcmp.lt.s32.totalorder %v4326_v2, 1  ;;  %vm4348_vm6 = vcmp.lt.s32.totalorder %v4326_v2, 4 }
 0x406   :  { %v4190_v56 = vsel %vm4107_vm7, %v4189_v40, %v4188_v26  ;;  %v11818_v16 = vsub.s32 %v4269_v12, %v4272_v5  ;;  %v4344_v48 = vor.u32 %v4343_v23, %v4342_v17  ;;  %vm4347_vm4 = vcmp.lt.s32.totalorder %v4326_v2, 3 }
 0x407   :  { %v4193_v47 = vsel %vm11749_vm9, %v14134_v10, %v4190_v56  ;;  %v4361_v49 = vshll.u32 %v4321_v44, 8  ;;  %vm4346_vm8 = vcmp.lt.s32.totalorder %v4326_v2, 2  ;;  %v4350_v1 = vsel %vm4348_vm6, %v4338_v14, 2102212464 }
 0x408   :  { %7766 = vcosq.f32 %v4193_v47  ;;  %v4275_v50 = vsub.s32 0, %v11818_v16  ;;  %v4353_v28 = vsel %vm4345_vm5, %v4332_v45, %v4335_v32  ;;  %v4354_v4 = vsel %vm4348_vm6, %v4341_v52, 920167782 }
 0x409   :  { %7768 = vsinq.f32 %v4193_v47  ;;  %v4420_v11 = vand.u32 2139095040, %v14143_v61  ;;  %v4349_v29 = vsel %vm4345_vm5, %v4329_v6, %v4332_v45  ;;  %v4355_v39 = vsel %vm4347_vm4, %v4338_v14, %v4354_v4 }
 0x40a   :  { %v7249_v41 = vmin.u32 %v4275_v50, %v11818_v16  ;;  %v4351_v15 = vsel %vm4347_vm4, %v4335_v32, %v4350_v1  ;;  %v4356_v51 = vsel %vm4346_vm8, %v4353_v28, %v4355_v39  ;;  %v4357_v27 = vsel %vm4345_vm5, %v4335_v32, %v4338_v14  ;;  %v14146_v39 = vld [vmem:[#allocation39_spill] sm:$0xff] }
 0x40b   :  { %v4358_v30 = vsel %vm4348_vm6, %v4344_v48, 1326507024  ;;  %vm4200_vm7 = vcmp.lt.s32.totalorder %v11812_v63, 2  ;;  %vm4211_vm9 = vcmp.lt.s32.totalorder %v14137_v55, 0  ;;  %v4421_v31 = vshrl.u32 %v4420_v11, 23 }
 0x40c   :  { %v4277_v33 = vclz %v7249_v41  ;;  %v4359_v35 = vsel %vm4347_vm4, %v4341_v52, %v4358_v30  ;;  %v11838_v43 = vmul.u32.u64.low %v4361_v49, %v4356_v51  ;;  %v11839_v36 = vmul.u32.u64.high %v4361_v49, %v4356_v51, %v11838_v43 }
 0x40d   :  { %v4295_v13 = vsub.s32 4, %v11807_v46  ;;  %v4352_v59 = vsel %vm4346_vm8, %v4349_v29, %v4351_v15  ;;  %v4360_v21 = vsel %vm4346_vm8, %v4357_v27, %v4359_v35  ;;  %v4417_v25 = vand.u32 2147483647, %v14143_v61 }
 0x40e   :  { %v7250_v12 = vadd.s32 4294967294, %v4277_v33  ;;  %v11845_v8 = vmul.u32.u64.low %v4361_v49, %v4360_v21  ;;  %v11846_v3 = vmul.u32.u64.high %v4361_v49, %v4360_v21, %v11845_v8  ;;  %v7256_v37 = vadd.s32 4294967169, %v4421_v31 }
 0x40f   :  { %vm4201_vm11 = vcmp.eq.s32.totalorder %v11812_v63, 0  ;;  %vm4204_vm12 = vcmp.eq.s32.totalorder %v11812_v63, 2  ;;  %v4265_v62 = vadd.s32 %v11778_v0, %v11774_v20  ;;  %v4368_v42 = vmul.u32 %v4361_v49, %v4352_v59 }
 0x410   :  { %vm7251_vm10 = vcmp.lt.s32.totalorder %v7250_v12, 0  ;;  %v4371_v57 = vadd.s32 1, %v11839_v36  ;;  %v4427_v9 = vadd.s32 1, %v7256_v37  ;;  %v4296_v17 = vsel %vm4211_vm9, %v4295_v13, %v11807_v46 }
 0x411   :  { %v4280_v7 = vsel %vm7251_vm10, 0, %v7250_v12  ;;  %vm4370_vm14 = vc.u32 %v11846_v3, %v11838_v43  ;;  %v4424_v20 = vand.u32 8388607, %v4417_v25  ;;  %vm4197_vm0 = vweird.f32 %v14134_v10 }
 0x412   :  { %v7767_v26 = vpop.eup %7766  ;;  %v4281_v2 = vsub.s32 32, %v4280_v7  ;;  %v4282_v22 = vshll.u32 %v11818_v16, %v4280_v7  ;;  %v4285_v44 = vsub.s32 4294967266, %v4280_v7  ;;  %vm4428_vm13 = vcmp.gt.s32.totalorder %v4427_v9, 0 }
 0x413   :  { %v7769_v23 = vpop.eup %7768  ;;  %v4205_v40 = vxor.u32 2147483648, %v7767_v26  ;;  %v4372_v45 = vsel %vm4370_vm14, %v4371_v57, %v11839_v36  ;;  %v4429_v14 = vsel %vm4428_vm13, %v4427_v9, 0  ;;  %vm11870_vm1 = vcmp.le.f32.partialorder %v4209_v54, 0.7853982 }
 0x414   :  { %v4202_v0 = vxor.u32 2147483648, %v7769_v23  ;;  %v4283_v5 = vshrl.u32 %v4265_v62, %v4281_v2  ;;  %v4286_v6 = vadd.s32 127, %v4285_v44  ;;  %v4373_v46 = vadd.s32 %v4372_v45, %v4368_v42 }
 0x415   :  { %v4206_v32 = vsel %vm4204_vm12, %v4205_v40, %v7769_v23  ;;  %v4298_v10 = vsel %vm11870_vm1, 0, %v4296_v17  ;;  %v4431_v50 = vand.u32 31, %v4429_v14  ;;  %v4425_v11 = vor.u32 8388608, %v4424_v20 }
 0x416   :  { %v4203_v52 = vsel %vm4201_vm11, %v7767_v26, %v4202_v0  ;;  %v4284_v16 = vor.u32 %v4283_v5, %v4282_v22  ;;  %v4287_v47 = vshll.u32 %v4286_v6, 23  ;;  %v4374_v49 = vadd.s32 536870912, %v4373_v46 }
 0x417   :  { %v4207_v48 = vsel %vm4200_vm7, %v4203_v52, %v4206_v32  ;;  %v4430_v54 = vshrl.u32 %v4429_v14, 5  ;;  %v4432_v29 = vsub.s32 32, %v4431_v50  ;;  %v4524_v15 = vand.u32 2139095040, %v14146_v39 }
 0x418   :  { %v4208_v1 = vsel %vm4197_vm0, nan, %v4207_v48  ;;  %v4288_v28 = vor.u32 4788187, %v4287_v47  ;;  %v4291_v4 = vcvt.s32.f32 %v4284_v16  ;;  %v11878_v41 = vshrl.u32 %v4374_v49, 30 }
 0x419   :  { %7053 = vst [vmem:[#allocation5 + $0x120] sm:$0xff] %v4208_v1  ;;  %v4434_v63 = vshll.u32 %v14044_v38, %v4431_v50  ;;  %v4437_v27 = vshll.u32 %v14038_v18, %v4431_v50  ;;  %v4440_v30 = vshll.u32 %v14039_v24, %v4431_v50  ;;  %v4435_v35 = vshrl.u32 %v14038_v18, %v4432_v29 }
 0x41a   :  { %v4289_v51 = vand.u32 2147483647, %v4288_v28  ;;  %v4376_v33 = vshll.u32 %v11878_v41, 30  ;;  %v4443_v36 = vshll.u32 %v14040_v19, %v4431_v50  ;;  %v4446_v31 = vshll.u32 %v14041_v34, %v4431_v50 }
 0x41b   :  { %v4438_v13 = vshrl.u32 %v14039_v24, %v4432_v29  ;;  %v4441_v59 = vshrl.u32 %v14040_v19, %v4432_v29  ;;  %v4444_v21 = vshrl.u32 %v14041_v34, %v4432_v29  ;;  %v4302_v8 = vadd.s32 3, %v4298_v10 }
 0x41c   :  { %v4292_v12 = vmul.f32 %v4291_v4, %v4289_v51  ;;  %v11891_v37 = vsub.s32 %v4373_v46, %v4376_v33  ;;  %v4447_v62 = vshrl.u32 %v14042_v60, %v4432_v29  ;;  %v11894_v7 = vshll.u32 %v4425_v11, 8 }
 0x41d   :  { %v4436_v57 = vor.u32 %v4435_v35, %v4434_v63  ;;  %v4439_v9 = vor.u32 %v4438_v13, %v4437_v27  ;;  %v4525_v26 = vshrl.u32 %v4524_v15, 23  ;;  %v4433_v22 = vshrl.u32 %v14044_v38, %v4432_v29 }
 0x41e   :  { %v4293_v42 = vxor.u32 2147483648, %v4292_v12  ;;  %v4379_v2 = vsub.s32 0, %v11891_v37  ;;  %v4445_v44 = vor.u32 %v4444_v21, %v4443_v36  ;;  %vm4449_vm15 = vcmp.lt.s32.totalorder %v4430_v54, 1 }
 0x41f   :  { %v4442_v23 = vor.u32 %v4441_v59, %v4440_v30  ;;  %v4448_v40 = vor.u32 %v4447_v62, %v4446_v31  ;;  %vm4452_vm2 = vcmp.lt.s32.totalorder %v4430_v54, 4  ;;  %vm4450_vm3 = vcmp.lt.s32.totalorder %v4430_v54, 2 }
 0x420   :  { %v4294_v17 = vsel %vm4211_vm9, %v4293_v42, %v4292_v12  ;;  %v7253_v0 = vmin.u32 %v4379_v2, %v11891_v37  ;;  %vm4451_vm5 = vcmp.lt.s32.totalorder %v4430_v54, 3  ;;  %vm4315_vm6 = vcmp.lt.s32.totalorder %v14140_v58, 0 }
 0x421   :  { %v4297_v20 = vsel %vm11870_vm1, %v14137_v55, %v4294_v17  ;;  %v4454_v5 = vsel %vm4452_vm2, %v4442_v23, 2102212464  ;;  %v4457_v6 = vsel %vm4449_vm15, %v4436_v57, %v4439_v9  ;;  %v4458_v45 = vsel %vm4452_vm2, %v4445_v44, 920167782 }
 0x422   :  { %7770 = vcosq.f32 %v4297_v20  ;;  %v4381_v32 = vclz %v7253_v0  ;;  %v4521_v46 = vand.u32 2147483647, %v14146_v39  ;;  %v7260_v14 = vadd.s32 4294967169, %v4525_v26 }
 0x423   :  { %7772 = vsinq.f32 %v4297_v20  ;;  %v4453_v52 = vsel %vm4449_vm15, %v4433_v22, %v4436_v57  ;;  %v4455_v56 = vsel %vm4451_vm5, %v4439_v9, %v4454_v5  ;;  %v4459_v16 = vsel %vm4451_vm5, %v4442_v23, %v4458_v45 }
 0x424   :  { %v4461_v47 = vsel %vm4449_vm15, %v4439_v9, %v4442_v23  ;;  %vm11915_vm4 = vcmp.le.f32.partialorder %v4313_v53, 0.7853982  ;;  %v4369_v10 = vadd.s32 %v11838_v43, %v11846_v3  ;;  %v7254_v49 = vadd.s32 4294967294, %v4381_v32 }
 0x425   :  { %v4460_v50 = vsel %vm4450_vm3, %v4457_v6, %v4459_v16  ;;  %v4462_v1 = vsel %vm4452_vm2, %v4448_v40, 1326507024  ;;  %v4399_v28 = vsub.s32 4, %v11878_v41  ;;  %vm4301_vm8 = vweird.f32 %v14137_v55 }
 0x426   :  { %v4463_v4 = vsel %vm4451_vm5, %v4445_v44, %v4462_v1  ;;  %v11926_v11 = vmul.u32.u64.low %v11894_v7, %v4460_v50  ;;  %v11927_v29 = vmul.u32.u64.high %v11894_v7, %v4460_v50, %v11926_v11  ;;  %vm7255_vm7 = vcmp.lt.s32.totalorder %v7254_v49, 0 }
 0x427   :  { %v4456_v53 = vsel %vm4450_vm3, %v4453_v52, %v4455_v56  ;;  %v4464_v43 = vsel %vm4450_vm3, %v4461_v47, %v4463_v4  ;;  %v4531_v3 = vadd.s32 1, %v7260_v14  ;;  %v4303_v15 = vand.u32 3, %v4302_v8 }
 0x428   :  { %v4384_v51 = vsel %vm7255_vm7, 0, %v7254_v49  ;;  %v11934_v63 = vmul.u32.u64.low %v11894_v7, %v4464_v43  ;;  %v11935_v27 = vmul.u32.u64.high %v11894_v7, %v4464_v43, %v11934_v63  ;;  %v4472_v36 = vmul.u32 %v11894_v7, %v4456_v53 }
 0x429   :  { %v4385_v30 = vsub.s32 32, %v4384_v51  ;;  %v4386_v33 = vshll.u32 %v11891_v37, %v4384_v51  ;;  %v4389_v35 = vsub.s32 4294967266, %v4384_v51  ;;  %vm4532_vm9 = vcmp.gt.s32.totalorder %v4531_v3, 0 }
 0x42a   :  { %v4475_v31 = vadd.s32 1, %v11927_v29  ;;  %v4528_v54 = vand.u32 8388607, %v4521_v46  ;;  %v4533_v12 = vsel %vm4532_vm9, %v4531_v3, 0  ;;  %v4400_v21 = vsel %vm4315_vm6, %v4399_v28, %v11878_v41 }
 0x42b   :  { %v4387_v13 = vshrl.u32 %v4369_v10, %v4385_v30  ;;  %v4390_v59 = vadd.s32 127, %v4389_v35  ;;  %v4535_v8 = vand.u32 31, %v4533_v12  ;;  %vm4304_vm11 = vcmp.lt.s32.totalorder %v4303_v15, 2 }
 0x42c   :  { %v7771_v62 = vpop.eup %7770  ;;  %vm4305_vm12 = vcmp.eq.s32.totalorder %v4303_v15, 0  ;;  %vm4308_vm10 = vcmp.eq.s32.totalorder %v4303_v15, 2  ;;  %vm4474_vm14 = vc.u32 %v11935_v27, %v11926_v11  ;;  %v4402_v2 = vsel %vm11915_vm4, 0, %v4400_v21 }
 0x42d   :  { %v7773_v37 = vpop.eup %7772  ;;  %v4309_v7 = vxor.u32 2147483648, %v7771_v62  ;;  %v4388_v42 = vor.u32 %v4387_v13, %v4386_v33  ;;  %v4391_v57 = vshll.u32 %v4390_v59, 23  ;;  %v4476_v9 = vsel %vm4474_vm14, %v4475_v31, %v11927_v29 }
 0x42e   :  { %v4306_v26 = vxor.u32 2147483648, %v7773_v37  ;;  %v4477_v22 = vadd.s32 %v4476_v9, %v4472_v36  ;;  %v4536_v41 = vsub.s32 32, %v4535_v8  ;;  %v4529_v40 = vor.u32 8388608, %v4528_v54 }
 0x42f   :  { %v4310_v44 = vsel %vm4308_vm10, %v4309_v7, %v7773_v37  ;;  %v4392_v17 = vor.u32 4788187, %v4391_v57  ;;  %v4395_v23 = vcvt.s32.f32 %v4388_v42  ;;  %v4538_v5 = vshll.u32 %v14044_v38, %v4535_v8 }
 0x430   :  { %v4307_v20 = vsel %vm4305_vm12, %v7771_v62, %v4306_v26  ;;  %v4478_v0 = vadd.s32 536870912, %v4477_v22  ;;  %v4541_v6 = vshll.u32 %v14038_v18, %v4535_v8  ;;  %v4539_v14 = vshrl.u32 %v14038_v18, %v4536_v41 }
 0x431   :  { %v4311_v45 = vsel %vm4304_vm11, %v4307_v20, %v4310_v44  ;;  %v4393_v32 = vand.u32 2147483647, %v4392_v17  ;;  %v4542_v52 = vshrl.u32 %v14039_v24, %v4536_v41  ;;  %v4544_v47 = vshll.u32 %v14039_v24, %v4535_v8  ;;  %v14151_v17 = vld [vmem:[#allocation40_spill] sm:$0xff] }
 0x432   :  { %v4312_v56 = vsel %vm4301_vm8, nan, %v4311_v45  ;;  %v4479_v16 = vshrl.u32 %v4478_v0, 30  ;;  %v4545_v10 = vshrl.u32 %v14040_v19, %v4536_v41  ;;  %v4534_v50 = vshrl.u32 %v4533_v12, 5 }
 0x433   :  { %v4396_v49 = vmul.f32 %v4395_v23, %v4393_v32  ;;  %v4547_v1 = vshll.u32 %v14040_v19, %v4535_v8  ;;  %v4548_v28 = vshrl.u32 %v14041_v34, %v4536_v41  ;;  %7054 = vst [vmem:[#allocation5 + $0x128] sm:$0xff] %v4312_v56  ;;  %v4406_v4 = vadd.s32 3, %v4402_v2 }
 0x434   :  { %v4480_v29 = vshll.u32 %v4479_v16, 30  ;;  %v4550_v53 = vshll.u32 %v14041_v34, %v4535_v8  ;;  %v11963_v43 = vshll.u32 %v4529_v40, 8  ;;  %v4537_v3 = vshrl.u32 %v14044_v38, %v4536_v41 }
 0x435   :  { %v4397_v55 = vxor.u32 2147483648, %v4396_v49  ;;  %v4549_v15 = vor.u32 %v4548_v28, %v4547_v1  ;;  %v4551_v51 = vshrl.u32 %v14042_v60, %v4536_v41  ;;  %v4540_v30 = vor.u32 %v4539_v14, %v4538_v5 }
 0x436   :  { %v11967_v63 = vsub.s32 %v4477_v22, %v4480_v29  ;;  %v4543_v33 = vor.u32 %v4542_v52, %v4541_v6  ;;  %v4546_v35 = vor.u32 %v4545_v10, %v4544_v47  ;;  %vm4553_vm13 = vcmp.lt.s32.totalorder %v4534_v50, 1 }
 0x437   :  { %v4398_v36 = vsel %vm4315_vm6, %v4397_v55, %v4396_v49  ;;  %v4552_v31 = vor.u32 %v4551_v51, %v4550_v53  ;;  %vm4556_vm0 = vcmp.lt.s32.totalorder %v4534_v50, 4  ;;  %vm4554_vm1 = vcmp.lt.s32.totalorder %v4534_v50, 2 }
 0x438   :  { %v4401_v54 = vsel %vm11915_vm4, %v14140_v58, %v4398_v36  ;;  %v4483_v12 = vsub.s32 0, %v11967_v63  ;;  %vm4555_vm15 = vcmp.lt.s32.totalorder %v4534_v50, 3  ;;  %v4557_v13 = vsel %vm4553_vm13, %v4537_v3, %v4540_v30 }
 0x439   :  { %7774 = vcosq.f32 %v4401_v54  ;;  %v4558_v59 = vsel %vm4556_vm0, %v4546_v35, 2102212464  ;;  %v4562_v21 = vsel %vm4556_vm0, %v4549_v15, 920167782  ;;  %v4561_v37 = vsel %vm4553_vm13, %v4540_v30, %v4543_v33 }
 0x43a   :  { %7776 = vsinq.f32 %v4401_v54  ;;  %v7257_v8 = vmin.u32 %v4483_v12, %v11967_v63  ;;  %v4559_v62 = vsel %vm4555_vm15, %v4543_v33, %v4558_v59  ;;  %v4407_v48 = vand.u32 3, %v4406_v4 }
 0x43b   :  { %v4563_v7 = vsel %vm4555_vm15, %v4546_v35, %v4562_v21  ;;  %v4565_v42 = vsel %vm4553_vm13, %v4543_v33, %v4546_v35  ;;  %v4566_v57 = vsel %vm4556_vm0, %v4552_v31, 1326507024  ;;  %vm11986_vm2 = vcmp.le.f32.partialorder %v4417_v25, 0.7853982 }
 0x43c   :  { %vm4419_vm3 = vcmp.lt.s32.totalorder %v14143_v61, 0  ;;  %v4485_v26 = vclz %v7257_v8  ;;  %v4503_v2 = vsub.s32 4, %v4479_v16  ;;  %v4560_v22 = vsel %vm4554_vm1, %v4557_v13, %v4559_v62 }
 0x43d   :  { %v4564_v41 = vsel %vm4554_vm1, %v4561_v37, %v4563_v7  ;;  %v4567_v44 = vsel %vm4555_vm15, %v4549_v15, %v4566_v57  ;;  %v4628_v23 = vand.u32 2139095040, %v14151_v17  ;;  %vm4405_vm5 = vweird.f32 %v14140_v58 }
 0x43e   :  { %v7258_v40 = vadd.s32 4294967294, %v4485_v26  ;;  %v4568_v25 = vsel %vm4554_vm1, %v4565_v42, %v4567_v44  ;;  %v11998_v20 = vmul.u32.u64.low %v11963_v43, %v4564_v41  ;;  %v11999_v0 = vmul.u32.u64.high %v11963_v43, %v4564_v41, %v11998_v20 }
 0x43f   :  { %vm4408_vm6 = vcmp.lt.s32.totalorder %v4407_v48, 2  ;;  %v12003_v5 = vmul.u32.u64.low %v11963_v43, %v4568_v25  ;;  %v12004_v6 = vmul.u32.u64.high %v11963_v43, %v4568_v25, %v12003_v5  ;;  %v4629_v45 = vshrl.u32 %v4628_v23, 23 }
 0x440   :  { %vm4409_vm4 = vcmp.eq.s32.totalorder %v4407_v48, 0  ;;  %v4473_v32 = vadd.s32 %v11926_v11, %v11935_v27  ;;  %vm7259_vm8 = vcmp.lt.s32.totalorder %v7258_v40, 0  ;;  %v4504_v14 = vsel %vm4419_vm3, %v4503_v2, %v4479_v16 }
 0x441   :  { %v4488_v52 = vsel %vm7259_vm8, 0, %v7258_v40  ;;  %v4576_v56 = vmul.u32 %v11963_v43, %v4560_v22  ;;  %v4625_v47 = vand.u32 2147483647, %v14151_v17  ;;  %v7264_v10 = vadd.s32 4294967169, %v4629_v45 }
 0x442   :  { %v4489_v49 = vsub.s32 32, %v4488_v52  ;;  %v4490_v50 = vshll.u32 %v11967_v63, %v4488_v52  ;;  %v4493_v1 = vsub.s32 4294967266, %v4488_v52  ;;  %v4579_v28 = vadd.s32 1, %v11999_v0 }
 0x443   :  { %v7775_v4 = vpop.eup %7774  ;;  %vm4412_vm7 = vcmp.eq.s32.totalorder %v4407_v48, 2  ;;  %v4506_v11 = vsel %vm11986_vm2, 0, %v4504_v14  ;;  %vm4578_vm9 = vc.u32 %v12004_v6, %v11998_v20  ;;  %v4635_v27 = vadd.s32 1, %v7264_v10 }
 0x444   :  { %v7777_v16 = vpop.eup %7776  ;;  %v4413_v29 = vxor.u32 2147483648, %v7775_v4  ;;  %v4491_v53 = vshrl.u32 %v4473_v32, %v4489_v49  ;;  %v4494_v43 = vadd.s32 127, %v4493_v1  ;;  %v4580_v55 = vsel %vm4578_vm9, %v4579_v28, %v11999_v0  ;;  %v14152_v32 = vld [vmem:[#allocation41_spill] sm:$0xff] }
 0x445   :  { %v4410_v3 = vxor.u32 2147483648, %v7777_v16  ;;  %v4581_v15 = vadd.s32 %v4580_v55, %v4576_v56  ;;  %v4632_v51 = vand.u32 8388607, %v4625_v47  ;;  %vm4636_vm11 = vcmp.gt.s32.totalorder %v4635_v27, 0 }
 0x446   :  { %v4414_v63 = vsel %vm4412_vm7, %v4413_v29, %v7777_v16  ;;  %v4492_v30 = vor.u32 %v4491_v53, %v4490_v50  ;;  %v4495_v33 = vshll.u32 %v4494_v43, 23  ;;  %v4637_v35 = vsel %vm4636_vm11, %v4635_v27, 0 }
 0x447   :  { %v4411_v36 = vsel %vm4409_vm4, %v7775_v4, %v4410_v3  ;;  %v4582_v31 = vadd.s32 536870912, %v4581_v15  ;;  %v4639_v54 = vand.u32 31, %v4637_v35  ;;  %v4510_v21 = vadd.s32 3, %v4506_v11 }
 0x448   :  { %v4415_v12 = vsel %vm4408_vm6, %v4411_v36, %v4414_v63  ;;  %v4496_v13 = vor.u32 4788187, %v4495_v33  ;;  %v4499_v59 = vcvt.s32.f32 %v4492_v30  ;;  %v4633_v37 = vor.u32 8388608, %v4632_v51 }
 0x449   :  { %v4416_v8 = vsel %vm4405_vm5, nan, %v4415_v12  ;;  %v12025_v62 = vshrl.u32 %v4582_v31, 30  ;;  %v4640_v7 = vsub.s32 32, %v4639_v54  ;;  %v4638_v57 = vshrl.u32 %v4637_v35, 5 }
 0x44a   :  { %v4497_v42 = vand.u32 2147483647, %v4496_v13  ;;  %v4642_v26 = vshll.u32 %v14044_v38, %v4639_v54  ;;  %v4645_v2 = vshll.u32 %v14038_v18, %v4639_v54  ;;  %7055 = vst [vmem:[#allocation5 + $0x130] sm:$0xff] %v4416_v8  ;;  %v4648_v41 = vshll.u32 %v14039_v24, %v4639_v54 }
 0x44b   :  { %v4584_v48 = vshll.u32 %v12025_v62, 30  ;;  %v4643_v22 = vshrl.u32 %v14038_v18, %v4640_v7  ;;  %v4651_v58 = vshll.u32 %v14040_v19, %v4639_v54  ;;  %v4646_v23 = vshrl.u32 %v14039_v24, %v4640_v7 }
 0x44c   :  { %v4500_v44 = vmul.f32 %v4499_v59, %v4497_v42  ;;  %v4649_v40 = vshrl.u32 %v14040_v19, %v4640_v7  ;;  %v4652_v25 = vshrl.u32 %v14041_v34, %v4640_v7  ;;  %v12036_v0 = vand.u32 3, %v4510_v21 }
 0x44d   :  { %v12038_v5 = vsub.s32 %v4581_v15, %v4584_v48  ;;  %v4654_v45 = vshll.u32 %v14041_v34, %v4639_v54  ;;  %v4732_v14 = vand.u32 2139095040, %v14152_v32  ;;  %v4577_v56 = vadd.s32 %v11998_v20, %v12004_v6 }
 0x44e   :  { %v4501_v52 = vxor.u32 2147483648, %v4500_v44  ;;  %v4641_v10 = vshrl.u32 %v14044_v38, %v4640_v7  ;;  %v12045_v49 = vshll.u32 %v4633_v37, 8  ;;  %v4644_v1 = vor.u32 %v4643_v22, %v4642_v26 }
 0x44f   :  { %v4587_v50 = vsub.s32 0, %v12038_v5  ;;  %v4647_v28 = vor.u32 %v4646_v23, %v4645_v2  ;;  %v4655_v4 = vshrl.u32 %v14042_v60, %v4640_v7  ;;  %v4650_v27 = vor.u32 %v4649_v40, %v4648_v41 }
 0x450   :  { %v4502_v11 = vsel %vm4419_vm3, %v4501_v52, %v4500_v44  ;;  %v4653_v16 = vor.u32 %v4652_v25, %v4651_v58  ;;  %vm4657_vm12 = vcmp.lt.s32.totalorder %v4638_v57, 1  ;;  %v4733_v53 = vshrl.u32 %v4732_v14, 23 }
 0x451   :  { %v4505_v20 = vsel %vm11986_vm2, %v14143_v61, %v4502_v11  ;;  %v7261_v6 = vmin.u32 %v4587_v50, %v12038_v5  ;;  %v4656_v29 = vor.u32 %v4655_v4, %v4654_v45  ;;  %vm4523_vm10 = vcmp.lt.s32.totalorder %v14146_v39, 0 }
 0x452   :  { %7778 = vcosq.f32 %v4505_v20  ;;  %vm4658_vm14 = vcmp.lt.s32.totalorder %v4638_v57, 2  ;;  %vm4659_vm13 = vcmp.lt.s32.totalorder %v4638_v57, 3  ;;  %vm4660_vm0 = vcmp.lt.s32.totalorder %v4638_v57, 4 }
 0x453   :  { %7780 = vsinq.f32 %v4505_v20  ;;  %v4589_v43 = vclz %v7261_v6  ;;  %v4661_v55 = vsel %vm4657_vm12, %v4641_v10, %v4644_v1  ;;  %v4665_v3 = vsel %vm4657_vm12, %v4644_v1, %v4647_v28 }
 0x454   :  { %v4607_v15 = vsub.s32 4, %v12025_v62  ;;  %v4662_v9 = vsel %vm4660_vm0, %v4650_v27, 2102212464  ;;  %v4666_v51 = vsel %vm4660_vm0, %v4653_v16, 920167782  ;;  %v4669_v63 = vsel %vm4657_vm12, %v4647_v28, %v4650_v27 }
 0x455   :  { %v7262_v30 = vadd.s32 4294967294, %v4589_v43  ;;  %v4663_v33 = vsel %vm4659_vm13, %v4647_v28, %v4662_v9  ;;  %v4667_v35 = vsel %vm4659_vm13, %v4650_v27, %v4666_v51  ;;  %v4670_v36 = vsel %vm4660_vm0, %v4656_v29, 1326507024 }
 0x456   :  { %v4664_v31 = vsel %vm4658_vm14, %v4661_v55, %v4663_v33  ;;  %v4668_v54 = vsel %vm4658_vm14, %v4665_v3, %v4667_v35  ;;  %v4671_v12 = vsel %vm4659_vm13, %v4653_v16, %v4670_v36  ;;  %v7268_v13 = vadd.s32 4294967169, %v4733_v53 }
 0x457   :  { %vm7263_vm1 = vcmp.lt.s32.totalorder %v7262_v30, 0  ;;  %v4672_v59 = vsel %vm4658_vm14, %v4669_v63, %v4671_v12  ;;  %v12067_v21 = vmul.u32.u64.low %v12045_v49, %v4668_v54  ;;  %v12068_v8 = vmul.u32.u64.high %v12045_v49, %v4668_v54, %v12067_v21 }
 0x458   :  { %v4592_v37 = vsel %vm7263_vm1, 0, %v7262_v30  ;;  %v12072_v7 = vmul.u32.u64.low %v12045_v49, %v4672_v59  ;;  %v12073_v42 = vmul.u32.u64.high %v12045_v49, %v4672_v59, %v12072_v7  ;;  %v4729_v26 = vand.u32 2147483647, %v14152_v32 }
 0x459   :  { %vm12078_vm15 = vcmp.le.f32.partialorder %v4521_v46, 0.7853982  ;;  %v4593_v57 = vsub.s32 32, %v4592_v37  ;;  %v4594_v48 = vshll.u32 %v12038_v5, %v4592_v37  ;;  %v4597_v22 = vsub.s32 4294967266, %v4592_v37 }
 0x45a   :  { %vm4512_vm2 = vcmp.lt.s32.totalorder %v12036_v0, 2  ;;  %vm4513_vm3 = vcmp.eq.s32.totalorder %v12036_v0, 0  ;;  %v4680_v41 = vmul.u32 %v12045_v49, %v4664_v31  ;;  %v4739_v58 = vadd.s32 1, %v7268_v13 }
 0x45b   :  { %v4595_v44 = vshrl.u32 %v4577_v56, %v4593_v57  ;;  %v4598_v23 = vadd.s32 127, %v4597_v22  ;;  %v4608_v46 = vsel %vm4523_vm10, %v4607_v15, %v12025_v62  ;;  %v4683_v40 = vadd.s32 1, %v12068_v8 }
 0x45c   :  { %v7779_v25 = vpop.eup %7778  ;;  %vm4516_vm5 = vcmp.eq.s32.totalorder %v12036_v0, 2  ;;  %vm4682_vm6 = vc.u32 %v12073_v42, %v12067_v21  ;;  %v4736_v5 = vand.u32 8388607, %v4729_v26  ;;  %vm4740_vm4 = vcmp.gt.s32.totalorder %v4739_v58, 0 }
 0x45d   :  { %v7781_v45 = vpop.eup %7780  ;;  %v4517_v14 = vxor.u32 2147483648, %v7779_v25  ;;  %v4596_v52 = vor.u32 %v4595_v44, %v4594_v48  ;;  %v4599_v56 = vshll.u32 %v4598_v23, 23  ;;  %v4684_v10 = vsel %vm4682_vm6, %v4683_v40, %v12068_v8 }
 0x45e   :  { %v4514_v49 = vxor.u32 2147483648, %v7781_v45  ;;  %v4610_v62 = vsel %vm12078_vm15, 0, %v4608_v46  ;;  %v4685_v50 = vadd.s32 %v4684_v10, %v4680_v41  ;;  %v4741_v1 = vsel %vm4740_vm4, %v4739_v58, 0  ;;  %v14155_v10 = vld [vmem:[#allocation19_spill] sm:$0xff] }
 0x45f   :  { %vm4509_vm8 = vweird.f32 %v14143_v61  ;;  %v4518_v28 = vsel %vm4516_vm5, %v4517_v14, %v7781_v45  ;;  %v4600_v4 = vor.u32 4788187, %v4599_v56  ;;  %v4603_v11 = vcvt.s32.f32 %v4596_v52 }
 0x460   :  { %v4515_v27 = vsel %vm4513_vm3, %v7779_v25, %v4514_v49  ;;  %v4686_v16 = vadd.s32 536870912, %v4685_v50  ;;  %v4743_v20 = vand.u32 31, %v4741_v1  ;;  %v4614_v53 = vadd.s32 3, %v4610_v62 }
 0x461   :  { %v4519_v6 = vsel %vm4512_vm2, %v4515_v27, %v4518_v28  ;;  %v4601_v29 = vand.u32 2147483647, %v4600_v4  ;;  %v4737_v43 = vor.u32 8388608, %v4736_v5  ;;  %v4742_v15 = vshrl.u32 %v4741_v1, 5 }
 0x462   :  { %v4520_v55 = vsel %vm4509_vm8, nan, %v4519_v6  ;;  %v12103_v3 = vshrl.u32 %v4686_v16, 30  ;;  %v4744_v9 = vsub.s32 32, %v4743_v20  ;;  %v4746_v51 = vshll.u32 %v14044_v38, %v4743_v20 }
 0x463   :  { %v4604_v61 = vmul.f32 %v4603_v11, %v4601_v29  ;;  %v4749_v63 = vshll.u32 %v14038_v18, %v4743_v20  ;;  %7056 = vst [vmem:[#allocation5 + $0x138] sm:$0xff] %v4520_v55  ;;  %v4752_v0 = vshll.u32 %v14039_v24, %v4743_v20  ;;  %v4755_v35 = vshll.u32 %v14040_v19, %v4743_v20 }
 0x464   :  { %v4688_v30 = vshll.u32 %v12103_v3, 30  ;;  %v4747_v33 = vshrl.u32 %v14038_v18, %v4744_v9  ;;  %v4750_v31 = vshrl.u32 %v14039_v24, %v4744_v9  ;;  %v4753_v54 = vshrl.u32 %v14040_v19, %v4744_v9 }
 0x465   :  { %v4605_v36 = vxor.u32 2147483648, %v4604_v61  ;;  %v4756_v12 = vshrl.u32 %v14041_v34, %v4744_v9  ;;  %v12114_v13 = vand.u32 3, %v4614_v53  ;;  %vm4761_vm7 = vcmp.lt.s32.totalorder %v4742_v15, 1 }
 0x466   :  { %v12116_v59 = vsub.s32 %v4685_v50, %v4688_v30  ;;  %v12118_v8 = vshll.u32 %v4737_v43, 8  ;;  %v4748_v7 = vor.u32 %v4747_v33, %v4746_v51  ;;  %v4751_v57 = vor.u32 %v4750_v31, %v4749_v63 }
 0x467   :  { %v4606_v37 = vsel %vm4523_vm10, %v4605_v36, %v4604_v61  ;;  %v4758_v48 = vshll.u32 %v14041_v34, %v4743_v20  ;;  %v4745_v58 = vshrl.u32 %v14044_v38, %v4744_v9  ;;  %v4757_v44 = vor.u32 %v4756_v12, %v4755_v35 }
 0x468   :  { %v4609_v22 = vsel %vm12078_vm15, %v14146_v39, %v4606_v37  ;;  %v4691_v41 = vsub.s32 0, %v12116_v59  ;;  %v4754_v23 = vor.u32 %v4753_v54, %v4752_v0  ;;  %v4759_v46 = vshrl.u32 %v14042_v60, %v4744_v9 }
 0x469   :  { %7782 = vcosq.f32 %v4609_v22  ;;  %vm4764_vm9 = vcmp.lt.s32.totalorder %v4742_v15, 4  ;;  %vm4762_vm11 = vcmp.lt.s32.totalorder %v4742_v15, 2  ;;  %vm4763_vm12 = vcmp.lt.s32.totalorder %v4742_v15, 3 }
 0x46a   :  { %7784 = vsinq.f32 %v4609_v22  ;;  %v7265_v40 = vmin.u32 %v4691_v41, %v12116_v59  ;;  %v4760_v25 = vor.u32 %v4759_v46, %v4758_v48  ;;  %v4766_v5 = vsel %vm4764_vm9, %v4754_v23, 2102212464 }
 0x46b   :  { %v4769_v2 = vsel %vm4761_vm7, %v4748_v7, %v4751_v57  ;;  %v4770_v45 = vsel %vm4764_vm9, %v4757_v44, 920167782  ;;  %v4681_v14 = vadd.s32 %v12067_v21, %v12073_v42  ;;  %v4765_v56 = vsel %vm4761_vm7, %v4745_v58, %v4748_v7 }
 0x46c   :  { %v4693_v52 = vclz %v7265_v40  ;;  %v4836_v49 = vand.u32 2139095040, %v14155_v10  ;;  %v4767_v62 = vsel %vm4763_vm12, %v4751_v57, %v4766_v5  ;;  %v4771_v50 = vsel %vm4763_vm12, %v4754_v23, %v4770_v45 }
 0x46d   :  { %v4773_v1 = vsel %vm4761_vm7, %v4751_v57, %v4754_v23  ;;  %v4774_v28 = vsel %vm4764_vm9, %v4760_v25, 1326507024  ;;  %vm4613_vm10 = vweird.f32 %v14146_v39  ;;  %v4711_v11 = vsub.s32 4, %v12103_v3 }
 0x46e   :  { %v7266_v4 = vadd.s32 4294967294, %v4693_v52  ;;  %v4772_v21 = vsel %vm4762_vm11, %v4769_v2, %v4771_v50  ;;  %v4775_v42 = vsel %vm4763_vm12, %v4757_v44, %v4774_v28  ;;  %v4768_v27 = vsel %vm4762_vm11, %v4765_v56, %v4767_v62 }
 0x46f   :  { %v4776_v16 = vsel %vm4762_vm11, %v4773_v1, %v4775_v42  ;;  %v12148_v20 = vmul.u32.u64.low %v12118_v8, %v4772_v21  ;;  %v12149_v6 = vmul.u32.u64.high %v12118_v8, %v4772_v21, %v12148_v20  ;;  %v4837_v43 = vshrl.u32 %v4836_v49, 23 }
 0x470   :  { %vm7267_vm14 = vcmp.lt.s32.totalorder %v7266_v4, 0  ;;  %v12153_v29 = vmul.u32.u64.low %v12118_v8, %v4776_v16  ;;  %v12154_v53 = vmul.u32.u64.high %v12118_v8, %v4776_v16, %v12153_v29  ;;  %vm4616_vm13 = vcmp.lt.s32.totalorder %v12114_v13, 2 }
 0x471   :  { %vm12159_vm0 = vcmp.le.f32.partialorder %v4625_v47, 0.7853982  ;;  %vm4627_vm1 = vcmp.lt.s32.totalorder %v14151_v17, 0  ;;  %v4696_v15 = vsel %vm7267_vm14, 0, %v7266_v4  ;;  %v7272_v63 = vadd.s32 4294967169, %v4837_v43 }
 0x472   :  { %v4697_v9 = vsub.s32 32, %v4696_v15  ;;  %v4698_v61 = vshll.u32 %v12116_v59, %v4696_v15  ;;  %v4701_v51 = vsub.s32 4294967266, %v4696_v15  ;;  %vm4617_vm15 = vcmp.eq.s32.totalorder %v12114_v13, 0 }
 0x473   :  { %v7783_v30 = vpop.eup %7782  ;;  %vm4620_vm2 = vcmp.eq.s32.totalorder %v12114_v13, 2  ;;  %v4784_v33 = vmul.u32 %v12118_v8, %v4768_v27  ;;  %v4787_v47 = vadd.s32 1, %v12149_v6  ;;  %v4712_v54 = vsel %vm4627_vm1, %v4711_v11, %v12103_v3 }
 0x474   :  { %v7785_v0 = vpop.eup %7784  ;;  %v4621_v35 = vxor.u32 2147483648, %v7783_v30  ;;  %v4699_v36 = vshrl.u32 %v4681_v14, %v4697_v9  ;;  %v4702_v31 = vadd.s32 127, %v4701_v51  ;;  %vm4786_vm3 = vc.u32 %v12154_v53, %v12148_v20 }
 0x475   :  { %v4618_v12 = vxor.u32 2147483648, %v7785_v0  ;;  %v4833_v59 = vand.u32 2147483647, %v14155_v10  ;;  %v4843_v37 = vadd.s32 1, %v7272_v63  ;;  %v4788_v48 = vsel %vm4786_vm3, %v4787_v47, %v12149_v6  ;;  %v14158_v63 = vld [vmem:[#allocation20_spill] sm:$0xff] }
 0x476   :  { %v4622_v7 = vsel %vm4620_vm2, %v4621_v35, %v7785_v0  ;;  %v4700_v57 = vor.u32 %v4699_v36, %v4698_v61  ;;  %v4703_v8 = vshll.u32 %v4702_v31, 23  ;;  %v4714_v41 = vsel %vm12159_vm0, 0, %v4712_v54 }
 0x477   :  { %v4619_v22 = vsel %vm4617_vm15, %v7783_v30, %v4618_v12  ;;  %v4789_v58 = vadd.s32 %v4788_v48, %v4784_v33  ;;  %vm4844_vm5 = vcmp.gt.s32.totalorder %v4843_v37, 0  ;;  %v4718_v45 = vadd.s32 3, %v4714_v41 }
 0x478   :  { %v4623_v3 = vsel %vm4616_vm13, %v4619_v22, %v4622_v7  ;;  %v4704_v44 = vor.u32 4788187, %v4703_v8  ;;  %v4707_v23 = vcvt.s32.f32 %v4700_v57  ;;  %v4845_v46 = vsel %vm4844_vm5, %v4843_v37, 0 }
 0x479   :  { %v4624_v40 = vsel %vm4613_vm10, nan, %v4623_v3  ;;  %v4790_v25 = vadd.s32 536870912, %v4789_v58  ;;  %v4847_v5 = vand.u32 31, %v4845_v46  ;;  %v4840_v52 = vand.u32 8388607, %v4833_v59 }
 0x47a   :  { %v4705_v2 = vand.u32 2147483647, %v4704_v44  ;;  %7057 = vst [vmem:[#allocation5 + $0x140] sm:$0xff] %v4624_v40  ;;  %v12186_v56 = vshrl.u32 %v4845_v46, 5  ;;  %v12197_v6 = vand.u32 3, %v4718_v45  ;;  %vm4731_vm6 = vcmp.lt.s32.totalorder %v14152_v32, 0 }
 0x47b   :  { %v4791_v14 = vshrl.u32 %v4790_v25, 30  ;;  %v4848_v49 = vsub.s32 32, %v4847_v5  ;;  %v4850_v62 = vshll.u32 %v14044_v38, %v4847_v5  ;;  %v4853_v50 = vshll.u32 %v14038_v18, %v4847_v5 }
 0x47c   :  { %v4708_v13 = vmul.f32 %v4707_v23, %v4705_v2  ;;  %v4856_v39 = vshll.u32 %v14039_v24, %v4847_v5  ;;  %v4859_v4 = vshll.u32 %v14040_v19, %v4847_v5  ;;  %v4862_v11 = vshll.u32 %v14041_v34, %v4847_v5 }
 0x47d   :  { %v4792_v1 = vshll.u32 %v4791_v14, 30  ;;  %v4851_v28 = vshrl.u32 %v14038_v18, %v4848_v49  ;;  %v4854_v42 = vshrl.u32 %v14039_v24, %v4848_v49  ;;  %v4857_v27 = vshrl.u32 %v14040_v19, %v4848_v49 }
 0x47e   :  { %v4709_v21 = vxor.u32 2147483648, %v4708_v13  ;;  %v4860_v16 = vshrl.u32 %v14041_v34, %v4848_v49  ;;  %v4841_v43 = vor.u32 8388608, %v4840_v52  ;;  %v4863_v15 = vshrl.u32 %v14042_v60, %v4848_v49 }
 0x47f   :  { %v12199_v29 = vsub.s32 %v4789_v58, %v4792_v1  ;;  %v4849_v61 = vshrl.u32 %v14044_v38, %v4848_v49  ;;  %v4852_v51 = vor.u32 %v4851_v28, %v4850_v62  ;;  %v4940_v30 = vand.u32 2139095040, %v14158_v63 }
 0x480   :  { %v4710_v9 = vsel %vm4627_vm1, %v4709_v21, %v4708_v13  ;;  %v4855_v0 = vor.u32 %v4854_v42, %v4853_v50  ;;  %v4858_v35 = vor.u32 %v4857_v27, %v4856_v39  ;;  %v4861_v36 = vor.u32 %v4860_v16, %v4859_v4 }
 0x481   :  { %v4713_v33 = vsel %vm12159_vm0, %v14151_v17, %v4710_v9  ;;  %v4795_v47 = vsub.s32 0, %v12199_v29  ;;  %v4864_v31 = vor.u32 %v4863_v15, %v4862_v11  ;;  %vm4865_vm4 = vcmp.lt.s32.totalorder %v12186_v56, 1 }
 0x482   :  { %7786 = vcosq.f32 %v4713_v33  ;;  %vm12214_vm8 = vcmp.le.f32.partialorder %v4729_v26, 0.7853982  ;;  %v4881_v55 = vshll.u32 %v4841_v43, 8  ;;  %v4815_v37 = vsub.s32 4, %v4791_v14 }
 0x483   :  { %7788 = vsinq.f32 %v4713_v33  ;;  %v7269_v12 = vmin.u32 %v4795_v47, %v12199_v29  ;;  %vm4867_vm7 = vcmp.lt.s32.totalorder %v12186_v56, 3  ;;  %vm4868_vm9 = vcmp.lt.s32.totalorder %v12186_v56, 4 }
 0x484   :  { %v4941_v7 = vshrl.u32 %v4940_v30, 23  ;;  %vm4866_vm11 = vcmp.lt.s32.totalorder %v12186_v56, 2  ;;  %v4873_v8 = vsel %vm4865_vm4, %v4852_v51, %v4855_v0  ;;  %v4877_v48 = vsel %vm4865_vm4, %v4855_v0, %v4858_v35 }
 0x485   :  { %v4797_v57 = vclz %v7269_v12  ;;  %vm4720_vm12 = vcmp.lt.s32.totalorder %v12197_v6, 2  ;;  %v4869_v26 = vsel %vm4865_vm4, %v4849_v61, %v4852_v51  ;;  %v4870_v22 = vsel %vm4868_vm9, %v4858_v35, 2102212464 }
 0x486   :  { %v4874_v41 = vsel %vm4868_vm9, %v4861_v36, 920167782  ;;  %v4878_v58 = vsel %vm4868_vm9, %v4864_v31, 1326507024  ;;  %vm4717_vm10 = vweird.f32 %v14151_v17  ;;  %v4871_v44 = vsel %vm4867_vm7, %v4855_v0, %v4870_v22 }
 0x487   :  { %v7270_v3 = vadd.s32 4294967294, %v4797_v57  ;;  %v4875_v23 = vsel %vm4867_vm7, %v4858_v35, %v4874_v41  ;;  %v4879_v46 = vsel %vm4867_vm7, %v4861_v36, %v4878_v58  ;;  %v4785_v40 = vadd.s32 %v12148_v20, %v12154_v53 }
 0x488   :  { %v4876_v25 = vsel %vm4866_vm11, %v4873_v8, %v4875_v23  ;;  %v4880_v5 = vsel %vm4866_vm11, %v4877_v48, %v4879_v46  ;;  %v7276_v2 = vadd.s32 4294967169, %v4941_v7  ;;  %v4816_v45 = vsel %vm4731_vm6, %v4815_v37, %v4791_v14 }
 0x489   :  { %vm7271_vm14 = vcmp.lt.s32.totalorder %v7270_v3, 0  ;;  %v12238_v52 = vmul.u32.u64.low %v4881_v55, %v4880_v5  ;;  %v12239_v49 = vmul.u32.u64.high %v4881_v55, %v4880_v5, %v12238_v52  ;;  %v4872_v62 = vsel %vm4866_vm11, %v4869_v26, %v4871_v44 }
 0x48a   :  { %v4800_v13 = vsel %vm7271_vm14, 0, %v7270_v3  ;;  %v12243_v50 = vmul.u32.u64.low %v4881_v55, %v4876_v25  ;;  %v12244_v20 = vmul.u32.u64.high %v4881_v55, %v4876_v25, %v12243_v50  ;;  %v4947_v28 = vadd.s32 1, %v7276_v2 }
 0x48b   :  { %v4801_v53 = vsub.s32 32, %v4800_v13  ;;  %v4802_v39 = vshll.u32 %v12199_v29, %v4800_v13  ;;  %v4805_v1 = vsub.s32 4294967266, %v4800_v13  ;;  %vm4721_vm13 = vcmp.eq.s32.totalorder %v12197_v6, 0 }
 0x48c   :  { %v7787_v4 = vpop.eup %7786  ;;  %vm4724_vm0 = vcmp.eq.s32.totalorder %v12197_v6, 2  ;;  %v4818_v14 = vsel %vm12214_vm8, 0, %v4816_v45  ;;  %v4937_v56 = vand.u32 2147483647, %v14158_v63  ;;  %v4888_v16 = vmul.u32 %v4881_v55, %v4872_v62 }
 0x48d   :  { %v7789_v11 = vpop.eup %7788  ;;  %v4725_v21 = vxor.u32 2147483648, %v7787_v4  ;;  %v4803_v42 = vshrl.u32 %v4785_v40, %v4801_v53  ;;  %v4806_v27 = vadd.s32 127, %v4805_v1  ;;  %vm4890_vm1 = vc.u32 %v12239_v49, %v12243_v50 }
 0x48e   :  { %v4722_v43 = vxor.u32 2147483648, %v7789_v11  ;;  %v4891_v29 = vadd.s32 1, %v12244_v20  ;;  %vm4948_vm15 = vcmp.gt.s32.totalorder %v4947_v28, 0  ;;  %v4944_v47 = vand.u32 8388607, %v4937_v56 }
 0x48f   :  { %v4726_v15 = vsel %vm4724_vm0, %v4725_v21, %v7789_v11  ;;  %v4804_v9 = vor.u32 %v4803_v42, %v4802_v39  ;;  %v4807_v61 = vshll.u32 %v4806_v27, 23  ;;  %v4949_v51 = vsel %vm4948_vm15, %v4947_v28, 0 }
 0x490   :  { %v4723_v30 = vsel %vm4721_vm13, %v7787_v4, %v4722_v43  ;;  %v4892_v33 = vsel %vm4890_vm1, %v4891_v29, %v12244_v20  ;;  %v4951_v0 = vand.u32 31, %v4949_v51  ;;  %v4822_v37 = vadd.s32 3, %v4818_v14  ;;  %v14161_v43 = vld [vmem:[#allocation21_spill] sm:$0xff] }
 0x491   :  { %v4727_v35 = vsel %vm4720_vm12, %v4723_v30, %v4726_v15  ;;  %v4808_v36 = vor.u32 4788187, %v4807_v61  ;;  %v4811_v31 = vcvt.s32.f32 %v4804_v9  ;;  %v4893_v12 = vadd.s32 %v4892_v33, %v4888_v16 }
 0x492   :  { %v4728_v55 = vsel %vm4717_vm10, nan, %v4727_v35  ;;  %v4952_v7 = vsub.s32 32, %v4951_v0  ;;  %v4954_v57 = vshll.u32 %v14044_v38, %v4951_v0  ;;  %v4957_v26 = vshll.u32 %v14038_v18, %v4951_v0 }
 0x493   :  { %v4809_v8 = vand.u32 2147483647, %v4808_v36  ;;  %v4894_v48 = vadd.s32 536870912, %v4893_v12  ;;  %v4960_v22 = vshll.u32 %v14039_v24, %v4951_v0  ;;  %7058 = vst [vmem:[#allocation5 + $0x148] sm:$0xff] %v4728_v55  ;;  %v4963_v17 = vshll.u32 %v14040_v19, %v4951_v0 }
 0x494   :  { %v4955_v6 = vshrl.u32 %v14038_v18, %v4952_v7  ;;  %v4958_v41 = vshrl.u32 %v14039_v24, %v4952_v7  ;;  %v4961_v58 = vshrl.u32 %v14040_v19, %v4952_v7  ;;  %v4950_v23 = vshrl.u32 %v4949_v51, 5 }
 0x495   :  { %v4812_v3 = vmul.f32 %v4811_v31, %v4809_v8  ;;  %v12272_v44 = vshrl.u32 %v4894_v48, 30  ;;  %v4964_v46 = vshrl.u32 %v14041_v34, %v4952_v7  ;;  %v4945_v40 = vor.u32 8388608, %v4944_v47 }
 0x496   :  { %v4966_v25 = vshll.u32 %v14041_v34, %v4951_v0  ;;  %v4967_v5 = vshrl.u32 %v14042_v60, %v4952_v7  ;;  %v12277_v45 = vand.u32 3, %v4822_v37  ;;  %v4953_v13 = vshrl.u32 %v14044_v38, %v4952_v7 }
 0x497   :  { %v4813_v2 = vxor.u32 2147483648, %v4812_v3  ;;  %v4896_v52 = vshll.u32 %v12272_v44, 30  ;;  %v4956_v62 = vor.u32 %v4955_v6, %v4954_v57  ;;  %v4959_v20 = vor.u32 %v4958_v41, %v4957_v26 }
 0x498   :  { %v4962_v53 = vor.u32 %v4961_v58, %v4960_v22  ;;  %v4965_v39 = vor.u32 %v4964_v46, %v4963_v17  ;;  %vm4969_vm2 = vcmp.lt.s32.totalorder %v4950_v23, 1  ;;  %vm4972_vm3 = vcmp.lt.s32.totalorder %v4950_v23, 4 }
 0x499   :  { %v4814_v1 = vsel %vm4731_vm6, %v4813_v2, %v4812_v3  ;;  %v12283_v28 = vsub.s32 %v4893_v12, %v4896_v52  ;;  %v4968_v14 = vor.u32 %v4967_v5, %v4966_v25  ;;  %vm4971_vm5 = vcmp.lt.s32.totalorder %v4950_v23, 3 }
 0x49a   :  { %v4817_v4 = vsel %vm12214_vm8, %v14152_v32, %v4814_v1  ;;  %v4985_v11 = vshll.u32 %v4945_v40, 8  ;;  %vm4970_vm4 = vcmp.lt.s32.totalorder %v4950_v23, 2  ;;  %v4974_v42 = vsel %vm4972_vm3, %v4962_v53, 2102212464 }
 0x49b   :  { %7790 = vcosq.f32 %v4817_v4  ;;  %v4899_v21 = vsub.s32 0, %v12283_v28  ;;  %v4977_v27 = vsel %vm4969_vm2, %v4956_v62, %v4959_v20  ;;  %v4978_v16 = vsel %vm4972_vm3, %v4965_v39, 920167782 }
 0x49c   :  { %7792 = vsinq.f32 %v4817_v4  ;;  %v5044_v29 = vand.u32 2139095040, %v14161_v43  ;;  %v4973_v54 = vsel %vm4969_vm2, %v4953_v13, %v4956_v62  ;;  %v4979_v9 = vsel %vm4971_vm5, %v4962_v53, %v4978_v16 }
 0x49d   :  { %v7273_v15 = vmin.u32 %v4899_v21, %v12283_v28  ;;  %v4975_v61 = vsel %vm4971_vm5, %v4959_v20, %v4974_v42  ;;  %v4980_v51 = vsel %vm4970_vm4, %v4977_v27, %v4979_v9  ;;  %v4981_v30 = vsel %vm4969_vm2, %v4959_v20, %v4962_v53  ;;  %v14164_v9 = vld [vmem:[#allocation22_spill] sm:$0xff] }
 0x49e   :  { %v4982_v33 = vsel %vm4972_vm3, %v4968_v14, 1326507024  ;;  %vm4824_vm6 = vcmp.lt.s32.totalorder %v12277_v45, 2  ;;  %vm4835_vm8 = vcmp.lt.s32.totalorder %v14155_v10, 0  ;;  %v5045_v31 = vshrl.u32 %v5044_v29, 23 }
 0x49f   :  { %v4901_v47 = vclz %v7273_v15  ;;  %v4983_v0 = vsel %vm4971_vm5, %v4965_v39, %v4982_v33  ;;  %v12303_v35 = vmul.u32.u64.low %v4985_v11, %v4980_v51  ;;  %v12304_v36 = vmul.u32.u64.high %v4985_v11, %v4980_v51, %v12303_v35 }
 0x4a0   :  { %v4919_v55 = vsub.s32 4, %v12272_v44  ;;  %v4976_v37 = vsel %vm4970_vm4, %v4973_v54, %v4975_v61  ;;  %v4984_v7 = vsel %vm4970_vm4, %v4981_v30, %v4983_v0  ;;  %v5041_v48 = vand.u32 2147483647, %v14161_v43 }
 0x4a1   :  { %v7274_v12 = vadd.s32 4294967294, %v4901_v47  ;;  %v12310_v57 = vmul.u32.u64.low %v4985_v11, %v4984_v7  ;;  %v12311_v8 = vmul.u32.u64.high %v4985_v11, %v4984_v7, %v12310_v57  ;;  %v7280_v26 = vadd.s32 4294967169, %v5045_v31 }
 0x4a2   :  { %vm4825_vm7 = vcmp.eq.s32.totalorder %v12277_v45, 0  ;;  %vm4828_vm9 = vcmp.eq.s32.totalorder %v12277_v45, 2  ;;  %v4889_v22 = vadd.s32 %v12243_v50, %v12239_v49  ;;  %v4992_v41 = vmul.u32 %v4985_v11, %v4976_v37 }
 0x4a3   :  { %vm7275_vm11 = vcmp.lt.s32.totalorder %v7274_v12, 0  ;;  %v4995_v58 = vadd.s32 1, %v12304_v36  ;;  %v5051_v17 = vadd.s32 1, %v7280_v26  ;;  %v4920_v25 = vsel %vm4835_vm8, %v4919_v55, %v12272_v44 }
 0x4a4   :  { %v4904_v6 = vsel %vm7275_vm11, 0, %v7274_v12  ;;  %vm4994_vm12 = vc.u32 %v12311_v8, %v12303_v35  ;;  %v5048_v49 = vand.u32 8388607, %v5041_v48  ;;  %vm4821_vm14 = vweird.f32 %v14152_v32 }
 0x4a5   :  { %v7791_v3 = vpop.eup %7790  ;;  %v4905_v23 = vsub.s32 32, %v4904_v6  ;;  %v4906_v46 = vshll.u32 %v12283_v28, %v4904_v6  ;;  %v4909_v40 = vsub.s32 4294967266, %v4904_v6  ;;  %vm5052_vm10 = vcmp.gt.s32.totalorder %v5051_v17, 0 }
 0x4a6   :  { %v7793_v5 = vpop.eup %7792  ;;  %v4829_v2 = vxor.u32 2147483648, %v7791_v3  ;;  %v4996_v62 = vsel %vm4994_vm12, %v4995_v58, %v12304_v36  ;;  %v5053_v53 = vsel %vm5052_vm10, %v5051_v17, 0  ;;  %vm12335_vm13 = vcmp.le.f32.partialorder %v4833_v59, 0.7853982 }
 0x4a7   :  { %v4826_v50 = vxor.u32 2147483648, %v7793_v5  ;;  %v4907_v52 = vshrl.u32 %v4889_v22, %v4905_v23  ;;  %v4910_v13 = vadd.s32 127, %v4909_v40  ;;  %v4997_v44 = vadd.s32 %v4996_v62, %v4992_v41 }
 0x4a8   :  { %v4830_v20 = vsel %vm4828_vm9, %v4829_v2, %v7793_v5  ;;  %v4922_v32 = vsel %vm12335_vm13, 0, %v4920_v25  ;;  %v5055_v21 = vand.u32 31, %v5053_v53  ;;  %v5049_v29 = vor.u32 8388608, %v5048_v49 }
 0x4a9   :  { %v4827_v39 = vsel %vm4825_vm7, %v7791_v3, %v4826_v50  ;;  %v4908_v28 = vor.u32 %v4907_v52, %v4906_v46  ;;  %v4911_v4 = vshll.u32 %v4910_v13, 23  ;;  %v4998_v11 = vadd.s32 536870912, %v4997_v44 }
 0x4aa   :  { %v4831_v14 = vsel %vm4824_vm6, %v4827_v39, %v4830_v20  ;;  %v5054_v59 = vshrl.u32 %v5053_v53, 5  ;;  %v5056_v54 = vsub.s32 32, %v5055_v21  ;;  %v5148_v61 = vand.u32 2139095040, %v14164_v9 }
 0x4ab   :  { %v4832_v42 = vsel %vm4821_vm14, nan, %v4831_v14  ;;  %v4912_v27 = vor.u32 4788187, %v4911_v4  ;;  %v4915_v16 = vcvt.s32.f32 %v4908_v28  ;;  %v12343_v15 = vshrl.u32 %v4998_v11, 30 }
 0x4ac   :  { %7059 = vst [vmem:[#allocation5 + $0x150] sm:$0xff] %v4832_v42  ;;  %v5058_v45 = vshll.u32 %v14044_v38, %v5055_v21  ;;  %v5061_v30 = vshll.u32 %v14038_v18, %v5055_v21  ;;  %v5064_v33 = vshll.u32 %v14039_v24, %v5055_v21  ;;  %v5059_v0 = vshrl.u32 %v14038_v18, %v5056_v54 }
 0x4ad   :  { %v4913_v51 = vand.u32 2147483647, %v4912_v27  ;;  %v5000_v47 = vshll.u32 %v12343_v15, 30  ;;  %v5067_v36 = vshll.u32 %v14040_v19, %v5055_v21  ;;  %v5070_v31 = vshll.u32 %v14041_v34, %v5055_v21 }
 0x4ae   :  { %v5062_v55 = vshrl.u32 %v14039_v24, %v5056_v54  ;;  %v5065_v37 = vshrl.u32 %v14040_v19, %v5056_v54  ;;  %v5068_v7 = vshrl.u32 %v14041_v34, %v5056_v54  ;;  %v4926_v57 = vadd.s32 3, %v4922_v32 }
 0x4af   :  { %v4916_v12 = vmul.f32 %v4915_v16, %v4913_v51  ;;  %v12356_v26 = vsub.s32 %v4997_v44, %v5000_v47  ;;  %v5071_v22 = vshrl.u32 %v14042_v60, %v5056_v54  ;;  %v12359_v6 = vshll.u32 %v5049_v29, 8 }
 0x4b0   :  { %v5060_v58 = vor.u32 %v5059_v0, %v5058_v45  ;;  %v5063_v17 = vor.u32 %v5062_v55, %v5061_v30  ;;  %v5149_v3 = vshrl.u32 %v5148_v61, 23  ;;  %v5057_v46 = vshrl.u32 %v14044_v38, %v5056_v54 }
 0x4b1   :  { %v4917_v41 = vxor.u32 2147483648, %v4916_v12  ;;  %v5003_v23 = vsub.s32 0, %v12356_v26  ;;  %v5069_v40 = vor.u32 %v5068_v7, %v5067_v36  ;;  %vm5073_vm0 = vcmp.lt.s32.totalorder %v5054_v59, 1 }
 0x4b2   :  { %v5066_v5 = vor.u32 %v5065_v37, %v5064_v33  ;;  %v5072_v2 = vor.u32 %v5071_v22, %v5070_v31  ;;  %vm5076_vm1 = vcmp.lt.s32.totalorder %v5054_v59, 4  ;;  %vm5074_vm15 = vcmp.lt.s32.totalorder %v5054_v59, 2 }
 0x4b3   :  { %v4918_v25 = vsel %vm4835_vm8, %v4917_v41, %v4916_v12  ;;  %v7277_v50 = vmin.u32 %v5003_v23, %v12356_v26  ;;  %vm5075_vm2 = vcmp.lt.s32.totalorder %v5054_v59, 3  ;;  %vm4939_vm3 = vcmp.lt.s32.totalorder %v14158_v63, 0 }
 0x4b4   :  { %v4921_v49 = vsel %vm12335_vm13, %v14155_v10, %v4918_v25  ;;  %v5078_v52 = vsel %vm5076_vm1, %v5066_v5, 2102212464  ;;  %v5081_v13 = vsel %vm5073_vm0, %v5060_v58, %v5063_v17  ;;  %v5082_v62 = vsel %vm5076_vm1, %v5069_v40, 920167782 }
 0x4b5   :  { %7794 = vcosq.f32 %v4921_v49  ;;  %v5005_v20 = vclz %v7277_v50  ;;  %v5145_v44 = vand.u32 2147483647, %v14164_v9  ;;  %v7284_v53 = vadd.s32 4294967169, %v5149_v3 }
 0x4b6   :  { %7796 = vsinq.f32 %v4921_v49  ;;  %v5077_v39 = vsel %vm5073_vm0, %v5057_v46, %v5060_v58  ;;  %v5079_v1 = vsel %vm5075_vm2, %v5063_v17, %v5078_v52  ;;  %v5083_v28 = vsel %vm5075_vm2, %v5066_v5, %v5082_v62 }
 0x4b7   :  { %v5085_v4 = vsel %vm5073_vm0, %v5063_v17, %v5066_v5  ;;  %vm12380_vm5 = vcmp.le.f32.partialorder %v4937_v56, 0.7853982  ;;  %v4993_v32 = vadd.s32 %v12303_v35, %v12311_v8  ;;  %v7278_v11 = vadd.s32 4294967294, %v5005_v20 }
 0x4b8   :  { %v5084_v21 = vsel %vm5074_vm15, %v5081_v13, %v5083_v28  ;;  %v5086_v42 = vsel %vm5076_vm1, %v5072_v2, 1326507024  ;;  %v5023_v27 = vsub.s32 4, %v12343_v15  ;;  %vm4925_vm4 = vweird.f32 %v14155_v10 }
 0x4b9   :  { %v5087_v16 = vsel %vm5075_vm2, %v5069_v40, %v5086_v42  ;;  %v12391_v29 = vmul.u32.u64.low %v12359_v6, %v5084_v21  ;;  %v12392_v54 = vmul.u32.u64.high %v12359_v6, %v5084_v21, %v12391_v29  ;;  %vm7279_vm6 = vcmp.lt.s32.totalorder %v7278_v11, 0 }
 0x4ba   :  { %v5080_v56 = vsel %vm5074_vm15, %v5077_v39, %v5079_v1  ;;  %v5088_v35 = vsel %vm5074_vm15, %v5085_v4, %v5087_v16  ;;  %v5155_v8 = vadd.s32 1, %v7284_v53  ;;  %v4927_v61 = vand.u32 3, %v4926_v57 }
 0x4bb   :  { %v5008_v51 = vsel %vm7279_vm6, 0, %v7278_v11  ;;  %v12399_v45 = vmul.u32.u64.low %v12359_v6, %v5088_v35  ;;  %v12400_v30 = vmul.u32.u64.high %v12359_v6, %v5088_v35, %v12399_v45  ;;  %v5096_v36 = vmul.u32 %v12359_v6, %v5080_v56 }
 0x4bc   :  { %v5009_v33 = vsub.s32 32, %v5008_v51  ;;  %v5010_v47 = vshll.u32 %v12356_v26, %v5008_v51  ;;  %v5013_v0 = vsub.s32 4294967266, %v5008_v51  ;;  %vm5156_vm8 = vcmp.gt.s32.totalorder %v5155_v8, 0 }
 0x4bd   :  { %v5099_v31 = vadd.s32 1, %v12392_v54  ;;  %v5152_v59 = vand.u32 8388607, %v5145_v44  ;;  %v5157_v12 = vsel %vm5156_vm8, %v5155_v8, 0  ;;  %v5024_v7 = vsel %vm4939_vm3, %v5023_v27, %v12343_v15 }
 0x4be   :  { %v5011_v55 = vshrl.u32 %v4993_v32, %v5009_v33  ;;  %v5014_v37 = vadd.s32 127, %v5013_v0  ;;  %v5159_v57 = vand.u32 31, %v5157_v12  ;;  %vm4928_vm7 = vcmp.lt.s32.totalorder %v4927_v61, 2 }
 0x4bf   :  { %v7795_v22 = vpop.eup %7794  ;;  %vm4929_vm9 = vcmp.eq.s32.totalorder %v4927_v61, 0  ;;  %vm4932_vm11 = vcmp.eq.s32.totalorder %v4927_v61, 2  ;;  %vm5098_vm12 = vc.u32 %v12400_v30, %v12391_v29  ;;  %v5026_v23 = vsel %vm12380_vm5, 0, %v5024_v7 }
 0x4c0   :  { %v7797_v26 = vpop.eup %7796  ;;  %v4933_v6 = vxor.u32 2147483648, %v7795_v22  ;;  %v5012_v41 = vor.u32 %v5011_v55, %v5010_v47  ;;  %v5015_v58 = vshll.u32 %v5014_v37, 23  ;;  %v5100_v17 = vsel %vm5098_vm12, %v5099_v31, %v12392_v54 }
 0x4c1   :  { %v4930_v3 = vxor.u32 2147483648, %v7797_v26  ;;  %v5101_v46 = vadd.s32 %v5100_v17, %v5096_v36  ;;  %v5160_v15 = vsub.s32 32, %v5159_v57  ;;  %v5153_v2 = vor.u32 8388608, %v5152_v59 }
 0x4c2   :  { %v4934_v40 = vsel %vm4932_vm11, %v4933_v6, %v7797_v26  ;;  %v5016_v25 = vor.u32 4788187, %v5015_v58  ;;  %v5019_v5 = vcvt.s32.f32 %v5012_v41  ;;  %v5162_v52 = vshll.u32 %v14044_v38, %v5159_v57 }
 0x4c3   :  { %v4931_v49 = vsel %vm4929_vm9, %v7795_v22, %v4930_v3  ;;  %v5102_v50 = vadd.s32 536870912, %v5101_v46  ;;  %v5165_v13 = vshll.u32 %v14038_v18, %v5159_v57  ;;  %v5163_v53 = vshrl.u32 %v14038_v18, %v5160_v15 }
 0x4c4   :  { %v4935_v62 = vsel %vm4928_vm7, %v4931_v49, %v4934_v40  ;;  %v5017_v20 = vand.u32 2147483647, %v5016_v25  ;;  %v5166_v39 = vshrl.u32 %v14039_v24, %v5160_v15  ;;  %v5168_v4 = vshll.u32 %v14039_v24, %v5159_v57  ;;  %v14169_v25 = vld [vmem:[#allocation23_spill] sm:$0xff] }
 0x4c5   :  { %v4936_v1 = vsel %vm4925_vm4, nan, %v4935_v62  ;;  %v5103_v28 = vshrl.u32 %v5102_v50, 30  ;;  %v5169_v32 = vshrl.u32 %v14040_v19, %v5160_v15  ;;  %v5158_v21 = vshrl.u32 %v5157_v12, 5 }
 0x4c6   :  { %v5020_v11 = vmul.f32 %v5019_v5, %v5017_v20  ;;  %v5171_v42 = vshll.u32 %v14040_v19, %v5159_v57  ;;  %v5172_v27 = vshrl.u32 %v14041_v34, %v5160_v15  ;;  %7060 = vst [vmem:[#allocation5 + $0x158] sm:$0xff] %v4936_v1  ;;  %v5030_v16 = vadd.s32 3, %v5026_v23 }
 0x4c7   :  { %v5104_v54 = vshll.u32 %v5103_v28, 30  ;;  %v5174_v56 = vshll.u32 %v14041_v34, %v5159_v57  ;;  %v12428_v35 = vshll.u32 %v5153_v2, 8  ;;  %v5161_v8 = vshrl.u32 %v14044_v38, %v5160_v15 }
 0x4c8   :  { %v5021_v10 = vxor.u32 2147483648, %v5020_v11  ;;  %v5173_v61 = vor.u32 %v5172_v27, %v5171_v42  ;;  %v5175_v51 = vshrl.u32 %v14042_v60, %v5160_v15  ;;  %v5164_v33 = vor.u32 %v5163_v53, %v5162_v52 }
 0x4c9   :  { %v12432_v45 = vsub.s32 %v5101_v46, %v5104_v54  ;;  %v5167_v47 = vor.u32 %v5166_v39, %v5165_v13  ;;  %v5170_v0 = vor.u32 %v5169_v32, %v5168_v4  ;;  %vm5177_vm10 = vcmp.lt.s32.totalorder %v5158_v21, 1 }
 0x4ca   :  { %v5022_v36 = vsel %vm4939_vm3, %v5021_v10, %v5020_v11  ;;  %v5176_v31 = vor.u32 %v5175_v51, %v5174_v56  ;;  %vm5180_vm14 = vcmp.lt.s32.totalorder %v5158_v21, 4  ;;  %vm5178_vm13 = vcmp.lt.s32.totalorder %v5158_v21, 2 }
 0x4cb   :  { %v5025_v59 = vsel %vm12380_vm5, %v14158_v63, %v5022_v36  ;;  %v5107_v12 = vsub.s32 0, %v12432_v45  ;;  %vm5179_vm0 = vcmp.lt.s32.totalorder %v5158_v21, 3  ;;  %v5181_v55 = vsel %vm5177_vm10, %v5161_v8, %v5164_v33 }
 0x4cc   :  { %7798 = vcosq.f32 %v5025_v59  ;;  %v5182_v37 = vsel %vm5180_vm14, %v5170_v0, 2102212464  ;;  %v5186_v7 = vsel %vm5180_vm14, %v5173_v61, 920167782  ;;  %v5185_v26 = vsel %vm5177_vm10, %v5164_v33, %v5167_v47 }
 0x4cd   :  { %7800 = vsinq.f32 %v5025_v59  ;;  %v7281_v57 = vmin.u32 %v5107_v12, %v12432_v45  ;;  %v5183_v22 = vsel %vm5179_vm0, %v5167_v47, %v5182_v37  ;;  %v5031_v14 = vand.u32 3, %v5030_v16 }
 0x4ce   :  { %v5187_v6 = vsel %vm5179_vm0, %v5170_v0, %v5186_v7  ;;  %v5189_v41 = vsel %vm5177_vm10, %v5167_v47, %v5170_v0  ;;  %v5190_v58 = vsel %vm5180_vm14, %v5176_v31, 1326507024  ;;  %vm12451_vm1 = vcmp.le.f32.partialorder %v5041_v48, 0.7853982 }
 0x4cf   :  { %vm5043_vm15 = vcmp.lt.s32.totalorder %v14161_v43, 0  ;;  %v5109_v3 = vclz %v7281_v57  ;;  %v5127_v23 = vsub.s32 4, %v5103_v28  ;;  %v5184_v46 = vsel %vm5178_vm13, %v5181_v55, %v5183_v22 }
 0x4d0   :  { %v5188_v15 = vsel %vm5178_vm13, %v5185_v26, %v5187_v6  ;;  %v5191_v40 = vsel %vm5179_vm0, %v5173_v61, %v5190_v58  ;;  %v5252_v5 = vand.u32 2139095040, %v14169_v25  ;;  %vm5029_vm2 = vweird.f32 %v14158_v63 }
 0x4d1   :  { %v7282_v2 = vadd.s32 4294967294, %v5109_v3  ;;  %v5192_v48 = vsel %vm5178_vm13, %v5189_v41, %v5191_v40  ;;  %v12463_v49 = vmul.u32.u64.low %v12428_v35, %v5188_v15  ;;  %v12464_v50 = vmul.u32.u64.high %v12428_v35, %v5188_v15, %v12463_v49 }
 0x4d2   :  { %vm5032_vm3 = vcmp.lt.s32.totalorder %v5031_v14, 2  ;;  %v12468_v52 = vmul.u32.u64.low %v12428_v35, %v5192_v48  ;;  %v12469_v13 = vmul.u32.u64.high %v12428_v35, %v5192_v48, %v12468_v52  ;;  %v5253_v62 = vshrl.u32 %v5252_v5, 23 }
 0x4d3   :  { %vm5033_vm5 = vcmp.eq.s32.totalorder %v5031_v14, 0  ;;  %v5097_v20 = vadd.s32 %v12391_v29, %v12400_v30  ;;  %vm7283_vm4 = vcmp.lt.s32.totalorder %v7282_v2, 0  ;;  %v5128_v53 = vsel %vm5043_vm15, %v5127_v23, %v5103_v28 }
 0x4d4   :  { %v5112_v39 = vsel %vm7283_vm4, 0, %v7282_v2  ;;  %v5200_v1 = vmul.u32 %v12428_v35, %v5184_v46  ;;  %v5249_v4 = vand.u32 2147483647, %v14169_v25  ;;  %v7288_v32 = vadd.s32 4294967169, %v5253_v62 }
 0x4d5   :  { %v5113_v11 = vsub.s32 32, %v5112_v39  ;;  %v5114_v21 = vshll.u32 %v12432_v45, %v5112_v39  ;;  %v5117_v42 = vsub.s32 4294967266, %v5112_v39  ;;  %v5203_v27 = vadd.s32 1, %v12464_v50 }
 0x4d6   :  { %v7799_v16 = vpop.eup %7798  ;;  %vm5036_vm6 = vcmp.eq.s32.totalorder %v5031_v14, 2  ;;  %v5130_v29 = vsel %vm12451_vm1, 0, %v5128_v53  ;;  %vm5202_vm8 = vc.u32 %v12469_v13, %v12463_v49  ;;  %v5259_v30 = vadd.s32 1, %v7288_v32 }
 0x4d7   :  { %v7801_v28 = vpop.eup %7800  ;;  %v5037_v54 = vxor.u32 2147483648, %v7799_v16  ;;  %v5115_v56 = vshrl.u32 %v5097_v20, %v5113_v11  ;;  %v5118_v35 = vadd.s32 127, %v5117_v42  ;;  %v5204_v10 = vsel %vm5202_vm8, %v5203_v27, %v12464_v50  ;;  %v14170_v20 = vld [vmem:[#allocation24_spill] sm:$0xff] }
 0x4d8   :  { %v5034_v8 = vxor.u32 2147483648, %v7801_v28  ;;  %v5205_v61 = vadd.s32 %v5204_v10, %v5200_v1  ;;  %v5256_v51 = vand.u32 8388607, %v5249_v4  ;;  %vm5260_vm7 = vcmp.gt.s32.totalorder %v5259_v30, 0 }
 0x4d9   :  { %v5038_v45 = vsel %vm5036_vm6, %v5037_v54, %v7801_v28  ;;  %v5116_v33 = vor.u32 %v5115_v56, %v5114_v21  ;;  %v5119_v47 = vshll.u32 %v5118_v35, 23  ;;  %v5261_v0 = vsel %vm5260_vm7, %v5259_v30, 0 }
 0x4da   :  { %v5035_v36 = vsel %vm5033_vm5, %v7799_v16, %v5034_v8  ;;  %v5206_v31 = vadd.s32 536870912, %v5205_v61  ;;  %v5263_v59 = vand.u32 31, %v5261_v0  ;;  %v5134_v7 = vadd.s32 3, %v5130_v29 }
 0x4db   :  { %v5039_v12 = vsel %vm5032_vm3, %v5035_v36, %v5038_v45  ;;  %v5120_v55 = vor.u32 4788187, %v5119_v47  ;;  %v5123_v37 = vcvt.s32.f32 %v5116_v33  ;;  %v5257_v26 = vor.u32 8388608, %v5256_v51 }
 0x4dc   :  { %v5040_v57 = vsel %vm5029_vm2, nan, %v5039_v12  ;;  %v12490_v22 = vshrl.u32 %v5206_v31, 30  ;;  %v5264_v6 = vsub.s32 32, %v5263_v59  ;;  %v5262_v58 = vshrl.u32 %v5261_v0, 5 }
 0x4dd   :  { %v5121_v41 = vand.u32 2147483647, %v5120_v55  ;;  %v5266_v3 = vshll.u32 %v14044_v38, %v5263_v59  ;;  %v5269_v23 = vshll.u32 %v14038_v18, %v5263_v59  ;;  %7061 = vst [vmem:[#allocation5 + $0x160] sm:$0xff] %v5040_v57  ;;  %v5272_v15 = vshll.u32 %v14039_v24, %v5263_v59 }
 0x4de   :  { %v5208_v14 = vshll.u32 %v12490_v22, 30  ;;  %v5267_v46 = vshrl.u32 %v14038_v18, %v5264_v6  ;;  %v5275_v63 = vshll.u32 %v14040_v19, %v5263_v59  ;;  %v5270_v5 = vshrl.u32 %v14039_v24, %v5264_v6 }
 0x4df   :  { %v5124_v40 = vmul.f32 %v5123_v37, %v5121_v41  ;;  %v5273_v2 = vshrl.u32 %v14040_v19, %v5264_v6  ;;  %v5276_v48 = vshrl.u32 %v14041_v34, %v5264_v6  ;;  %v12501_v50 = vand.u32 3, %v5134_v7 }
 0x4e0   :  { %v12503_v52 = vsub.s32 %v5205_v61, %v5208_v14  ;;  %v5278_v62 = vshll.u32 %v14041_v34, %v5263_v59  ;;  %v5356_v53 = vand.u32 2139095040, %v14170_v20  ;;  %v5201_v1 = vadd.s32 %v12463_v49, %v12469_v13 }
 0x4e1   :  { %v5125_v39 = vxor.u32 2147483648, %v5124_v40  ;;  %v5265_v32 = vshrl.u32 %v14044_v38, %v5264_v6  ;;  %v12510_v11 = vshll.u32 %v5257_v26, 8  ;;  %v5268_v42 = vor.u32 %v5267_v46, %v5266_v3 }
 0x4e2   :  { %v5211_v21 = vsub.s32 0, %v12503_v52  ;;  %v5271_v27 = vor.u32 %v5270_v5, %v5269_v23  ;;  %v5279_v16 = vshrl.u32 %v14042_v60, %v5264_v6  ;;  %v5274_v30 = vor.u32 %v5273_v2, %v5272_v15 }
 0x4e3   :  { %v5126_v29 = vsel %vm5043_vm15, %v5125_v39, %v5124_v40  ;;  %v5277_v28 = vor.u32 %v5276_v48, %v5275_v63  ;;  %vm5281_vm9 = vcmp.lt.s32.totalorder %v5262_v58, 1  ;;  %v5357_v56 = vshrl.u32 %v5356_v53, 23 }
 0x4e4   :  { %v5129_v49 = vsel %vm12451_vm1, %v14161_v43, %v5126_v29  ;;  %v7285_v13 = vmin.u32 %v5211_v21, %v12503_v52  ;;  %v5280_v54 = vor.u32 %v5279_v16, %v5278_v62  ;;  %vm5147_vm11 = vcmp.lt.s32.totalorder %v14164_v9, 0 }
 0x4e5   :  { %7802 = vcosq.f32 %v5129_v49  ;;  %vm5282_vm12 = vcmp.lt.s32.totalorder %v5262_v58, 2  ;;  %vm5283_vm10 = vcmp.lt.s32.totalorder %v5262_v58, 3  ;;  %vm5284_vm14 = vcmp.lt.s32.totalorder %v5262_v58, 4 }
 0x4e6   :  { %7804 = vsinq.f32 %v5129_v49  ;;  %v5213_v35 = vclz %v7285_v13  ;;  %v5285_v10 = vsel %vm5281_vm9, %v5265_v32, %v5268_v42  ;;  %v5289_v8 = vsel %vm5281_vm9, %v5268_v42, %v5271_v27 }
 0x4e7   :  { %v5231_v61 = vsub.s32 4, %v12490_v22  ;;  %v5286_v17 = vsel %vm5284_vm14, %v5274_v30, 2102212464  ;;  %v5290_v51 = vsel %vm5284_vm14, %v5277_v28, 920167782  ;;  %v5293_v45 = vsel %vm5281_vm9, %v5271_v27, %v5274_v30 }
 0x4e8   :  { %v7286_v33 = vadd.s32 4294967294, %v5213_v35  ;;  %v5287_v47 = vsel %vm5283_vm10, %v5271_v27, %v5286_v17  ;;  %v5291_v0 = vsel %vm5283_vm10, %v5274_v30, %v5290_v51  ;;  %v5294_v36 = vsel %vm5284_vm14, %v5280_v54, 1326507024 }
 0x4e9   :  { %v5288_v31 = vsel %vm5282_vm12, %v5285_v10, %v5287_v47  ;;  %v5292_v59 = vsel %vm5282_vm12, %v5289_v8, %v5291_v0  ;;  %v5295_v12 = vsel %vm5283_vm10, %v5277_v28, %v5294_v36  ;;  %v7292_v55 = vadd.s32 4294967169, %v5357_v56 }
 0x4ea   :  { %vm7287_vm13 = vcmp.lt.s32.totalorder %v7286_v33, 0  ;;  %v5296_v37 = vsel %vm5282_vm12, %v5293_v45, %v5295_v12  ;;  %v12532_v7 = vmul.u32.u64.low %v12510_v11, %v5292_v59  ;;  %v12533_v57 = vmul.u32.u64.high %v12510_v11, %v5292_v59, %v12532_v7 }
 0x4eb   :  { %v5216_v26 = vsel %vm7287_vm13, 0, %v7286_v33  ;;  %v12537_v6 = vmul.u32.u64.low %v12510_v11, %v5296_v37  ;;  %v12538_v41 = vmul.u32.u64.high %v12510_v11, %v5296_v37, %v12537_v6  ;;  %v5353_v3 = vand.u32 2147483647, %v14170_v20 }
 0x4ec   :  { %vm12543_vm0 = vcmp.le.f32.partialorder %v5145_v44, 0.7853982  ;;  %v5217_v58 = vsub.s32 32, %v5216_v26  ;;  %v5218_v14 = vshll.u32 %v12503_v52, %v5216_v26  ;;  %v5221_v46 = vsub.s32 4294967266, %v5216_v26 }
 0x4ed   :  { %vm5136_vm1 = vcmp.lt.s32.totalorder %v12501_v50, 2  ;;  %vm5137_vm15 = vcmp.eq.s32.totalorder %v12501_v50, 0  ;;  %v5304_v15 = vmul.u32 %v12510_v11, %v5288_v31  ;;  %v5363_v63 = vadd.s32 1, %v7292_v55 }
 0x4ee   :  { %v5219_v40 = vshrl.u32 %v5201_v1, %v5217_v58  ;;  %v5222_v5 = vadd.s32 127, %v5221_v46  ;;  %v5232_v44 = vsel %vm5147_vm11, %v5231_v61, %v12490_v22  ;;  %v5307_v2 = vadd.s32 1, %v12533_v57 }
 0x4ef   :  { %v7803_v48 = vpop.eup %7802  ;;  %vm5140_vm2 = vcmp.eq.s32.totalorder %v12501_v50, 2  ;;  %vm5306_vm3 = vc.u32 %v12538_v41, %v12532_v7  ;;  %v5360_v52 = vand.u32 8388607, %v5353_v3  ;;  %vm5364_vm5 = vcmp.gt.s32.totalorder %v5363_v63, 0 }
 0x4f0   :  { %v7805_v62 = vpop.eup %7804  ;;  %v5141_v53 = vxor.u32 2147483648, %v7803_v48  ;;  %v5220_v39 = vor.u32 %v5219_v40, %v5218_v14  ;;  %v5223_v1 = vshll.u32 %v5222_v5, 23  ;;  %v5308_v32 = vsel %vm5306_vm3, %v5307_v2, %v12533_v57 }
 0x4f1   :  { %v5138_v11 = vxor.u32 2147483648, %v7805_v62  ;;  %v5234_v22 = vsel %vm12543_vm0, 0, %v5232_v44  ;;  %v5309_v21 = vadd.s32 %v5308_v32, %v5304_v15  ;;  %v5365_v42 = vsel %vm5364_vm5, %v5363_v63, 0  ;;  %v14173_v32 = vld [vmem:[#allocation25_spill] sm:$0xff] }
 0x4f2   :  { %vm5133_vm4 = vweird.f32 %v14161_v43  ;;  %v5142_v27 = vsel %vm5140_vm2, %v5141_v53, %v7805_v62  ;;  %v5224_v16 = vor.u32 4788187, %v5223_v1  ;;  %v5227_v29 = vcvt.s32.f32 %v5220_v39 }
 0x4f3   :  { %v5139_v30 = vsel %vm5137_vm15, %v7803_v48, %v5138_v11  ;;  %v5310_v28 = vadd.s32 536870912, %v5309_v21  ;;  %v5367_v49 = vand.u32 31, %v5365_v42  ;;  %v5238_v56 = vadd.s32 3, %v5234_v22 }
 0x4f4   :  { %v5143_v13 = vsel %vm5136_vm1, %v5139_v30, %v5142_v27  ;;  %v5225_v54 = vand.u32 2147483647, %v5224_v16  ;;  %v5361_v35 = vor.u32 8388608, %v5360_v52  ;;  %v5366_v61 = vshrl.u32 %v5365_v42, 5 }
 0x4f5   :  { %v5144_v10 = vsel %vm5133_vm4, nan, %v5143_v13  ;;  %v12568_v8 = vshrl.u32 %v5310_v28, 30  ;;  %v5368_v17 = vsub.s32 32, %v5367_v49  ;;  %v5370_v51 = vshll.u32 %v14044_v38, %v5367_v49 }
 0x4f6   :  { %v5228_v43 = vmul.f32 %v5227_v29, %v5225_v54  ;;  %v5373_v45 = vshll.u32 %v14038_v18, %v5367_v49  ;;  %7062 = vst [vmem:[#allocation5 + $0x168] sm:$0xff] %v5144_v10  ;;  %v5376_v50 = vshll.u32 %v14039_v24, %v5367_v49  ;;  %v5379_v0 = vshll.u32 %v14040_v19, %v5367_v49 }
 0x4f7   :  { %v5312_v33 = vshll.u32 %v12568_v8, 30  ;;  %v5371_v47 = vshrl.u32 %v14038_v18, %v5368_v17  ;;  %v5374_v31 = vshrl.u32 %v14039_v24, %v5368_v17  ;;  %v5377_v59 = vshrl.u32 %v14040_v19, %v5368_v17 }
 0x4f8   :  { %v5229_v36 = vxor.u32 2147483648, %v5228_v43  ;;  %v5380_v12 = vshrl.u32 %v14041_v34, %v5368_v17  ;;  %v12579_v55 = vand.u32 3, %v5238_v56  ;;  %vm5385_vm6 = vcmp.lt.s32.totalorder %v5366_v61, 1 }
 0x4f9   :  { %v12581_v37 = vsub.s32 %v5309_v21, %v5312_v33  ;;  %v12583_v57 = vshll.u32 %v5361_v35, 8  ;;  %v5372_v6 = vor.u32 %v5371_v47, %v5370_v51  ;;  %v5375_v58 = vor.u32 %v5374_v31, %v5373_v45 }
 0x4fa   :  { %v5230_v26 = vsel %vm5147_vm11, %v5229_v36, %v5228_v43  ;;  %v5382_v14 = vshll.u32 %v14041_v34, %v5367_v49  ;;  %v5369_v63 = vshrl.u32 %v14044_v38, %v5368_v17  ;;  %v5381_v40 = vor.u32 %v5380_v12, %v5379_v0 }
 0x4fb   :  { %v5233_v46 = vsel %vm12543_vm0, %v14164_v9, %v5230_v26  ;;  %v5315_v15 = vsub.s32 0, %v12581_v37  ;;  %v5378_v5 = vor.u32 %v5377_v59, %v5376_v50  ;;  %v5383_v44 = vshrl.u32 %v14042_v60, %v5368_v17 }
 0x4fc   :  { %7806 = vcosq.f32 %v5233_v46  ;;  %vm5388_vm8 = vcmp.lt.s32.totalorder %v5366_v61, 4  ;;  %vm5386_vm7 = vcmp.lt.s32.totalorder %v5366_v61, 2  ;;  %vm5387_vm9 = vcmp.lt.s32.totalorder %v5366_v61, 3 }
 0x4fd   :  { %7808 = vsinq.f32 %v5233_v46  ;;  %v7289_v2 = vmin.u32 %v5315_v15, %v12581_v37  ;;  %v5384_v48 = vor.u32 %v5383_v44, %v5382_v14  ;;  %v5390_v52 = vsel %vm5388_vm8, %v5378_v5, 2102212464 }
 0x4fe   :  { %v5393_v23 = vsel %vm5385_vm6, %v5372_v6, %v5375_v58  ;;  %v5394_v62 = vsel %vm5388_vm8, %v5381_v40, 920167782  ;;  %v5305_v53 = vadd.s32 %v12532_v7, %v12538_v41  ;;  %v5389_v1 = vsel %vm5385_vm6, %v5369_v63, %v5372_v6 }
 0x4ff   :  { %v5317_v39 = vclz %v7289_v2  ;;  %v5460_v11 = vand.u32 2139095040, %v14173_v32  ;;  %v5391_v22 = vsel %vm5387_vm9, %v5375_v58, %v5390_v52  ;;  %v5395_v21 = vsel %vm5387_vm9, %v5378_v5, %v5394_v62 }
 0x500   :  { %v5397_v42 = vsel %vm5385_vm6, %v5375_v58, %v5378_v5  ;;  %v5398_v27 = vsel %vm5388_vm8, %v5384_v48, 1326507024  ;;  %vm5237_vm11 = vweird.f32 %v14164_v9  ;;  %v5335_v29 = vsub.s32 4, %v12568_v8 }
 0x501   :  { %v7290_v16 = vadd.s32 4294967294, %v5317_v39  ;;  %v5396_v7 = vsel %vm5386_vm7, %v5393_v23, %v5395_v21  ;;  %v5399_v41 = vsel %vm5387_vm9, %v5381_v40, %v5398_v27  ;;  %v5392_v30 = vsel %vm5386_vm7, %v5389_v1, %v5391_v22 }
 0x502   :  { %v5400_v28 = vsel %vm5386_vm7, %v5397_v42, %v5399_v41  ;;  %v12613_v49 = vmul.u32.u64.low %v12583_v57, %v5396_v7  ;;  %v12614_v13 = vmul.u32.u64.high %v12583_v57, %v5396_v7, %v12613_v49  ;;  %v5461_v35 = vshrl.u32 %v5460_v11, 23 }
 0x503   :  { %vm7291_vm12 = vcmp.lt.s32.totalorder %v7290_v16, 0  ;;  %v12618_v54 = vmul.u32.u64.low %v12583_v57, %v5400_v28  ;;  %v12619_v56 = vmul.u32.u64.high %v12583_v57, %v5400_v28, %v12618_v54  ;;  %vm5240_vm10 = vcmp.lt.s32.totalorder %v12579_v55, 2 }
 0x504   :  { %vm12624_vm14 = vcmp.le.f32.partialorder %v5249_v4, 0.7853982  ;;  %vm5251_vm13 = vcmp.lt.s32.totalorder %v14169_v25, 0  ;;  %v5320_v61 = vsel %vm7291_vm12, 0, %v7290_v16  ;;  %v7296_v45 = vadd.s32 4294967169, %v5461_v35 }
 0x505   :  { %v5321_v17 = vsub.s32 32, %v5320_v61  ;;  %v5322_v43 = vshll.u32 %v12581_v37, %v5320_v61  ;;  %v5325_v51 = vsub.s32 4294967266, %v5320_v61  ;;  %vm5241_vm0 = vcmp.eq.s32.totalorder %v12579_v55, 0 }
 0x506   :  { %v7807_v33 = vpop.eup %7806  ;;  %vm5244_vm1 = vcmp.eq.s32.totalorder %v12579_v55, 2  ;;  %v5408_v47 = vmul.u32 %v12583_v57, %v5392_v30  ;;  %v5411_v4 = vadd.s32 1, %v12614_v13  ;;  %v5336_v59 = vsel %vm5251_vm13, %v5335_v29, %v12568_v8 }
 0x507   :  { %v7809_v50 = vpop.eup %7808  ;;  %v5245_v0 = vxor.u32 2147483648, %v7807_v33  ;;  %v5323_v36 = vshrl.u32 %v5305_v53, %v5321_v17  ;;  %v5326_v31 = vadd.s32 127, %v5325_v51  ;;  %vm5410_vm15 = vc.u32 %v12619_v56, %v12613_v49 }
 0x508   :  { %v5242_v12 = vxor.u32 2147483648, %v7809_v50  ;;  %v5457_v37 = vand.u32 2147483647, %v14173_v32  ;;  %v5467_v26 = vadd.s32 1, %v7296_v45  ;;  %v5412_v14 = vsel %vm5410_vm15, %v5411_v4, %v12614_v13  ;;  %v14176_v45 = vld [vmem:[#allocation42_spill] sm:$0xff] }
 0x509   :  { %v5246_v6 = vsel %vm5244_vm1, %v5245_v0, %v7809_v50  ;;  %v5324_v58 = vor.u32 %v5323_v36, %v5322_v43  ;;  %v5327_v57 = vshll.u32 %v5326_v31, 23  ;;  %v5338_v15 = vsel %vm12624_vm14, 0, %v5336_v59 }
 0x50a   :  { %v5243_v46 = vsel %vm5241_vm0, %v7807_v33, %v5242_v12  ;;  %v5413_v63 = vadd.s32 %v5412_v14, %v5408_v47  ;;  %vm5468_vm2 = vcmp.gt.s32.totalorder %v5467_v26, 0  ;;  %v5342_v62 = vadd.s32 3, %v5338_v15 }
 0x50b   :  { %v5247_v8 = vsel %vm5240_vm10, %v5243_v46, %v5246_v6  ;;  %v5328_v40 = vor.u32 4788187, %v5327_v57  ;;  %v5331_v5 = vcvt.s32.f32 %v5324_v58  ;;  %v5469_v44 = vsel %vm5468_vm2, %v5467_v26, 0 }
 0x50c   :  { %v5248_v2 = vsel %vm5237_vm11, nan, %v5247_v8  ;;  %v5414_v48 = vadd.s32 536870912, %v5413_v63  ;;  %v5471_v52 = vand.u32 31, %v5469_v44  ;;  %v5464_v39 = vand.u32 8388607, %v5457_v37 }
 0x50d   :  { %v5329_v23 = vand.u32 2147483647, %v5328_v40  ;;  %7063 = vst [vmem:[#allocation5 + $0x170] sm:$0xff] %v5248_v2  ;;  %v12651_v1 = vshrl.u32 %v5469_v44, 5  ;;  %v12662_v13 = vand.u32 3, %v5342_v62  ;;  %vm5355_vm3 = vcmp.lt.s32.totalorder %v14170_v20, 0 }
 0x50e   :  { %v5415_v53 = vshrl.u32 %v5414_v48, 30  ;;  %v5472_v11 = vsub.s32 32, %v5471_v52  ;;  %v5474_v22 = vshll.u32 %v14044_v38, %v5471_v52  ;;  %v5477_v21 = vshll.u32 %v14038_v18, %v5471_v52 }
 0x50f   :  { %v5332_v55 = vmul.f32 %v5331_v5, %v5329_v23  ;;  %v5480_v9 = vshll.u32 %v14039_v24, %v5471_v52  ;;  %v5483_v16 = vshll.u32 %v14040_v19, %v5471_v52  ;;  %v5486_v29 = vshll.u32 %v14041_v34, %v5471_v52 }
 0x510   :  { %v5416_v42 = vshll.u32 %v5415_v53, 30  ;;  %v5475_v27 = vshrl.u32 %v14038_v18, %v5472_v11  ;;  %v5478_v41 = vshrl.u32 %v14039_v24, %v5472_v11  ;;  %v5481_v30 = vshrl.u32 %v14040_v19, %v5472_v11 }
 0x511   :  { %v5333_v7 = vxor.u32 2147483648, %v5332_v55  ;;  %v5484_v28 = vshrl.u32 %v14041_v34, %v5472_v11  ;;  %v5465_v35 = vor.u32 8388608, %v5464_v39  ;;  %v5487_v61 = vshrl.u32 %v14042_v60, %v5472_v11 }
 0x512   :  { %v12664_v54 = vsub.s32 %v5413_v63, %v5416_v42  ;;  %v5473_v43 = vshrl.u32 %v14044_v38, %v5472_v11  ;;  %v5476_v51 = vor.u32 %v5475_v27, %v5474_v22  ;;  %v5564_v33 = vand.u32 2139095040, %v14176_v45 }
 0x513   :  { %v5334_v17 = vsel %vm5251_vm13, %v5333_v7, %v5332_v55  ;;  %v5479_v50 = vor.u32 %v5478_v41, %v5477_v21  ;;  %v5482_v0 = vor.u32 %v5481_v30, %v5480_v9  ;;  %v5485_v36 = vor.u32 %v5484_v28, %v5483_v16 }
 0x514   :  { %v5337_v47 = vsel %vm12624_vm14, %v14169_v25, %v5334_v17  ;;  %v5419_v4 = vsub.s32 0, %v12664_v54  ;;  %v5488_v31 = vor.u32 %v5487_v61, %v5486_v29  ;;  %vm5489_vm5 = vcmp.lt.s32.totalorder %v12651_v1, 1 }
 0x515   :  { %7810 = vcosq.f32 %v5337_v47  ;;  %vm12679_vm4 = vcmp.le.f32.partialorder %v5353_v3, 0.7853982  ;;  %v5505_v10 = vshll.u32 %v5465_v35, 8  ;;  %v5439_v26 = vsub.s32 4, %v5415_v53 }
 0x516   :  { %7812 = vsinq.f32 %v5337_v47  ;;  %v7293_v12 = vmin.u32 %v5419_v4, %v12664_v54  ;;  %vm5491_vm6 = vcmp.lt.s32.totalorder %v12651_v1, 3  ;;  %vm5492_vm8 = vcmp.lt.s32.totalorder %v12651_v1, 4 }
 0x517   :  { %v5565_v6 = vshrl.u32 %v5564_v33, 23  ;;  %vm5490_vm7 = vcmp.lt.s32.totalorder %v12651_v1, 2  ;;  %v5497_v57 = vsel %vm5489_vm5, %v5476_v51, %v5479_v50  ;;  %v5501_v14 = vsel %vm5489_vm5, %v5479_v50, %v5482_v0 }
 0x518   :  { %v5421_v58 = vclz %v7293_v12  ;;  %vm5344_vm9 = vcmp.lt.s32.totalorder %v12662_v13, 2  ;;  %v5493_v3 = vsel %vm5489_vm5, %v5473_v43, %v5476_v51  ;;  %v5494_v46 = vsel %vm5492_vm8, %v5482_v0, 2102212464 }
 0x519   :  { %v5498_v15 = vsel %vm5492_vm8, %v5485_v36, 920167782  ;;  %v5502_v63 = vsel %vm5492_vm8, %v5488_v31, 1326507024  ;;  %vm5341_vm11 = vweird.f32 %v14169_v25  ;;  %v5495_v40 = vsel %vm5491_vm6, %v5479_v50, %v5494_v46 }
 0x51a   :  { %v7294_v8 = vadd.s32 4294967294, %v5421_v58  ;;  %v5499_v5 = vsel %vm5491_vm6, %v5482_v0, %v5498_v15  ;;  %v5503_v44 = vsel %vm5491_vm6, %v5485_v36, %v5502_v63  ;;  %v5409_v2 = vadd.s32 %v12613_v49, %v12619_v56 }
 0x51b   :  { %v5500_v48 = vsel %vm5490_vm7, %v5497_v57, %v5499_v5  ;;  %v5504_v52 = vsel %vm5490_vm7, %v5501_v14, %v5503_v44  ;;  %v7300_v23 = vadd.s32 4294967169, %v5565_v6  ;;  %v5440_v62 = vsel %vm5355_vm3, %v5439_v26, %v5415_v53 }
 0x51c   :  { %vm7295_vm12 = vcmp.lt.s32.totalorder %v7294_v8, 0  ;;  %v12703_v39 = vmul.u32.u64.low %v5505_v10, %v5504_v52  ;;  %v12704_v11 = vmul.u32.u64.high %v5505_v10, %v5504_v52, %v12703_v39  ;;  %v5496_v22 = vsel %vm5490_vm7, %v5493_v3, %v5495_v40 }
 0x51d   :  { %v5424_v55 = vsel %vm7295_vm12, 0, %v7294_v8  ;;  %v12708_v21 = vmul.u32.u64.low %v5505_v10, %v5500_v48  ;;  %v12709_v49 = vmul.u32.u64.high %v5505_v10, %v5500_v48, %v12708_v21  ;;  %v5571_v27 = vadd.s32 1, %v7300_v23 }
 0x51e   :  { %v5425_v56 = vsub.s32 32, %v5424_v55  ;;  %v5426_v9 = vshll.u32 %v12664_v54, %v5424_v55  ;;  %v5429_v42 = vsub.s32 4294967266, %v5424_v55  ;;  %vm5345_vm10 = vcmp.eq.s32.totalorder %v12662_v13, 0 }
 0x51f   :  { %v7811_v16 = vpop.eup %7810  ;;  %vm5348_vm14 = vcmp.eq.s32.totalorder %v12662_v13, 2  ;;  %v5442_v53 = vsel %vm12679_vm4, 0, %v5440_v62  ;;  %v5561_v1 = vand.u32 2147483647, %v14176_v45  ;;  %v5512_v28 = vmul.u32 %v5505_v10, %v5496_v22 }
 0x520   :  { %v7813_v29 = vpop.eup %7812  ;;  %v5349_v7 = vxor.u32 2147483648, %v7811_v16  ;;  %v5427_v41 = vshrl.u32 %v5409_v2, %v5425_v56  ;;  %v5430_v30 = vadd.s32 127, %v5429_v42  ;;  %vm5514_vm13 = vc.u32 %v12704_v11, %v12708_v21 }
 0x521   :  { %v5346_v35 = vxor.u32 2147483648, %v7813_v29  ;;  %v5515_v54 = vadd.s32 1, %v12709_v49  ;;  %vm5572_vm0 = vcmp.gt.s32.totalorder %v5571_v27, 0  ;;  %v5568_v4 = vand.u32 8388607, %v5561_v1 }
 0x522   :  { %v5350_v61 = vsel %vm5348_vm14, %v5349_v7, %v7813_v29  ;;  %v5428_v17 = vor.u32 %v5427_v41, %v5426_v9  ;;  %v5431_v43 = vshll.u32 %v5430_v30, 23  ;;  %v5573_v51 = vsel %vm5572_vm0, %v5571_v27, 0 }
 0x523   :  { %v5347_v33 = vsel %vm5345_vm10, %v7811_v16, %v5346_v35  ;;  %v5516_v47 = vsel %vm5514_vm13, %v5515_v54, %v12709_v49  ;;  %v5575_v50 = vand.u32 31, %v5573_v51  ;;  %v5446_v26 = vadd.s32 3, %v5442_v53  ;;  %v14179_v35 = vld [vmem:[#allocation43_spill] sm:$0xff] }
 0x524   :  { %v5351_v0 = vsel %vm5344_vm9, %v5347_v33, %v5350_v61  ;;  %v5432_v36 = vor.u32 4788187, %v5431_v43  ;;  %v5435_v31 = vcvt.s32.f32 %v5428_v17  ;;  %v5517_v12 = vadd.s32 %v5516_v47, %v5512_v28 }
 0x525   :  { %v5352_v10 = vsel %vm5341_vm11, nan, %v5351_v0  ;;  %v5576_v6 = vsub.s32 32, %v5575_v50  ;;  %v5578_v58 = vshll.u32 %v14044_v38, %v5575_v50  ;;  %v5581_v3 = vshll.u32 %v14038_v18, %v5575_v50 }
 0x526   :  { %v5433_v57 = vand.u32 2147483647, %v5432_v36  ;;  %v5518_v14 = vadd.s32 536870912, %v5517_v12  ;;  %v5584_v46 = vshll.u32 %v14039_v24, %v5575_v50  ;;  %7064 = vst [vmem:[#allocation5 + $0x178] sm:$0xff] %v5352_v10  ;;  %v5587_v25 = vshll.u32 %v14040_v19, %v5575_v50 }
 0x527   :  { %v5579_v13 = vshrl.u32 %v14038_v18, %v5576_v6  ;;  %v5582_v15 = vshrl.u32 %v14039_v24, %v5576_v6  ;;  %v5585_v63 = vshrl.u32 %v14040_v19, %v5576_v6  ;;  %v5574_v5 = vshrl.u32 %v5573_v51, 5 }
 0x528   :  { %v5436_v8 = vmul.f32 %v5435_v31, %v5433_v57  ;;  %v12737_v40 = vshrl.u32 %v5518_v14, 30  ;;  %v5588_v44 = vshrl.u32 %v14041_v34, %v5576_v6  ;;  %v5569_v2 = vor.u32 8388608, %v5568_v4 }
 0x529   :  { %v5590_v48 = vshll.u32 %v14041_v34, %v5575_v50  ;;  %v5591_v52 = vshrl.u32 %v14042_v60, %v5576_v6  ;;  %v12742_v62 = vand.u32 3, %v5446_v26  ;;  %v5577_v55 = vshrl.u32 %v14044_v38, %v5576_v6 }
 0x52a   :  { %v5437_v23 = vxor.u32 2147483648, %v5436_v8  ;;  %v5520_v39 = vshll.u32 %v12737_v40, 30  ;;  %v5580_v22 = vor.u32 %v5579_v13, %v5578_v58  ;;  %v5583_v49 = vor.u32 %v5582_v15, %v5581_v3 }
 0x52b   :  { %v5586_v56 = vor.u32 %v5585_v63, %v5584_v46  ;;  %v5589_v9 = vor.u32 %v5588_v44, %v5587_v25  ;;  %vm5593_vm1 = vcmp.lt.s32.totalorder %v5574_v5, 1  ;;  %vm5596_vm15 = vcmp.lt.s32.totalorder %v5574_v5, 4 }
 0x52c   :  { %v5438_v42 = vsel %vm5355_vm3, %v5437_v23, %v5436_v8  ;;  %v12748_v27 = vsub.s32 %v5517_v12, %v5520_v39  ;;  %v5592_v53 = vor.u32 %v5591_v52, %v5590_v48  ;;  %vm5595_vm2 = vcmp.lt.s32.totalorder %v5574_v5, 3 }
 0x52d   :  { %v5441_v16 = vsel %vm12679_vm4, %v14170_v20, %v5438_v42  ;;  %v5609_v29 = vshll.u32 %v5569_v2, 8  ;;  %vm5594_vm5 = vcmp.lt.s32.totalorder %v5574_v5, 2  ;;  %v5598_v41 = vsel %vm5596_vm15, %v5586_v56, 2102212464 }
 0x52e   :  { %7814 = vcosq.f32 %v5441_v16  ;;  %v5523_v7 = vsub.s32 0, %v12748_v27  ;;  %v5601_v30 = vsel %vm5593_vm1, %v5580_v22, %v5583_v49  ;;  %v5602_v28 = vsel %vm5596_vm15, %v5589_v9, 920167782 }
 0x52f   :  { %7816 = vsinq.f32 %v5441_v16  ;;  %v5668_v54 = vand.u32 2139095040, %v14179_v35  ;;  %v5597_v59 = vsel %vm5593_vm1, %v5577_v55, %v5580_v22  ;;  %v5603_v17 = vsel %vm5595_vm2, %v5586_v56, %v5602_v28 }
 0x530   :  { %v7297_v61 = vmin.u32 %v5523_v7, %v12748_v27  ;;  %v5599_v43 = vsel %vm5595_vm2, %v5583_v49, %v5598_v41  ;;  %v5604_v51 = vsel %vm5594_vm5, %v5601_v30, %v5603_v17  ;;  %v5605_v33 = vsel %vm5593_vm1, %v5583_v49, %v5586_v56  ;;  %v14182_v17 = vld [vmem:[#allocation44_spill] sm:$0xff] }
 0x531   :  { %v5606_v47 = vsel %vm5596_vm15, %v5592_v53, 1326507024  ;;  %vm5448_vm3 = vcmp.lt.s32.totalorder %v12742_v62, 2  ;;  %vm5459_vm4 = vcmp.lt.s32.totalorder %v14173_v32, 0  ;;  %v5669_v31 = vshrl.u32 %v5668_v54, 23 }
 0x532   :  { %v5525_v4 = vclz %v7297_v61  ;;  %v5607_v50 = vsel %vm5595_vm2, %v5589_v9, %v5606_v47  ;;  %v12768_v0 = vmul.u32.u64.low %v5609_v29, %v5604_v51  ;;  %v12769_v36 = vmul.u32.u64.high %v5609_v29, %v5604_v51, %v12768_v0 }
 0x533   :  { %v5543_v10 = vsub.s32 4, %v12737_v40  ;;  %v5600_v26 = vsel %vm5594_vm5, %v5597_v59, %v5599_v43  ;;  %v5608_v6 = vsel %vm5594_vm5, %v5605_v33, %v5607_v50  ;;  %v5665_v14 = vand.u32 2147483647, %v14179_v35 }
 0x534   :  { %v7298_v12 = vadd.s32 4294967294, %v5525_v4  ;;  %v12775_v58 = vmul.u32.u64.low %v5609_v29, %v5608_v6  ;;  %v12776_v57 = vmul.u32.u64.high %v5609_v29, %v5608_v6, %v12775_v58  ;;  %v7304_v3 = vadd.s32 4294967169, %v5669_v31 }
 0x535   :  { %vm5449_vm6 = vcmp.eq.s32.totalorder %v12742_v62, 0  ;;  %vm5452_vm8 = vcmp.eq.s32.totalorder %v12742_v62, 2  ;;  %v5513_v46 = vadd.s32 %v12708_v21, %v12704_v11  ;;  %v5616_v15 = vmul.u32 %v5609_v29, %v5600_v26 }
 0x536   :  { %vm7299_vm7 = vcmp.lt.s32.totalorder %v7298_v12, 0  ;;  %v5619_v63 = vadd.s32 1, %v12769_v36  ;;  %v5675_v25 = vadd.s32 1, %v7304_v3  ;;  %v5544_v48 = vsel %vm5459_vm4, %v5543_v10, %v12737_v40 }
 0x537   :  { %v5528_v13 = vsel %vm7299_vm7, 0, %v7298_v12  ;;  %vm5618_vm9 = vc.u32 %v12776_v57, %v12768_v0  ;;  %v5672_v11 = vand.u32 8388607, %v5665_v14  ;;  %vm5445_vm12 = vweird.f32 %v14170_v20 }
 0x538   :  { %v7815_v8 = vpop.eup %7814  ;;  %v5529_v5 = vsub.s32 32, %v5528_v13  ;;  %v5530_v44 = vshll.u32 %v12748_v27, %v5528_v13  ;;  %v5533_v2 = vsub.s32 4294967266, %v5528_v13  ;;  %vm5676_vm11 = vcmp.gt.s32.totalorder %v5675_v25, 0 }
 0x539   :  { %v7817_v52 = vpop.eup %7816  ;;  %v5453_v23 = vxor.u32 2147483648, %v7815_v8  ;;  %v5620_v22 = vsel %vm5618_vm9, %v5619_v63, %v12769_v36  ;;  %v5677_v56 = vsel %vm5676_vm11, %v5675_v25, 0  ;;  %vm12800_vm10 = vcmp.le.f32.partialorder %v5457_v37, 0.7853982 }
 0x53a   :  { %v5450_v21 = vxor.u32 2147483648, %v7817_v52  ;;  %v5531_v39 = vshrl.u32 %v5513_v46, %v5529_v5  ;;  %v5534_v55 = vadd.s32 127, %v5533_v2  ;;  %v5621_v40 = vadd.s32 %v5620_v22, %v5616_v15 }
 0x53b   :  { %v5454_v49 = vsel %vm5452_vm8, %v5453_v23, %v7817_v52  ;;  %v5546_v20 = vsel %vm12800_vm10, 0, %v5544_v48  ;;  %v5679_v7 = vand.u32 31, %v5677_v56  ;;  %v5673_v54 = vor.u32 8388608, %v5672_v11 }
 0x53c   :  { %v5451_v9 = vsel %vm5449_vm6, %v7815_v8, %v5450_v21  ;;  %v5532_v27 = vor.u32 %v5531_v39, %v5530_v44  ;;  %v5535_v16 = vshll.u32 %v5534_v55, 23  ;;  %v5622_v29 = vadd.s32 536870912, %v5621_v40 }
 0x53d   :  { %v5455_v53 = vsel %vm5448_vm3, %v5451_v9, %v5454_v49  ;;  %v5678_v37 = vshrl.u32 %v5677_v56, 5  ;;  %v5680_v59 = vsub.s32 32, %v5679_v7  ;;  %v5772_v43 = vand.u32 2139095040, %v14182_v17 }
 0x53e   :  { %v5456_v41 = vsel %vm5445_vm12, nan, %v5455_v53  ;;  %v5536_v30 = vor.u32 4788187, %v5535_v16  ;;  %v5539_v28 = vcvt.s32.f32 %v5532_v27  ;;  %v12808_v61 = vshrl.u32 %v5622_v29, 30 }
 0x53f   :  { %7065 = vst [vmem:[#allocation5 + $0x180] sm:$0xff] %v5456_v41  ;;  %v5682_v62 = vshll.u32 %v14044_v38, %v5679_v7  ;;  %v5685_v33 = vshll.u32 %v14038_v18, %v5679_v7  ;;  %v5688_v47 = vshll.u32 %v14039_v24, %v5679_v7  ;;  %v5683_v50 = vshrl.u32 %v14038_v18, %v5680_v59 }
 0x540   :  { %v5537_v51 = vand.u32 2147483647, %v5536_v30  ;;  %v5624_v4 = vshll.u32 %v12808_v61, 30  ;;  %v5691_v36 = vshll.u32 %v14040_v19, %v5679_v7  ;;  %v5694_v31 = vshll.u32 %v14041_v34, %v5679_v7 }
 0x541   :  { %v5686_v10 = vshrl.u32 %v14039_v24, %v5680_v59  ;;  %v5689_v26 = vshrl.u32 %v14040_v19, %v5680_v59  ;;  %v5692_v6 = vshrl.u32 %v14041_v34, %v5680_v59  ;;  %v5550_v58 = vadd.s32 3, %v5546_v20 }
 0x542   :  { %v5540_v12 = vmul.f32 %v5539_v28, %v5537_v51  ;;  %v12821_v3 = vsub.s32 %v5621_v40, %v5624_v4  ;;  %v5695_v46 = vshrl.u32 %v14042_v60, %v5680_v59  ;;  %v12824_v13 = vshll.u32 %v5673_v54, 8 }
 0x543   :  { %v5684_v63 = vor.u32 %v5683_v50, %v5682_v62  ;;  %v5687_v25 = vor.u32 %v5686_v10, %v5685_v33  ;;  %v5773_v8 = vshrl.u32 %v5772_v43, 23  ;;  %v5681_v44 = vshrl.u32 %v14044_v38, %v5680_v59 }
 0x544   :  { %v5541_v15 = vxor.u32 2147483648, %v5540_v12  ;;  %v5627_v5 = vsub.s32 0, %v12821_v3  ;;  %v5693_v2 = vor.u32 %v5692_v6, %v5691_v36  ;;  %vm5697_vm14 = vcmp.lt.s32.totalorder %v5678_v37, 1 }
 0x545   :  { %v5690_v52 = vor.u32 %v5689_v26, %v5688_v47  ;;  %v5696_v23 = vor.u32 %v5695_v46, %v5694_v31  ;;  %vm5700_vm13 = vcmp.lt.s32.totalorder %v5678_v37, 4  ;;  %vm5698_vm0 = vcmp.lt.s32.totalorder %v5678_v37, 2 }
 0x546   :  { %v5542_v48 = vsel %vm5459_vm4, %v5541_v15, %v5540_v12  ;;  %v7301_v21 = vmin.u32 %v5627_v5, %v12821_v3  ;;  %vm5699_vm1 = vcmp.lt.s32.totalorder %v5678_v37, 3  ;;  %vm5563_vm15 = vcmp.lt.s32.totalorder %v14176_v45, 0 }
 0x547   :  { %v5545_v11 = vsel %vm12800_vm10, %v14173_v32, %v5542_v48  ;;  %v5702_v39 = vsel %vm5700_vm13, %v5690_v52, 2102212464  ;;  %v5705_v55 = vsel %vm5697_vm14, %v5684_v63, %v5687_v25  ;;  %v5706_v22 = vsel %vm5700_vm13, %v5693_v2, 920167782 }
 0x548   :  { %7818 = vcosq.f32 %v5545_v11  ;;  %v5629_v49 = vclz %v7301_v21  ;;  %v5769_v40 = vand.u32 2147483647, %v14182_v17  ;;  %v7308_v56 = vadd.s32 4294967169, %v5773_v8 }
 0x549   :  { %7820 = vsinq.f32 %v5545_v11  ;;  %v5701_v9 = vsel %vm5697_vm14, %v5681_v44, %v5684_v63  ;;  %v5703_v42 = vsel %vm5699_vm1, %v5687_v25, %v5702_v39  ;;  %v5707_v27 = vsel %vm5699_vm1, %v5690_v52, %v5706_v22 }
 0x54a   :  { %v5709_v16 = vsel %vm5697_vm14, %v5687_v25, %v5690_v52  ;;  %vm12845_vm2 = vcmp.le.f32.partialorder %v5561_v1, 0.7853982  ;;  %v5617_v20 = vadd.s32 %v12768_v0, %v12776_v57  ;;  %v7302_v29 = vadd.s32 4294967294, %v5629_v49 }
 0x54b   :  { %v5708_v7 = vsel %vm5698_vm0, %v5705_v55, %v5707_v27  ;;  %v5710_v41 = vsel %vm5700_vm13, %v5696_v23, 1326507024  ;;  %v5647_v30 = vsub.s32 4, %v12808_v61  ;;  %vm5549_vm5 = vweird.f32 %v14173_v32 }
 0x54c   :  { %v5711_v28 = vsel %vm5699_vm1, %v5693_v2, %v5710_v41  ;;  %v12856_v54 = vmul.u32.u64.low %v12824_v13, %v5708_v7  ;;  %v12857_v59 = vmul.u32.u64.high %v12824_v13, %v5708_v7, %v12856_v54  ;;  %vm7303_vm3 = vcmp.lt.s32.totalorder %v7302_v29, 0 }
 0x54d   :  { %v5704_v1 = vsel %vm5698_vm0, %v5701_v9, %v5703_v42  ;;  %v5712_v0 = vsel %vm5698_vm0, %v5709_v16, %v5711_v28  ;;  %v5779_v57 = vadd.s32 1, %v7308_v56  ;;  %v5551_v43 = vand.u32 3, %v5550_v58 }
 0x54e   :  { %v5632_v51 = vsel %vm7303_vm3, 0, %v7302_v29  ;;  %v12864_v62 = vmul.u32.u64.low %v12824_v13, %v5712_v0  ;;  %v12865_v33 = vmul.u32.u64.high %v12824_v13, %v5712_v0, %v12864_v62  ;;  %v5720_v36 = vmul.u32 %v12824_v13, %v5704_v1 }
 0x54f   :  { %v5633_v47 = vsub.s32 32, %v5632_v51  ;;  %v5634_v4 = vshll.u32 %v12821_v3, %v5632_v51  ;;  %v5637_v50 = vsub.s32 4294967266, %v5632_v51  ;;  %vm5780_vm4 = vcmp.gt.s32.totalorder %v5779_v57, 0 }
 0x550   :  { %v5723_v31 = vadd.s32 1, %v12857_v59  ;;  %v5776_v37 = vand.u32 8388607, %v5769_v40  ;;  %v5781_v12 = vsel %vm5780_vm4, %v5779_v57, 0  ;;  %v5648_v6 = vsel %vm5563_vm15, %v5647_v30, %v12808_v61 }
 0x551   :  { %v5635_v10 = vshrl.u32 %v5617_v20, %v5633_v47  ;;  %v5638_v26 = vadd.s32 127, %v5637_v50  ;;  %v5783_v58 = vand.u32 31, %v5781_v12  ;;  %vm5552_vm6 = vcmp.lt.s32.totalorder %v5551_v43, 2 }
 0x552   :  { %v7819_v46 = vpop.eup %7818  ;;  %vm5553_vm8 = vcmp.eq.s32.totalorder %v5551_v43, 0  ;;  %vm5556_vm7 = vcmp.eq.s32.totalorder %v5551_v43, 2  ;;  %vm5722_vm9 = vc.u32 %v12865_v33, %v12856_v54  ;;  %v5650_v5 = vsel %vm12845_vm2, 0, %v5648_v6 }
 0x553   :  { %v7821_v3 = vpop.eup %7820  ;;  %v5557_v13 = vxor.u32 2147483648, %v7819_v46  ;;  %v5636_v15 = vor.u32 %v5635_v10, %v5634_v4  ;;  %v5639_v63 = vshll.u32 %v5638_v26, 23  ;;  %v5724_v25 = vsel %vm5722_vm9, %v5723_v31, %v12857_v59 }
 0x554   :  { %v5554_v8 = vxor.u32 2147483648, %v7821_v3  ;;  %v5725_v44 = vadd.s32 %v5724_v25, %v5720_v36  ;;  %v5784_v61 = vsub.s32 32, %v5783_v58  ;;  %v5777_v23 = vor.u32 8388608, %v5776_v37 }
 0x555   :  { %v5558_v2 = vsel %vm5556_vm7, %v5557_v13, %v7821_v3  ;;  %v5640_v48 = vor.u32 4788187, %v5639_v63  ;;  %v5643_v52 = vcvt.s32.f32 %v5636_v15  ;;  %v5786_v39 = vshll.u32 %v14044_v38, %v5783_v58 }
 0x556   :  { %v5555_v11 = vsel %vm5553_vm8, %v7819_v46, %v5554_v8  ;;  %v5726_v21 = vadd.s32 536870912, %v5725_v44  ;;  %v5789_v55 = vshll.u32 %v14038_v18, %v5783_v58  ;;  %v5787_v56 = vshrl.u32 %v14038_v18, %v5784_v61 }
 0x557   :  { %v5559_v22 = vsel %vm5552_vm6, %v5555_v11, %v5558_v2  ;;  %v5641_v49 = vand.u32 2147483647, %v5640_v48  ;;  %v5790_v9 = vshrl.u32 %v14039_v24, %v5784_v61  ;;  %v5792_v16 = vshll.u32 %v14039_v24, %v5783_v58  ;;  %v14187_v48 = vld [vmem:[#allocation45_spill] sm:$0xff] }
 0x558   :  { %v5560_v42 = vsel %vm5549_vm5, nan, %v5559_v22  ;;  %v5727_v27 = vshrl.u32 %v5726_v21, 30  ;;  %v5793_v20 = vshrl.u32 %v14040_v19, %v5784_v61  ;;  %v5782_v7 = vshrl.u32 %v5781_v12, 5 }
 0x559   :  { %v5644_v29 = vmul.f32 %v5643_v52, %v5641_v49  ;;  %v5795_v41 = vshll.u32 %v14040_v19, %v5783_v58  ;;  %v5796_v30 = vshrl.u32 %v14041_v34, %v5784_v61  ;;  %7066 = vst [vmem:[#allocation5 + $0x188] sm:$0xff] %v5560_v42  ;;  %v5654_v28 = vadd.s32 3, %v5650_v5 }
 0x55a   :  { %v5728_v59 = vshll.u32 %v5727_v27, 30  ;;  %v5798_v1 = vshll.u32 %v14041_v34, %v5783_v58  ;;  %v12893_v0 = vshll.u32 %v5777_v23, 8  ;;  %v5785_v57 = vshrl.u32 %v14044_v38, %v5784_v61 }
 0x55b   :  { %v5645_v32 = vxor.u32 2147483648, %v5644_v29  ;;  %v5797_v43 = vor.u32 %v5796_v30, %v5795_v41  ;;  %v5799_v51 = vshrl.u32 %v14042_v60, %v5784_v61  ;;  %v5788_v47 = vor.u32 %v5787_v56, %v5786_v39 }
 0x55c   :  { %v12897_v62 = vsub.s32 %v5725_v44, %v5728_v59  ;;  %v5791_v4 = vor.u32 %v5790_v9, %v5789_v55  ;;  %v5794_v50 = vor.u32 %v5793_v20, %v5792_v16  ;;  %vm5801_vm11 = vcmp.lt.s32.totalorder %v5782_v7, 1 }
 0x55d   :  { %v5646_v36 = vsel %vm5563_vm15, %v5645_v32, %v5644_v29  ;;  %v5800_v31 = vor.u32 %v5799_v51, %v5798_v1  ;;  %vm5804_vm12 = vcmp.lt.s32.totalorder %v5782_v7, 4  ;;  %vm5802_vm10 = vcmp.lt.s32.totalorder %v5782_v7, 2 }
 0x55e   :  { %v5649_v37 = vsel %vm12845_vm2, %v14176_v45, %v5646_v36  ;;  %v5731_v12 = vsub.s32 0, %v12897_v62  ;;  %vm5803_vm14 = vcmp.lt.s32.totalorder %v5782_v7, 3  ;;  %v5805_v10 = vsel %vm5801_vm11, %v5785_v57, %v5788_v47 }
 0x55f   :  { %7822 = vcosq.f32 %v5649_v37  ;;  %v5806_v26 = vsel %vm5804_vm12, %v5794_v50, 2102212464  ;;  %v5810_v6 = vsel %vm5804_vm12, %v5797_v43, 920167782  ;;  %v5809_v3 = vsel %vm5801_vm11, %v5788_v47, %v5791_v4 }
 0x560   :  { %7824 = vsinq.f32 %v5649_v37  ;;  %v7305_v58 = vmin.u32 %v5731_v12, %v12897_v62  ;;  %v5807_v46 = vsel %vm5803_vm14, %v5791_v4, %v5806_v26  ;;  %v5655_v53 = vand.u32 3, %v5654_v28 }
 0x561   :  { %v5811_v13 = vsel %vm5803_vm14, %v5794_v50, %v5810_v6  ;;  %v5813_v15 = vsel %vm5801_vm11, %v5791_v4, %v5794_v50  ;;  %v5814_v63 = vsel %vm5804_vm12, %v5800_v31, 1326507024  ;;  %vm12916_vm13 = vcmp.le.f32.partialorder %v5665_v14, 0.7853982 }
 0x562   :  { %vm5667_vm0 = vcmp.lt.s32.totalorder %v14179_v35, 0  ;;  %v5733_v8 = vclz %v7305_v58  ;;  %v5751_v5 = vsub.s32 4, %v5727_v27  ;;  %v5808_v44 = vsel %vm5802_vm10, %v5805_v10, %v5807_v46 }
 0x563   :  { %v5812_v61 = vsel %vm5802_vm10, %v5809_v3, %v5811_v13  ;;  %v5815_v2 = vsel %vm5803_vm14, %v5797_v43, %v5814_v63  ;;  %v5876_v52 = vand.u32 2139095040, %v14187_v48  ;;  %vm5653_vm1 = vweird.f32 %v14176_v45 }
 0x564   :  { %v7306_v23 = vadd.s32 4294967294, %v5733_v8  ;;  %v5816_v14 = vsel %vm5802_vm10, %v5813_v15, %v5815_v2  ;;  %v12928_v11 = vmul.u32.u64.low %v12893_v0, %v5812_v61  ;;  %v12929_v21 = vmul.u32.u64.high %v12893_v0, %v5812_v61, %v12928_v11 }
 0x565   :  { %vm5656_vm15 = vcmp.lt.s32.totalorder %v5655_v53, 2  ;;  %v12933_v39 = vmul.u32.u64.low %v12893_v0, %v5816_v14  ;;  %v12934_v55 = vmul.u32.u64.high %v12893_v0, %v5816_v14, %v12933_v39  ;;  %v5877_v22 = vshrl.u32 %v5876_v52, 23 }
 0x566   :  { %vm5657_vm2 = vcmp.eq.s32.totalorder %v5655_v53, 0  ;;  %v5721_v49 = vadd.s32 %v12856_v54, %v12865_v33  ;;  %vm7307_vm5 = vcmp.lt.s32.totalorder %v7306_v23, 0  ;;  %v5752_v56 = vsel %vm5667_vm0, %v5751_v5, %v5727_v27 }
 0x567   :  { %v5736_v9 = vsel %vm7307_vm5, 0, %v7306_v23  ;;  %v5824_v42 = vmul.u32 %v12893_v0, %v5808_v44  ;;  %v5873_v16 = vand.u32 2147483647, %v14187_v48  ;;  %v7312_v20 = vadd.s32 4294967169, %v5877_v22 }
 0x568   :  { %v5737_v29 = vsub.s32 32, %v5736_v9  ;;  %v5738_v7 = vshll.u32 %v12897_v62, %v5736_v9  ;;  %v5741_v41 = vsub.s32 4294967266, %v5736_v9  ;;  %v5827_v30 = vadd.s32 1, %v12929_v21 }
 0x569   :  { %v7823_v28 = vpop.eup %7822  ;;  %vm5660_vm3 = vcmp.eq.s32.totalorder %v5655_v53, 2  ;;  %v5754_v54 = vsel %vm12916_vm13, 0, %v5752_v56  ;;  %vm5826_vm4 = vc.u32 %v12934_v55, %v12928_v11  ;;  %v5883_v33 = vadd.s32 1, %v7312_v20 }
 0x56a   :  { %v7825_v27 = vpop.eup %7824  ;;  %v5661_v59 = vxor.u32 2147483648, %v7823_v28  ;;  %v5739_v1 = vshrl.u32 %v5721_v49, %v5737_v29  ;;  %v5742_v0 = vadd.s32 127, %v5741_v41  ;;  %v5828_v32 = vsel %vm5826_vm4, %v5827_v30, %v12929_v21  ;;  %v14188_v49 = vld [vmem:[#allocation46_spill] sm:$0xff] }
 0x56b   :  { %v5658_v57 = vxor.u32 2147483648, %v7825_v27  ;;  %v5829_v43 = vadd.s32 %v5828_v32, %v5824_v42  ;;  %v5880_v51 = vand.u32 8388607, %v5873_v16  ;;  %vm5884_vm6 = vcmp.gt.s32.totalorder %v5883_v33, 0 }
 0x56c   :  { %v5662_v62 = vsel %vm5660_vm3, %v5661_v59, %v7825_v27  ;;  %v5740_v47 = vor.u32 %v5739_v1, %v5738_v7  ;;  %v5743_v4 = vshll.u32 %v5742_v0, 23  ;;  %v5885_v50 = vsel %vm5884_vm6, %v5883_v33, 0 }
 0x56d   :  { %v5659_v36 = vsel %vm5657_vm2, %v7823_v28, %v5658_v57  ;;  %v5830_v31 = vadd.s32 536870912, %v5829_v43  ;;  %v5887_v37 = vand.u32 31, %v5885_v50  ;;  %v5758_v6 = vadd.s32 3, %v5754_v54 }
 0x56e   :  { %v5663_v12 = vsel %vm5656_vm15, %v5659_v36, %v5662_v62  ;;  %v5744_v10 = vor.u32 4788187, %v5743_v4  ;;  %v5747_v26 = vcvt.s32.f32 %v5740_v47  ;;  %v5881_v3 = vor.u32 8388608, %v5880_v51 }
 0x56f   :  { %v5664_v58 = vsel %vm5653_vm1, nan, %v5663_v12  ;;  %v12955_v46 = vshrl.u32 %v5830_v31, 30  ;;  %v5888_v13 = vsub.s32 32, %v5887_v37  ;;  %v5886_v63 = vshrl.u32 %v5885_v50, 5 }
 0x570   :  { %v5745_v15 = vand.u32 2147483647, %v5744_v10  ;;  %v5890_v8 = vshll.u32 %v14044_v38, %v5887_v37  ;;  %v5893_v5 = vshll.u32 %v14038_v18, %v5887_v37  ;;  %7067 = vst [vmem:[#allocation5 + $0x190] sm:$0xff] %v5664_v58  ;;  %v5896_v61 = vshll.u32 %v14039_v24, %v5887_v37 }
 0x571   :  { %v5832_v53 = vshll.u32 %v12955_v46, 30  ;;  %v5891_v44 = vshrl.u32 %v14038_v18, %v5888_v13  ;;  %v5899_v45 = vshll.u32 %v14040_v19, %v5887_v37  ;;  %v5894_v52 = vshrl.u32 %v14039_v24, %v5888_v13 }
 0x572   :  { %v5748_v2 = vmul.f32 %v5747_v26, %v5745_v15  ;;  %v5897_v23 = vshrl.u32 %v14040_v19, %v5888_v13  ;;  %v5900_v14 = vshrl.u32 %v14041_v34, %v5888_v13  ;;  %v12966_v21 = vand.u32 3, %v5758_v6 }
 0x573   :  { %v12968_v39 = vsub.s32 %v5829_v43, %v5832_v53  ;;  %v5902_v22 = vshll.u32 %v14041_v34, %v5887_v37  ;;  %v5980_v56 = vand.u32 2139095040, %v14188_v49  ;;  %v5825_v42 = vadd.s32 %v12928_v11, %v12934_v55 }
 0x574   :  { %v5749_v9 = vxor.u32 2147483648, %v5748_v2  ;;  %v5889_v20 = vshrl.u32 %v14044_v38, %v5888_v13  ;;  %v12975_v29 = vshll.u32 %v5881_v3, 8  ;;  %v5892_v41 = vor.u32 %v5891_v44, %v5890_v8 }
 0x575   :  { %v5835_v7 = vsub.s32 0, %v12968_v39  ;;  %v5895_v30 = vor.u32 %v5894_v52, %v5893_v5  ;;  %v5903_v28 = vshrl.u32 %v14042_v60, %v5888_v13  ;;  %v5898_v33 = vor.u32 %v5897_v23, %v5896_v61 }
 0x576   :  { %v5750_v54 = vsel %vm5667_vm0, %v5749_v9, %v5748_v2  ;;  %v5901_v27 = vor.u32 %v5900_v14, %v5899_v45  ;;  %vm5905_vm8 = vcmp.lt.s32.totalorder %v5886_v63, 1  ;;  %v5981_v1 = vshrl.u32 %v5980_v56, 23 }
 0x577   :  { %v5753_v11 = vsel %vm12916_vm13, %v14179_v35, %v5750_v54  ;;  %v7309_v55 = vmin.u32 %v5835_v7, %v12968_v39  ;;  %v5904_v59 = vor.u32 %v5903_v28, %v5902_v22  ;;  %vm5771_vm7 = vcmp.lt.s32.totalorder %v14182_v17, 0 }
 0x578   :  { %7826 = vcosq.f32 %v5753_v11  ;;  %vm5906_vm9 = vcmp.lt.s32.totalorder %v5886_v63, 2  ;;  %vm5907_vm11 = vcmp.lt.s32.totalorder %v5886_v63, 3  ;;  %vm5908_vm12 = vcmp.lt.s32.totalorder %v5886_v63, 4 }
 0x579   :  { %7828 = vsinq.f32 %v5753_v11  ;;  %v5837_v0 = vclz %v7309_v55  ;;  %v5909_v32 = vsel %vm5905_vm8, %v5889_v20, %v5892_v41  ;;  %v5913_v57 = vsel %vm5905_vm8, %v5892_v41, %v5895_v30 }
 0x57a   :  { %v5855_v43 = vsub.s32 4, %v12955_v46  ;;  %v5910_v25 = vsel %vm5908_vm12, %v5898_v33, 2102212464  ;;  %v5914_v51 = vsel %vm5908_vm12, %v5901_v27, 920167782  ;;  %v5917_v62 = vsel %vm5905_vm8, %v5895_v30, %v5898_v33 }
 0x57b   :  { %v7310_v47 = vadd.s32 4294967294, %v5837_v0  ;;  %v5911_v4 = vsel %vm5907_vm11, %v5895_v30, %v5910_v25  ;;  %v5915_v50 = vsel %vm5907_vm11, %v5898_v33, %v5914_v51  ;;  %v5918_v36 = vsel %vm5908_vm12, %v5904_v59, 1326507024 }
 0x57c   :  { %v5912_v31 = vsel %vm5906_vm9, %v5909_v32, %v5911_v4  ;;  %v5916_v37 = vsel %vm5906_vm9, %v5913_v57, %v5915_v50  ;;  %v5919_v12 = vsel %vm5907_vm11, %v5901_v27, %v5918_v36  ;;  %v7316_v10 = vadd.s32 4294967169, %v5981_v1 }
 0x57d   :  { %vm7311_vm10 = vcmp.lt.s32.totalorder %v7310_v47, 0  ;;  %v5920_v26 = vsel %vm5906_vm9, %v5917_v62, %v5919_v12  ;;  %v12997_v6 = vmul.u32.u64.low %v12975_v29, %v5916_v37  ;;  %v12998_v58 = vmul.u32.u64.high %v12975_v29, %v5916_v37, %v12997_v6 }
 0x57e   :  { %v5840_v3 = vsel %vm7311_vm10, 0, %v7310_v47  ;;  %v13002_v13 = vmul.u32.u64.low %v12975_v29, %v5920_v26  ;;  %v13003_v15 = vmul.u32.u64.high %v12975_v29, %v5920_v26, %v13002_v13  ;;  %v5977_v8 = vand.u32 2147483647, %v14188_v49 }
 0x57f   :  { %vm13008_vm14 = vcmp.le.f32.partialorder %v5769_v40, 0.7853982  ;;  %v5841_v63 = vsub.s32 32, %v5840_v3  ;;  %v5842_v53 = vshll.u32 %v12968_v39, %v5840_v3  ;;  %v5845_v44 = vsub.s32 4294967266, %v5840_v3 }
 0x580   :  { %vm5760_vm13 = vcmp.lt.s32.totalorder %v12966_v21, 2  ;;  %vm5761_vm0 = vcmp.eq.s32.totalorder %v12966_v21, 0  ;;  %v5928_v61 = vmul.u32 %v12975_v29, %v5912_v31  ;;  %v5987_v45 = vadd.s32 1, %v7316_v10 }
 0x581   :  { %v5843_v2 = vshrl.u32 %v5825_v42, %v5841_v63  ;;  %v5846_v52 = vadd.s32 127, %v5845_v44  ;;  %v5856_v40 = vsel %vm5771_vm7, %v5855_v43, %v12955_v46  ;;  %v5931_v23 = vadd.s32 1, %v12998_v58 }
 0x582   :  { %v7827_v14 = vpop.eup %7826  ;;  %vm5764_vm1 = vcmp.eq.s32.totalorder %v12966_v21, 2  ;;  %vm5930_vm15 = vc.u32 %v13003_v15, %v12997_v6  ;;  %v5984_v39 = vand.u32 8388607, %v5977_v8  ;;  %vm5988_vm2 = vcmp.gt.s32.totalorder %v5987_v45, 0 }
 0x583   :  { %v7829_v22 = vpop.eup %7828  ;;  %v5765_v56 = vxor.u32 2147483648, %v7827_v14  ;;  %v5844_v9 = vor.u32 %v5843_v2, %v5842_v53  ;;  %v5847_v42 = vshll.u32 %v5846_v52, 23  ;;  %v5932_v20 = vsel %vm5930_vm15, %v5931_v23, %v12998_v58 }
 0x584   :  { %v5762_v29 = vxor.u32 2147483648, %v7829_v22  ;;  %v5858_v46 = vsel %vm13008_vm14, 0, %v5856_v40  ;;  %v5933_v7 = vadd.s32 %v5932_v20, %v5928_v61  ;;  %v5989_v41 = vsel %vm5988_vm2, %v5987_v45, 0  ;;  %v14191_v20 = vld [vmem:[#allocation26_spill] sm:$0xff] }
 0x585   :  { %vm5757_vm5 = vweird.f32 %v14179_v35  ;;  %v5766_v30 = vsel %vm5764_vm1, %v5765_v56, %v7829_v22  ;;  %v5848_v28 = vor.u32 4788187, %v5847_v42  ;;  %v5851_v54 = vcvt.s32.f32 %v5844_v9 }
 0x586   :  { %v5763_v33 = vsel %vm5761_vm0, %v7827_v14, %v5762_v29  ;;  %v5934_v27 = vadd.s32 536870912, %v5933_v7  ;;  %v5991_v11 = vand.u32 31, %v5989_v41  ;;  %v5862_v1 = vadd.s32 3, %v5858_v46 }
 0x587   :  { %v5767_v55 = vsel %vm5760_vm13, %v5763_v33, %v5766_v30  ;;  %v5849_v59 = vand.u32 2147483647, %v5848_v28  ;;  %v5985_v0 = vor.u32 8388608, %v5984_v39  ;;  %v5990_v43 = vshrl.u32 %v5989_v41, 5 }
 0x588   :  { %v5768_v32 = vsel %vm5757_vm5, nan, %v5767_v55  ;;  %v13033_v57 = vshrl.u32 %v5934_v27, 30  ;;  %v5992_v25 = vsub.s32 32, %v5991_v11  ;;  %v5994_v51 = vshll.u32 %v14044_v38, %v5991_v11 }
 0x589   :  { %v5852_v35 = vmul.f32 %v5851_v54, %v5849_v59  ;;  %v5997_v62 = vshll.u32 %v14038_v18, %v5991_v11  ;;  %7068 = vst [vmem:[#allocation5 + $0x198] sm:$0xff] %v5768_v32  ;;  %v6000_v21 = vshll.u32 %v14039_v24, %v5991_v11  ;;  %v6003_v50 = vshll.u32 %v14040_v19, %v5991_v11 }
 0x58a   :  { %v5936_v47 = vshll.u32 %v13033_v57, 30  ;;  %v5995_v4 = vshrl.u32 %v14038_v18, %v5992_v25  ;;  %v5998_v31 = vshrl.u32 %v14039_v24, %v5992_v25  ;;  %v6001_v37 = vshrl.u32 %v14040_v19, %v5992_v25 }
 0x58b   :  { %v5853_v36 = vxor.u32 2147483648, %v5852_v35  ;;  %v6004_v12 = vshrl.u32 %v14041_v34, %v5992_v25  ;;  %v13044_v10 = vand.u32 3, %v5862_v1  ;;  %vm6009_vm3 = vcmp.lt.s32.totalorder %v5990_v43, 1 }
 0x58c   :  { %v13046_v26 = vsub.s32 %v5933_v7, %v5936_v47  ;;  %v13048_v58 = vshll.u32 %v5985_v0, 8  ;;  %v5996_v13 = vor.u32 %v5995_v4, %v5994_v51  ;;  %v5999_v63 = vor.u32 %v5998_v31, %v5997_v62 }
 0x58d   :  { %v5854_v3 = vsel %vm5771_vm7, %v5853_v36, %v5852_v35  ;;  %v6006_v53 = vshll.u32 %v14041_v34, %v5991_v11  ;;  %v5993_v45 = vshrl.u32 %v14044_v38, %v5992_v25  ;;  %v6005_v2 = vor.u32 %v6004_v12, %v6003_v50 }
 0x58e   :  { %v5857_v44 = vsel %vm13008_vm14, %v14182_v17, %v5854_v3  ;;  %v5939_v61 = vsub.s32 0, %v13046_v26  ;;  %v6002_v52 = vor.u32 %v6001_v37, %v6000_v21  ;;  %v6007_v40 = vshrl.u32 %v14042_v60, %v5992_v25 }
 0x58f   :  { %7830 = vcosq.f32 %v5857_v44  ;;  %vm6012_vm4 = vcmp.lt.s32.totalorder %v5990_v43, 4  ;;  %vm6010_vm6 = vcmp.lt.s32.totalorder %v5990_v43, 2  ;;  %vm6011_vm8 = vcmp.lt.s32.totalorder %v5990_v43, 3 }
 0x590   :  { %7832 = vsinq.f32 %v5857_v44  ;;  %v7313_v23 = vmin.u32 %v5939_v61, %v13046_v26  ;;  %v6008_v14 = vor.u32 %v6007_v40, %v6006_v53  ;;  %v6014_v39 = vsel %vm6012_vm4, %v6002_v52, 2102212464 }
 0x591   :  { %v6017_v5 = vsel %vm6009_vm3, %v5996_v13, %v5999_v63  ;;  %v6018_v22 = vsel %vm6012_vm4, %v6005_v2, 920167782  ;;  %v5929_v56 = vadd.s32 %v12997_v6, %v13003_v15  ;;  %v6013_v42 = vsel %vm6009_vm3, %v5993_v45, %v5996_v13 }
 0x592   :  { %v5941_v9 = vclz %v7313_v23  ;;  %v6084_v29 = vand.u32 2139095040, %v14191_v20  ;;  %v6015_v46 = vsel %vm6011_vm8, %v5999_v63, %v6014_v39  ;;  %v6019_v7 = vsel %vm6011_vm8, %v6002_v52, %v6018_v22 }
 0x593   :  { %v6021_v41 = vsel %vm6009_vm3, %v5999_v63, %v6002_v52  ;;  %v6022_v30 = vsel %vm6012_vm4, %v6008_v14, 1326507024  ;;  %vm5861_vm7 = vweird.f32 %v14182_v17  ;;  %v5959_v54 = vsub.s32 4, %v13033_v57 }
 0x594   :  { %v7314_v28 = vadd.s32 4294967294, %v5941_v9  ;;  %v6020_v6 = vsel %vm6010_vm6, %v6017_v5, %v6019_v7  ;;  %v6023_v15 = vsel %vm6011_vm8, %v6005_v2, %v6022_v30  ;;  %v6016_v33 = vsel %vm6010_vm6, %v6013_v42, %v6015_v46 }
 0x595   :  { %v6024_v27 = vsel %vm6010_vm6, %v6021_v41, %v6023_v15  ;;  %v13078_v11 = vmul.u32.u64.low %v13048_v58, %v6020_v6  ;;  %v13079_v55 = vmul.u32.u64.high %v13048_v58, %v6020_v6, %v13078_v11  ;;  %v6085_v0 = vshrl.u32 %v6084_v29, 23 }
 0x596   :  { %vm7315_vm9 = vcmp.lt.s32.totalorder %v7314_v28, 0  ;;  %v13083_v59 = vmul.u32.u64.low %v13048_v58, %v6024_v27  ;;  %v13084_v1 = vmul.u32.u64.high %v13048_v58, %v6024_v27, %v13083_v59  ;;  %vm5864_vm11 = vcmp.lt.s32.totalorder %v13044_v10, 2 }
 0x597   :  { %vm13089_vm12 = vcmp.le.f32.partialorder %v5873_v16, 0.7853982  ;;  %vm5875_vm10 = vcmp.lt.s32.totalorder %v14187_v48, 0  ;;  %v5944_v43 = vsel %vm7315_vm9, 0, %v7314_v28  ;;  %v7320_v62 = vadd.s32 4294967169, %v6085_v0 }
 0x598   :  { %v5945_v25 = vsub.s32 32, %v5944_v43  ;;  %v5946_v35 = vshll.u32 %v13046_v26, %v5944_v43  ;;  %v5949_v51 = vsub.s32 4294967266, %v5944_v43  ;;  %vm5865_vm14 = vcmp.eq.s32.totalorder %v13044_v10, 0 }
 0x599   :  { %v7831_v47 = vpop.eup %7830  ;;  %vm5868_vm13 = vcmp.eq.s32.totalorder %v13044_v10, 2  ;;  %v6032_v4 = vmul.u32 %v13048_v58, %v6016_v33  ;;  %v6035_v16 = vadd.s32 1, %v13079_v55  ;;  %v5960_v37 = vsel %vm5875_vm10, %v5959_v54, %v13033_v57 }
 0x59a   :  { %v7833_v21 = vpop.eup %7832  ;;  %v5869_v50 = vxor.u32 2147483648, %v7831_v47  ;;  %v5947_v36 = vshrl.u32 %v5929_v56, %v5945_v25  ;;  %v5950_v31 = vadd.s32 127, %v5949_v51  ;;  %vm6034_vm0 = vc.u32 %v13084_v1, %v13078_v11 }
 0x59b   :  { %v5866_v12 = vxor.u32 2147483648, %v7833_v21  ;;  %v6081_v26 = vand.u32 2147483647, %v14191_v20  ;;  %v6091_v3 = vadd.s32 1, %v7320_v62  ;;  %v6036_v53 = vsel %vm6034_vm0, %v6035_v16, %v13079_v55  ;;  %v14194_v62 = vld [vmem:[#allocation27_spill] sm:$0xff] }
 0x59c   :  { %v5870_v13 = vsel %vm5868_vm13, %v5869_v50, %v7833_v21  ;;  %v5948_v63 = vor.u32 %v5947_v36, %v5946_v35  ;;  %v5951_v58 = vshll.u32 %v5950_v31, 23  ;;  %v5962_v61 = vsel %vm13089_vm12, 0, %v5960_v37 }
 0x59d   :  { %v5867_v44 = vsel %vm5865_vm14, %v7831_v47, %v5866_v12  ;;  %v6037_v45 = vadd.s32 %v6036_v53, %v6032_v4  ;;  %vm6092_vm1 = vcmp.gt.s32.totalorder %v6091_v3, 0  ;;  %v5966_v22 = vadd.s32 3, %v5962_v61 }
 0x59e   :  { %v5871_v57 = vsel %vm5864_vm11, %v5867_v44, %v5870_v13  ;;  %v5952_v2 = vor.u32 4788187, %v5951_v58  ;;  %v5955_v52 = vcvt.s32.f32 %v5948_v63  ;;  %v6093_v40 = vsel %vm6092_vm1, %v6091_v3, 0 }
 0x59f   :  { %v5872_v23 = vsel %vm5861_vm7, nan, %v5871_v57  ;;  %v6038_v14 = vadd.s32 536870912, %v6037_v45  ;;  %v6095_v39 = vand.u32 31, %v6093_v40  ;;  %v6088_v9 = vand.u32 8388607, %v6081_v26 }
 0x5a0   :  { %v5953_v5 = vand.u32 2147483647, %v5952_v2  ;;  %7069 = vst [vmem:[#allocation5 + $0x1a0] sm:$0xff] %v5872_v23  ;;  %v13116_v42 = vshrl.u32 %v6093_v40, 5  ;;  %v13127_v55 = vand.u32 3, %v5966_v22  ;;  %vm5979_vm15 = vcmp.lt.s32.totalorder %v14188_v49, 0 }
 0x5a1   :  { %v6039_v56 = vshrl.u32 %v6038_v14, 30  ;;  %v6096_v29 = vsub.s32 32, %v6095_v39  ;;  %v6098_v46 = vshll.u32 %v14044_v38, %v6095_v39  ;;  %v6101_v7 = vshll.u32 %v14038_v18, %v6095_v39 }
 0x5a2   :  { %v5956_v10 = vmul.f32 %v5955_v52, %v5953_v5  ;;  %v6104_v17 = vshll.u32 %v14039_v24, %v6095_v39  ;;  %v6107_v28 = vshll.u32 %v14040_v19, %v6095_v39  ;;  %v6110_v54 = vshll.u32 %v14041_v34, %v6095_v39 }
 0x5a3   :  { %v6040_v41 = vshll.u32 %v6039_v56, 30  ;;  %v6099_v30 = vshrl.u32 %v14038_v18, %v6096_v29  ;;  %v6102_v15 = vshrl.u32 %v14039_v24, %v6096_v29  ;;  %v6105_v33 = vshrl.u32 %v14040_v19, %v6096_v29 }
 0x5a4   :  { %v5957_v6 = vxor.u32 2147483648, %v5956_v10  ;;  %v6108_v27 = vshrl.u32 %v14041_v34, %v6096_v29  ;;  %v6089_v0 = vor.u32 8388608, %v6088_v9  ;;  %v6111_v43 = vshrl.u32 %v14042_v60, %v6096_v29 }
 0x5a5   :  { %v13129_v59 = vsub.s32 %v6037_v45, %v6040_v41  ;;  %v6097_v35 = vshrl.u32 %v14044_v38, %v6096_v29  ;;  %v6100_v51 = vor.u32 %v6099_v30, %v6098_v46  ;;  %v6188_v47 = vand.u32 2139095040, %v14194_v62 }
 0x5a6   :  { %v5958_v25 = vsel %vm5875_vm10, %v5957_v6, %v5956_v10  ;;  %v6103_v21 = vor.u32 %v6102_v15, %v6101_v7  ;;  %v6106_v50 = vor.u32 %v6105_v33, %v6104_v17  ;;  %v6109_v36 = vor.u32 %v6108_v27, %v6107_v28 }
 0x5a7   :  { %v5961_v4 = vsel %vm13089_vm12, %v14187_v48, %v5958_v25  ;;  %v6043_v16 = vsub.s32 0, %v13129_v59  ;;  %v6112_v31 = vor.u32 %v6111_v43, %v6110_v54  ;;  %vm6113_vm2 = vcmp.lt.s32.totalorder %v13116_v42, 1 }
 0x5a8   :  { %7834 = vcosq.f32 %v5961_v4  ;;  %vm13144_vm5 = vcmp.le.f32.partialorder %v5977_v8, 0.7853982  ;;  %v6129_v32 = vshll.u32 %v6089_v0, 8  ;;  %v6063_v3 = vsub.s32 4, %v6039_v56 }
 0x5a9   :  { %7836 = vsinq.f32 %v5961_v4  ;;  %v7317_v12 = vmin.u32 %v6043_v16, %v13129_v59  ;;  %vm6115_vm3 = vcmp.lt.s32.totalorder %v13116_v42, 3  ;;  %vm6116_vm4 = vcmp.lt.s32.totalorder %v13116_v42, 4 }
 0x5aa   :  { %v6189_v13 = vshrl.u32 %v6188_v47, 23  ;;  %vm6114_vm6 = vcmp.lt.s32.totalorder %v13116_v42, 2  ;;  %v6121_v58 = vsel %vm6113_vm2, %v6100_v51, %v6103_v21  ;;  %v6125_v53 = vsel %vm6113_vm2, %v6103_v21, %v6106_v50 }
 0x5ab   :  { %v6045_v63 = vclz %v7317_v12  ;;  %vm5968_vm8 = vcmp.lt.s32.totalorder %v13127_v55, 2  ;;  %v6117_v8 = vsel %vm6113_vm2, %v6097_v35, %v6100_v51  ;;  %v6118_v44 = vsel %vm6116_vm4, %v6106_v50, 2102212464 }
 0x5ac   :  { %v6122_v61 = vsel %vm6116_vm4, %v6109_v36, 920167782  ;;  %v6126_v45 = vsel %vm6116_vm4, %v6112_v31, 1326507024  ;;  %vm5965_vm7 = vweird.f32 %v14187_v48  ;;  %v6119_v2 = vsel %vm6115_vm3, %v6103_v21, %v6118_v44 }
 0x5ad   :  { %v7318_v57 = vadd.s32 4294967294, %v6045_v63  ;;  %v6123_v52 = vsel %vm6115_vm3, %v6106_v50, %v6122_v61  ;;  %v6127_v40 = vsel %vm6115_vm3, %v6109_v36, %v6126_v45  ;;  %v6033_v23 = vadd.s32 %v13078_v11, %v13084_v1 }
 0x5ae   :  { %v6124_v14 = vsel %vm6114_vm6, %v6121_v58, %v6123_v52  ;;  %v6128_v39 = vsel %vm6114_vm6, %v6125_v53, %v6127_v40  ;;  %v7324_v5 = vadd.s32 4294967169, %v6189_v13  ;;  %v6064_v22 = vsel %vm5979_vm15, %v6063_v3, %v6039_v56 }
 0x5af   :  { %vm7319_vm9 = vcmp.lt.s32.totalorder %v7318_v57, 0  ;;  %v13168_v9 = vmul.u32.u64.low %v6129_v32, %v6128_v39  ;;  %v13169_v29 = vmul.u32.u64.high %v6129_v32, %v6128_v39, %v13168_v9  ;;  %v6120_v46 = vsel %vm6114_vm6, %v6117_v8, %v6119_v2 }
 0x5b0   :  { %v6048_v10 = vsel %vm7319_vm9, 0, %v7318_v57  ;;  %v13173_v7 = vmul.u32.u64.low %v6129_v32, %v6124_v14  ;;  %v13174_v11 = vmul.u32.u64.high %v6129_v32, %v6124_v14, %v13173_v7  ;;  %v6195_v30 = vadd.s32 1, %v7324_v5 }
 0x5b1   :  { %v6049_v1 = vsub.s32 32, %v6048_v10  ;;  %v6050_v17 = vshll.u32 %v13129_v59, %v6048_v10  ;;  %v6053_v41 = vsub.s32 4294967266, %v6048_v10  ;;  %vm5969_vm11 = vcmp.eq.s32.totalorder %v13127_v55, 0 }
 0x5b2   :  { %v7835_v28 = vpop.eup %7834  ;;  %vm5972_vm12 = vcmp.eq.s32.totalorder %v13127_v55, 2  ;;  %v6066_v56 = vsel %vm13144_vm5, 0, %v6064_v22  ;;  %v6185_v42 = vand.u32 2147483647, %v14194_v62  ;;  %v6136_v27 = vmul.u32 %v6129_v32, %v6120_v46 }
 0x5b3   :  { %v7837_v54 = vpop.eup %7836  ;;  %v5973_v6 = vxor.u32 2147483648, %v7835_v28  ;;  %v6051_v15 = vshrl.u32 %v6033_v23, %v6049_v1  ;;  %v6054_v33 = vadd.s32 127, %v6053_v41  ;;  %vm6138_vm10 = vc.u32 %v13169_v29, %v13173_v7 }
 0x5b4   :  { %v5970_v0 = vxor.u32 2147483648, %v7837_v54  ;;  %v6139_v59 = vadd.s32 1, %v13174_v11  ;;  %vm6196_vm14 = vcmp.gt.s32.totalorder %v6195_v30, 0  ;;  %v6192_v16 = vand.u32 8388607, %v6185_v42 }
 0x5b5   :  { %v5974_v43 = vsel %vm5972_vm12, %v5973_v6, %v7837_v54  ;;  %v6052_v25 = vor.u32 %v6051_v15, %v6050_v17  ;;  %v6055_v35 = vshll.u32 %v6054_v33, 23  ;;  %v6197_v51 = vsel %vm6196_vm14, %v6195_v30, 0 }
 0x5b6   :  { %v5971_v47 = vsel %vm5969_vm11, %v7835_v28, %v5970_v0  ;;  %v6140_v4 = vsel %vm6138_vm10, %v6139_v59, %v13174_v11  ;;  %v6199_v21 = vand.u32 31, %v6197_v51  ;;  %v6070_v3 = vadd.s32 3, %v6066_v56  ;;  %v14197_v0 = vld [vmem:[#allocation10_spill] sm:$0xff] }
 0x5b7   :  { %v5975_v50 = vsel %vm5968_vm8, %v5971_v47, %v5974_v43  ;;  %v6056_v36 = vor.u32 4788187, %v6055_v35  ;;  %v6059_v31 = vcvt.s32.f32 %v6052_v25  ;;  %v6141_v12 = vadd.s32 %v6140_v4, %v6136_v27 }
 0x5b8   :  { %v5976_v32 = vsel %vm5965_vm7, nan, %v5975_v50  ;;  %v6200_v13 = vsub.s32 32, %v6199_v21  ;;  %v6202_v63 = vshll.u32 %v14044_v38, %v6199_v21  ;;  %v6205_v8 = vshll.u32 %v14038_v18, %v6199_v21 }
 0x5b9   :  { %v6057_v58 = vand.u32 2147483647, %v6056_v36  ;;  %v6142_v53 = vadd.s32 536870912, %v6141_v12  ;;  %v6208_v44 = vshll.u32 %v14039_v24, %v6199_v21  ;;  %7070 = vst [vmem:[#allocation5 + $0x1a8] sm:$0xff] %v5976_v32  ;;  %v6211_v48 = vshll.u32 %v14040_v19, %v6199_v21 }
 0x5ba   :  { %v6203_v55 = vshrl.u32 %v14038_v18, %v6200_v13  ;;  %v6206_v61 = vshrl.u32 %v14039_v24, %v6200_v13  ;;  %v6209_v45 = vshrl.u32 %v14040_v19, %v6200_v13  ;;  %v6198_v52 = vshrl.u32 %v6197_v51, 5 }
 0x5bb   :  { %v6060_v57 = vmul.f32 %v6059_v31, %v6057_v58  ;;  %v13202_v2 = vshrl.u32 %v6142_v53, 30  ;;  %v6212_v40 = vshrl.u32 %v14041_v34, %v6200_v13  ;;  %v6193_v23 = vor.u32 8388608, %v6192_v16 }
 0x5bc   :  { %v6214_v14 = vshll.u32 %v14041_v34, %v6199_v21  ;;  %v6215_v39 = vshrl.u32 %v14042_v60, %v6200_v13  ;;  %v13207_v22 = vand.u32 3, %v6070_v3  ;;  %v6201_v10 = vshrl.u32 %v14044_v38, %v6200_v13 }
 0x5bd   :  { %v6061_v5 = vxor.u32 2147483648, %v6060_v57  ;;  %v6144_v9 = vshll.u32 %v13202_v2, 30  ;;  %v6204_v46 = vor.u32 %v6203_v55, %v6202_v63  ;;  %v6207_v11 = vor.u32 %v6206_v61, %v6205_v8 }
 0x5be   :  { %v6210_v1 = vor.u32 %v6209_v45, %v6208_v44  ;;  %v6213_v17 = vor.u32 %v6212_v40, %v6211_v48  ;;  %vm6217_vm13 = vcmp.lt.s32.totalorder %v6198_v52, 1  ;;  %vm6220_vm0 = vcmp.lt.s32.totalorder %v6198_v52, 4 }
 0x5bf   :  { %v6062_v41 = vsel %vm5979_vm15, %v6061_v5, %v6060_v57  ;;  %v13213_v30 = vsub.s32 %v6141_v12, %v6144_v9  ;;  %v6216_v56 = vor.u32 %v6215_v39, %v6214_v14  ;;  %vm6219_vm1 = vcmp.lt.s32.totalorder %v6198_v52, 3 }
 0x5c0   :  { %v6065_v28 = vsel %vm13144_vm5, %v14188_v49, %v6062_v41  ;;  %v6233_v54 = vshll.u32 %v6193_v23, 8  ;;  %vm6218_vm2 = vcmp.lt.s32.totalorder %v6198_v52, 2  ;;  %v6222_v15 = vsel %vm6220_vm0, %v6210_v1, 2102212464 }
 0x5c1   :  { %7838 = vcosq.f32 %v6065_v28  ;;  %v6147_v6 = vsub.s32 0, %v13213_v30  ;;  %v6225_v33 = vsel %vm6217_vm13, %v6204_v46, %v6207_v11  ;;  %v6226_v27 = vsel %vm6220_vm0, %v6213_v17, 920167782 }
 0x5c2   :  { %7840 = vsinq.f32 %v6065_v28  ;;  %v6292_v59 = vand.u32 2139095040, %v14197_v0  ;;  %v6221_v37 = vsel %vm6217_vm13, %v6201_v10, %v6204_v46  ;;  %v6227_v25 = vsel %vm6219_vm1, %v6210_v1, %v6226_v27 }
 0x5c3   :  { %v7321_v43 = vmin.u32 %v6147_v6, %v13213_v30  ;;  %v6223_v35 = vsel %vm6219_vm1, %v6207_v11, %v6222_v15  ;;  %v6228_v51 = vsel %vm6218_vm2, %v6225_v33, %v6227_v25  ;;  %v6229_v47 = vsel %vm6217_vm13, %v6207_v11, %v6210_v1  ;;  %v14200_v25 = vld [vmem:[#allocation47_spill] sm:$0xff] }
 0x5c4   :  { %v6230_v4 = vsel %vm6220_vm0, %v6216_v56, 1326507024  ;;  %vm6072_vm15 = vcmp.lt.s32.totalorder %v13207_v22, 2  ;;  %vm6083_vm5 = vcmp.lt.s32.totalorder %v14191_v20, 0  ;;  %v6293_v31 = vshrl.u32 %v6292_v59, 23 }
 0x5c5   :  { %v6149_v16 = vclz %v7321_v43  ;;  %v6231_v21 = vsel %vm6219_vm1, %v6213_v17, %v6230_v4  ;;  %v13233_v50 = vmul.u32.u64.low %v6233_v54, %v6228_v51  ;;  %v13234_v36 = vmul.u32.u64.high %v6233_v54, %v6228_v51, %v13233_v50 }
 0x5c6   :  { %v6167_v32 = vsub.s32 4, %v13202_v2  ;;  %v6224_v3 = vsel %vm6218_vm2, %v6221_v37, %v6223_v35  ;;  %v6232_v13 = vsel %vm6218_vm2, %v6229_v47, %v6231_v21  ;;  %v6289_v53 = vand.u32 2147483647, %v14197_v0 }
 0x5c7   :  { %v7322_v12 = vadd.s32 4294967294, %v6149_v16  ;;  %v13240_v63 = vmul.u32.u64.low %v6233_v54, %v6232_v13  ;;  %v13241_v58 = vmul.u32.u64.high %v6233_v54, %v6232_v13, %v13240_v63  ;;  %v7328_v8 = vadd.s32 4294967169, %v6293_v31 }
 0x5c8   :  { %vm6073_vm3 = vcmp.eq.s32.totalorder %v13207_v22, 0  ;;  %vm6076_vm4 = vcmp.eq.s32.totalorder %v13207_v22, 2  ;;  %v6137_v44 = vadd.s32 %v13173_v7, %v13169_v29  ;;  %v6240_v61 = vmul.u32 %v6233_v54, %v6224_v3 }
 0x5c9   :  { %vm7323_vm6 = vcmp.lt.s32.totalorder %v7322_v12, 0  ;;  %v6243_v45 = vadd.s32 1, %v13234_v36  ;;  %v6299_v48 = vadd.s32 1, %v7328_v8  ;;  %v6168_v14 = vsel %vm6083_vm5, %v6167_v32, %v13202_v2 }
 0x5ca   :  { %v6152_v55 = vsel %vm7323_vm6, 0, %v7322_v12  ;;  %vm6242_vm8 = vc.u32 %v13241_v58, %v13233_v50  ;;  %v6296_v29 = vand.u32 8388607, %v6289_v53  ;;  %vm6069_vm9 = vweird.f32 %v14188_v49 }
 0x5cb   :  { %v7839_v57 = vpop.eup %7838  ;;  %v6153_v52 = vsub.s32 32, %v6152_v55  ;;  %v6154_v40 = vshll.u32 %v13213_v30, %v6152_v55  ;;  %v6157_v23 = vsub.s32 4294967266, %v6152_v55  ;;  %vm6300_vm7 = vcmp.gt.s32.totalorder %v6299_v48, 0 }
 0x5cc   :  { %v7841_v39 = vpop.eup %7840  ;;  %v6077_v5 = vxor.u32 2147483648, %v7839_v57  ;;  %v6244_v46 = vsel %vm6242_vm8, %v6243_v45, %v13234_v36  ;;  %v6301_v1 = vsel %vm6300_vm7, %v6299_v48, 0  ;;  %vm13265_vm11 = vcmp.le.f32.partialorder %v6081_v26, 0.7853982 }
 0x5cd   :  { %v6074_v7 = vxor.u32 2147483648, %v7841_v39  ;;  %v6155_v9 = vshrl.u32 %v6137_v44, %v6153_v52  ;;  %v6158_v10 = vadd.s32 127, %v6157_v23  ;;  %v6245_v2 = vadd.s32 %v6244_v46, %v6240_v61 }
 0x5ce   :  { %v6078_v11 = vsel %vm6076_vm4, %v6077_v5, %v7841_v39  ;;  %v6170_v49 = vsel %vm13265_vm11, 0, %v6168_v14  ;;  %v6303_v6 = vand.u32 31, %v6301_v1  ;;  %v6297_v59 = vor.u32 8388608, %v6296_v29 }
 0x5cf   :  { %v6075_v17 = vsel %vm6073_vm3, %v7839_v57, %v6074_v7  ;;  %v6156_v30 = vor.u32 %v6155_v9, %v6154_v40  ;;  %v6159_v28 = vshll.u32 %v6158_v10, 23  ;;  %v6246_v54 = vadd.s32 536870912, %v6245_v2 }
 0x5d0   :  { %v6079_v56 = vsel %vm6072_vm15, %v6075_v17, %v6078_v11  ;;  %v6302_v26 = vshrl.u32 %v6301_v1, 5  ;;  %v6304_v37 = vsub.s32 32, %v6303_v6  ;;  %v6396_v35 = vand.u32 2139095040, %v14200_v25 }
 0x5d1   :  { %v6080_v15 = vsel %vm6069_vm9, nan, %v6079_v56  ;;  %v6160_v33 = vor.u32 4788187, %v6159_v28  ;;  %v6163_v27 = vcvt.s32.f32 %v6156_v30  ;;  %v13273_v43 = vshrl.u32 %v6246_v54, 30 }
 0x5d2   :  { %7071 = vst [vmem:[#allocation5 + $0x1b0] sm:$0xff] %v6080_v15  ;;  %v6306_v22 = vshll.u32 %v14044_v38, %v6303_v6  ;;  %v6309_v47 = vshll.u32 %v14038_v18, %v6303_v6  ;;  %v6312_v4 = vshll.u32 %v14039_v24, %v6303_v6  ;;  %v6307_v21 = vshrl.u32 %v14038_v18, %v6304_v37 }
 0x5d3   :  { %v6161_v51 = vand.u32 2147483647, %v6160_v33  ;;  %v6248_v16 = vshll.u32 %v13273_v43, 30  ;;  %v6315_v36 = vshll.u32 %v14040_v19, %v6303_v6  ;;  %v6318_v31 = vshll.u32 %v14041_v34, %v6303_v6 }
 0x5d4   :  { %v6310_v32 = vshrl.u32 %v14039_v24, %v6304_v37  ;;  %v6313_v3 = vshrl.u32 %v14040_v19, %v6304_v37  ;;  %v6316_v13 = vshrl.u32 %v14041_v34, %v6304_v37  ;;  %v6174_v63 = vadd.s32 3, %v6170_v49 }
 0x5d5   :  { %v6164_v12 = vmul.f32 %v6163_v27, %v6161_v51  ;;  %v13286_v8 = vsub.s32 %v6245_v2, %v6248_v16  ;;  %v6319_v44 = vshrl.u32 %v14042_v60, %v6304_v37  ;;  %v13289_v55 = vshll.u32 %v6297_v59, 8 }
 0x5d6   :  { %v6308_v45 = vor.u32 %v6307_v21, %v6306_v22  ;;  %v6311_v48 = vor.u32 %v6310_v32, %v6309_v47  ;;  %v6397_v57 = vshrl.u32 %v6396_v35, 23  ;;  %v6305_v40 = vshrl.u32 %v14044_v38, %v6304_v37 }
 0x5d7   :  { %v6165_v61 = vxor.u32 2147483648, %v6164_v12  ;;  %v6251_v52 = vsub.s32 0, %v13286_v8  ;;  %v6317_v23 = vor.u32 %v6316_v13, %v6315_v36  ;;  %vm6321_vm12 = vcmp.lt.s32.totalorder %v6302_v26, 1 }
 0x5d8   :  { %v6314_v39 = vor.u32 %v6313_v3, %v6312_v4  ;;  %v6320_v5 = vor.u32 %v6319_v44, %v6318_v31  ;;  %vm6324_vm10 = vcmp.lt.s32.totalorder %v6302_v26, 4  ;;  %vm6322_vm14 = vcmp.lt.s32.totalorder %v6302_v26, 2 }
 0x5d9   :  { %v6166_v14 = vsel %vm6083_vm5, %v6165_v61, %v6164_v12  ;;  %v7325_v7 = vmin.u32 %v6251_v52, %v13286_v8  ;;  %vm6323_vm13 = vcmp.lt.s32.totalorder %v6302_v26, 3  ;;  %vm6187_vm0 = vcmp.lt.s32.totalorder %v14194_v62, 0 }
 0x5da   :  { %v6169_v29 = vsel %vm13265_vm11, %v14191_v20, %v6166_v14  ;;  %v6326_v9 = vsel %vm6324_vm10, %v6314_v39, 2102212464  ;;  %v6329_v10 = vsel %vm6321_vm12, %v6308_v45, %v6311_v48  ;;  %v6330_v46 = vsel %vm6324_vm10, %v6317_v23, 920167782 }
 0x5db   :  { %7842 = vcosq.f32 %v6169_v29  ;;  %v6253_v11 = vclz %v7325_v7  ;;  %v6393_v2 = vand.u32 2147483647, %v14200_v25  ;;  %v7332_v1 = vadd.s32 4294967169, %v6397_v57 }
 0x5dc   :  { %7844 = vsinq.f32 %v6169_v29  ;;  %v6325_v17 = vsel %vm6321_vm12, %v6305_v40, %v6308_v45  ;;  %v6327_v41 = vsel %vm6323_vm13, %v6311_v48, %v6326_v9  ;;  %v6331_v30 = vsel %vm6323_vm13, %v6314_v39, %v6330_v46 }
 0x5dd   :  { %v6333_v28 = vsel %vm6321_vm12, %v6311_v48, %v6314_v39  ;;  %vm13310_vm1 = vcmp.le.f32.partialorder %v6185_v42, 0.7853982  ;;  %v6241_v49 = vadd.s32 %v13233_v50, %v13241_v58  ;;  %v7326_v54 = vadd.s32 4294967294, %v6253_v11 }
 0x5de   :  { %v6332_v6 = vsel %vm6322_vm14, %v6329_v10, %v6331_v30  ;;  %v6334_v15 = vsel %vm6324_vm10, %v6320_v5, 1326507024  ;;  %v6271_v33 = vsub.s32 4, %v13273_v43  ;;  %vm6173_vm2 = vweird.f32 %v14191_v20 }
 0x5df   :  { %v6335_v27 = vsel %vm6323_vm13, %v6317_v23, %v6334_v15  ;;  %v13321_v59 = vmul.u32.u64.low %v13289_v55, %v6332_v6  ;;  %v13322_v37 = vmul.u32.u64.high %v13289_v55, %v6332_v6, %v13321_v59  ;;  %vm7327_vm15 = vcmp.lt.s32.totalorder %v7326_v54, 0 }
 0x5e0   :  { %v6328_v42 = vsel %vm6322_vm14, %v6325_v17, %v6327_v41  ;;  %v6336_v50 = vsel %vm6322_vm14, %v6333_v28, %v6335_v27  ;;  %v6403_v58 = vadd.s32 1, %v7332_v1  ;;  %v6175_v35 = vand.u32 3, %v6174_v63 }
 0x5e1   :  { %v6256_v51 = vsel %vm7327_vm15, 0, %v7326_v54  ;;  %v13329_v22 = vmul.u32.u64.low %v13289_v55, %v6336_v50  ;;  %v13330_v47 = vmul.u32.u64.high %v13289_v55, %v6336_v50, %v13329_v22  ;;  %v6344_v36 = vmul.u32 %v13289_v55, %v6328_v42 }
 0x5e2   :  { %v6257_v4 = vsub.s32 32, %v6256_v51  ;;  %v6258_v16 = vshll.u32 %v13286_v8, %v6256_v51  ;;  %v6261_v21 = vsub.s32 4294967266, %v6256_v51  ;;  %vm6404_vm5 = vcmp.gt.s32.totalorder %v6403_v58, 0 }
 0x5e3   :  { %v6347_v31 = vadd.s32 1, %v13322_v37  ;;  %v6400_v26 = vand.u32 8388607, %v6393_v2  ;;  %v6405_v12 = vsel %vm6404_vm5, %v6403_v58, 0  ;;  %v6272_v13 = vsel %vm6187_vm0, %v6271_v33, %v13273_v43 }
 0x5e4   :  { %v6259_v32 = vshrl.u32 %v6241_v49, %v6257_v4  ;;  %v6262_v3 = vadd.s32 127, %v6261_v21  ;;  %v6407_v63 = vand.u32 31, %v6405_v12  ;;  %vm6176_vm3 = vcmp.lt.s32.totalorder %v6175_v35, 2 }
 0x5e5   :  { %v7843_v44 = vpop.eup %7842  ;;  %vm6177_vm4 = vcmp.eq.s32.totalorder %v6175_v35, 0  ;;  %vm6180_vm6 = vcmp.eq.s32.totalorder %v6175_v35, 2  ;;  %vm6346_vm8 = vc.u32 %v13330_v47, %v13321_v59  ;;  %v6274_v52 = vsel %vm13310_vm1, 0, %v6272_v13 }
 0x5e6   :  { %v7845_v8 = vpop.eup %7844  ;;  %v6181_v55 = vxor.u32 2147483648, %v7843_v44  ;;  %v6260_v61 = vor.u32 %v6259_v32, %v6258_v16  ;;  %v6263_v45 = vshll.u32 %v6262_v3, 23  ;;  %v6348_v48 = vsel %vm6346_vm8, %v6347_v31, %v13322_v37 }
 0x5e7   :  { %v6178_v57 = vxor.u32 2147483648, %v7845_v8  ;;  %v6349_v40 = vadd.s32 %v6348_v48, %v6344_v36  ;;  %v6408_v43 = vsub.s32 32, %v6407_v63  ;;  %v6401_v5 = vor.u32 8388608, %v6400_v26 }
 0x5e8   :  { %v6182_v23 = vsel %vm6180_vm6, %v6181_v55, %v7845_v8  ;;  %v6264_v14 = vor.u32 4788187, %v6263_v45  ;;  %v6267_v39 = vcvt.s32.f32 %v6260_v61  ;;  %v6410_v9 = vshll.u32 %v14044_v38, %v6407_v63 }
 0x5e9   :  { %v6179_v29 = vsel %vm6177_vm4, %v7843_v44, %v6178_v57  ;;  %v6350_v7 = vadd.s32 536870912, %v6349_v40  ;;  %v6413_v10 = vshll.u32 %v14038_v18, %v6407_v63  ;;  %v6411_v1 = vshrl.u32 %v14038_v18, %v6408_v43 }
 0x5ea   :  { %v6183_v46 = vsel %vm6176_vm3, %v6179_v29, %v6182_v23  ;;  %v6265_v11 = vand.u32 2147483647, %v6264_v14  ;;  %v6414_v17 = vshrl.u32 %v14039_v24, %v6408_v43  ;;  %v6416_v28 = vshll.u32 %v14039_v24, %v6407_v63  ;;  %v14205_v14 = vld [vmem:[#allocation48_spill] sm:$0xff] }
 0x5eb   :  { %v6184_v41 = vsel %vm6173_vm2, nan, %v6183_v46  ;;  %v6351_v30 = vshrl.u32 %v6350_v7, 30  ;;  %v6417_v49 = vshrl.u32 %v14040_v19, %v6408_v43  ;;  %v6406_v6 = vshrl.u32 %v6405_v12, 5 }
 0x5ec   :  { %v6268_v54 = vmul.f32 %v6267_v39, %v6265_v11  ;;  %v6419_v15 = vshll.u32 %v14040_v19, %v6407_v63  ;;  %v6420_v33 = vshrl.u32 %v14041_v34, %v6408_v43  ;;  %7072 = vst [vmem:[#allocation5 + $0x1b8] sm:$0xff] %v6184_v41  ;;  %v6278_v27 = vadd.s32 3, %v6274_v52 }
 0x5ed   :  { %v6352_v37 = vshll.u32 %v6351_v30, 30  ;;  %v6422_v42 = vshll.u32 %v14041_v34, %v6407_v63  ;;  %v13358_v50 = vshll.u32 %v6401_v5, 8  ;;  %v6409_v58 = vshrl.u32 %v14044_v38, %v6408_v43 }
 0x5ee   :  { %v6269_v20 = vxor.u32 2147483648, %v6268_v54  ;;  %v6421_v35 = vor.u32 %v6420_v33, %v6419_v15  ;;  %v6423_v51 = vshrl.u32 %v14042_v60, %v6408_v43  ;;  %v6412_v4 = vor.u32 %v6411_v1, %v6410_v9 }
 0x5ef   :  { %v13362_v22 = vsub.s32 %v6349_v40, %v6352_v37  ;;  %v6415_v16 = vor.u32 %v6414_v17, %v6413_v10  ;;  %v6418_v21 = vor.u32 %v6417_v49, %v6416_v28  ;;  %vm6425_vm7 = vcmp.lt.s32.totalorder %v6406_v6, 1 }
 0x5f0   :  { %v6270_v36 = vsel %vm6187_vm0, %v6269_v20, %v6268_v54  ;;  %v6424_v31 = vor.u32 %v6423_v51, %v6422_v42  ;;  %vm6428_vm9 = vcmp.lt.s32.totalorder %v6406_v6, 4  ;;  %vm6426_vm11 = vcmp.lt.s32.totalorder %v6406_v6, 2 }
 0x5f1   :  { %v6273_v26 = vsel %vm13310_vm1, %v14194_v62, %v6270_v36  ;;  %v6355_v12 = vsub.s32 0, %v13362_v22  ;;  %vm6427_vm12 = vcmp.lt.s32.totalorder %v6406_v6, 3  ;;  %v6429_v32 = vsel %vm6425_vm7, %v6409_v58, %v6412_v4 }
 0x5f2   :  { %7846 = vcosq.f32 %v6273_v26  ;;  %v6430_v3 = vsel %vm6428_vm9, %v6418_v21, 2102212464  ;;  %v6434_v13 = vsel %vm6428_vm9, %v6421_v35, 920167782  ;;  %v6433_v8 = vsel %vm6425_vm7, %v6412_v4, %v6415_v16 }
 0x5f3   :  { %7848 = vsinq.f32 %v6273_v26  ;;  %v7329_v63 = vmin.u32 %v6355_v12, %v13362_v22  ;;  %v6431_v44 = vsel %vm6427_vm12, %v6415_v16, %v6430_v3  ;;  %v6279_v56 = vand.u32 3, %v6278_v27 }
 0x5f4   :  { %v6435_v55 = vsel %vm6427_vm12, %v6418_v21, %v6434_v13  ;;  %v6437_v61 = vsel %vm6425_vm7, %v6415_v16, %v6418_v21  ;;  %v6438_v45 = vsel %vm6428_vm9, %v6424_v31, 1326507024  ;;  %vm13381_vm10 = vcmp.le.f32.partialorder %v6289_v53, 0.7853982 }
 0x5f5   :  { %vm6291_vm14 = vcmp.lt.s32.totalorder %v14197_v0, 0  ;;  %v6357_v57 = vclz %v7329_v63  ;;  %v6375_v52 = vsub.s32 4, %v6351_v30  ;;  %v6432_v40 = vsel %vm6426_vm11, %v6429_v32, %v6431_v44 }
 0x5f6   :  { %v6436_v43 = vsel %vm6426_vm11, %v6433_v8, %v6435_v55  ;;  %v6439_v23 = vsel %vm6427_vm12, %v6421_v35, %v6438_v45  ;;  %v6500_v39 = vand.u32 2139095040, %v14205_v14  ;;  %vm6277_vm13 = vweird.f32 %v14194_v62 }
 0x5f7   :  { %v7330_v5 = vadd.s32 4294967294, %v6357_v57  ;;  %v6440_v53 = vsel %vm6426_vm11, %v6437_v61, %v6439_v23  ;;  %v13393_v29 = vmul.u32.u64.low %v13358_v50, %v6436_v43  ;;  %v13394_v7 = vmul.u32.u64.high %v13358_v50, %v6436_v43, %v13393_v29 }
 0x5f8   :  { %vm6280_vm0 = vcmp.lt.s32.totalorder %v6279_v56, 2  ;;  %v13398_v9 = vmul.u32.u64.low %v13358_v50, %v6440_v53  ;;  %v13399_v10 = vmul.u32.u64.high %v13358_v50, %v6440_v53, %v13398_v9  ;;  %v6501_v46 = vshrl.u32 %v6500_v39, 23 }
 0x5f9   :  { %vm6281_vm1 = vcmp.eq.s32.totalorder %v6279_v56, 0  ;;  %v6345_v11 = vadd.s32 %v13321_v59, %v13330_v47  ;;  %vm7331_vm2 = vcmp.lt.s32.totalorder %v7330_v5, 0  ;;  %v6376_v1 = vsel %vm6291_vm14, %v6375_v52, %v6351_v30 }
 0x5fa   :  { %v6360_v17 = vsel %vm7331_vm2, 0, %v7330_v5  ;;  %v6448_v41 = vmul.u32 %v13358_v50, %v6432_v40  ;;  %v6497_v28 = vand.u32 2147483647, %v14205_v14  ;;  %v7336_v49 = vadd.s32 4294967169, %v6501_v46 }
 0x5fb   :  { %v6361_v54 = vsub.s32 32, %v6360_v17  ;;  %v6362_v6 = vshll.u32 %v13362_v22, %v6360_v17  ;;  %v6365_v15 = vsub.s32 4294967266, %v6360_v17  ;;  %v6451_v33 = vadd.s32 1, %v13394_v7 }
 0x5fc   :  { %v7847_v27 = vpop.eup %7846  ;;  %vm6284_vm15 = vcmp.eq.s32.totalorder %v6279_v56, 2  ;;  %v6378_v59 = vsel %vm13381_vm10, 0, %v6376_v1  ;;  %vm6450_vm5 = vc.u32 %v13399_v10, %v13393_v29  ;;  %v6507_v47 = vadd.s32 1, %v7336_v49 }
 0x5fd   :  { %v7849_v30 = vpop.eup %7848  ;;  %v6285_v37 = vxor.u32 2147483648, %v7847_v27  ;;  %v6363_v42 = vshrl.u32 %v6345_v11, %v6361_v54  ;;  %v6366_v50 = vadd.s32 127, %v6365_v15  ;;  %v6452_v20 = vsel %vm6450_vm5, %v6451_v33, %v13394_v7  ;;  %v14206_v11 = vld [vmem:[#allocation11_spill] sm:$0xff] }
 0x5fe   :  { %v6282_v58 = vxor.u32 2147483648, %v7849_v30  ;;  %v6453_v35 = vadd.s32 %v6452_v20, %v6448_v41  ;;  %v6504_v51 = vand.u32 8388607, %v6497_v28  ;;  %vm6508_vm3 = vcmp.gt.s32.totalorder %v6507_v47, 0 }
 0x5ff   :  { %v6286_v22 = vsel %vm6284_vm15, %v6285_v37, %v7849_v30  ;;  %v6364_v4 = vor.u32 %v6363_v42, %v6362_v6  ;;  %v6367_v16 = vshll.u32 %v6366_v50, 23  ;;  %v6509_v21 = vsel %vm6508_vm3, %v6507_v47, 0 }
 0x600   :  { %v6283_v36 = vsel %vm6281_vm1, %v7847_v27, %v6282_v58  ;;  %v6454_v31 = vadd.s32 536870912, %v6453_v35  ;;  %v6511_v26 = vand.u32 31, %v6509_v21  ;;  %v6382_v13 = vadd.s32 3, %v6378_v59 }
 0x601   :  { %v6287_v12 = vsel %vm6280_vm0, %v6283_v36, %v6286_v22  ;;  %v6368_v32 = vor.u32 4788187, %v6367_v16  ;;  %v6371_v3 = vcvt.s32.f32 %v6364_v4  ;;  %v6505_v8 = vor.u32 8388608, %v6504_v51 }
 0x602   :  { %v6288_v63 = vsel %vm6277_vm13, nan, %v6287_v12  ;;  %v13420_v44 = vshrl.u32 %v6454_v31, 30  ;;  %v6512_v55 = vsub.s32 32, %v6511_v26  ;;  %v6510_v45 = vshrl.u32 %v6509_v21, 5 }
 0x603   :  { %v6369_v61 = vand.u32 2147483647, %v6368_v32  ;;  %v6514_v57 = vshll.u32 %v14044_v38, %v6511_v26  ;;  %v6517_v52 = vshll.u32 %v14038_v18, %v6511_v26  ;;  %7073 = vst [vmem:[#allocation5 + $0x1c0] sm:$0xff] %v6288_v63  ;;  %v6520_v43 = vshll.u32 %v14039_v24, %v6511_v26 }
 0x604   :  { %v6456_v56 = vshll.u32 %v13420_v44, 30  ;;  %v6515_v40 = vshrl.u32 %v14038_v18, %v6512_v55  ;;  %v6523_v62 = vshll.u32 %v14040_v19, %v6511_v26  ;;  %v6518_v39 = vshrl.u32 %v14039_v24, %v6512_v55 }
 0x605   :  { %v6372_v23 = vmul.f32 %v6371_v3, %v6369_v61  ;;  %v6521_v5 = vshrl.u32 %v14040_v19, %v6512_v55  ;;  %v6524_v53 = vshrl.u32 %v14041_v34, %v6512_v55  ;;  %v13431_v7 = vand.u32 3, %v6382_v13 }
 0x606   :  { %v13433_v9 = vsub.s32 %v6453_v35, %v6456_v56  ;;  %v6526_v46 = vshll.u32 %v14041_v34, %v6511_v26  ;;  %v6604_v1 = vand.u32 2139095040, %v14206_v11  ;;  %v6449_v41 = vadd.s32 %v13393_v29, %v13399_v10 }
 0x607   :  { %v6373_v17 = vxor.u32 2147483648, %v6372_v23  ;;  %v6513_v49 = vshrl.u32 %v14044_v38, %v6512_v55  ;;  %v13440_v54 = vshll.u32 %v6505_v8, 8  ;;  %v6516_v15 = vor.u32 %v6515_v40, %v6514_v57 }
 0x608   :  { %v6459_v6 = vsub.s32 0, %v13433_v9  ;;  %v6519_v33 = vor.u32 %v6518_v39, %v6517_v52  ;;  %v6527_v27 = vshrl.u32 %v14042_v60, %v6512_v55  ;;  %v6522_v47 = vor.u32 %v6521_v5, %v6520_v43 }
 0x609   :  { %v6374_v59 = vsel %vm6291_vm14, %v6373_v17, %v6372_v23  ;;  %v6525_v30 = vor.u32 %v6524_v53, %v6523_v62  ;;  %vm6529_vm4 = vcmp.lt.s32.totalorder %v6510_v45, 1  ;;  %v6605_v42 = vshrl.u32 %v6604_v1, 23 }
 0x60a   :  { %v6377_v29 = vsel %vm13381_vm10, %v14197_v0, %v6374_v59  ;;  %v7333_v10 = vmin.u32 %v6459_v6, %v13433_v9  ;;  %v6528_v37 = vor.u32 %v6527_v27, %v6526_v46  ;;  %vm6395_vm6 = vcmp.lt.s32.totalorder %v14200_v25, 0 }
 0x60b   :  { %7850 = vcosq.f32 %v6377_v29  ;;  %vm6530_vm8 = vcmp.lt.s32.totalorder %v6510_v45, 2  ;;  %vm6531_vm7 = vcmp.lt.s32.totalorder %v6510_v45, 3  ;;  %vm6532_vm9 = vcmp.lt.s32.totalorder %v6510_v45, 4 }
 0x60c   :  { %7852 = vsinq.f32 %v6377_v29  ;;  %v6461_v50 = vclz %v7333_v10  ;;  %v6533_v20 = vsel %vm6529_vm4, %v6513_v49, %v6516_v15  ;;  %v6537_v58 = vsel %vm6529_vm4, %v6516_v15, %v6519_v33 }
 0x60d   :  { %v6479_v35 = vsub.s32 4, %v13420_v44  ;;  %v6534_v48 = vsel %vm6532_vm9, %v6522_v47, 2102212464  ;;  %v6538_v51 = vsel %vm6532_vm9, %v6525_v30, 920167782  ;;  %v6541_v22 = vsel %vm6529_vm4, %v6519_v33, %v6522_v47 }
 0x60e   :  { %v7334_v4 = vadd.s32 4294967294, %v6461_v50  ;;  %v6535_v16 = vsel %vm6531_vm7, %v6519_v33, %v6534_v48  ;;  %v6539_v21 = vsel %vm6531_vm7, %v6522_v47, %v6538_v51  ;;  %v6542_v36 = vsel %vm6532_vm9, %v6528_v37, 1326507024 }
 0x60f   :  { %v6536_v31 = vsel %vm6530_vm8, %v6533_v20, %v6535_v16  ;;  %v6540_v26 = vsel %vm6530_vm8, %v6537_v58, %v6539_v21  ;;  %v6543_v12 = vsel %vm6531_vm7, %v6525_v30, %v6542_v36  ;;  %v7340_v32 = vadd.s32 4294967169, %v6605_v42 }
 0x610   :  { %vm7335_vm11 = vcmp.lt.s32.totalorder %v7334_v4, 0  ;;  %v6544_v3 = vsel %vm6530_vm8, %v6541_v22, %v6543_v12  ;;  %v13462_v13 = vmul.u32.u64.low %v13440_v54, %v6540_v26  ;;  %v13463_v63 = vmul.u32.u64.high %v13440_v54, %v6540_v26, %v13462_v13 }
 0x611   :  { %v6464_v8 = vsel %vm7335_vm11, 0, %v7334_v4  ;;  %v13467_v55 = vmul.u32.u64.low %v13440_v54, %v6544_v3  ;;  %v13468_v61 = vmul.u32.u64.high %v13440_v54, %v6544_v3, %v13467_v55  ;;  %v6601_v57 = vand.u32 2147483647, %v14206_v11 }
 0x612   :  { %vm13473_vm12 = vcmp.le.f32.partialorder %v6393_v2, 0.7853982  ;;  %v6465_v45 = vsub.s32 32, %v6464_v8  ;;  %v6466_v56 = vshll.u32 %v13433_v9, %v6464_v8  ;;  %v6469_v40 = vsub.s32 4294967266, %v6464_v8 }
 0x613   :  { %vm6384_vm10 = vcmp.lt.s32.totalorder %v13431_v7, 2  ;;  %vm6385_vm14 = vcmp.eq.s32.totalorder %v13431_v7, 0  ;;  %v6552_v43 = vmul.u32 %v13440_v54, %v6536_v31  ;;  %v6611_v62 = vadd.s32 1, %v7340_v32 }
 0x614   :  { %v6467_v23 = vshrl.u32 %v6449_v41, %v6465_v45  ;;  %v6470_v39 = vadd.s32 127, %v6469_v40  ;;  %v6480_v2 = vsel %vm6395_vm6, %v6479_v35, %v13420_v44  ;;  %v6555_v5 = vadd.s32 1, %v13463_v63 }
 0x615   :  { %v7851_v53 = vpop.eup %7850  ;;  %vm6388_vm13 = vcmp.eq.s32.totalorder %v13431_v7, 2  ;;  %vm6554_vm0 = vc.u32 %v13468_v61, %v13462_v13  ;;  %v6608_v9 = vand.u32 8388607, %v6601_v57  ;;  %vm6612_vm1 = vcmp.gt.s32.totalorder %v6611_v62, 0 }
 0x616   :  { %v7853_v46 = vpop.eup %7852  ;;  %v6389_v1 = vxor.u32 2147483648, %v7851_v53  ;;  %v6468_v17 = vor.u32 %v6467_v23, %v6466_v56  ;;  %v6471_v41 = vshll.u32 %v6470_v39, 23  ;;  %v6556_v49 = vsel %vm6554_vm0, %v6555_v5, %v13463_v63 }
 0x617   :  { %v6386_v54 = vxor.u32 2147483648, %v7853_v46  ;;  %v6482_v44 = vsel %vm13473_vm12, 0, %v6480_v2  ;;  %v6557_v6 = vadd.s32 %v6556_v49, %v6552_v43  ;;  %v6613_v15 = vsel %vm6612_vm1, %v6611_v62, 0  ;;  %v14209_v49 = vld [vmem:[#allocation49_spill] sm:$0xff] }
 0x618   :  { %vm6381_vm2 = vweird.f32 %v14197_v0  ;;  %v6390_v33 = vsel %vm6388_vm13, %v6389_v1, %v7853_v46  ;;  %v6472_v27 = vor.u32 4788187, %v6471_v41  ;;  %v6475_v59 = vcvt.s32.f32 %v6468_v17 }
 0x619   :  { %v6387_v47 = vsel %vm6385_vm14, %v7851_v53, %v6386_v54  ;;  %v6558_v30 = vadd.s32 536870912, %v6557_v6  ;;  %v6615_v29 = vand.u32 31, %v6613_v15  ;;  %v6486_v42 = vadd.s32 3, %v6482_v44 }
 0x61a   :  { %v6391_v10 = vsel %vm6384_vm10, %v6387_v47, %v6390_v33  ;;  %v6473_v37 = vand.u32 2147483647, %v6472_v27  ;;  %v6609_v50 = vor.u32 8388608, %v6608_v9  ;;  %v6614_v35 = vshrl.u32 %v6613_v15, 5 }
 0x61b   :  { %v6392_v20 = vsel %vm6381_vm2, nan, %v6391_v10  ;;  %v13498_v58 = vshrl.u32 %v6558_v30, 30  ;;  %v6616_v48 = vsub.s32 32, %v6615_v29  ;;  %v6618_v51 = vshll.u32 %v14044_v38, %v6615_v29 }
 0x61c   :  { %v6476_v0 = vmul.f32 %v6475_v59, %v6473_v37  ;;  %v6621_v22 = vshll.u32 %v14038_v18, %v6615_v29  ;;  %7074 = vst [vmem:[#allocation5 + $0x1c8] sm:$0xff] %v6392_v20  ;;  %v6624_v7 = vshll.u32 %v14039_v24, %v6615_v29  ;;  %v6627_v21 = vshll.u32 %v14040_v19, %v6615_v29 }
 0x61d   :  { %v6560_v4 = vshll.u32 %v13498_v58, 30  ;;  %v6619_v16 = vshrl.u32 %v14038_v18, %v6616_v48  ;;  %v6622_v31 = vshrl.u32 %v14039_v24, %v6616_v48  ;;  %v6625_v26 = vshrl.u32 %v14040_v19, %v6616_v48 }
 0x61e   :  { %v6477_v36 = vxor.u32 2147483648, %v6476_v0  ;;  %v6628_v12 = vshrl.u32 %v14041_v34, %v6616_v48  ;;  %v13509_v32 = vand.u32 3, %v6486_v42  ;;  %vm6633_vm15 = vcmp.lt.s32.totalorder %v6614_v35, 1 }
 0x61f   :  { %v13511_v3 = vsub.s32 %v6557_v6, %v6560_v4  ;;  %v13513_v63 = vshll.u32 %v6609_v50, 8  ;;  %v6620_v55 = vor.u32 %v6619_v16, %v6618_v51  ;;  %v6623_v45 = vor.u32 %v6622_v31, %v6621_v22 }
 0x620   :  { %v6478_v8 = vsel %vm6395_vm6, %v6477_v36, %v6476_v0  ;;  %v6630_v56 = vshll.u32 %v14041_v34, %v6615_v29  ;;  %v6617_v62 = vshrl.u32 %v14044_v38, %v6616_v48  ;;  %v6629_v23 = vor.u32 %v6628_v12, %v6627_v21 }
 0x621   :  { %v6481_v40 = vsel %vm13473_vm12, %v14200_v25, %v6478_v8  ;;  %v6563_v43 = vsub.s32 0, %v13511_v3  ;;  %v6626_v39 = vor.u32 %v6625_v26, %v6624_v7  ;;  %v6631_v2 = vshrl.u32 %v14042_v60, %v6616_v48 }
 0x622   :  { %7854 = vcosq.f32 %v6481_v40  ;;  %vm6636_vm5 = vcmp.lt.s32.totalorder %v6614_v35, 4  ;;  %vm6634_vm3 = vcmp.lt.s32.totalorder %v6614_v35, 2  ;;  %vm6635_vm4 = vcmp.lt.s32.totalorder %v6614_v35, 3 }
 0x623   :  { %7856 = vsinq.f32 %v6481_v40  ;;  %v7337_v5 = vmin.u32 %v6563_v43, %v13511_v3  ;;  %v6632_v53 = vor.u32 %v6631_v2, %v6630_v56  ;;  %v6638_v9 = vsel %vm6636_vm5, %v6626_v39, 2102212464 }
 0x624   :  { %v6641_v52 = vsel %vm6633_vm15, %v6620_v55, %v6623_v45  ;;  %v6642_v46 = vsel %vm6636_vm5, %v6629_v23, 920167782  ;;  %v6553_v1 = vadd.s32 %v13462_v13, %v13468_v61  ;;  %v6637_v41 = vsel %vm6633_vm15, %v6617_v62, %v6620_v55 }
 0x625   :  { %v6565_v17 = vclz %v7337_v5  ;;  %v6708_v54 = vand.u32 2139095040, %v14209_v49  ;;  %v6639_v44 = vsel %vm6635_vm4, %v6623_v45, %v6638_v9  ;;  %v6643_v6 = vsel %vm6635_vm4, %v6626_v39, %v6642_v46 }
 0x626   :  { %v6645_v15 = vsel %vm6633_vm15, %v6623_v45, %v6626_v39  ;;  %v6646_v33 = vsel %vm6636_vm5, %v6632_v53, 1326507024  ;;  %vm6485_vm6 = vweird.f32 %v14200_v25  ;;  %v6583_v59 = vsub.s32 4, %v13498_v58 }
 0x627   :  { %v7338_v27 = vadd.s32 4294967294, %v6565_v17  ;;  %v6644_v13 = vsel %vm6634_vm3, %v6641_v52, %v6643_v6  ;;  %v6647_v61 = vsel %vm6635_vm4, %v6629_v23, %v6646_v33  ;;  %v6640_v47 = vsel %vm6634_vm3, %v6637_v41, %v6639_v44 }
 0x628   :  { %v6648_v30 = vsel %vm6634_vm3, %v6645_v15, %v6647_v61  ;;  %v13543_v29 = vmul.u32.u64.low %v13513_v63, %v6644_v13  ;;  %v13544_v10 = vmul.u32.u64.high %v13513_v63, %v6644_v13, %v13543_v29  ;;  %v6709_v50 = vshrl.u32 %v6708_v54, 23 }
 0x629   :  { %vm7339_vm8 = vcmp.lt.s32.totalorder %v7338_v27, 0  ;;  %v13548_v37 = vmul.u32.u64.low %v13513_v63, %v6648_v30  ;;  %v13549_v42 = vmul.u32.u64.high %v13513_v63, %v6648_v30, %v13548_v37  ;;  %vm6488_vm7 = vcmp.lt.s32.totalorder %v13509_v32, 2 }
 0x62a   :  { %vm13554_vm9 = vcmp.le.f32.partialorder %v6497_v28, 0.7853982  ;;  %vm6499_vm11 = vcmp.lt.s32.totalorder %v14205_v14, 0  ;;  %v6568_v35 = vsel %vm7339_vm8, 0, %v7338_v27  ;;  %v7344_v22 = vadd.s32 4294967169, %v6709_v50 }
 0x62b   :  { %v6569_v48 = vsub.s32 32, %v6568_v35  ;;  %v6570_v0 = vshll.u32 %v13511_v3, %v6568_v35  ;;  %v6573_v51 = vsub.s32 4294967266, %v6568_v35  ;;  %vm6489_vm12 = vcmp.eq.s32.totalorder %v13509_v32, 0 }
 0x62c   :  { %v7855_v4 = vpop.eup %7854  ;;  %vm6492_vm10 = vcmp.eq.s32.totalorder %v13509_v32, 2  ;;  %v6656_v16 = vmul.u32 %v13513_v63, %v6640_v47  ;;  %v6659_v28 = vadd.s32 1, %v13544_v10  ;;  %v6584_v26 = vsel %vm6499_vm11, %v6583_v59, %v13498_v58 }
 0x62d   :  { %v7857_v7 = vpop.eup %7856  ;;  %v6493_v21 = vxor.u32 2147483648, %v7855_v4  ;;  %v6571_v36 = vshrl.u32 %v6553_v1, %v6569_v48  ;;  %v6574_v31 = vadd.s32 127, %v6573_v51  ;;  %vm6658_vm14 = vc.u32 %v13549_v42, %v13543_v29 }
 0x62e   :  { %v6490_v12 = vxor.u32 2147483648, %v7857_v7  ;;  %v6705_v3 = vand.u32 2147483647, %v14209_v49  ;;  %v6715_v8 = vadd.s32 1, %v7344_v22  ;;  %v6660_v56 = vsel %vm6658_vm14, %v6659_v28, %v13544_v10  ;;  %v14212_v22 = vld [vmem:[#allocation50_spill] sm:$0xff] }
 0x62f   :  { %v6494_v55 = vsel %vm6492_vm10, %v6493_v21, %v7857_v7  ;;  %v6572_v45 = vor.u32 %v6571_v36, %v6570_v0  ;;  %v6575_v63 = vshll.u32 %v6574_v31, 23  ;;  %v6586_v43 = vsel %vm13554_vm9, 0, %v6584_v26 }
 0x630   :  { %v6491_v40 = vsel %vm6489_vm12, %v7855_v4, %v6490_v12  ;;  %v6661_v62 = vadd.s32 %v6660_v56, %v6656_v16  ;;  %vm6716_vm13 = vcmp.gt.s32.totalorder %v6715_v8, 0  ;;  %v6590_v46 = vadd.s32 3, %v6586_v43 }
 0x631   :  { %v6495_v58 = vsel %vm6488_vm7, %v6491_v40, %v6494_v55  ;;  %v6576_v23 = vor.u32 4788187, %v6575_v63  ;;  %v6579_v39 = vcvt.s32.f32 %v6572_v45  ;;  %v6717_v2 = vsel %vm6716_vm13, %v6715_v8, 0 }
 0x632   :  { %v6496_v5 = vsel %vm6485_vm6, nan, %v6495_v58  ;;  %v6662_v53 = vadd.s32 536870912, %v6661_v62  ;;  %v6719_v9 = vand.u32 31, %v6717_v2  ;;  %v6712_v17 = vand.u32 8388607, %v6705_v3 }
 0x633   :  { %v6577_v52 = vand.u32 2147483647, %v6576_v23  ;;  %7075 = vst [vmem:[#allocation5 + $0x1d0] sm:$0xff] %v6496_v5  ;;  %v6718_v41 = vshrl.u32 %v6717_v2, 5  ;;  %v13593_v10 = vand.u32 3, %v6590_v46  ;;  %v6812_v4 = vand.u32 2139095040, %v14212_v22 }
 0x634   :  { %v13579_v1 = vshrl.u32 %v6662_v53, 30  ;;  %v6720_v54 = vsub.s32 32, %v6719_v9  ;;  %v6722_v44 = vshll.u32 %v14044_v38, %v6719_v9  ;;  %v6725_v6 = vshll.u32 %v14038_v18, %v6719_v9 }
 0x635   :  { %v6580_v32 = vmul.f32 %v6579_v39, %v6577_v52  ;;  %v6728_v25 = vshll.u32 %v14039_v24, %v6719_v9  ;;  %v6731_v27 = vshll.u32 %v14040_v19, %v6719_v9  ;;  %v6734_v59 = vshll.u32 %v14041_v34, %v6719_v9 }
 0x636   :  { %v6664_v15 = vshll.u32 %v13579_v1, 30  ;;  %v6723_v33 = vshrl.u32 %v14038_v18, %v6720_v54  ;;  %v6726_v61 = vshrl.u32 %v14039_v24, %v6720_v54  ;;  %v6729_v47 = vshrl.u32 %v14040_v19, %v6720_v54 }
 0x637   :  { %v6581_v13 = vxor.u32 2147483648, %v6580_v32  ;;  %v6732_v30 = vshrl.u32 %v14041_v34, %v6720_v54  ;;  %v6713_v50 = vor.u32 8388608, %v6712_v17  ;;  %v6735_v35 = vshrl.u32 %v14042_v60, %v6720_v54 }
 0x638   :  { %v13595_v37 = vsub.s32 %v6661_v62, %v6664_v15  ;;  %v6721_v0 = vshrl.u32 %v14044_v38, %v6720_v54  ;;  %v6724_v51 = vor.u32 %v6723_v33, %v6722_v44  ;;  %v6727_v7 = vor.u32 %v6726_v61, %v6725_v6 }
 0x639   :  { %v6582_v48 = vsel %vm6499_vm11, %v6581_v13, %v6580_v32  ;;  %v6730_v21 = vor.u32 %v6729_v47, %v6728_v25  ;;  %v6733_v36 = vor.u32 %v6732_v30, %v6731_v27  ;;  %v6736_v31 = vor.u32 %v6735_v35, %v6734_v59 }
 0x63a   :  { %v6585_v16 = vsel %vm13554_vm9, %v14205_v14, %v6582_v48  ;;  %v6667_v28 = vsub.s32 0, %v13595_v37  ;;  %vm6737_vm0 = vcmp.lt.s32.totalorder %v6718_v41, 1  ;;  %vm6603_vm1 = vcmp.lt.s32.totalorder %v14206_v11, 0 }
 0x63b   :  { %7858 = vcosq.f32 %v6585_v16  ;;  %vm6739_vm2 = vcmp.lt.s32.totalorder %v6718_v41, 3  ;;  %vm6740_vm15 = vcmp.lt.s32.totalorder %v6718_v41, 4  ;;  %v6753_v12 = vshll.u32 %v6713_v50, 8 }
 0x63c   :  { %7860 = vsinq.f32 %v6585_v16  ;;  %v7341_v26 = vmin.u32 %v6667_v28, %v13595_v37  ;;  %v6813_v8 = vshrl.u32 %v6812_v4, 23  ;;  %vm6738_vm5 = vcmp.lt.s32.totalorder %v6718_v41, 2 }
 0x63d   :  { %v6745_v20 = vsel %vm6737_vm0, %v6724_v51, %v6727_v7  ;;  %v6749_v45 = vsel %vm6737_vm0, %v6727_v7, %v6730_v21  ;;  %vm6592_vm3 = vcmp.lt.s32.totalorder %v13593_v10, 2  ;;  %v6741_v63 = vsel %vm6737_vm0, %v6721_v0, %v6724_v51 }
 0x63e   :  { %v6669_v55 = vclz %v7341_v26  ;;  %v6742_v56 = vsel %vm6740_vm15, %v6730_v21, 2102212464  ;;  %v6746_v40 = vsel %vm6740_vm15, %v6733_v36, 920167782  ;;  %v6750_v43 = vsel %vm6740_vm15, %v6736_v31, 1326507024 }
 0x63f   :  { %vm6589_vm4 = vweird.f32 %v14205_v14  ;;  %v6743_v58 = vsel %vm6739_vm2, %v6727_v7, %v6742_v56  ;;  %v6747_v23 = vsel %vm6739_vm2, %v6730_v21, %v6746_v40  ;;  %v6751_v39 = vsel %vm6739_vm2, %v6733_v36, %v6750_v43 }
 0x640   :  { %v7342_v62 = vadd.s32 4294967294, %v6669_v55  ;;  %v6687_v2 = vsub.s32 4, %v13579_v1  ;;  %v6748_v5 = vsel %vm6738_vm5, %v6745_v20, %v6747_v23  ;;  %v6752_v53 = vsel %vm6738_vm5, %v6749_v45, %v6751_v39 }
 0x641   :  { %v7348_v9 = vadd.s32 4294967169, %v6813_v8  ;;  %vm13618_vm6 = vcmp.le.f32.partialorder %v6601_v57, 0.7853982  ;;  %v6657_v46 = vadd.s32 %v13543_v29, %v13549_v42  ;;  %v6744_v44 = vsel %vm6738_vm5, %v6741_v63, %v6743_v58 }
 0x642   :  { %vm7343_vm8 = vcmp.lt.s32.totalorder %v7342_v62, 0  ;;  %v13624_v17 = vmul.u32.u64.low %v6753_v12, %v6752_v53  ;;  %v13625_v54 = vmul.u32.u64.high %v6753_v12, %v6752_v53, %v13624_v17  ;;  %vm6593_vm7 = vcmp.eq.s32.totalorder %v13593_v10, 0 }
 0x643   :  { %v6672_v32 = vsel %vm7343_vm8, 0, %v7342_v62  ;;  %v13628_v6 = vmul.u32.u64.low %v6753_v12, %v6748_v5  ;;  %v13629_v25 = vmul.u32.u64.high %v6753_v12, %v6748_v5, %v13628_v6  ;;  %v6819_v27 = vadd.s32 1, %v7348_v9 }
 0x644   :  { %v6673_v15 = vsub.s32 32, %v6672_v32  ;;  %v6674_v57 = vshll.u32 %v13595_v37, %v6672_v32  ;;  %v6677_v33 = vsub.s32 4294967266, %v6672_v32  ;;  %vm6596_vm9 = vcmp.eq.s32.totalorder %v13593_v10, 2 }
 0x645   :  { %v7859_v59 = vpop.eup %7858  ;;  %v6688_v29 = vsel %vm6603_vm1, %v6687_v2, %v13579_v1  ;;  %v6809_v42 = vand.u32 2147483647, %v14212_v22  ;;  %v6760_v30 = vmul.u32 %v6753_v12, %v6744_v44  ;;  %vm6762_vm11 = vc.u32 %v13625_v54, %v13628_v6 }
 0x646   :  { %v7861_v41 = vpop.eup %7860  ;;  %v6597_v13 = vxor.u32 2147483648, %v7859_v59  ;;  %v6675_v61 = vshrl.u32 %v6657_v46, %v6673_v15  ;;  %v6678_v47 = vadd.s32 127, %v6677_v33  ;;  %v6763_v37 = vadd.s32 1, %v13629_v25 }
 0x647   :  { %v6594_v50 = vxor.u32 2147483648, %v7861_v41  ;;  %vm6820_vm12 = vcmp.gt.s32.totalorder %v6819_v27, 0  ;;  %v6816_v16 = vand.u32 8388607, %v6809_v42  ;;  %v6690_v12 = vsel %vm13618_vm6, 0, %v6688_v29 }
 0x648   :  { %v6598_v35 = vsel %vm6596_vm9, %v6597_v13, %v7861_v41  ;;  %v6676_v48 = vor.u32 %v6675_v61, %v6674_v57  ;;  %v6679_v0 = vshll.u32 %v6678_v47, 23  ;;  %v6821_v51 = vsel %vm6820_vm12, %v6819_v27, 0 }
 0x649   :  { %v6595_v1 = vsel %vm6593_vm7, %v7859_v59, %v6594_v50  ;;  %v6764_v4 = vsel %vm6762_vm11, %v6763_v37, %v13629_v25  ;;  %v6823_v28 = vand.u32 31, %v6821_v51  ;;  %v6822_v23 = vshrl.u32 %v6821_v51, 5  ;;  %v14215_v50 = vld [vmem:[#allocation51_spill] sm:$0xff] }
 0x64a   :  { %v6599_v7 = vsel %vm6592_vm3, %v6595_v1, %v6598_v35  ;;  %v6680_v21 = vor.u32 4788187, %v6679_v0  ;;  %v6683_v36 = vcvt.s32.f32 %v6676_v48  ;;  %v6765_v31 = vadd.s32 %v6764_v4, %v6760_v30 }
 0x64b   :  { %v6600_v26 = vsel %vm6589_vm4, nan, %v6599_v7  ;;  %v6824_v8 = vsub.s32 32, %v6823_v28  ;;  %v6826_v55 = vshll.u32 %v14044_v38, %v6823_v28  ;;  %v6829_v63 = vshll.u32 %v14038_v18, %v6823_v28 }
 0x64c   :  { %v6681_v20 = vand.u32 2147483647, %v6680_v21  ;;  %v6766_v45 = vadd.s32 536870912, %v6765_v31  ;;  %v6832_v56 = vshll.u32 %v14039_v24, %v6823_v28  ;;  %7076 = vst [vmem:[#allocation5 + $0x1d8] sm:$0xff] %v6600_v26  ;;  %v6835_v43 = vshll.u32 %v14040_v19, %v6823_v28 }
 0x64d   :  { %v6827_v10 = vshrl.u32 %v14038_v18, %v6824_v8  ;;  %v6830_v40 = vshrl.u32 %v14039_v24, %v6824_v8  ;;  %v6833_v14 = vshrl.u32 %v14040_v19, %v6824_v8  ;;  %v6836_v39 = vshrl.u32 %v14041_v34, %v6824_v8 }
 0x64e   :  { %v6684_v62 = vmul.f32 %v6683_v36, %v6681_v20  ;;  %v13660_v58 = vshrl.u32 %v6766_v45, 30  ;;  %v6817_v2 = vor.u32 8388608, %v6816_v16  ;;  %v6838_v5 = vshll.u32 %v14041_v34, %v6823_v28 }
 0x64f   :  { %v6839_v53 = vshrl.u32 %v14042_v60, %v6824_v8  ;;  %v6694_v46 = vadd.s32 3, %v6690_v12  ;;  %v6825_v32 = vshrl.u32 %v14044_v38, %v6824_v8  ;;  %v6828_v44 = vor.u32 %v6827_v10, %v6826_v55 }
 0x650   :  { %v6685_v9 = vxor.u32 2147483648, %v6684_v62  ;;  %v6768_v17 = vshll.u32 %v13660_v58, 30  ;;  %v6831_v25 = vor.u32 %v6830_v40, %v6829_v63  ;;  %v6834_v15 = vor.u32 %v6833_v14, %v6832_v56 }
 0x651   :  { %v6837_v57 = vor.u32 %v6836_v39, %v6835_v43  ;;  %vm6841_vm10 = vcmp.lt.s32.totalorder %v6822_v23, 1  ;;  %vm6844_vm14 = vcmp.lt.s32.totalorder %v6822_v23, 4  ;;  %v6840_v29 = vor.u32 %v6839_v53, %v6838_v5 }
 0x652   :  { %v6686_v33 = vsel %vm6603_vm1, %v6685_v9, %v6684_v62  ;;  %v13669_v27 = vsub.s32 %v6765_v31, %v6768_v17  ;;  %vm6843_vm13 = vcmp.lt.s32.totalorder %v6822_v23, 3  ;;  %v6857_v41 = vshll.u32 %v6817_v2, 8 }
 0x653   :  { %v6689_v59 = vsel %vm13618_vm6, %v14206_v11, %v6686_v33  ;;  %vm6842_vm0 = vcmp.lt.s32.totalorder %v6822_v23, 2  ;;  %v6846_v61 = vsel %vm6844_vm14, %v6834_v15, 2102212464  ;;  %v6849_v47 = vsel %vm6841_vm10, %v6828_v44, %v6831_v25 }
 0x654   :  { %7862 = vcosq.f32 %v6689_v59  ;;  %v6771_v13 = vsub.s32 0, %v13669_v27  ;;  %v6850_v30 = vsel %vm6844_vm14, %v6837_v57, 920167782  ;;  %v6916_v37 = vand.u32 2139095040, %v14215_v50 }
 0x655   :  { %7864 = vsinq.f32 %v6689_v59  ;;  %v6695_v35 = vand.u32 3, %v6694_v46  ;;  %v6845_v48 = vsel %vm6841_vm10, %v6825_v32, %v6828_v44  ;;  %v6851_v0 = vsel %vm6843_vm13, %v6834_v15, %v6850_v30 }
 0x656   :  { %v7345_v52 = vmin.u32 %v6771_v13, %v13669_v27  ;;  %v6847_v51 = vsel %vm6843_vm13, %v6831_v25, %v6846_v61  ;;  %v6852_v1 = vsel %vm6842_vm0, %v6849_v47, %v6851_v0  ;;  %v6853_v4 = vsel %vm6841_vm10, %v6831_v25, %v6834_v15 }
 0x657   :  { %v6854_v16 = vsel %vm6844_vm14, %v6840_v29, 1326507024  ;;  %v13687_v21 = vmul.u32.u64.low %v6857_v41, %v6852_v1  ;;  %v13688_v36 = vmul.u32.u64.high %v6857_v41, %v6852_v1, %v13687_v21  ;;  %v6917_v31 = vshrl.u32 %v6916_v37, 23 }
 0x658   :  { %v6773_v28 = vclz %v7345_v52  ;;  %v6855_v7 = vsel %vm6843_vm13, %v6837_v57, %v6854_v16  ;;  %vm6693_vm1 = vweird.f32 %v14206_v11  ;;  %v6848_v12 = vsel %vm6842_vm0, %v6845_v48, %v6847_v51 }
 0x659   :  { %v6856_v8 = vsel %vm6842_vm0, %v6853_v4, %v6855_v7  ;;  %vm6696_vm2 = vcmp.lt.s32.totalorder %v6695_v35, 2  ;;  %v7352_v45 = vadd.s32 4294967169, %v6917_v31  ;;  %vm6697_vm15 = vcmp.eq.s32.totalorder %v6695_v35, 0 }
 0x65a   :  { %v7346_v26 = vadd.s32 4294967294, %v6773_v28  ;;  %v13694_v55 = vmul.u32.u64.low %v6857_v41, %v6856_v8  ;;  %v13695_v20 = vmul.u32.u64.high %v6857_v41, %v6856_v8, %v13694_v55  ;;  %v6761_v63 = vadd.s32 %v13628_v6, %v13625_v54 }
 0x65b   :  { %v6913_v56 = vand.u32 2147483647, %v14215_v50  ;;  %v6864_v40 = vmul.u32 %v6857_v41, %v6848_v12  ;;  %v6867_v14 = vadd.s32 1, %v13688_v36  ;;  %v6923_v43 = vadd.s32 1, %v7352_v45 }
 0x65c   :  { %vm7347_vm5 = vcmp.lt.s32.totalorder %v7346_v26, 0  ;;  %vm6700_vm3 = vcmp.eq.s32.totalorder %v6695_v35, 2  ;;  %v6791_v9 = vsub.s32 4, %v13660_v58  ;;  %vm6866_vm4 = vc.u32 %v13695_v20, %v13687_v21 }
 0x65d   :  { %v6776_v10 = vsel %vm7347_vm5, 0, %v7346_v26  ;;  %vm6924_vm6 = vcmp.gt.s32.totalorder %v6923_v43, 0  ;;  %v6868_v17 = vsel %vm6866_vm4, %v6867_v14, %v13688_v36  ;;  %v6920_v25 = vand.u32 8388607, %v6913_v56 }
 0x65e   :  { %v7863_v62 = vpop.eup %7862  ;;  %v6777_v23 = vsub.s32 32, %v6776_v10  ;;  %v6778_v39 = vshll.u32 %v13669_v27, %v6776_v10  ;;  %v6781_v2 = vsub.s32 4294967266, %v6776_v10  ;;  %v6869_v44 = vadd.s32 %v6868_v17, %v6864_v40 }
 0x65f   :  { %v7865_v5 = vpop.eup %7864  ;;  %v6701_v53 = vxor.u32 2147483648, %v7863_v62  ;;  %v6925_v15 = vsel %vm6924_vm6, %v6923_v43, 0  ;;  %vm6707_vm8 = vcmp.lt.s32.totalorder %v14209_v49, 0  ;;  %vm13713_vm7 = vcmp.le.f32.partialorder %v6705_v3, 0.7853982 }
 0x660   :  { %v6698_v54 = vxor.u32 2147483648, %v7865_v5  ;;  %v6779_v6 = vshrl.u32 %v6761_v63, %v6777_v23  ;;  %v6782_v46 = vadd.s32 127, %v6781_v2  ;;  %v6870_v41 = vadd.s32 536870912, %v6869_v44 }
 0x661   :  { %v6702_v32 = vsel %vm6700_vm3, %v6701_v53, %v7865_v5  ;;  %v6927_v13 = vand.u32 31, %v6925_v15  ;;  %v6792_v37 = vsel %vm6707_vm8, %v6791_v9, %v13660_v58  ;;  %v6921_v35 = vor.u32 8388608, %v6920_v25 }
 0x662   :  { %v6699_v57 = vsel %vm6697_vm15, %v7863_v62, %v6698_v54  ;;  %v6780_v33 = vor.u32 %v6779_v6, %v6778_v39  ;;  %v6783_v27 = vshll.u32 %v6782_v46, 23  ;;  %v13722_v52 = vshrl.u32 %v6870_v41, 30 }
 0x663   :  { %v6703_v59 = vsel %vm6696_vm2, %v6699_v57, %v6702_v32  ;;  %v6926_v48 = vshrl.u32 %v6925_v15, 5  ;;  %v6928_v0 = vsub.s32 32, %v6927_v13  ;;  %v6930_v51 = vshll.u32 %v14044_v38, %v6927_v13 }
 0x664   :  { %v6704_v61 = vsel %vm6693_vm1, nan, %v6703_v59  ;;  %v6784_v47 = vor.u32 4788187, %v6783_v27  ;;  %v6787_v30 = vcvt.s32.f32 %v6780_v33  ;;  %v6933_v1 = vshll.u32 %v14038_v18, %v6927_v13 }
 0x665   :  { %7077 = vst [vmem:[#allocation5 + $0x1e0] sm:$0xff] %v6704_v61  ;;  %v6936_v11 = vshll.u32 %v14039_v24, %v6927_v13  ;;  %v6872_v4 = vshll.u32 %v13722_v52, 30  ;;  %v6931_v16 = vshrl.u32 %v14038_v18, %v6928_v0  ;;  %v6939_v28 = vshll.u32 %v14040_v19, %v6927_v13 }
 0x666   :  { %v6785_v3 = vand.u32 2147483647, %v6784_v47  ;;  %v6942_v58 = vshll.u32 %v14041_v34, %v6927_v13  ;;  %v6934_v36 = vshrl.u32 %v14039_v24, %v6928_v0  ;;  %v6937_v31 = vshrl.u32 %v14040_v19, %v6928_v0 }
 0x667   :  { %v6940_v26 = vshrl.u32 %v14041_v34, %v6928_v0  ;;  %v6794_v12 = vsel %vm13713_vm7, 0, %v6792_v37  ;;  %v6873_v8 = vsub.s32 %v6869_v44, %v6872_v4  ;;  %v6943_v55 = vshrl.u32 %v14042_v60, %v6928_v0 }
 0x668   :  { %v6788_v7 = vmul.f32 %v6787_v30, %v6785_v3  ;;  %v6932_v63 = vor.u32 %v6931_v16, %v6930_v51  ;;  %v6935_v18 = vor.u32 %v6934_v36, %v6933_v1  ;;  %v6961_v10 = vshll.u32 %v6921_v35, 8 }
 0x669   :  { %v6875_v40 = vsub.s32 0, %v6873_v8  ;;  %v6929_v14 = vshrl.u32 %v14044_v38, %v6928_v0  ;;  %v6941_v43 = vor.u32 %v6940_v26, %v6939_v28  ;;  %vm6945_vm9 = vcmp.lt.s32.totalorder %v6926_v48, 1 }
 0x66a   :  { %v6789_v45 = vxor.u32 2147483648, %v6788_v7  ;;  %v6938_v19 = vor.u32 %v6937_v31, %v6936_v11  ;;  %v6944_v34 = vor.u32 %v6943_v55, %v6942_v58  ;;  %vm6948_vm11 = vcmp.lt.s32.totalorder %v6926_v48, 4 }
 0x66b   :  { %v7349_v60 = vmin.u32 %v6875_v40, %v6873_v8  ;;  %vm6946_vm12 = vcmp.lt.s32.totalorder %v6926_v48, 2  ;;  %vm6947_vm10 = vcmp.lt.s32.totalorder %v6926_v48, 3  ;;  %v6953_v38 = vsel %vm6945_vm9, %v6932_v63, %v6935_v18 }
 0x66c   :  { %v6790_v24 = vsel %vm6707_vm8, %v6789_v45, %v6788_v7  ;;  %v6950_v23 = vsel %vm6948_vm11, %v6938_v19, 2102212464  ;;  %v6954_v39 = vsel %vm6948_vm11, %v6941_v43, 920167782  ;;  %v6798_v2 = vadd.s32 3, %v6794_v12 }
 0x66d   :  { %v6793_v62 = vsel %vm13713_vm7, %v14209_v49, %v6790_v24  ;;  %v6877_v5 = vclz %v7349_v60  ;;  %v6949_v53 = vsel %vm6945_vm9, %v6929_v14, %v6932_v63  ;;  %v6951_v9 = vsel %vm6947_vm10, %v6935_v18, %v6950_v23 }
 0x66e   :  { %7866 = vcosq.f32 %v6793_v62  ;;  %v6955_v54 = vsel %vm6947_vm10, %v6938_v19, %v6954_v39  ;;  %v6957_v6 = vsel %vm6945_vm9, %v6935_v18, %v6938_v19  ;;  %v6958_v32 = vsel %vm6948_vm11, %v6944_v34, 1326507024 }
 0x66f   :  { %7868 = vsinq.f32 %v6793_v62  ;;  %v7350_v46 = vadd.s32 4294967294, %v6877_v5  ;;  %v6956_v17 = vsel %vm6946_vm12, %v6953_v38, %v6955_v54  ;;  %v6959_v44 = vsel %vm6947_vm10, %v6941_v43, %v6958_v32 }
 0x670   :  { %v13750_v25 = vmul.u32.u64.low %v6961_v10, %v6956_v17  ;;  %v13751_v15 = vmul.u32.u64.high %v6961_v10, %v6956_v17, %v13750_v25  ;;  %v6865_v57 = vadd.s32 %v13687_v21, %v13695_v20  ;;  %v6952_v33 = vsel %vm6946_vm12, %v6949_v53, %v6951_v9 }
 0x671   :  { %vm7351_vm14 = vcmp.lt.s32.totalorder %v7350_v46, 0  ;;  %v6960_v27 = vsel %vm6946_vm12, %v6957_v6, %v6959_v44  ;;  %v6799_v59 = vand.u32 3, %v6798_v2  ;;  %v6968_v37 = vmul.u32 %v6961_v10, %v6952_v33 }
 0x672   :  { %v6880_v29 = vsel %vm7351_vm14, 0, %v7350_v46  ;;  %v13757_v41 = vmul.u32.u64.low %v6961_v10, %v6960_v27  ;;  %v13758_v13 = vmul.u32.u64.high %v6961_v10, %v6960_v27, %v13757_v41  ;;  %v6971_v35 = vadd.s32 1, %v13751_v15 }
 0x673   :  { %v6881_v61 = vsub.s32 32, %v6880_v29  ;;  %v6882_v47 = vshll.u32 %v6873_v8, %v6880_v29  ;;  %v6885_v30 = vsub.s32 4294967266, %v6880_v29  ;;  %vm6801_vm13 = vcmp.eq.s32.totalorder %v6799_v59, 0 }
 0x674   :  { %vm6804_vm0 = vcmp.eq.s32.totalorder %v6799_v59, 2  ;;  %vm6970_vm1 = vc.u32 %v13758_v13, %v13750_v25  ;;  %vm6800_vm2 = vcmp.lt.s32.totalorder %v6799_v59, 2  ;;  %vm6797_vm15 = vweird.f32 %v14209_v49 }
 0x675   :  { %v6883_v0 = vshrl.u32 %v6865_v57, %v6881_v61  ;;  %v6886_v3 = vadd.s32 127, %v6885_v30  ;;  %v6972_v11 = vsel %vm6970_vm1, %v6971_v35, %v13751_v15  ;;  %v6895_v8 = vsub.s32 4, %v13722_v52 }
 0x676   :  { %v6973_v16 = vadd.s32 %v6972_v11, %v6968_v37  ;;  %vm6811_vm5 = vcmp.lt.s32.totalorder %v14212_v22, 0  ;;  %vm6810_vm3 = vcmp.le.f32.partialorder %v6809_v42, 0.7853982  ;;  %v6969_v39 = vadd.s32 %v13750_v25, %v13758_v13 }
 0x677   :  { %v6884_v48 = vor.u32 %v6883_v0, %v6882_v47  ;;  %v6887_v1 = vshll.u32 %v6886_v3, 23  ;;  %v6896_v10 = vsel %vm6811_vm5, %v6895_v8, %v13722_v52  ;;  %vm6901_vm9 = vweird.f32 %v14212_v22 }
 0x678   :  { %v7867_v51 = vpop.eup %7866  ;;  %v6974_v31 = vadd.s32 536870912, %v6973_v16  ;;  %v6898_v24 = vsel %vm6810_vm3, 0, %v6896_v10  ;;  %vm6915_vm11 = vcmp.lt.s32.totalorder %v14215_v50, 0  ;;  %vm6914_vm12 = vcmp.le.f32.partialorder %v6913_v56, 0.7853982 }
 0x679   :  { %v7869_v21 = vpop.eup %7868  ;;  %v6805_v20 = vxor.u32 2147483648, %v7867_v51  ;;  %v6888_v58 = vor.u32 4788187, %v6887_v1  ;;  %v6891_v7 = vcvt.s32.f32 %v6884_v48  ;;  %v6902_v62 = vadd.s32 3, %v6898_v24 }
 0x67a   :  { %v6802_v4 = vxor.u32 2147483648, %v7869_v21  ;;  %v6975_v45 = vshrl.u32 %v6974_v31, 30 }
 0x67b   :  { %v6806_v28 = vsel %vm6804_vm0, %v6805_v20, %v7869_v21  ;;  %v6889_v12 = vand.u32 2147483647, %v6888_v58  ;;  %v6903_v38 = vand.u32 3, %v6902_v62  ;;  %vm7005_vm0 = vweird.f32 %v14215_v50 }
 0x67c   :  { %v6803_v36 = vsel %vm6801_vm13, %v7867_v51, %v6802_v4  ;;  %v6976_v18 = vshll.u32 %v6975_v45, 30  ;;  %v6999_v41 = vsub.s32 4, %v6975_v45 }
 0x67d   :  { %v6807_v26 = vsel %vm6800_vm2, %v6803_v36, %v6806_v28  ;;  %v6892_v63 = vmul.f32 %v6891_v7, %v6889_v12  ;;  %vm6908_vm6 = vcmp.eq.s32.totalorder %v6903_v38, 2  ;;  %vm6905_vm8 = vcmp.eq.s32.totalorder %v6903_v38, 0 }
 0x67e   :  { %v6808_v55 = vsel %vm6797_vm15, nan, %v6807_v26  ;;  %v6977_v40 = vsub.s32 %v6973_v16, %v6976_v18  ;;  %vm6904_vm7 = vcmp.lt.s32.totalorder %v6903_v38, 2  ;;  %v7000_v47 = vsel %vm6915_vm11, %v6999_v41, %v6975_v45 }
 0x67f   :  { %7078 = vst [vmem:[#allocation5 + $0x1e8] sm:$0xff] %v6808_v55  ;;  %v6893_v49 = vxor.u32 2147483648, %v6892_v63  ;;  %v7002_v37 = vsel %vm6914_vm12, 0, %v7000_v47 }
 0x680   :  { %v6979_v19 = vsub.s32 0, %v6977_v40  ;;  %v7006_v35 = vadd.s32 3, %v7002_v37 }
 0x681   :  { %v6894_v14 = vsel %vm6811_vm5, %v6893_v49, %v6892_v63 }
 0x682   :  { %v6897_v43 = vsel %vm6810_vm3, %v14212_v22, %v6894_v14  ;;  %v7353_v34 = vmin.u32 %v6979_v19, %v6977_v40  ;;  %v7007_v0 = vand.u32 3, %v7006_v35 }
 0x683   :  { %7870 = vcosq.f32 %v6897_v43 }
 0x684   :  { %7872 = vsinq.f32 %v6897_v43  ;;  %v6981_v60 = vclz %v7353_v34  ;;  %vm7012_vm10 = vcmp.eq.s32.totalorder %v7007_v0, 2  ;;  %vm7009_vm14 = vcmp.eq.s32.totalorder %v7007_v0, 0 }
 0x685   :  { %vm7008_vm13 = vcmp.lt.s32.totalorder %v7007_v0, 2 }
 0x686   :  { %v7354_v23 = vadd.s32 4294967294, %v6981_v60 }
 0x688   :  { %vm7355_vm4 = vcmp.lt.s32.totalorder %v7354_v23, 0 }
 0x689   :  { %v6984_v42 = vsel %vm7355_vm4, 0, %v7354_v23 }
 0x68a   :  { %v6985_v2 = vsub.s32 32, %v6984_v42  ;;  %v6986_v5 = vshll.u32 %v6977_v40, %v6984_v42  ;;  %v6989_v52 = vsub.s32 4294967266, %v6984_v42 }
 0x68c   :  { %v6987_v6 = vshrl.u32 %v6969_v39, %v6985_v2  ;;  %v6990_v46 = vadd.s32 127, %v6989_v52 }
 0x68d   :  { %v7871_v53 = vpop.eup %7870 }
 0x68e   :  { %v7873_v9 = vpop.eup %7872  ;;  %v6909_v54 = vxor.u32 2147483648, %v7871_v53  ;;  %v6988_v44 = vor.u32 %v6987_v6, %v6986_v5  ;;  %v6991_v15 = vshll.u32 %v6990_v46, 23 }
 0x68f   :  { %v6906_v17 = vxor.u32 2147483648, %v7873_v9 }
 0x690   :  { %v6910_v32 = vsel %vm6908_vm6, %v6909_v54, %v7873_v9  ;;  %v6992_v33 = vor.u32 4788187, %v6991_v15  ;;  %v6995_v27 = vcvt.s32.f32 %v6988_v44 }
 0x691   :  { %v6907_v25 = vsel %vm6905_vm8, %v7871_v53, %v6906_v17 }
 0x692   :  { %v6911_v57 = vsel %vm6904_vm7, %v6907_v25, %v6910_v32  ;;  %v6993_v29 = vand.u32 2147483647, %v6992_v33 }
 0x693   :  { %v6912_v59 = vsel %vm6901_vm9, nan, %v6911_v57 }
 0x694   :  { %7079 = vst [vmem:[#allocation5 + $0x1f0] sm:$0xff] %v6912_v59  ;;  %v6996_v13 = vmul.f32 %v6995_v27, %v6993_v29 }
 0x696   :  { %v6997_v61 = vxor.u32 2147483648, %v6996_v13 }
 0x698   :  { %v6998_v22 = vsel %vm6915_vm11, %v6997_v61, %v6996_v13 }
 0x699   :  { %v7001_v30 = vsel %vm6914_vm12, %v14215_v50, %v6998_v22 }
 0x69a   :  { %7874 = vcosq.f32 %v7001_v30 }
 0x69b   :  { %7876 = vsinq.f32 %v7001_v30 }
 0x6a4   :  { %v7875_v3 = vpop.eup %7874 }
 0x6a5   :  { %v7877_v51 = vpop.eup %7876  ;;  %v7013_v21 = vxor.u32 2147483648, %v7875_v3 }
 0x6a6   :  { %v7010_v20 = vxor.u32 2147483648, %v7877_v51 }
 0x6a7   :  { %v7014_v56 = vsel %vm7012_vm10, %v7013_v21, %v7877_v51 }
 0x6a8   :  { %v7011_v48 = vsel %vm7009_vm14, %v7875_v3, %v7010_v20 }
 0x6a9   :  { %v7015_v1 = vsel %vm7008_vm13, %v7011_v48, %v7014_v56 }
 0x6aa   :  { %v7016_v11 = vsel %vm7005_vm0, nan, %v7015_v1 }
 0x6ab   :  { %7080 = vst [vmem:[#allocation5 + $0x1f8] sm:$0xff] %v7016_v11 }
 0x6ac   :  { %7911 = shalt.err (!%p7908_p12)
}
 0x6ad   :  { %s7912_s27 = scalar_lea.hbm %s13791_s2, 8192 }
 0x6ae   :  { %p7913_p13 = scmp.ne.s32.totalorder %s13791_s2, %s7912_s27  ;;  %p7916_p0 = scmp.lt.u32.totalorder %s7912_s27, %s13791_s2 }
 0x6b0   :  { %p7918_p1 = pnand %p7916_p0, %p7913_p13 }
 0x6b2   :  { %7921 = shalt.err (!%p7918_p1)
}
 0x6b3   :  { %s7934_s4 = smov 128   ;;  %s7935_s5 = smov 8  }
 0x6b4   :  { %7092 = dma.vmem_to_hbm [thread:$0]  %s7087_s23, 8192, %s13791_s2, [#allocation4], %s7934_s4, %s7934_s4, %s7935_s5  }
 0x6b5   :  { %7924 = dma.done.wait [#allocation4], 8192  }
 0x6b6   :  { %7925 = vsyncadd [#allocation4], 4294959104 }
 0x6b7   :  { %7096 = vsyncpa [#allocation3], 1 }
 0x6b8   :  { %7097 = vsyncpa [#allocation4], 1 }

</bundles_post_ra>
